<compile_context>
chip_gen: v5e
topology: v5e:2x2
jax: 0.10.0
libtpu: 0.0.40
codegen_flags: <defaults>
</compile_context>

<pallas_src>
import functools

import jax
import jax.numpy as jnp
from jax.experimental import pallas as pl
from jax.experimental.pallas import tpu as pltpu


# --------------------------------------------------------------------------
# Fused whole-network kernel: one grid step == one batch element.
# --------------------------------------------------------------------------
def _gcntf_fused_kernel(x_ref, *rest, C, K, T, bs, dilations):
  L = len(dilations)
  nw = 8 * L + 2
  wrefs = rest[:nw]
  out_ref = rest[nw]
  xcur_ref = rest[nw + 1]    # [C, T] running layer input/output
  zpad_ref = rest[nw + 2]    # [C, T] gated-conv output -> modulated skip
  h_ref = rest[nw + 3]       # [C, 1] TFiLM LSTM hidden state
  c_ref = rest[nw + 4]       # [C, 1] TFiLM LSTM cell state
  fw_ref, fb_ref = wrefs[nw - 2], wrefs[nw - 1]
  nsteps = T // bs

  for l, dil in enumerate(dilations):
    (cw_ref, cb_ref, wih_ref, whh_ref,
     bih_ref, bhh_ref, mw_ref, mb_ref) = wrefs[8 * l:8 * l + 8]
    pad = (K - 1) * dil
    t_out = T - pad

    # ---- dilated conv (valid, no padding) -------------------------------
    if l == 0:
      # in_ch == 1: VPU broadcast-multiply instead of a K=1 matmul.
      x_in = x_ref[0]                                     # [1, T]
      cw = cw_ref[...]                                    # [2C, K]
      y = jnp.zeros((2 * C, t_out), jnp.float32)
      for k in range(K):
        y = y + cw[:, k:k + 1] * x_in[:, k * dil:k * dil + t_out]
    else:
      # im2col over the K taps -> one [2C, K*C] x [K*C, t_out] MXU matmul.
      xs = jnp.concatenate(
          [xcur_ref[:, k * dil:k * dil + t_out] for k in range(K)], axis=0)
      y = jnp.dot(cw_ref[...], xs, preferred_element_type=jnp.float32)
    y = y + cb_ref[...]

    # ---- gated activation + left zero-pad (single full-width store) -----
    z = jnp.tanh(y[:C, :]) * jax.nn.sigmoid(y[C:, :])     # [C, t_out]
    zpad_ref[...] = jnp.concatenate(
        [jnp.zeros((C, pad), jnp.float32), z], axis=1)    # [C, T]

    # ---- TFiLM: fused max-pool + LSTM + modulation, one pass over time ---
    w_ih = wih_ref[...]
    w_hh = whh_ref[...]
    b_ih = bih_ref[...]
    b_hh = bhh_ref[...]
    h_ref[...] = jnp.zeros((C, 1), jnp.float32)
    c_ref[...] = jnp.zeros((C, 1), jnp.float32)

    def tfilm_block(off):
      blk = zpad_ref[:, pl.ds(off, bs)]                   # [C, bs]
      xd = jnp.max(blk, axis=1, keepdims=True)            # block max-pool
      gates = (jnp.dot(w_ih, xd, preferred_element_type=jnp.float32) + b_ih
               + jnp.dot(w_hh, h_ref[...],
                         preferred_element_type=jnp.float32) + b_hh)
      i_g = jax.nn.sigmoid(gates[0 * C:1 * C, :])
      f_g = jax.nn.sigmoid(gates[1 * C:2 * C, :])
      g_g = jnp.tanh(gates[2 * C:3 * C, :])
      o_g = jax.nn.sigmoid(gates[3 * C:4 * C, :])
      c_new = f_g * c_ref[...] + i_g * g_g
      h_new = o_g * jnp.tanh(c_new)
      h_ref[...] = h_new
      c_ref[...] = c_new
      zpad_ref[:, pl.ds(off, bs)] = blk * h_new           # modulate in place

    if bs % 128 == 0:
      # Lane-tile-aligned block offsets -> real loop, no trace unrolling.
      @pl.loop(0, nsteps)
      def _(s):
        tfilm_block(pl.multiple_of(s * bs, bs))
    else:
      # TODO(synk): block sizes not a multiple of 128 use a static unroll
      # (fine for small test configs; the module default of 128 takes the
      # aligned pl.loop path above).
      for s in range(nsteps):
        tfilm_block(s * bs)

    # ---- 1x1 mix conv + residual -> next layer input ---------------------
    z_mod = zpad_ref[...]                                 # [C, T]
    residual = x_ref[0] if l == 0 else xcur_ref[...]      # broadcasts if 1ch
    xcur_ref[...] = (jnp.dot(mw_ref[...], z_mod,
                             preferred_element_type=jnp.float32)
                     + mb_ref[...] + residual)

    # ---- fold this layer's skip output straight into the final 1x1 conv --
    contrib = jnp.dot(fw_ref[:, l * C:(l + 1) * C], z_mod,
                      preferred_element_type=jnp.float32)  # [1, T]
    if l == 0:
      out_ref[0] = contrib
    else:
      out_ref[0] = out_ref[0] + contrib

  out_ref[0] = out_ref[0] + fb_ref[...]


# --------------------------------------------------------------------------
# Wrapper: parameter re-layout + a single batch-parallel pallas_call.
# --------------------------------------------------------------------------
def gcntf_forward(x, layer_params, final_params, *, nchannels, kernel_size,
                  block_size):
  B, in0, T = x.shape
  C, K = nchannels, kernel_size
  L = len(layer_params)
  assert in0 == 1, "GCNTF input must have a single channel"
  assert T % block_size == 0, "T must be a multiple of the TFiLM block size"
  dils = tuple(int(lp["dilation"]) for lp in layer_params)
  for d in dils:
    assert (K - 1) * d < T, "layer receptive field exceeds sequence length"

  weights = []
  for lp in layer_params:
    cw = lp["conv_w"]                                    # [2C, in_ch, K]
    if cw.shape[1] == 1:
      cw_k = cw[:, 0, :]                                 # [2C, K]
    else:
      cw_k = jnp.transpose(cw, (0, 2, 1)).reshape(2 * C, K * C)  # im2col form
    weights += [
        cw_k,
        lp["conv_b"].reshape(2 * C, 1),
        lp["w_ih"],
        lp["w_hh"],
        lp["b_ih"].reshape(4 * C, 1),
        lp["b_hh"].reshape(4 * C, 1),
        lp["mix_w"][:, :, 0],
        lp["mix_b"].reshape(C, 1),
    ]
  weights += [final_params["w"][:, :, 0],                # [1, L*C]
              final_params["b"].reshape(1, 1)]

  def _const_spec(arr):
    zeros = (0,) * arr.ndim
    return pl.BlockSpec(arr.shape, lambda b, _z=zeros: _z)

  kern = functools.partial(_gcntf_fused_kernel, C=C, K=K, T=T, bs=block_size,
                           dilations=dils)

  grid_spec = pltpu.PrefetchScalarGridSpec(
      num_scalar_prefetch=0,
      grid=(B,),
      in_specs=[pl.BlockSpec((1, 1, T), lambda b: (b, 0, 0))]
               + [_const_spec(w) for w in weights],
      out_specs=pl.BlockSpec((1, 1, T), lambda b: (b, 0, 0)),
      scratch_shapes=[
          pltpu.VMEM((C, T), jnp.float32),   # running layer input/output
          pltpu.VMEM((C, T), jnp.float32),   # gated-conv / modulated skip
          pltpu.VMEM((C, 1), jnp.float32),   # LSTM h
          pltpu.VMEM((C, 1), jnp.float32),   # LSTM c
      ],
  )

  return pl.pallas_call(
      kern,
      out_shape=jax.ShapeDtypeStruct((B, 1, T), jnp.float32),
      grid_spec=grid_spec,
      compiler_params=pltpu.CompilerParams(
          dimension_semantics=("parallel",),
          vmem_limit_bytes=64 * 1024 * 1024),
  )(x, *weights)


# --------------------------------------------------------------------------
# Deterministic synthetic parameters (PyTorch layouts / shapes).
# --------------------------------------------------------------------------
def init_params(key, *, nblocks, nlayers, nchannels, kernel_size,
                dilation_growth):
  C, K = nchannels, kernel_size
  layers = []
  for b in range(nblocks):
    for l in range(nlayers):
      in_ch = 1 if (b == 0 and l == 0) else C
      d = dilation_growth ** l
      key, *ks = jax.random.split(key, 9)
      layers.append({
          "dilation": d,
          "conv_w": 0.3 * jax.random.normal(ks[0], (2 * C, in_ch, K), jnp.float32),
          "conv_b": 0.1 * jax.random.normal(ks[1], (2 * C,), jnp.float32),
          "w_ih": 0.3 * jax.random.normal(ks[2], (4 * C, C), jnp.float32),
          "w_hh": 0.3 * jax.random.normal(ks[3], (4 * C, C), jnp.float32),
          "b_ih": 0.1 * jax.random.normal(ks[4], (4 * C,), jnp.float32),
          "b_hh": 0.1 * jax.random.normal(ks[5], (4 * C,), jnp.float32),
          "mix_w": 0.3 * jax.random.normal(ks[6], (C, C, 1), jnp.float32),
          "mix_b": 0.1 * jax.random.normal(ks[7], (C,), jnp.float32),
      })
  ctot = nblocks * nlayers * C
  key, k1, k2 = jax.random.split(key, 3)
  final = {"w": 0.1 * jax.random.normal(k1, (1, ctot, 1), jnp.float32),
           "b": 0.1 * jax.random.normal(k2, (1,), jnp.float32)}
  return layers, final


# --------------------------------------------------------------------------
# Pure-JAX reference mirroring the PyTorch forward (for correctness checks).
# --------------------------------------------------------------------------
def ref_forward(x, layer_params, final_params, *, nchannels, kernel_size,
                block_size):
  C, K = nchannels, kernel_size
  z_list = []
  for lp in layer_params:
    B, in_ch, T = x.shape
    d = lp["dilation"]
    pad = (K - 1) * d
    t_out = T - pad
    w = lp["conv_w"]
    acc = jnp.zeros((B, 2 * C, t_out), jnp.float32)
    for k in range(K):
      acc = acc + jnp.einsum("oi,bit->bot", w[:, :, k],
                             x[:, :, k * d:k * d + t_out])
    y = acc + lp["conv_b"][None, :, None]
    z = jnp.tanh(y[:, :C]) * jax.nn.sigmoid(y[:, C:])
    z = jnp.concatenate([jnp.zeros((B, C, pad), jnp.float32), z], axis=2)

    nsteps = T // block_size
    zb = z.reshape(B, C, nsteps, block_size)
    x_down = zb.max(axis=-1)                             # [B, C, nsteps]
    h = jnp.zeros((B, C), jnp.float32)
    c = jnp.zeros((B, C), jnp.float32)
    hs = []
    for s in range(nsteps):
      xt = x_down[:, :, s]
      gates = (xt @ lp["w_ih"].T + lp["b_ih"][None]
               + h @ lp["w_hh"].T + lp["b_hh"][None])
      i_g = jax.nn.sigmoid(gates[:, :C])
      f_g = jax.nn.sigmoid(gates[:, C:2 * C])
      g_g = jnp.tanh(gates[:, 2 * C:3 * C])
      o_g = jax.nn.sigmoid(gates[:, 3 * C:])
      c = f_g * c + i_g * g_g
      h = o_g * jnp.tanh(c)
      hs.append(h)
    xn = jnp.stack(hs, axis=-1)                          # [B, C, nsteps]
    z_mod = (zb * xn[:, :, :, None]).reshape(B, C, T)

    x = (jnp.einsum("oc,bct->bot", lp["mix_w"][:, :, 0], z_mod)
         + lp["mix_b"][None, :, None] + x)
    z_list.append(z_mod)

  z_all = jnp.concatenate(z_list, axis=1)
  return (jnp.einsum("oc,bct->bot", final_params["w"][:, :, 0], z_all)
          + final_params["b"][None, :, None])


# --------------------------------------------------------------------------
# Self-test
# --------------------------------------------------------------------------
def _run_case(key, *, B, T, nblocks, nlayers, nchannels, kernel_size,
              dilation_growth, tfilm_block_size):
  kx, kp = jax.random.split(key)
  x = jax.random.normal(kx, (B, 1, T), jnp.float32)
  layers, final = init_params(kp, nblocks=nblocks, nlayers=nlayers,
                              nchannels=nchannels, kernel_size=kernel_size,
                              dilation_growth=dilation_growth)
  out = gcntf_forward(x, layers, final, nchannels=nchannels,
                      kernel_size=kernel_size, block_size=tfilm_block_size)
  out = jax.block_until_ready(out)
  ref = ref_forward(x, layers, final, nchannels=nchannels,
                    kernel_size=kernel_size, block_size=tfilm_block_size)
  ref = jax.block_until_ready(ref)
  assert out.shape == (B, 1, T), out.shape
  err = float(jnp.max(jnp.abs(out - ref)))
  assert jnp.allclose(out, ref, rtol=1e-2, atol=1e-2), err
  return err


if __name__ == "__main__":
  master = jax.random.PRNGKey(0)
  k_small, k_aligned = jax.random.split(master)

  # Small config: tfilm_block_size < 128 -> static-unroll TFiLM path.
  _run_case(k_small, B=2, T=32, nblocks=2, nlayers=3, nchannels=8,
            kernel_size=3, dilation_growth=2, tfilm_block_size=8)

  # Module-default block size (128): lane-aligned pl.loop TFiLM path.
  _run_case(k_aligned, B=2, T=512, nblocks=1, nlayers=3, nchannels=8,
            kernel_size=3, dilation_growth=2, tfilm_block_size=128)

  print("KERNEL_OK")
</pallas_src>

<mosaic_0001>
module attributes {stable_mosaic.version = 11 : i64} {
  func.func @_gcntf_fused_kernel(%arg0: i32, %arg1: memref<1x1x32xf32, #tpu.memory_space<vmem>>, %arg2: memref<16x3xf32, #tpu.memory_space<vmem>>, %arg3: memref<16x1xf32, #tpu.memory_space<vmem>>, %arg4: memref<32x8xf32, #tpu.memory_space<vmem>>, %arg5: memref<32x8xf32, #tpu.memory_space<vmem>>, %arg6: memref<32x1xf32, #tpu.memory_space<vmem>>, %arg7: memref<32x1xf32, #tpu.memory_space<vmem>>, %arg8: memref<8x8xf32, #tpu.memory_space<vmem>>, %arg9: memref<8x1xf32, #tpu.memory_space<vmem>>, %arg10: memref<16x24xf32, #tpu.memory_space<vmem>>, %arg11: memref<16x1xf32, #tpu.memory_space<vmem>>, %arg12: memref<32x8xf32, #tpu.memory_space<vmem>>, %arg13: memref<32x8xf32, #tpu.memory_space<vmem>>, %arg14: memref<32x1xf32, #tpu.memory_space<vmem>>, %arg15: memref<32x1xf32, #tpu.memory_space<vmem>>, %arg16: memref<8x8xf32, #tpu.memory_space<vmem>>, %arg17: memref<8x1xf32, #tpu.memory_space<vmem>>, %arg18: memref<16x24xf32, #tpu.memory_space<vmem>>, %arg19: memref<16x1xf32, #tpu.memory_space<vmem>>, %arg20: memref<32x8xf32, #tpu.memory_space<vmem>>, %arg21: memref<32x8xf32, #tpu.memory_space<vmem>>, %arg22: memref<32x1xf32, #tpu.memory_space<vmem>>, %arg23: memref<32x1xf32, #tpu.memory_space<vmem>>, %arg24: memref<8x8xf32, #tpu.memory_space<vmem>>, %arg25: memref<8x1xf32, #tpu.memory_space<vmem>>, %arg26: memref<16x24xf32, #tpu.memory_space<vmem>>, %arg27: memref<16x1xf32, #tpu.memory_space<vmem>>, %arg28: memref<32x8xf32, #tpu.memory_space<vmem>>, %arg29: memref<32x8xf32, #tpu.memory_space<vmem>>, %arg30: memref<32x1xf32, #tpu.memory_space<vmem>>, %arg31: memref<32x1xf32, #tpu.memory_space<vmem>>, %arg32: memref<8x8xf32, #tpu.memory_space<vmem>>, %arg33: memref<8x1xf32, #tpu.memory_space<vmem>>, %arg34: memref<16x24xf32, #tpu.memory_space<vmem>>, %arg35: memref<16x1xf32, #tpu.memory_space<vmem>>, %arg36: memref<32x8xf32, #tpu.memory_space<vmem>>, %arg37: memref<32x8xf32, #tpu.memory_space<vmem>>, %arg38: memref<32x1xf32, #tpu.memory_space<vmem>>, %arg39: memref<32x1xf32, #tpu.memory_space<vmem>>, %arg40: memref<8x8xf32, #tpu.memory_space<vmem>>, %arg41: memref<8x1xf32, #tpu.memory_space<vmem>>, %arg42: memref<16x24xf32, #tpu.memory_space<vmem>>, %arg43: memref<16x1xf32, #tpu.memory_space<vmem>>, %arg44: memref<32x8xf32, #tpu.memory_space<vmem>>, %arg45: memref<32x8xf32, #tpu.memory_space<vmem>>, %arg46: memref<32x1xf32, #tpu.memory_space<vmem>>, %arg47: memref<32x1xf32, #tpu.memory_space<vmem>>, %arg48: memref<8x8xf32, #tpu.memory_space<vmem>>, %arg49: memref<8x1xf32, #tpu.memory_space<vmem>>, %arg50: memref<1x48xf32, #tpu.memory_space<vmem>>, %arg51: memref<1x1xf32, #tpu.memory_space<vmem>>, %arg52: memref<1x1x32xf32, #tpu.memory_space<vmem>>, %arg53: memref<8x32xf32, #tpu.memory_space<vmem>>, %arg54: memref<8x32xf32, #tpu.memory_space<vmem>>, %arg55: memref<8x1xf32, #tpu.memory_space<vmem>>, %arg56: memref<8x1xf32, #tpu.memory_space<vmem>>) attributes {dimension_semantics = [#tpu.dimension_semantics<parallel>], iteration_bounds = array<i64: 2>, scalar_prefetch = 0 : i64, scratch_operands = 4 : i64, tpu.core_type = #tpu.core_type<tc>, window_params = [{transform_indices = @transform_0, window_bounds = array<i64: 1, 1, 32>}, {pipeline_mode = #tpu.pipeline_mode<synchronous>, transform_indices = @transform_1, window_bounds = array<i64: 16, 3>}, {pipeline_mode = #tpu.pipeline_mode<synchronous>, transform_indices = @transform_2, window_bounds = array<i64: 16, 1>}, {pipeline_mode = #tpu.pipeline_mode<synchronous>, transform_indices = @transform_3, window_bounds = array<i64: 32, 8>}, {pipeline_mode = #tpu.pipeline_mode<synchronous>, transform_indices = @transform_4, window_bounds = array<i64: 32, 8>}, {pipeline_mode = #tpu.pipeline_mode<synchronous>, transform_indices = @transform_5, window_bounds = array<i64: 32, 1>}, {pipeline_mode = #tpu.pipeline_mode<synchronous>, transform_indices = @transform_6, window_bounds = array<i64: 32, 1>}, {pipeline_mode = #tpu.pipeline_mode<synchronous>, transform_indices = @transform_7, window_bounds = array<i64: 8, 8>}, {pipeline_mode = #tpu.pipeline_mode<synchronous>, transform_indices = @transform_8, window_bounds = array<i64: 8, 1>}, {pipeline_mode = #tpu.pipeline_mode<synchronous>, transform_indices = @transform_9, window_bounds = array<i64: 16, 24>}, {pipeline_mode = #tpu.pipeline_mode<synchronous>, transform_indices = @transform_10, window_bounds = array<i64: 16, 1>}, {pipeline_mode = #tpu.pipeline_mode<synchronous>, transform_indices = @transform_11, window_bounds = array<i64: 32, 8>}, {pipeline_mode = #tpu.pipeline_mode<synchronous>, transform_indices = @transform_12, window_bounds = array<i64: 32, 8>}, {pipeline_mode = #tpu.pipeline_mode<synchronous>, transform_indices = @transform_13, window_bounds = array<i64: 32, 1>}, {pipeline_mode = #tpu.pipeline_mode<synchronous>, transform_indices = @transform_14, window_bounds = array<i64: 32, 1>}, {pipeline_mode = #tpu.pipeline_mode<synchronous>, transform_indices = @transform_15, window_bounds = array<i64: 8, 8>}, {pipeline_mode = #tpu.pipeline_mode<synchronous>, transform_indices = @transform_16, window_bounds = array<i64: 8, 1>}, {pipeline_mode = #tpu.pipeline_mode<synchronous>, transform_indices = @transform_17, window_bounds = array<i64: 16, 24>}, {pipeline_mode = #tpu.pipeline_mode<synchronous>, transform_indices = @transform_18, window_bounds = array<i64: 16, 1>}, {pipeline_mode = #tpu.pipeline_mode<synchronous>, transform_indices = @transform_19, window_bounds = array<i64: 32, 8>}, {pipeline_mode = #tpu.pipeline_mode<synchronous>, transform_indices = @transform_20, window_bounds = array<i64: 32, 8>}, {pipeline_mode = #tpu.pipeline_mode<synchronous>, transform_indices = @transform_21, window_bounds = array<i64: 32, 1>}, {pipeline_mode = #tpu.pipeline_mode<synchronous>, transform_indices = @transform_22, window_bounds = array<i64: 32, 1>}, {pipeline_mode = #tpu.pipeline_mode<synchronous>, transform_indices = @transform_23, window_bounds = array<i64: 8, 8>}, {pipeline_mode = #tpu.pipeline_mode<synchronous>, transform_indices = @transform_24, window_bounds = array<i64: 8, 1>}, {pipeline_mode = #tpu.pipeline_mode<synchronous>, transform_indices = @transform_25, window_bounds = array<i64: 16, 24>}, {pipeline_mode = #tpu.pipeline_mode<synchronous>, transform_indices = @transform_26, window_bounds = array<i64: 16, 1>}, {pipeline_mode = #tpu.pipeline_mode<synchronous>, transform_indices = @transform_27, window_bounds = array<i64: 32, 8>}, {pipeline_mode = #tpu.pipeline_mode<synchronous>, transform_indices = @transform_28, window_bounds = array<i64: 32, 8>}, {pipeline_mode = #tpu.pipeline_mode<synchronous>, transform_indices = @transform_29, window_bounds = array<i64: 32, 1>}, {pipeline_mode = #tpu.pipeline_mode<synchronous>, transform_indices = @transform_30, window_bounds = array<i64: 32, 1>}, {pipeline_mode = #tpu.pipeline_mode<synchronous>, transform_indices = @transform_31, window_bounds = array<i64: 8, 8>}, {pipeline_mode = #tpu.pipeline_mode<synchronous>, transform_indices = @transform_32, window_bounds = array<i64: 8, 1>}, {pipeline_mode = #tpu.pipeline_mode<synchronous>, transform_indices = @transform_33, window_bounds = array<i64: 16, 24>}, {pipeline_mode = #tpu.pipeline_mode<synchronous>, transform_indices = @transform_34, window_bounds = array<i64: 16, 1>}, {pipeline_mode = #tpu.pipeline_mode<synchronous>, transform_indices = @transform_35, window_bounds = array<i64: 32, 8>}, {pipeline_mode = #tpu.pipeline_mode<synchronous>, transform_indices = @transform_36, window_bounds = array<i64: 32, 8>}, {pipeline_mode = #tpu.pipeline_mode<synchronous>, transform_indices = @transform_37, window_bounds = array<i64: 32, 1>}, {pipeline_mode = #tpu.pipeline_mode<synchronous>, transform_indices = @transform_38, window_bounds = array<i64: 32, 1>}, {pipeline_mode = #tpu.pipeline_mode<synchronous>, transform_indices = @transform_39, window_bounds = array<i64: 8, 8>}, {pipeline_mode = #tpu.pipeline_mode<synchronous>, transform_indices = @transform_40, window_bounds = array<i64: 8, 1>}, {pipeline_mode = #tpu.pipeline_mode<synchronous>, transform_indices = @transform_41, window_bounds = array<i64: 16, 24>}, {pipeline_mode = #tpu.pipeline_mode<synchronous>, transform_indices = @transform_42, window_bounds = array<i64: 16, 1>}, {pipeline_mode = #tpu.pipeline_mode<synchronous>, transform_indices = @transform_43, window_bounds = array<i64: 32, 8>}, {pipeline_mode = #tpu.pipeline_mode<synchronous>, transform_indices = @transform_44, window_bounds = array<i64: 32, 8>}, {pipeline_mode = #tpu.pipeline_mode<synchronous>, transform_indices = @transform_45, window_bounds = array<i64: 32, 1>}, {pipeline_mode = #tpu.pipeline_mode<synchronous>, transform_indices = @transform_46, window_bounds = array<i64: 32, 1>}, {pipeline_mode = #tpu.pipeline_mode<synchronous>, transform_indices = @transform_47, window_bounds = array<i64: 8, 8>}, {pipeline_mode = #tpu.pipeline_mode<synchronous>, transform_indices = @transform_48, window_bounds = array<i64: 8, 1>}, {pipeline_mode = #tpu.pipeline_mode<synchronous>, transform_indices = @transform_49, window_bounds = array<i64: 1, 48>}, {pipeline_mode = #tpu.pipeline_mode<synchronous>, transform_indices = @transform_50, window_bounds = array<i64: 1, 1>}, {transform_indices = @transform_51, window_bounds = array<i64: 1, 1, 32>}]} {
    %c0 = arith.constant 0 : index
    %c0_0 = arith.constant 0 : index
    %c0_1 = arith.constant 0 : index
    %0 = vector.load %arg1[%c0, %c0_0, %c0_1] : memref<1x1x32xf32, #tpu.memory_space<vmem>>, vector<1x1x32xf32>
    %1 = vector.shape_cast %0 : vector<1x1x32xf32> to vector<1x32xf32>
    %c0_2 = arith.constant 0 : index
    %c0_3 = arith.constant 0 : index
    %2 = vector.load %arg2[%c0_2, %c0_3] : memref<16x3xf32, #tpu.memory_space<vmem>>, vector<16x3xf32>
    %cst = arith.constant 0.000000e+00 : f32
    %3 = vector.broadcast %cst : f32 to vector<16x30xf32>
    %4 = vector.extract_strided_slice %2 {offsets = [0, 0], sizes = [16, 1], strides = [1, 1]} : vector<16x3xf32> to vector<16x1xf32>
    %5 = vector.extract_strided_slice %1 {offsets = [0, 0], sizes = [1, 30], strides = [1, 1]} : vector<1x32xf32> to vector<1x30xf32>
    %6 = vector.broadcast %4 : vector<16x1xf32> to vector<16x30xf32>
    %7 = vector.broadcast %5 : vector<1x30xf32> to vector<16x30xf32>
    %8 = arith.mulf %6, %7 : vector<16x30xf32>
    %9 = arith.addf %3, %8 : vector<16x30xf32>
    %10 = vector.extract_strided_slice %2 {offsets = [0, 1], sizes = [16, 1], strides = [1, 1]} : vector<16x3xf32> to vector<16x1xf32>
    %11 = vector.extract_strided_slice %1 {offsets = [0, 1], sizes = [1, 30], strides = [1, 1]} : vector<1x32xf32> to vector<1x30xf32>
    %12 = vector.broadcast %10 : vector<16x1xf32> to vector<16x30xf32>
    %13 = vector.broadcast %11 : vector<1x30xf32> to vector<16x30xf32>
    %14 = arith.mulf %12, %13 : vector<16x30xf32>
    %15 = arith.addf %9, %14 : vector<16x30xf32>
    %16 = vector.extract_strided_slice %2 {offsets = [0, 2], sizes = [16, 1], strides = [1, 1]} : vector<16x3xf32> to vector<16x1xf32>
    %17 = vector.extract_strided_slice %1 {offsets = [0, 2], sizes = [1, 30], strides = [1, 1]} : vector<1x32xf32> to vector<1x30xf32>
    %18 = vector.broadcast %16 : vector<16x1xf32> to vector<16x30xf32>
    %19 = vector.broadcast %17 : vector<1x30xf32> to vector<16x30xf32>
    %20 = arith.mulf %18, %19 : vector<16x30xf32>
    %21 = arith.addf %15, %20 : vector<16x30xf32>
    %c0_4 = arith.constant 0 : index
    %c0_5 = arith.constant 0 : index
    %22 = vector.load %arg3[%c0_4, %c0_5] : memref<16x1xf32, #tpu.memory_space<vmem>>, vector<16x1xf32>
    %23 = vector.broadcast %22 : vector<16x1xf32> to vector<16x30xf32>
    %24 = arith.addf %21, %23 : vector<16x30xf32>
    %25 = vector.extract_strided_slice %24 {offsets = [0, 0], sizes = [8, 30], strides = [1, 1]} : vector<16x30xf32> to vector<8x30xf32>
    %26 = math.tanh %25 : vector<8x30xf32>
    %27 = vector.extract_strided_slice %24 {offsets = [8, 0], sizes = [8, 30], strides = [1, 1]} : vector<16x30xf32> to vector<8x30xf32>
    %28 = arith.negf %27 : vector<8x30xf32>
    %29 = math.exp %28 : vector<8x30xf32>
    %cst_6 = arith.constant 1.000000e+00 : f32
    %30 = vector.broadcast %cst_6 : f32 to vector<8x30xf32>
    %31 = arith.addf %30, %29 : vector<8x30xf32>
    %32 = arith.divf %30, %31 : vector<8x30xf32>
    %33 = arith.mulf %26, %32 : vector<8x30xf32>
    %cst_7 = arith.constant 0.000000e+00 : f32
    %34 = vector.broadcast %cst_7 : f32 to vector<8x2xf32>
    %35 = tpu.concatenate %34, %33 in 1 : vector<8x2xf32>, vector<8x30xf32> -> vector<8x32xf32>
    %c0_8 = arith.constant 0 : index
    %c0_9 = arith.constant 0 : index
    %36 = vector.load %arg54[%c0_8, %c0_9] : memref<8x32xf32, #tpu.memory_space<vmem>>, vector<8x32xf32>
    tpu.vector_store %arg54[%c0_8, %c0_9], %35 {strides = array<i32>} : memref<8x32xf32, #tpu.memory_space<vmem>>, vector<8x32xf32>,
    %c0_10 = arith.constant 0 : index
    %c0_11 = arith.constant 0 : index
    %37 = vector.load %arg4[%c0_10, %c0_11] : memref<32x8xf32, #tpu.memory_space<vmem>>, vector<32x8xf32>
    %c0_12 = arith.constant 0 : index
    %c0_13 = arith.constant 0 : index
    %38 = vector.load %arg5[%c0_12, %c0_13] : memref<32x8xf32, #tpu.memory_space<vmem>>, vector<32x8xf32>
    %c0_14 = arith.constant 0 : index
    %c0_15 = arith.constant 0 : index
    %39 = vector.load %arg6[%c0_14, %c0_15] : memref<32x1xf32, #tpu.memory_space<vmem>>, vector<32x1xf32>
    %c0_16 = arith.constant 0 : index
    %c0_17 = arith.constant 0 : index
    %40 = vector.load %arg7[%c0_16, %c0_17] : memref<32x1xf32, #tpu.memory_space<vmem>>, vector<32x1xf32>
    %cst_18 = arith.constant 0.000000e+00 : f32
    %41 = vector.broadcast %cst_18 : f32 to vector<8x1xf32>
    %c0_19 = arith.constant 0 : index
    %c0_20 = arith.constant 0 : index
    %42 = vector.load %arg55[%c0_19, %c0_20] : memref<8x1xf32, #tpu.memory_space<vmem>>, vector<8x1xf32>
    tpu.vector_store %arg55[%c0_19, %c0_20], %41 {strides = array<i32>} : memref<8x1xf32, #tpu.memory_space<vmem>>, vector<8x1xf32>,
    %cst_21 = arith.constant 0.000000e+00 : f32
    %43 = vector.broadcast %cst_21 : f32 to vector<8x1xf32>
    %c0_22 = arith.constant 0 : index
    %c0_23 = arith.constant 0 : index
    %44 = vector.load %arg56[%c0_22, %c0_23] : memref<8x1xf32, #tpu.memory_space<vmem>>, vector<8x1xf32>
    tpu.vector_store %arg56[%c0_22, %c0_23], %43 {strides = array<i32>} : memref<8x1xf32, #tpu.memory_space<vmem>>, vector<8x1xf32>,
    %c0_24 = arith.constant 0 : index
    %c0_25 = arith.constant 0 : index
    %45 = vector.load %arg54[%c0_24, %c0_25] : memref<8x32xf32, #tpu.memory_space<vmem>>, vector<8x8xf32>
    %cst_26 = arith.constant dense<0xFF800000> : vector<8xf32>
    %46 = vector.multi_reduction <maximumf>, %45, %cst_26 [1] : vector<8x8xf32> to vector<8xf32>
    %47 = vector.shape_cast %46 : vector<8xf32> to vector<8x1xf32>
    %cst_27 = arith.constant dense<0.000000e+00> : vector<32x1xf32>
    %48 = tpu.matmul %37, %47, %cst_27 {dimension_numbers = #tpu.dot_dimension_numbers<[1], [0], [0], [1], [0, 0, 1, 1], [], []>} : vector<32x8xf32>, vector<8x1xf32>, vector<32x1xf32> -> vector<32x1xf32>
    %49 = arith.addf %48, %39 : vector<32x1xf32>
    %c0_28 = arith.constant 0 : index
    %c0_29 = arith.constant 0 : index
    %50 = vector.load %arg55[%c0_28, %c0_29] : memref<8x1xf32, #tpu.memory_space<vmem>>, vector<8x1xf32>
    %cst_30 = arith.constant dense<0.000000e+00> : vector<32x1xf32>
    %51 = tpu.matmul %38, %50, %cst_30 {dimension_numbers = #tpu.dot_dimension_numbers<[1], [0], [0], [1], [0, 0, 1, 1], [], []>} : vector<32x8xf32>, vector<8x1xf32>, vector<32x1xf32> -> vector<32x1xf32>
    %52 = arith.addf %49, %51 : vector<32x1xf32>
    %53 = arith.addf %52, %40 : vector<32x1xf32>
    %54 = vector.extract_strided_slice %53 {offsets = [0, 0], sizes = [8, 1], strides = [1, 1]} : vector<32x1xf32> to vector<8x1xf32>
    %55 = arith.negf %54 : vector<8x1xf32>
    %56 = math.exp %55 : vector<8x1xf32>
    %cst_31 = arith.constant 1.000000e+00 : f32
    %57 = vector.broadcast %cst_31 : f32 to vector<8x1xf32>
    %58 = arith.addf %57, %56 : vector<8x1xf32>
    %59 = arith.divf %57, %58 : vector<8x1xf32>
    %60 = vector.extract_strided_slice %53 {offsets = [8, 0], sizes = [8, 1], strides = [1, 1]} : vector<32x1xf32> to vector<8x1xf32>
    %61 = arith.negf %60 : vector<8x1xf32>
    %62 = math.exp %61 : vector<8x1xf32>
    %cst_32 = arith.constant 1.000000e+00 : f32
    %63 = vector.broadcast %cst_32 : f32 to vector<8x1xf32>
    %64 = arith.addf %63, %62 : vector<8x1xf32>
    %65 = arith.divf %63, %64 : vector<8x1xf32>
    %66 = vector.extract_strided_slice %53 {offsets = [16, 0], sizes = [8, 1], strides = [1, 1]} : vector<32x1xf32> to vector<8x1xf32>
    %67 = math.tanh %66 : vector<8x1xf32>
    %68 = vector.extract_strided_slice %53 {offsets = [24, 0], sizes = [8, 1], strides = [1, 1]} : vector<32x1xf32> to vector<8x1xf32>
    %69 = arith.negf %68 : vector<8x1xf32>
    %70 = math.exp %69 : vector<8x1xf32>
    %cst_33 = arith.constant 1.000000e+00 : f32
    %71 = vector.broadcast %cst_33 : f32 to vector<8x1xf32>
    %72 = arith.addf %71, %70 : vector<8x1xf32>
    %73 = arith.divf %71, %72 : vector<8x1xf32>
    %c0_34 = arith.constant 0 : index
    %c0_35 = arith.constant 0 : index
    %74 = vector.load %arg56[%c0_34, %c0_35] : memref<8x1xf32, #tpu.memory_space<vmem>>, vector<8x1xf32>
    %75 = arith.mulf %65, %74 : vector<8x1xf32>
    %76 = arith.mulf %59, %67 : vector<8x1xf32>
    %77 = arith.addf %75, %76 : vector<8x1xf32>
    %78 = math.tanh %77 : vector<8x1xf32>
    %79 = arith.mulf %73, %78 : vector<8x1xf32>
    %c0_36 = arith.constant 0 : index
    %c0_37 = arith.constant 0 : index
    %80 = vector.load %arg55[%c0_36, %c0_37] : memref<8x1xf32, #tpu.memory_space<vmem>>, vector<8x1xf32>
    tpu.vector_store %arg55[%c0_36, %c0_37], %79 {strides = array<i32>} : memref<8x1xf32, #tpu.memory_space<vmem>>, vector<8x1xf32>,
    %c0_38 = arith.constant 0 : index
    %c0_39 = arith.constant 0 : index
    %81 = vector.load %arg56[%c0_38, %c0_39] : memref<8x1xf32, #tpu.memory_space<vmem>>, vector<8x1xf32>
    tpu.vector_store %arg56[%c0_38, %c0_39], %77 {strides = array<i32>} : memref<8x1xf32, #tpu.memory_space<vmem>>, vector<8x1xf32>,
    %82 = vector.broadcast %79 : vector<8x1xf32> to vector<8x8xf32>
    %83 = arith.mulf %45, %82 : vector<8x8xf32>
    %c0_40 = arith.constant 0 : index
    %c0_41 = arith.constant 0 : index
    %84 = vector.load %arg54[%c0_40, %c0_41] : memref<8x32xf32, #tpu.memory_space<vmem>>, vector<8x8xf32>
    tpu.vector_store %arg54[%c0_40, %c0_41], %83 {strides = array<i32>} : memref<8x32xf32, #tpu.memory_space<vmem>>, vector<8x8xf32>,
    %c0_42 = arith.constant 0 : index
    %c8 = arith.constant 8 : index
    %85 = vector.load %arg54[%c0_42, %c8] : memref<8x32xf32, #tpu.memory_space<vmem>>, vector<8x8xf32>
    %cst_43 = arith.constant dense<0xFF800000> : vector<8xf32>
    %86 = vector.multi_reduction <maximumf>, %85, %cst_43 [1] : vector<8x8xf32> to vector<8xf32>
    %87 = vector.shape_cast %86 : vector<8xf32> to vector<8x1xf32>
    %cst_44 = arith.constant dense<0.000000e+00> : vector<32x1xf32>
    %88 = tpu.matmul %37, %87, %cst_44 {dimension_numbers = #tpu.dot_dimension_numbers<[1], [0], [0], [1], [0, 0, 1, 1], [], []>} : vector<32x8xf32>, vector<8x1xf32>, vector<32x1xf32> -> vector<32x1xf32>
    %89 = arith.addf %88, %39 : vector<32x1xf32>
    %c0_45 = arith.constant 0 : index
    %c0_46 = arith.constant 0 : index
    %90 = vector.load %arg55[%c0_45, %c0_46] : memref<8x1xf32, #tpu.memory_space<vmem>>, vector<8x1xf32>
    %cst_47 = arith.constant dense<0.000000e+00> : vector<32x1xf32>
    %91 = tpu.matmul %38, %90, %cst_47 {dimension_numbers = #tpu.dot_dimension_numbers<[1], [0], [0], [1], [0, 0, 1, 1], [], []>} : vector<32x8xf32>, vector<8x1xf32>, vector<32x1xf32> -> vector<32x1xf32>
    %92 = arith.addf %89, %91 : vector<32x1xf32>
    %93 = arith.addf %92, %40 : vector<32x1xf32>
    %94 = vector.extract_strided_slice %93 {offsets = [0, 0], sizes = [8, 1], strides = [1, 1]} : vector<32x1xf32> to vector<8x1xf32>
    %95 = arith.negf %94 : vector<8x1xf32>
    %96 = math.exp %95 : vector<8x1xf32>
    %cst_48 = arith.constant 1.000000e+00 : f32
    %97 = vector.broadcast %cst_48 : f32 to vector<8x1xf32>
    %98 = arith.addf %97, %96 : vector<8x1xf32>
    %99 = arith.divf %97, %98 : vector<8x1xf32>
    %100 = vector.extract_strided_slice %93 {offsets = [8, 0], sizes = [8, 1], strides = [1, 1]} : vector<32x1xf32> to vector<8x1xf32>
    %101 = arith.negf %100 : vector<8x1xf32>
    %102 = math.exp %101 : vector<8x1xf32>
    %cst_49 = arith.constant 1.000000e+00 : f32
    %103 = vector.broadcast %cst_49 : f32 to vector<8x1xf32>
    %104 = arith.addf %103, %102 : vector<8x1xf32>
    %105 = arith.divf %103, %104 : vector<8x1xf32>
    %106 = vector.extract_strided_slice %93 {offsets = [16, 0], sizes = [8, 1], strides = [1, 1]} : vector<32x1xf32> to vector<8x1xf32>
    %107 = math.tanh %106 : vector<8x1xf32>
    %108 = vector.extract_strided_slice %93 {offsets = [24, 0], sizes = [8, 1], strides = [1, 1]} : vector<32x1xf32> to vector<8x1xf32>
    %109 = arith.negf %108 : vector<8x1xf32>
    %110 = math.exp %109 : vector<8x1xf32>
    %cst_50 = arith.constant 1.000000e+00 : f32
    %111 = vector.broadcast %cst_50 : f32 to vector<8x1xf32>
    %112 = arith.addf %111, %110 : vector<8x1xf32>
    %113 = arith.divf %111, %112 : vector<8x1xf32>
    %c0_51 = arith.constant 0 : index
    %c0_52 = arith.constant 0 : index
    %114 = vector.load %arg56[%c0_51, %c0_52] : memref<8x1xf32, #tpu.memory_space<vmem>>, vector<8x1xf32>
    %115 = arith.mulf %105, %114 : vector<8x1xf32>
    %116 = arith.mulf %99, %107 : vector<8x1xf32>
    %117 = arith.addf %115, %116 : vector<8x1xf32>
    %118 = math.tanh %117 : vector<8x1xf32>
    %119 = arith.mulf %113, %118 : vector<8x1xf32>
    %c0_53 = arith.constant 0 : index
    %c0_54 = arith.constant 0 : index
    %120 = vector.load %arg55[%c0_53, %c0_54] : memref<8x1xf32, #tpu.memory_space<vmem>>, vector<8x1xf32>
    tpu.vector_store %arg55[%c0_53, %c0_54], %119 {strides = array<i32>} : memref<8x1xf32, #tpu.memory_space<vmem>>, vector<8x1xf32>,
    %c0_55 = arith.constant 0 : index
    %c0_56 = arith.constant 0 : index
    %121 = vector.load %arg56[%c0_55, %c0_56] : memref<8x1xf32, #tpu.memory_space<vmem>>, vector<8x1xf32>
    tpu.vector_store %arg56[%c0_55, %c0_56], %117 {strides = array<i32>} : memref<8x1xf32, #tpu.memory_space<vmem>>, vector<8x1xf32>,
    %122 = vector.broadcast %119 : vector<8x1xf32> to vector<8x8xf32>
    %123 = arith.mulf %85, %122 : vector<8x8xf32>
    %c0_57 = arith.constant 0 : index
    %c8_58 = arith.constant 8 : index
    %124 = vector.load %arg54[%c0_57, %c8_58] : memref<8x32xf32, #tpu.memory_space<vmem>>, vector<8x8xf32>
    tpu.vector_store %arg54[%c0_57, %c8_58], %123 {strides = array<i32>} : memref<8x32xf32, #tpu.memory_space<vmem>>, vector<8x8xf32>,
    %c0_59 = arith.constant 0 : index
    %c16 = arith.constant 16 : index
    %125 = vector.load %arg54[%c0_59, %c16] : memref<8x32xf32, #tpu.memory_space<vmem>>, vector<8x8xf32>
    %cst_60 = arith.constant dense<0xFF800000> : vector<8xf32>
    %126 = vector.multi_reduction <maximumf>, %125, %cst_60 [1] : vector<8x8xf32> to vector<8xf32>
    %127 = vector.shape_cast %126 : vector<8xf32> to vector<8x1xf32>
    %cst_61 = arith.constant dense<0.000000e+00> : vector<32x1xf32>
    %128 = tpu.matmul %37, %127, %cst_61 {dimension_numbers = #tpu.dot_dimension_numbers<[1], [0], [0], [1], [0, 0, 1, 1], [], []>} : vector<32x8xf32>, vector<8x1xf32>, vector<32x1xf32> -> vector<32x1xf32>
    %129 = arith.addf %128, %39 : vector<32x1xf32>
    %c0_62 = arith.constant 0 : index
    %c0_63 = arith.constant 0 : index
    %130 = vector.load %arg55[%c0_62, %c0_63] : memref<8x1xf32, #tpu.memory_space<vmem>>, vector<8x1xf32>
    %cst_64 = arith.constant dense<0.000000e+00> : vector<32x1xf32>
    %131 = tpu.matmul %38, %130, %cst_64 {dimension_numbers = #tpu.dot_dimension_numbers<[1], [0], [0], [1], [0, 0, 1, 1], [], []>} : vector<32x8xf32>, vector<8x1xf32>, vector<32x1xf32> -> vector<32x1xf32>
    %132 = arith.addf %129, %131 : vector<32x1xf32>
    %133 = arith.addf %132, %40 : vector<32x1xf32>
    %134 = vector.extract_strided_slice %133 {offsets = [0, 0], sizes = [8, 1], strides = [1, 1]} : vector<32x1xf32> to vector<8x1xf32>
    %135 = arith.negf %134 : vector<8x1xf32>
    %136 = math.exp %135 : vector<8x1xf32>
    %cst_65 = arith.constant 1.000000e+00 : f32
    %137 = vector.broadcast %cst_65 : f32 to vector<8x1xf32>
    %138 = arith.addf %137, %136 : vector<8x1xf32>
    %139 = arith.divf %137, %138 : vector<8x1xf32>
    %140 = vector.extract_strided_slice %133 {offsets = [8, 0], sizes = [8, 1], strides = [1, 1]} : vector<32x1xf32> to vector<8x1xf32>
    %141 = arith.negf %140 : vector<8x1xf32>
    %142 = math.exp %141 : vector<8x1xf32>
    %cst_66 = arith.constant 1.000000e+00 : f32
    %143 = vector.broadcast %cst_66 : f32 to vector<8x1xf32>
    %144 = arith.addf %143, %142 : vector<8x1xf32>
    %145 = arith.divf %143, %144 : vector<8x1xf32>
    %146 = vector.extract_strided_slice %133 {offsets = [16, 0], sizes = [8, 1], strides = [1, 1]} : vector<32x1xf32> to vector<8x1xf32>
    %147 = math.tanh %146 : vector<8x1xf32>
    %148 = vector.extract_strided_slice %133 {offsets = [24, 0], sizes = [8, 1], strides = [1, 1]} : vector<32x1xf32> to vector<8x1xf32>
    %149 = arith.negf %148 : vector<8x1xf32>
    %150 = math.exp %149 : vector<8x1xf32>
    %cst_67 = arith.constant 1.000000e+00 : f32
    %151 = vector.broadcast %cst_67 : f32 to vector<8x1xf32>
    %152 = arith.addf %151, %150 : vector<8x1xf32>
    %153 = arith.divf %151, %152 : vector<8x1xf32>
    %c0_68 = arith.constant 0 : index
    %c0_69 = arith.constant 0 : index
    %154 = vector.load %arg56[%c0_68, %c0_69] : memref<8x1xf32, #tpu.memory_space<vmem>>, vector<8x1xf32>
    %155 = arith.mulf %145, %154 : vector<8x1xf32>
    %156 = arith.mulf %139, %147 : vector<8x1xf32>
    %157 = arith.addf %155, %156 : vector<8x1xf32>
    %158 = math.tanh %157 : vector<8x1xf32>
    %159 = arith.mulf %153, %158 : vector<8x1xf32>
    %c0_70 = arith.constant 0 : index
    %c0_71 = arith.constant 0 : index
    %160 = vector.load %arg55[%c0_70, %c0_71] : memref<8x1xf32, #tpu.memory_space<vmem>>, vector<8x1xf32>
    tpu.vector_store %arg55[%c0_70, %c0_71], %159 {strides = array<i32>} : memref<8x1xf32, #tpu.memory_space<vmem>>, vector<8x1xf32>,
    %c0_72 = arith.constant 0 : index
    %c0_73 = arith.constant 0 : index
    %161 = vector.load %arg56[%c0_72, %c0_73] : memref<8x1xf32, #tpu.memory_space<vmem>>, vector<8x1xf32>
    tpu.vector_store %arg56[%c0_72, %c0_73], %157 {strides = array<i32>} : memref<8x1xf32, #tpu.memory_space<vmem>>, vector<8x1xf32>,
    %162 = vector.broadcast %159 : vector<8x1xf32> to vector<8x8xf32>
    %163 = arith.mulf %125, %162 : vector<8x8xf32>
    %c0_74 = arith.constant 0 : index
    %c16_75 = arith.constant 16 : index
    %164 = vector.load %arg54[%c0_74, %c16_75] : memref<8x32xf32, #tpu.memory_space<vmem>>, vector<8x8xf32>
    tpu.vector_store %arg54[%c0_74, %c16_75], %163 {strides = array<i32>} : memref<8x32xf32, #tpu.memory_space<vmem>>, vector<8x8xf32>,
    %c0_76 = arith.constant 0 : index
    %c24 = arith.constant 24 : index
    %165 = vector.load %arg54[%c0_76, %c24] : memref<8x32xf32, #tpu.memory_space<vmem>>, vector<8x8xf32>
    %cst_77 = arith.constant dense<0xFF800000> : vector<8xf32>
    %166 = vector.multi_reduction <maximumf>, %165, %cst_77 [1] : vector<8x8xf32> to vector<8xf32>
    %167 = vector.shape_cast %166 : vector<8xf32> to vector<8x1xf32>
    %cst_78 = arith.constant dense<0.000000e+00> : vector<32x1xf32>
    %168 = tpu.matmul %37, %167, %cst_78 {dimension_numbers = #tpu.dot_dimension_numbers<[1], [0], [0], [1], [0, 0, 1, 1], [], []>} : vector<32x8xf32>, vector<8x1xf32>, vector<32x1xf32> -> vector<32x1xf32>
    %169 = arith.addf %168, %39 : vector<32x1xf32>
    %c0_79 = arith.constant 0 : index
    %c0_80 = arith.constant 0 : index
    %170 = vector.load %arg55[%c0_79, %c0_80] : memref<8x1xf32, #tpu.memory_space<vmem>>, vector<8x1xf32>
    %cst_81 = arith.constant dense<0.000000e+00> : vector<32x1xf32>
    %171 = tpu.matmul %38, %170, %cst_81 {dimension_numbers = #tpu.dot_dimension_numbers<[1], [0], [0], [1], [0, 0, 1, 1], [], []>} : vector<32x8xf32>, vector<8x1xf32>, vector<32x1xf32> -> vector<32x1xf32>
    %172 = arith.addf %169, %171 : vector<32x1xf32>
    %173 = arith.addf %172, %40 : vector<32x1xf32>
    %174 = vector.extract_strided_slice %173 {offsets = [0, 0], sizes = [8, 1], strides = [1, 1]} : vector<32x1xf32> to vector<8x1xf32>
    %175 = arith.negf %174 : vector<8x1xf32>
    %176 = math.exp %175 : vector<8x1xf32>
    %cst_82 = arith.constant 1.000000e+00 : f32
    %177 = vector.broadcast %cst_82 : f32 to vector<8x1xf32>
    %178 = arith.addf %177, %176 : vector<8x1xf32>
    %179 = arith.divf %177, %178 : vector<8x1xf32>
    %180 = vector.extract_strided_slice %173 {offsets = [8, 0], sizes = [8, 1], strides = [1, 1]} : vector<32x1xf32> to vector<8x1xf32>
    %181 = arith.negf %180 : vector<8x1xf32>
    %182 = math.exp %181 : vector<8x1xf32>
    %cst_83 = arith.constant 1.000000e+00 : f32
    %183 = vector.broadcast %cst_83 : f32 to vector<8x1xf32>
    %184 = arith.addf %183, %182 : vector<8x1xf32>
    %185 = arith.divf %183, %184 : vector<8x1xf32>
    %186 = vector.extract_strided_slice %173 {offsets = [16, 0], sizes = [8, 1], strides = [1, 1]} : vector<32x1xf32> to vector<8x1xf32>
    %187 = math.tanh %186 : vector<8x1xf32>
    %188 = vector.extract_strided_slice %173 {offsets = [24, 0], sizes = [8, 1], strides = [1, 1]} : vector<32x1xf32> to vector<8x1xf32>
    %189 = arith.negf %188 : vector<8x1xf32>
    %190 = math.exp %189 : vector<8x1xf32>
    %cst_84 = arith.constant 1.000000e+00 : f32
    %191 = vector.broadcast %cst_84 : f32 to vector<8x1xf32>
    %192 = arith.addf %191, %190 : vector<8x1xf32>
    %193 = arith.divf %191, %192 : vector<8x1xf32>
    %c0_85 = arith.constant 0 : index
    %c0_86 = arith.constant 0 : index
    %194 = vector.load %arg56[%c0_85, %c0_86] : memref<8x1xf32, #tpu.memory_space<vmem>>, vector<8x1xf32>
    %195 = arith.mulf %185, %194 : vector<8x1xf32>
    %196 = arith.mulf %179, %187 : vector<8x1xf32>
    %197 = arith.addf %195, %196 : vector<8x1xf32>
    %198 = math.tanh %197 : vector<8x1xf32>
    %199 = arith.mulf %193, %198 : vector<8x1xf32>
    %c0_87 = arith.constant 0 : index
    %c0_88 = arith.constant 0 : index
    %200 = vector.load %arg55[%c0_87, %c0_88] : memref<8x1xf32, #tpu.memory_space<vmem>>, vector<8x1xf32>
    tpu.vector_store %arg55[%c0_87, %c0_88], %199 {strides = array<i32>} : memref<8x1xf32, #tpu.memory_space<vmem>>, vector<8x1xf32>,
    %c0_89 = arith.constant 0 : index
    %c0_90 = arith.constant 0 : index
    %201 = vector.load %arg56[%c0_89, %c0_90] : memref<8x1xf32, #tpu.memory_space<vmem>>, vector<8x1xf32>
    tpu.vector_store %arg56[%c0_89, %c0_90], %197 {strides = array<i32>} : memref<8x1xf32, #tpu.memory_space<vmem>>, vector<8x1xf32>,
    %202 = vector.broadcast %199 : vector<8x1xf32> to vector<8x8xf32>
    %203 = arith.mulf %165, %202 : vector<8x8xf32>
    %c0_91 = arith.constant 0 : index
    %c24_92 = arith.constant 24 : index
    %204 = vector.load %arg54[%c0_91, %c24_92] : memref<8x32xf32, #tpu.memory_space<vmem>>, vector<8x8xf32>
    tpu.vector_store %arg54[%c0_91, %c24_92], %203 {strides = array<i32>} : memref<8x32xf32, #tpu.memory_space<vmem>>, vector<8x8xf32>,
    %c0_93 = arith.constant 0 : index
    %c0_94 = arith.constant 0 : index
    %205 = vector.load %arg54[%c0_93, %c0_94] : memref<8x32xf32, #tpu.memory_space<vmem>>, vector<8x32xf32>
    %c0_95 = arith.constant 0 : index
    %c0_96 = arith.constant 0 : index
    %c0_97 = arith.constant 0 : index
    %206 = vector.load %arg1[%c0_95, %c0_96, %c0_97] : memref<1x1x32xf32, #tpu.memory_space<vmem>>, vector<1x1x32xf32>
    %207 = vector.shape_cast %206 : vector<1x1x32xf32> to vector<1x32xf32>
    %c0_98 = arith.constant 0 : index
    %c0_99 = arith.constant 0 : index
    %208 = vector.load %arg8[%c0_98, %c0_99] : memref<8x8xf32, #tpu.memory_space<vmem>>, vector<8x8xf32>
    %cst_100 = arith.constant dense<0.000000e+00> : vector<8x32xf32>
    %209 = tpu.matmul %208, %205, %cst_100 {dimension_numbers = #tpu.dot_dimension_numbers<[1], [0], [0], [1], [0, 0, 1, 1], [], []>} : vector<8x8xf32>, vector<8x32xf32>, vector<8x32xf32> -> vector<8x32xf32>
    %c0_101 = arith.constant 0 : index
    %c0_102 = arith.constant 0 : index
    %210 = vector.load %arg9[%c0_101, %c0_102] : memref<8x1xf32, #tpu.memory_space<vmem>>, vector<8x1xf32>
    %211 = vector.broadcast %210 : vector<8x1xf32> to vector<8x32xf32>
    %212 = arith.addf %209, %211 : vector<8x32xf32>
    %213 = vector.broadcast %207 : vector<1x32xf32> to vector<8x32xf32>
    %214 = arith.addf %212, %213 : vector<8x32xf32>
    %c0_103 = arith.constant 0 : index
    %c0_104 = arith.constant 0 : index
    %215 = vector.load %arg53[%c0_103, %c0_104] : memref<8x32xf32, #tpu.memory_space<vmem>>, vector<8x32xf32>
    tpu.vector_store %arg53[%c0_103, %c0_104], %214 {strides = array<i32>} : memref<8x32xf32, #tpu.memory_space<vmem>>, vector<8x32xf32>,
    %c0_105 = arith.constant 0 : index
    %c0_106 = arith.constant 0 : index
    %216 = vector.load %arg50[%c0_105, %c0_106] : memref<1x48xf32, #tpu.memory_space<vmem>>, vector<1x8xf32>
    %cst_107 = arith.constant dense<0.000000e+00> : vector<1x32xf32>
    %217 = tpu.matmul %216, %205, %cst_107 {dimension_numbers = #tpu.dot_dimension_numbers<[1], [0], [0], [1], [0, 0, 1, 1], [], []>} : vector<1x8xf32>, vector<8x32xf32>, vector<1x32xf32> -> vector<1x32xf32>
    %c0_108 = arith.constant 0 : index
    %c0_109 = arith.constant 0 : index
    %c0_110 = arith.constant 0 : index
    %218 = vector.load %arg52[%c0_108, %c0_109, %c0_110] : memref<1x1x32xf32, #tpu.memory_space<vmem>>, vector<1x1x32xf32>
    %219 = vector.shape_cast %218 : vector<1x1x32xf32> to vector<1x32xf32>
    %220 = vector.shape_cast %217 : vector<1x32xf32> to vector<1x1x32xf32>
    tpu.vector_store %arg52[%c0_108, %c0_109, %c0_110], %220 {strides = array<i32>} : memref<1x1x32xf32, #tpu.memory_space<vmem>>, vector<1x1x32xf32>,
    %c0_111 = arith.constant 0 : index
    %c0_112 = arith.constant 0 : index
    %221 = vector.load %arg53[%c0_111, %c0_112] : memref<8x32xf32, #tpu.memory_space<vmem>>, vector<8x28xf32>
    %c0_113 = arith.constant 0 : index
    %c2 = arith.constant 2 : index
    %222 = vector.load %arg53[%c0_113, %c2] : memref<8x32xf32, #tpu.memory_space<vmem>>, vector<8x28xf32>
    %c0_114 = arith.constant 0 : index
    %c4 = arith.constant 4 : index
    %223 = vector.load %arg53[%c0_114, %c4] : memref<8x32xf32, #tpu.memory_space<vmem>>, vector<8x28xf32>
    %224 = tpu.concatenate %221, %222, %223 in 0 : vector<8x28xf32>, vector<8x28xf32>, vector<8x28xf32> -> vector<24x28xf32>
    %c0_115 = arith.constant 0 : index
    %c0_116 = arith.constant 0 : index
    %225 = vector.load %arg10[%c0_115, %c0_116] : memref<16x24xf32, #tpu.memory_space<vmem>>, vector<16x24xf32>
    %cst_117 = arith.constant dense<0.000000e+00> : vector<16x28xf32>
    %226 = tpu.matmul %225, %224, %cst_117 {dimension_numbers = #tpu.dot_dimension_numbers<[1], [0], [0], [1], [0, 0, 1, 1], [], []>} : vector<16x24xf32>, vector<24x28xf32>, vector<16x28xf32> -> vector<16x28xf32>
    %c0_118 = arith.constant 0 : index
    %c0_119 = arith.constant 0 : index
    %227 = vector.load %arg11[%c0_118, %c0_119] : memref<16x1xf32, #tpu.memory_space<vmem>>, vector<16x1xf32>
    %228 = vector.broadcast %227 : vector<16x1xf32> to vector<16x28xf32>
    %229 = arith.addf %226, %228 : vector<16x28xf32>
    %230 = vector.extract_strided_slice %229 {offsets = [0, 0], sizes = [8, 28], strides = [1, 1]} : vector<16x28xf32> to vector<8x28xf32>
    %231 = math.tanh %230 : vector<8x28xf32>
    %232 = vector.extract_strided_slice %229 {offsets = [8, 0], sizes = [8, 28], strides = [1, 1]} : vector<16x28xf32> to vector<8x28xf32>
    %233 = arith.negf %232 : vector<8x28xf32>
    %234 = math.exp %233 : vector<8x28xf32>
    %cst_120 = arith.constant 1.000000e+00 : f32
    %235 = vector.broadcast %cst_120 : f32 to vector<8x28xf32>
    %236 = arith.addf %235, %234 : vector<8x28xf32>
    %237 = arith.divf %235, %236 : vector<8x28xf32>
    %238 = arith.mulf %231, %237 : vector<8x28xf32>
    %cst_121 = arith.constant 0.000000e+00 : f32
    %239 = vector.broadcast %cst_121 : f32 to vector<8x4xf32>
    %240 = tpu.concatenate %239, %238 in 1 : vector<8x4xf32>, vector<8x28xf32> -> vector<8x32xf32>
    %c0_122 = arith.constant 0 : index
    %c0_123 = arith.constant 0 : index
    %241 = vector.load %arg54[%c0_122, %c0_123] : memref<8x32xf32, #tpu.memory_space<vmem>>, vector<8x32xf32>
    tpu.vector_store %arg54[%c0_122, %c0_123], %240 {strides = array<i32>} : memref<8x32xf32, #tpu.memory_space<vmem>>, vector<8x32xf32>,
    %c0_124 = arith.constant 0 : index
    %c0_125 = arith.constant 0 : index
    %242 = vector.load %arg12[%c0_124, %c0_125] : memref<32x8xf32, #tpu.memory_space<vmem>>, vector<32x8xf32>
    %c0_126 = arith.constant 0 : index
    %c0_127 = arith.constant 0 : index
    %243 = vector.load %arg13[%c0_126, %c0_127] : memref<32x8xf32, #tpu.memory_space<vmem>>, vector<32x8xf32>
    %c0_128 = arith.constant 0 : index
    %c0_129 = arith.constant 0 : index
    %244 = vector.load %arg14[%c0_128, %c0_129] : memref<32x1xf32, #tpu.memory_space<vmem>>, vector<32x1xf32>
    %c0_130 = arith.constant 0 : index
    %c0_131 = arith.constant 0 : index
    %245 = vector.load %arg15[%c0_130, %c0_131] : memref<32x1xf32, #tpu.memory_space<vmem>>, vector<32x1xf32>
    %cst_132 = arith.constant 0.000000e+00 : f32
    %246 = vector.broadcast %cst_132 : f32 to vector<8x1xf32>
    %c0_133 = arith.constant 0 : index
    %c0_134 = arith.constant 0 : index
    %247 = vector.load %arg55[%c0_133, %c0_134] : memref<8x1xf32, #tpu.memory_space<vmem>>, vector<8x1xf32>
    tpu.vector_store %arg55[%c0_133, %c0_134], %246 {strides = array<i32>} : memref<8x1xf32, #tpu.memory_space<vmem>>, vector<8x1xf32>,
    %cst_135 = arith.constant 0.000000e+00 : f32
    %248 = vector.broadcast %cst_135 : f32 to vector<8x1xf32>
    %c0_136 = arith.constant 0 : index
    %c0_137 = arith.constant 0 : index
    %249 = vector.load %arg56[%c0_136, %c0_137] : memref<8x1xf32, #tpu.memory_space<vmem>>, vector<8x1xf32>
    tpu.vector_store %arg56[%c0_136, %c0_137], %248 {strides = array<i32>} : memref<8x1xf32, #tpu.memory_space<vmem>>, vector<8x1xf32>,
    %c0_138 = arith.constant 0 : index
    %c0_139 = arith.constant 0 : index
    %250 = vector.load %arg54[%c0_138, %c0_139] : memref<8x32xf32, #tpu.memory_space<vmem>>, vector<8x8xf32>
    %cst_140 = arith.constant dense<0xFF800000> : vector<8xf32>
    %251 = vector.multi_reduction <maximumf>, %250, %cst_140 [1] : vector<8x8xf32> to vector<8xf32>
    %252 = vector.shape_cast %251 : vector<8xf32> to vector<8x1xf32>
    %cst_141 = arith.constant dense<0.000000e+00> : vector<32x1xf32>
    %253 = tpu.matmul %242, %252, %cst_141 {dimension_numbers = #tpu.dot_dimension_numbers<[1], [0], [0], [1], [0, 0, 1, 1], [], []>} : vector<32x8xf32>, vector<8x1xf32>, vector<32x1xf32> -> vector<32x1xf32>
    %254 = arith.addf %253, %244 : vector<32x1xf32>
    %c0_142 = arith.constant 0 : index
    %c0_143 = arith.constant 0 : index
    %255 = vector.load %arg55[%c0_142, %c0_143] : memref<8x1xf32, #tpu.memory_space<vmem>>, vector<8x1xf32>
    %cst_144 = arith.constant dense<0.000000e+00> : vector<32x1xf32>
    %256 = tpu.matmul %243, %255, %cst_144 {dimension_numbers = #tpu.dot_dimension_numbers<[1], [0], [0], [1], [0, 0, 1, 1], [], []>} : vector<32x8xf32>, vector<8x1xf32>, vector<32x1xf32> -> vector<32x1xf32>
    %257 = arith.addf %254, %256 : vector<32x1xf32>
    %258 = arith.addf %257, %245 : vector<32x1xf32>
    %259 = vector.extract_strided_slice %258 {offsets = [0, 0], sizes = [8, 1], strides = [1, 1]} : vector<32x1xf32> to vector<8x1xf32>
    %260 = arith.negf %259 : vector<8x1xf32>
    %261 = math.exp %260 : vector<8x1xf32>
    %cst_145 = arith.constant 1.000000e+00 : f32
    %262 = vector.broadcast %cst_145 : f32 to vector<8x1xf32>
    %263 = arith.addf %262, %261 : vector<8x1xf32>
    %264 = arith.divf %262, %263 : vector<8x1xf32>
    %265 = vector.extract_strided_slice %258 {offsets = [8, 0], sizes = [8, 1], strides = [1, 1]} : vector<32x1xf32> to vector<8x1xf32>
    %266 = arith.negf %265 : vector<8x1xf32>
    %267 = math.exp %266 : vector<8x1xf32>
    %cst_146 = arith.constant 1.000000e+00 : f32
    %268 = vector.broadcast %cst_146 : f32 to vector<8x1xf32>
    %269 = arith.addf %268, %267 : vector<8x1xf32>
    %270 = arith.divf %268, %269 : vector<8x1xf32>
    %271 = vector.extract_strided_slice %258 {offsets = [16, 0], sizes = [8, 1], strides = [1, 1]} : vector<32x1xf32> to vector<8x1xf32>
    %272 = math.tanh %271 : vector<8x1xf32>
    %273 = vector.extract_strided_slice %258 {offsets = [24, 0], sizes = [8, 1], strides = [1, 1]} : vector<32x1xf32> to vector<8x1xf32>
    %274 = arith.negf %273 : vector<8x1xf32>
    %275 = math.exp %274 : vector<8x1xf32>
    %cst_147 = arith.constant 1.000000e+00 : f32
    %276 = vector.broadcast %cst_147 : f32 to vector<8x1xf32>
    %277 = arith.addf %276, %275 : vector<8x1xf32>
    %278 = arith.divf %276, %277 : vector<8x1xf32>
    %c0_148 = arith.constant 0 : index
    %c0_149 = arith.constant 0 : index
    %279 = vector.load %arg56[%c0_148, %c0_149] : memref<8x1xf32, #tpu.memory_space<vmem>>, vector<8x1xf32>
    %280 = arith.mulf %270, %279 : vector<8x1xf32>
    %281 = arith.mulf %264, %272 : vector<8x1xf32>
    %282 = arith.addf %280, %281 : vector<8x1xf32>
    %283 = math.tanh %282 : vector<8x1xf32>
    %284 = arith.mulf %278, %283 : vector<8x1xf32>
    %c0_150 = arith.constant 0 : index
    %c0_151 = arith.constant 0 : index
    %285 = vector.load %arg55[%c0_150, %c0_151] : memref<8x1xf32, #tpu.memory_space<vmem>>, vector<8x1xf32>
    tpu.vector_store %arg55[%c0_150, %c0_151], %284 {strides = array<i32>} : memref<8x1xf32, #tpu.memory_space<vmem>>, vector<8x1xf32>,
    %c0_152 = arith.constant 0 : index
    %c0_153 = arith.constant 0 : index
    %286 = vector.load %arg56[%c0_152, %c0_153] : memref<8x1xf32, #tpu.memory_space<vmem>>, vector<8x1xf32>
    tpu.vector_store %arg56[%c0_152, %c0_153], %282 {strides = array<i32>} : memref<8x1xf32, #tpu.memory_space<vmem>>, vector<8x1xf32>,
    %287 = vector.broadcast %284 : vector<8x1xf32> to vector<8x8xf32>
    %288 = arith.mulf %250, %287 : vector<8x8xf32>
    %c0_154 = arith.constant 0 : index
    %c0_155 = arith.constant 0 : index
    %289 = vector.load %arg54[%c0_154, %c0_155] : memref<8x32xf32, #tpu.memory_space<vmem>>, vector<8x8xf32>
    tpu.vector_store %arg54[%c0_154, %c0_155], %288 {strides = array<i32>} : memref<8x32xf32, #tpu.memory_space<vmem>>, vector<8x8xf32>,
    %c0_156 = arith.constant 0 : index
    %c8_157 = arith.constant 8 : index
    %290 = vector.load %arg54[%c0_156, %c8_157] : memref<8x32xf32, #tpu.memory_space<vmem>>, vector<8x8xf32>
    %cst_158 = arith.constant dense<0xFF800000> : vector<8xf32>
    %291 = vector.multi_reduction <maximumf>, %290, %cst_158 [1] : vector<8x8xf32> to vector<8xf32>
    %292 = vector.shape_cast %291 : vector<8xf32> to vector<8x1xf32>
    %cst_159 = arith.constant dense<0.000000e+00> : vector<32x1xf32>
    %293 = tpu.matmul %242, %292, %cst_159 {dimension_numbers = #tpu.dot_dimension_numbers<[1], [0], [0], [1], [0, 0, 1, 1], [], []>} : vector<32x8xf32>, vector<8x1xf32>, vector<32x1xf32> -> vector<32x1xf32>
    %294 = arith.addf %293, %244 : vector<32x1xf32>
    %c0_160 = arith.constant 0 : index
    %c0_161 = arith.constant 0 : index
    %295 = vector.load %arg55[%c0_160, %c0_161] : memref<8x1xf32, #tpu.memory_space<vmem>>, vector<8x1xf32>
    %cst_162 = arith.constant dense<0.000000e+00> : vector<32x1xf32>
    %296 = tpu.matmul %243, %295, %cst_162 {dimension_numbers = #tpu.dot_dimension_numbers<[1], [0], [0], [1], [0, 0, 1, 1], [], []>} : vector<32x8xf32>, vector<8x1xf32>, vector<32x1xf32> -> vector<32x1xf32>
    %297 = arith.addf %294, %296 : vector<32x1xf32>
    %298 = arith.addf %297, %245 : vector<32x1xf32>
    %299 = vector.extract_strided_slice %298 {offsets = [0, 0], sizes = [8, 1], strides = [1, 1]} : vector<32x1xf32> to vector<8x1xf32>
    %300 = arith.negf %299 : vector<8x1xf32>
    %301 = math.exp %300 : vector<8x1xf32>
    %cst_163 = arith.constant 1.000000e+00 : f32
    %302 = vector.broadcast %cst_163 : f32 to vector<8x1xf32>
    %303 = arith.addf %302, %301 : vector<8x1xf32>
    %304 = arith.divf %302, %303 : vector<8x1xf32>
    %305 = vector.extract_strided_slice %298 {offsets = [8, 0], sizes = [8, 1], strides = [1, 1]} : vector<32x1xf32> to vector<8x1xf32>
    %306 = arith.negf %305 : vector<8x1xf32>
    %307 = math.exp %306 : vector<8x1xf32>
    %cst_164 = arith.constant 1.000000e+00 : f32
    %308 = vector.broadcast %cst_164 : f32 to vector<8x1xf32>
    %309 = arith.addf %308, %307 : vector<8x1xf32>
    %310 = arith.divf %308, %309 : vector<8x1xf32>
    %311 = vector.extract_strided_slice %298 {offsets = [16, 0], sizes = [8, 1], strides = [1, 1]} : vector<32x1xf32> to vector<8x1xf32>
    %312 = math.tanh %311 : vector<8x1xf32>
    %313 = vector.extract_strided_slice %298 {offsets = [24, 0], sizes = [8, 1], strides = [1, 1]} : vector<32x1xf32> to vector<8x1xf32>
    %314 = arith.negf %313 : vector<8x1xf32>
    %315 = math.exp %314 : vector<8x1xf32>
    %cst_165 = arith.constant 1.000000e+00 : f32
    %316 = vector.broadcast %cst_165 : f32 to vector<8x1xf32>
    %317 = arith.addf %316, %315 : vector<8x1xf32>
    %318 = arith.divf %316, %317 : vector<8x1xf32>
    %c0_166 = arith.constant 0 : index
    %c0_167 = arith.constant 0 : index
    %319 = vector.load %arg56[%c0_166, %c0_167] : memref<8x1xf32, #tpu.memory_space<vmem>>, vector<8x1xf32>
    %320 = arith.mulf %310, %319 : vector<8x1xf32>
    %321 = arith.mulf %304, %312 : vector<8x1xf32>
    %322 = arith.addf %320, %321 : vector<8x1xf32>
    %323 = math.tanh %322 : vector<8x1xf32>
    %324 = arith.mulf %318, %323 : vector<8x1xf32>
    %c0_168 = arith.constant 0 : index
    %c0_169 = arith.constant 0 : index
    %325 = vector.load %arg55[%c0_168, %c0_169] : memref<8x1xf32, #tpu.memory_space<vmem>>, vector<8x1xf32>
    tpu.vector_store %arg55[%c0_168, %c0_169], %324 {strides = array<i32>} : memref<8x1xf32, #tpu.memory_space<vmem>>, vector<8x1xf32>,
    %c0_170 = arith.constant 0 : index
    %c0_171 = arith.constant 0 : index
    %326 = vector.load %arg56[%c0_170, %c0_171] : memref<8x1xf32, #tpu.memory_space<vmem>>, vector<8x1xf32>
    tpu.vector_store %arg56[%c0_170, %c0_171], %322 {strides = array<i32>} : memref<8x1xf32, #tpu.memory_space<vmem>>, vector<8x1xf32>,
    %327 = vector.broadcast %324 : vector<8x1xf32> to vector<8x8xf32>
    %328 = arith.mulf %290, %327 : vector<8x8xf32>
    %c0_172 = arith.constant 0 : index
    %c8_173 = arith.constant 8 : index
    %329 = vector.load %arg54[%c0_172, %c8_173] : memref<8x32xf32, #tpu.memory_space<vmem>>, vector<8x8xf32>
    tpu.vector_store %arg54[%c0_172, %c8_173], %328 {strides = array<i32>} : memref<8x32xf32, #tpu.memory_space<vmem>>, vector<8x8xf32>,
    %c0_174 = arith.constant 0 : index
    %c16_175 = arith.constant 16 : index
    %330 = vector.load %arg54[%c0_174, %c16_175] : memref<8x32xf32, #tpu.memory_space<vmem>>, vector<8x8xf32>
    %cst_176 = arith.constant dense<0xFF800000> : vector<8xf32>
    %331 = vector.multi_reduction <maximumf>, %330, %cst_176 [1] : vector<8x8xf32> to vector<8xf32>
    %332 = vector.shape_cast %331 : vector<8xf32> to vector<8x1xf32>
    %cst_177 = arith.constant dense<0.000000e+00> : vector<32x1xf32>
    %333 = tpu.matmul %242, %332, %cst_177 {dimension_numbers = #tpu.dot_dimension_numbers<[1], [0], [0], [1], [0, 0, 1, 1], [], []>} : vector<32x8xf32>, vector<8x1xf32>, vector<32x1xf32> -> vector<32x1xf32>
    %334 = arith.addf %333, %244 : vector<32x1xf32>
    %c0_178 = arith.constant 0 : index
    %c0_179 = arith.constant 0 : index
    %335 = vector.load %arg55[%c0_178, %c0_179] : memref<8x1xf32, #tpu.memory_space<vmem>>, vector<8x1xf32>
    %cst_180 = arith.constant dense<0.000000e+00> : vector<32x1xf32>
    %336 = tpu.matmul %243, %335, %cst_180 {dimension_numbers = #tpu.dot_dimension_numbers<[1], [0], [0], [1], [0, 0, 1, 1], [], []>} : vector<32x8xf32>, vector<8x1xf32>, vector<32x1xf32> -> vector<32x1xf32>
    %337 = arith.addf %334, %336 : vector<32x1xf32>
    %338 = arith.addf %337, %245 : vector<32x1xf32>
    %339 = vector.extract_strided_slice %338 {offsets = [0, 0], sizes = [8, 1], strides = [1, 1]} : vector<32x1xf32> to vector<8x1xf32>
    %340 = arith.negf %339 : vector<8x1xf32>
    %341 = math.exp %340 : vector<8x1xf32>
    %cst_181 = arith.constant 1.000000e+00 : f32
    %342 = vector.broadcast %cst_181 : f32 to vector<8x1xf32>
    %343 = arith.addf %342, %341 : vector<8x1xf32>
    %344 = arith.divf %342, %343 : vector<8x1xf32>
    %345 = vector.extract_strided_slice %338 {offsets = [8, 0], sizes = [8, 1], strides = [1, 1]} : vector<32x1xf32> to vector<8x1xf32>
    %346 = arith.negf %345 : vector<8x1xf32>
    %347 = math.exp %346 : vector<8x1xf32>
    %cst_182 = arith.constant 1.000000e+00 : f32
    %348 = vector.broadcast %cst_182 : f32 to vector<8x1xf32>
    %349 = arith.addf %348, %347 : vector<8x1xf32>
    %350 = arith.divf %348, %349 : vector<8x1xf32>
    %351 = vector.extract_strided_slice %338 {offsets = [16, 0], sizes = [8, 1], strides = [1, 1]} : vector<32x1xf32> to vector<8x1xf32>
    %352 = math.tanh %351 : vector<8x1xf32>
    %353 = vector.extract_strided_slice %338 {offsets = [24, 0], sizes = [8, 1], strides = [1, 1]} : vector<32x1xf32> to vector<8x1xf32>
    %354 = arith.negf %353 : vector<8x1xf32>
    %355 = math.exp %354 : vector<8x1xf32>
    %cst_183 = arith.constant 1.000000e+00 : f32
    %356 = vector.broadcast %cst_183 : f32 to vector<8x1xf32>
    %357 = arith.addf %356, %355 : vector<8x1xf32>
    %358 = arith.divf %356, %357 : vector<8x1xf32>
    %c0_184 = arith.constant 0 : index
    %c0_185 = arith.constant 0 : index
    %359 = vector.load %arg56[%c0_184, %c0_185] : memref<8x1xf32, #tpu.memory_space<vmem>>, vector<8x1xf32>
    %360 = arith.mulf %350, %359 : vector<8x1xf32>
    %361 = arith.mulf %344, %352 : vector<8x1xf32>
    %362 = arith.addf %360, %361 : vector<8x1xf32>
    %363 = math.tanh %362 : vector<8x1xf32>
    %364 = arith.mulf %358, %363 : vector<8x1xf32>
    %c0_186 = arith.constant 0 : index
    %c0_187 = arith.constant 0 : index
    %365 = vector.load %arg55[%c0_186, %c0_187] : memref<8x1xf32, #tpu.memory_space<vmem>>, vector<8x1xf32>
    tpu.vector_store %arg55[%c0_186, %c0_187], %364 {strides = array<i32>} : memref<8x1xf32, #tpu.memory_space<vmem>>, vector<8x1xf32>,
    %c0_188 = arith.constant 0 : index
    %c0_189 = arith.constant 0 : index
    %366 = vector.load %arg56[%c0_188, %c0_189] : memref<8x1xf32, #tpu.memory_space<vmem>>, vector<8x1xf32>
    tpu.vector_store %arg56[%c0_188, %c0_189], %362 {strides = array<i32>} : memref<8x1xf32, #tpu.memory_space<vmem>>, vector<8x1xf32>,
    %367 = vector.broadcast %364 : vector<8x1xf32> to vector<8x8xf32>
    %368 = arith.mulf %330, %367 : vector<8x8xf32>
    %c0_190 = arith.constant 0 : index
    %c16_191 = arith.constant 16 : index
    %369 = vector.load %arg54[%c0_190, %c16_191] : memref<8x32xf32, #tpu.memory_space<vmem>>, vector<8x8xf32>
    tpu.vector_store %arg54[%c0_190, %c16_191], %368 {strides = array<i32>} : memref<8x32xf32, #tpu.memory_space<vmem>>, vector<8x8xf32>,
    %c0_192 = arith.constant 0 : index
    %c24_193 = arith.constant 24 : index
    %370 = vector.load %arg54[%c0_192, %c24_193] : memref<8x32xf32, #tpu.memory_space<vmem>>, vector<8x8xf32>
    %cst_194 = arith.constant dense<0xFF800000> : vector<8xf32>
    %371 = vector.multi_reduction <maximumf>, %370, %cst_194 [1] : vector<8x8xf32> to vector<8xf32>
    %372 = vector.shape_cast %371 : vector<8xf32> to vector<8x1xf32>
    %cst_195 = arith.constant dense<0.000000e+00> : vector<32x1xf32>
    %373 = tpu.matmul %242, %372, %cst_195 {dimension_numbers = #tpu.dot_dimension_numbers<[1], [0], [0], [1], [0, 0, 1, 1], [], []>} : vector<32x8xf32>, vector<8x1xf32>, vector<32x1xf32> -> vector<32x1xf32>
    %374 = arith.addf %373, %244 : vector<32x1xf32>
    %c0_196 = arith.constant 0 : index
    %c0_197 = arith.constant 0 : index
    %375 = vector.load %arg55[%c0_196, %c0_197] : memref<8x1xf32, #tpu.memory_space<vmem>>, vector<8x1xf32>
    %cst_198 = arith.constant dense<0.000000e+00> : vector<32x1xf32>
    %376 = tpu.matmul %243, %375, %cst_198 {dimension_numbers = #tpu.dot_dimension_numbers<[1], [0], [0], [1], [0, 0, 1, 1], [], []>} : vector<32x8xf32>, vector<8x1xf32>, vector<32x1xf32> -> vector<32x1xf32>
    %377 = arith.addf %374, %376 : vector<32x1xf32>
    %378 = arith.addf %377, %245 : vector<32x1xf32>
    %379 = vector.extract_strided_slice %378 {offsets = [0, 0], sizes = [8, 1], strides = [1, 1]} : vector<32x1xf32> to vector<8x1xf32>
    %380 = arith.negf %379 : vector<8x1xf32>
    %381 = math.exp %380 : vector<8x1xf32>
    %cst_199 = arith.constant 1.000000e+00 : f32
    %382 = vector.broadcast %cst_199 : f32 to vector<8x1xf32>
    %383 = arith.addf %382, %381 : vector<8x1xf32>
    %384 = arith.divf %382, %383 : vector<8x1xf32>
    %385 = vector.extract_strided_slice %378 {offsets = [8, 0], sizes = [8, 1], strides = [1, 1]} : vector<32x1xf32> to vector<8x1xf32>
    %386 = arith.negf %385 : vector<8x1xf32>
    %387 = math.exp %386 : vector<8x1xf32>
    %cst_200 = arith.constant 1.000000e+00 : f32
    %388 = vector.broadcast %cst_200 : f32 to vector<8x1xf32>
    %389 = arith.addf %388, %387 : vector<8x1xf32>
    %390 = arith.divf %388, %389 : vector<8x1xf32>
    %391 = vector.extract_strided_slice %378 {offsets = [16, 0], sizes = [8, 1], strides = [1, 1]} : vector<32x1xf32> to vector<8x1xf32>
    %392 = math.tanh %391 : vector<8x1xf32>
    %393 = vector.extract_strided_slice %378 {offsets = [24, 0], sizes = [8, 1], strides = [1, 1]} : vector<32x1xf32> to vector<8x1xf32>
    %394 = arith.negf %393 : vector<8x1xf32>
    %395 = math.exp %394 : vector<8x1xf32>
    %cst_201 = arith.constant 1.000000e+00 : f32
    %396 = vector.broadcast %cst_201 : f32 to vector<8x1xf32>
    %397 = arith.addf %396, %395 : vector<8x1xf32>
    %398 = arith.divf %396, %397 : vector<8x1xf32>
    %c0_202 = arith.constant 0 : index
    %c0_203 = arith.constant 0 : index
    %399 = vector.load %arg56[%c0_202, %c0_203] : memref<8x1xf32, #tpu.memory_space<vmem>>, vector<8x1xf32>
    %400 = arith.mulf %390, %399 : vector<8x1xf32>
    %401 = arith.mulf %384, %392 : vector<8x1xf32>
    %402 = arith.addf %400, %401 : vector<8x1xf32>
    %403 = math.tanh %402 : vector<8x1xf32>
    %404 = arith.mulf %398, %403 : vector<8x1xf32>
    %c0_204 = arith.constant 0 : index
    %c0_205 = arith.constant 0 : index
    %405 = vector.load %arg55[%c0_204, %c0_205] : memref<8x1xf32, #tpu.memory_space<vmem>>, vector<8x1xf32>
    tpu.vector_store %arg55[%c0_204, %c0_205], %404 {strides = array<i32>} : memref<8x1xf32, #tpu.memory_space<vmem>>, vector<8x1xf32>,
    %c0_206 = arith.constant 0 : index
    %c0_207 = arith.constant 0 : index
    %406 = vector.load %arg56[%c0_206, %c0_207] : memref<8x1xf32, #tpu.memory_space<vmem>>, vector<8x1xf32>
    tpu.vector_store %arg56[%c0_206, %c0_207], %402 {strides = array<i32>} : memref<8x1xf32, #tpu.memory_space<vmem>>, vector<8x1xf32>,
    %407 = vector.broadcast %404 : vector<8x1xf32> to vector<8x8xf32>
    %408 = arith.mulf %370, %407 : vector<8x8xf32>
    %c0_208 = arith.constant 0 : index
    %c24_209 = arith.constant 24 : index
    %409 = vector.load %arg54[%c0_208, %c24_209] : memref<8x32xf32, #tpu.memory_space<vmem>>, vector<8x8xf32>
    tpu.vector_store %arg54[%c0_208, %c24_209], %408 {strides = array<i32>} : memref<8x32xf32, #tpu.memory_space<vmem>>, vector<8x8xf32>,
    %c0_210 = arith.constant 0 : index
    %c0_211 = arith.constant 0 : index
    %410 = vector.load %arg54[%c0_210, %c0_211] : memref<8x32xf32, #tpu.memory_space<vmem>>, vector<8x32xf32>
    %c0_212 = arith.constant 0 : index
    %c0_213 = arith.constant 0 : index
    %411 = vector.load %arg53[%c0_212, %c0_213] : memref<8x32xf32, #tpu.memory_space<vmem>>, vector<8x32xf32>
    %c0_214 = arith.constant 0 : index
    %c0_215 = arith.constant 0 : index
    %412 = vector.load %arg16[%c0_214, %c0_215] : memref<8x8xf32, #tpu.memory_space<vmem>>, vector<8x8xf32>
    %cst_216 = arith.constant dense<0.000000e+00> : vector<8x32xf32>
    %413 = tpu.matmul %412, %410, %cst_216 {dimension_numbers = #tpu.dot_dimension_numbers<[1], [0], [0], [1], [0, 0, 1, 1], [], []>} : vector<8x8xf32>, vector<8x32xf32>, vector<8x32xf32> -> vector<8x32xf32>
    %c0_217 = arith.constant 0 : index
    %c0_218 = arith.constant 0 : index
    %414 = vector.load %arg17[%c0_217, %c0_218] : memref<8x1xf32, #tpu.memory_space<vmem>>, vector<8x1xf32>
    %415 = vector.broadcast %414 : vector<8x1xf32> to vector<8x32xf32>
    %416 = arith.addf %413, %415 : vector<8x32xf32>
    %417 = arith.addf %416, %411 : vector<8x32xf32>
    %c0_219 = arith.constant 0 : index
    %c0_220 = arith.constant 0 : index
    %418 = vector.load %arg53[%c0_219, %c0_220] : memref<8x32xf32, #tpu.memory_space<vmem>>, vector<8x32xf32>
    tpu.vector_store %arg53[%c0_219, %c0_220], %417 {strides = array<i32>} : memref<8x32xf32, #tpu.memory_space<vmem>>, vector<8x32xf32>,
    %c0_221 = arith.constant 0 : index
    %c8_222 = arith.constant 8 : index
    %419 = vector.load %arg50[%c0_221, %c8_222] : memref<1x48xf32, #tpu.memory_space<vmem>>, vector<1x8xf32>
    %cst_223 = arith.constant dense<0.000000e+00> : vector<1x32xf32>
    %420 = tpu.matmul %419, %410, %cst_223 {dimension_numbers = #tpu.dot_dimension_numbers<[1], [0], [0], [1], [0, 0, 1, 1], [], []>} : vector<1x8xf32>, vector<8x32xf32>, vector<1x32xf32> -> vector<1x32xf32>
    %c0_224 = arith.constant 0 : index
    %c0_225 = arith.constant 0 : index
    %c0_226 = arith.constant 0 : index
    %421 = vector.load %arg52[%c0_224, %c0_225, %c0_226] : memref<1x1x32xf32, #tpu.memory_space<vmem>>, vector<1x1x32xf32>
    %422 = vector.shape_cast %421 : vector<1x1x32xf32> to vector<1x32xf32>
    %423 = arith.addf %422, %420 : vector<1x32xf32>
    %c0_227 = arith.constant 0 : index
    %c0_228 = arith.constant 0 : index
    %c0_229 = arith.constant 0 : index
    %424 = vector.load %arg52[%c0_227, %c0_228, %c0_229] : memref<1x1x32xf32, #tpu.memory_space<vmem>>, vector<1x1x32xf32>
    %425 = vector.shape_cast %424 : vector<1x1x32xf32> to vector<1x32xf32>
    %426 = vector.shape_cast %423 : vector<1x32xf32> to vector<1x1x32xf32>
    tpu.vector_store %arg52[%c0_227, %c0_228, %c0_229], %426 {strides = array<i32>} : memref<1x1x32xf32, #tpu.memory_space<vmem>>, vector<1x1x32xf32>,
    %c0_230 = arith.constant 0 : index
    %c0_231 = arith.constant 0 : index
    %427 = vector.load %arg53[%c0_230, %c0_231] : memref<8x32xf32, #tpu.memory_space<vmem>>, vector<8x24xf32>
    %c0_232 = arith.constant 0 : index
    %c4_233 = arith.constant 4 : index
    %428 = vector.load %arg53[%c0_232, %c4_233] : memref<8x32xf32, #tpu.memory_space<vmem>>, vector<8x24xf32>
    %c0_234 = arith.constant 0 : index
    %c8_235 = arith.constant 8 : index
    %429 = vector.load %arg53[%c0_234, %c8_235] : memref<8x32xf32, #tpu.memory_space<vmem>>, vector<8x24xf32>
    %430 = tpu.concatenate %427, %428, %429 in 0 : vector<8x24xf32>, vector<8x24xf32>, vector<8x24xf32> -> vector<24x24xf32>
    %c0_236 = arith.constant 0 : index
    %c0_237 = arith.constant 0 : index
    %431 = vector.load %arg18[%c0_236, %c0_237] : memref<16x24xf32, #tpu.memory_space<vmem>>, vector<16x24xf32>
    %cst_238 = arith.constant dense<0.000000e+00> : vector<16x24xf32>
    %432 = tpu.matmul %431, %430, %cst_238 {dimension_numbers = #tpu.dot_dimension_numbers<[1], [0], [0], [1], [0, 0, 1, 1], [], []>} : vector<16x24xf32>, vector<24x24xf32>, vector<16x24xf32> -> vector<16x24xf32>
    %c0_239 = arith.constant 0 : index
    %c0_240 = arith.constant 0 : index
    %433 = vector.load %arg19[%c0_239, %c0_240] : memref<16x1xf32, #tpu.memory_space<vmem>>, vector<16x1xf32>
    %434 = vector.broadcast %433 : vector<16x1xf32> to vector<16x24xf32>
    %435 = arith.addf %432, %434 : vector<16x24xf32>
    %436 = vector.extract_strided_slice %435 {offsets = [0, 0], sizes = [8, 24], strides = [1, 1]} : vector<16x24xf32> to vector<8x24xf32>
    %437 = math.tanh %436 : vector<8x24xf32>
    %438 = vector.extract_strided_slice %435 {offsets = [8, 0], sizes = [8, 24], strides = [1, 1]} : vector<16x24xf32> to vector<8x24xf32>
    %439 = arith.negf %438 : vector<8x24xf32>
    %440 = math.exp %439 : vector<8x24xf32>
    %cst_241 = arith.constant 1.000000e+00 : f32
    %441 = vector.broadcast %cst_241 : f32 to vector<8x24xf32>
    %442 = arith.addf %441, %440 : vector<8x24xf32>
    %443 = arith.divf %441, %442 : vector<8x24xf32>
    %444 = arith.mulf %437, %443 : vector<8x24xf32>
    %cst_242 = arith.constant 0.000000e+00 : f32
    %445 = vector.broadcast %cst_242 : f32 to vector<8x8xf32>
    %446 = tpu.concatenate %445, %444 in 1 : vector<8x8xf32>, vector<8x24xf32> -> vector<8x32xf32>
    %c0_243 = arith.constant 0 : index
    %c0_244 = arith.constant 0 : index
    %447 = vector.load %arg54[%c0_243, %c0_244] : memref<8x32xf32, #tpu.memory_space<vmem>>, vector<8x32xf32>
    tpu.vector_store %arg54[%c0_243, %c0_244], %446 {strides = array<i32>} : memref<8x32xf32, #tpu.memory_space<vmem>>, vector<8x32xf32>,
    %c0_245 = arith.constant 0 : index
    %c0_246 = arith.constant 0 : index
    %448 = vector.load %arg20[%c0_245, %c0_246] : memref<32x8xf32, #tpu.memory_space<vmem>>, vector<32x8xf32>
    %c0_247 = arith.constant 0 : index
    %c0_248 = arith.constant 0 : index
    %449 = vector.load %arg21[%c0_247, %c0_248] : memref<32x8xf32, #tpu.memory_space<vmem>>, vector<32x8xf32>
    %c0_249 = arith.constant 0 : index
    %c0_250 = arith.constant 0 : index
    %450 = vector.load %arg22[%c0_249, %c0_250] : memref<32x1xf32, #tpu.memory_space<vmem>>, vector<32x1xf32>
    %c0_251 = arith.constant 0 : index
    %c0_252 = arith.constant 0 : index
    %451 = vector.load %arg23[%c0_251, %c0_252] : memref<32x1xf32, #tpu.memory_space<vmem>>, vector<32x1xf32>
    %cst_253 = arith.constant 0.000000e+00 : f32
    %452 = vector.broadcast %cst_253 : f32 to vector<8x1xf32>
    %c0_254 = arith.constant 0 : index
    %c0_255 = arith.constant 0 : index
    %453 = vector.load %arg55[%c0_254, %c0_255] : memref<8x1xf32, #tpu.memory_space<vmem>>, vector<8x1xf32>
    tpu.vector_store %arg55[%c0_254, %c0_255], %452 {strides = array<i32>} : memref<8x1xf32, #tpu.memory_space<vmem>>, vector<8x1xf32>,
    %cst_256 = arith.constant 0.000000e+00 : f32
    %454 = vector.broadcast %cst_256 : f32 to vector<8x1xf32>
    %c0_257 = arith.constant 0 : index
    %c0_258 = arith.constant 0 : index
    %455 = vector.load %arg56[%c0_257, %c0_258] : memref<8x1xf32, #tpu.memory_space<vmem>>, vector<8x1xf32>
    tpu.vector_store %arg56[%c0_257, %c0_258], %454 {strides = array<i32>} : memref<8x1xf32, #tpu.memory_space<vmem>>, vector<8x1xf32>,
    %c0_259 = arith.constant 0 : index
    %c0_260 = arith.constant 0 : index
    %456 = vector.load %arg54[%c0_259, %c0_260] : memref<8x32xf32, #tpu.memory_space<vmem>>, vector<8x8xf32>
    %cst_261 = arith.constant dense<0xFF800000> : vector<8xf32>
    %457 = vector.multi_reduction <maximumf>, %456, %cst_261 [1] : vector<8x8xf32> to vector<8xf32>
    %458 = vector.shape_cast %457 : vector<8xf32> to vector<8x1xf32>
    %cst_262 = arith.constant dense<0.000000e+00> : vector<32x1xf32>
    %459 = tpu.matmul %448, %458, %cst_262 {dimension_numbers = #tpu.dot_dimension_numbers<[1], [0], [0], [1], [0, 0, 1, 1], [], []>} : vector<32x8xf32>, vector<8x1xf32>, vector<32x1xf32> -> vector<32x1xf32>
    %460 = arith.addf %459, %450 : vector<32x1xf32>
    %c0_263 = arith.constant 0 : index
    %c0_264 = arith.constant 0 : index
    %461 = vector.load %arg55[%c0_263, %c0_264] : memref<8x1xf32, #tpu.memory_space<vmem>>, vector<8x1xf32>
    %cst_265 = arith.constant dense<0.000000e+00> : vector<32x1xf32>
    %462 = tpu.matmul %449, %461, %cst_265 {dimension_numbers = #tpu.dot_dimension_numbers<[1], [0], [0], [1], [0, 0, 1, 1], [], []>} : vector<32x8xf32>, vector<8x1xf32>, vector<32x1xf32> -> vector<32x1xf32>
    %463 = arith.addf %460, %462 : vector<32x1xf32>
    %464 = arith.addf %463, %451 : vector<32x1xf32>
    %465 = vector.extract_strided_slice %464 {offsets = [0, 0], sizes = [8, 1], strides = [1, 1]} : vector<32x1xf32> to vector<8x1xf32>
    %466 = arith.negf %465 : vector<8x1xf32>
    %467 = math.exp %466 : vector<8x1xf32>
    %cst_266 = arith.constant 1.000000e+00 : f32
    %468 = vector.broadcast %cst_266 : f32 to vector<8x1xf32>
    %469 = arith.addf %468, %467 : vector<8x1xf32>
    %470 = arith.divf %468, %469 : vector<8x1xf32>
    %471 = vector.extract_strided_slice %464 {offsets = [8, 0], sizes = [8, 1], strides = [1, 1]} : vector<32x1xf32> to vector<8x1xf32>
    %472 = arith.negf %471 : vector<8x1xf32>
    %473 = math.exp %472 : vector<8x1xf32>
    %cst_267 = arith.constant 1.000000e+00 : f32
    %474 = vector.broadcast %cst_267 : f32 to vector<8x1xf32>
    %475 = arith.addf %474, %473 : vector<8x1xf32>
    %476 = arith.divf %474, %475 : vector<8x1xf32>
    %477 = vector.extract_strided_slice %464 {offsets = [16, 0], sizes = [8, 1], strides = [1, 1]} : vector<32x1xf32> to vector<8x1xf32>
    %478 = math.tanh %477 : vector<8x1xf32>
    %479 = vector.extract_strided_slice %464 {offsets = [24, 0], sizes = [8, 1], strides = [1, 1]} : vector<32x1xf32> to vector<8x1xf32>
    %480 = arith.negf %479 : vector<8x1xf32>
    %481 = math.exp %480 : vector<8x1xf32>
    %cst_268 = arith.constant 1.000000e+00 : f32
    %482 = vector.broadcast %cst_268 : f32 to vector<8x1xf32>
    %483 = arith.addf %482, %481 : vector<8x1xf32>
    %484 = arith.divf %482, %483 : vector<8x1xf32>
    %c0_269 = arith.constant 0 : index
    %c0_270 = arith.constant 0 : index
    %485 = vector.load %arg56[%c0_269, %c0_270] : memref<8x1xf32, #tpu.memory_space<vmem>>, vector<8x1xf32>
    %486 = arith.mulf %476, %485 : vector<8x1xf32>
    %487 = arith.mulf %470, %478 : vector<8x1xf32>
    %488 = arith.addf %486, %487 : vector<8x1xf32>
    %489 = math.tanh %488 : vector<8x1xf32>
    %490 = arith.mulf %484, %489 : vector<8x1xf32>
    %c0_271 = arith.constant 0 : index
    %c0_272 = arith.constant 0 : index
    %491 = vector.load %arg55[%c0_271, %c0_272] : memref<8x1xf32, #tpu.memory_space<vmem>>, vector<8x1xf32>
    tpu.vector_store %arg55[%c0_271, %c0_272], %490 {strides = array<i32>} : memref<8x1xf32, #tpu.memory_space<vmem>>, vector<8x1xf32>,
    %c0_273 = arith.constant 0 : index
    %c0_274 = arith.constant 0 : index
    %492 = vector.load %arg56[%c0_273, %c0_274] : memref<8x1xf32, #tpu.memory_space<vmem>>, vector<8x1xf32>
    tpu.vector_store %arg56[%c0_273, %c0_274], %488 {strides = array<i32>} : memref<8x1xf32, #tpu.memory_space<vmem>>, vector<8x1xf32>,
    %493 = vector.broadcast %490 : vector<8x1xf32> to vector<8x8xf32>
    %494 = arith.mulf %456, %493 : vector<8x8xf32>
    %c0_275 = arith.constant 0 : index
    %c0_276 = arith.constant 0 : index
    %495 = vector.load %arg54[%c0_275, %c0_276] : memref<8x32xf32, #tpu.memory_space<vmem>>, vector<8x8xf32>
    tpu.vector_store %arg54[%c0_275, %c0_276], %494 {strides = array<i32>} : memref<8x32xf32, #tpu.memory_space<vmem>>, vector<8x8xf32>,
    %c0_277 = arith.constant 0 : index
    %c8_278 = arith.constant 8 : index
    %496 = vector.load %arg54[%c0_277, %c8_278] : memref<8x32xf32, #tpu.memory_space<vmem>>, vector<8x8xf32>
    %cst_279 = arith.constant dense<0xFF800000> : vector<8xf32>
    %497 = vector.multi_reduction <maximumf>, %496, %cst_279 [1] : vector<8x8xf32> to vector<8xf32>
    %498 = vector.shape_cast %497 : vector<8xf32> to vector<8x1xf32>
    %cst_280 = arith.constant dense<0.000000e+00> : vector<32x1xf32>
    %499 = tpu.matmul %448, %498, %cst_280 {dimension_numbers = #tpu.dot_dimension_numbers<[1], [0], [0], [1], [0, 0, 1, 1], [], []>} : vector<32x8xf32>, vector<8x1xf32>, vector<32x1xf32> -> vector<32x1xf32>
    %500 = arith.addf %499, %450 : vector<32x1xf32>
    %c0_281 = arith.constant 0 : index
    %c0_282 = arith.constant 0 : index
    %501 = vector.load %arg55[%c0_281, %c0_282] : memref<8x1xf32, #tpu.memory_space<vmem>>, vector<8x1xf32>
    %cst_283 = arith.constant dense<0.000000e+00> : vector<32x1xf32>
    %502 = tpu.matmul %449, %501, %cst_283 {dimension_numbers = #tpu.dot_dimension_numbers<[1], [0], [0], [1], [0, 0, 1, 1], [], []>} : vector<32x8xf32>, vector<8x1xf32>, vector<32x1xf32> -> vector<32x1xf32>
    %503 = arith.addf %500, %502 : vector<32x1xf32>
    %504 = arith.addf %503, %451 : vector<32x1xf32>
    %505 = vector.extract_strided_slice %504 {offsets = [0, 0], sizes = [8, 1], strides = [1, 1]} : vector<32x1xf32> to vector<8x1xf32>
    %506 = arith.negf %505 : vector<8x1xf32>
    %507 = math.exp %506 : vector<8x1xf32>
    %cst_284 = arith.constant 1.000000e+00 : f32
    %508 = vector.broadcast %cst_284 : f32 to vector<8x1xf32>
    %509 = arith.addf %508, %507 : vector<8x1xf32>
    %510 = arith.divf %508, %509 : vector<8x1xf32>
    %511 = vector.extract_strided_slice %504 {offsets = [8, 0], sizes = [8, 1], strides = [1, 1]} : vector<32x1xf32> to vector<8x1xf32>
    %512 = arith.negf %511 : vector<8x1xf32>
    %513 = math.exp %512 : vector<8x1xf32>
    %cst_285 = arith.constant 1.000000e+00 : f32
    %514 = vector.broadcast %cst_285 : f32 to vector<8x1xf32>
    %515 = arith.addf %514, %513 : vector<8x1xf32>
    %516 = arith.divf %514, %515 : vector<8x1xf32>
    %517 = vector.extract_strided_slice %504 {offsets = [16, 0], sizes = [8, 1], strides = [1, 1]} : vector<32x1xf32> to vector<8x1xf32>
    %518 = math.tanh %517 : vector<8x1xf32>
    %519 = vector.extract_strided_slice %504 {offsets = [24, 0], sizes = [8, 1], strides = [1, 1]} : vector<32x1xf32> to vector<8x1xf32>
    %520 = arith.negf %519 : vector<8x1xf32>
    %521 = math.exp %520 : vector<8x1xf32>
    %cst_286 = arith.constant 1.000000e+00 : f32
    %522 = vector.broadcast %cst_286 : f32 to vector<8x1xf32>
    %523 = arith.addf %522, %521 : vector<8x1xf32>
    %524 = arith.divf %522, %523 : vector<8x1xf32>
    %c0_287 = arith.constant 0 : index
    %c0_288 = arith.constant 0 : index
    %525 = vector.load %arg56[%c0_287, %c0_288] : memref<8x1xf32, #tpu.memory_space<vmem>>, vector<8x1xf32>
    %526 = arith.mulf %516, %525 : vector<8x1xf32>
    %527 = arith.mulf %510, %518 : vector<8x1xf32>
    %528 = arith.addf %526, %527 : vector<8x1xf32>
    %529 = math.tanh %528 : vector<8x1xf32>
    %530 = arith.mulf %524, %529 : vector<8x1xf32>
    %c0_289 = arith.constant 0 : index
    %c0_290 = arith.constant 0 : index
    %531 = vector.load %arg55[%c0_289, %c0_290] : memref<8x1xf32, #tpu.memory_space<vmem>>, vector<8x1xf32>
    tpu.vector_store %arg55[%c0_289, %c0_290], %530 {strides = array<i32>} : memref<8x1xf32, #tpu.memory_space<vmem>>, vector<8x1xf32>,
    %c0_291 = arith.constant 0 : index
    %c0_292 = arith.constant 0 : index
    %532 = vector.load %arg56[%c0_291, %c0_292] : memref<8x1xf32, #tpu.memory_space<vmem>>, vector<8x1xf32>
    tpu.vector_store %arg56[%c0_291, %c0_292], %528 {strides = array<i32>} : memref<8x1xf32, #tpu.memory_space<vmem>>, vector<8x1xf32>,
    %533 = vector.broadcast %530 : vector<8x1xf32> to vector<8x8xf32>
    %534 = arith.mulf %496, %533 : vector<8x8xf32>
    %c0_293 = arith.constant 0 : index
    %c8_294 = arith.constant 8 : index
    %535 = vector.load %arg54[%c0_293, %c8_294] : memref<8x32xf32, #tpu.memory_space<vmem>>, vector<8x8xf32>
    tpu.vector_store %arg54[%c0_293, %c8_294], %534 {strides = array<i32>} : memref<8x32xf32, #tpu.memory_space<vmem>>, vector<8x8xf32>,
    %c0_295 = arith.constant 0 : index
    %c16_296 = arith.constant 16 : index
    %536 = vector.load %arg54[%c0_295, %c16_296] : memref<8x32xf32, #tpu.memory_space<vmem>>, vector<8x8xf32>
    %cst_297 = arith.constant dense<0xFF800000> : vector<8xf32>
    %537 = vector.multi_reduction <maximumf>, %536, %cst_297 [1] : vector<8x8xf32> to vector<8xf32>
    %538 = vector.shape_cast %537 : vector<8xf32> to vector<8x1xf32>
    %cst_298 = arith.constant dense<0.000000e+00> : vector<32x1xf32>
    %539 = tpu.matmul %448, %538, %cst_298 {dimension_numbers = #tpu.dot_dimension_numbers<[1], [0], [0], [1], [0, 0, 1, 1], [], []>} : vector<32x8xf32>, vector<8x1xf32>, vector<32x1xf32> -> vector<32x1xf32>
    %540 = arith.addf %539, %450 : vector<32x1xf32>
    %c0_299 = arith.constant 0 : index
    %c0_300 = arith.constant 0 : index
    %541 = vector.load %arg55[%c0_299, %c0_300] : memref<8x1xf32, #tpu.memory_space<vmem>>, vector<8x1xf32>
    %cst_301 = arith.constant dense<0.000000e+00> : vector<32x1xf32>
    %542 = tpu.matmul %449, %541, %cst_301 {dimension_numbers = #tpu.dot_dimension_numbers<[1], [0], [0], [1], [0, 0, 1, 1], [], []>} : vector<32x8xf32>, vector<8x1xf32>, vector<32x1xf32> -> vector<32x1xf32>
    %543 = arith.addf %540, %542 : vector<32x1xf32>
    %544 = arith.addf %543, %451 : vector<32x1xf32>
    %545 = vector.extract_strided_slice %544 {offsets = [0, 0], sizes = [8, 1], strides = [1, 1]} : vector<32x1xf32> to vector<8x1xf32>
    %546 = arith.negf %545 : vector<8x1xf32>
    %547 = math.exp %546 : vector<8x1xf32>
    %cst_302 = arith.constant 1.000000e+00 : f32
    %548 = vector.broadcast %cst_302 : f32 to vector<8x1xf32>
    %549 = arith.addf %548, %547 : vector<8x1xf32>
    %550 = arith.divf %548, %549 : vector<8x1xf32>
    %551 = vector.extract_strided_slice %544 {offsets = [8, 0], sizes = [8, 1], strides = [1, 1]} : vector<32x1xf32> to vector<8x1xf32>
    %552 = arith.negf %551 : vector<8x1xf32>
    %553 = math.exp %552 : vector<8x1xf32>
    %cst_303 = arith.constant 1.000000e+00 : f32
    %554 = vector.broadcast %cst_303 : f32 to vector<8x1xf32>
    %555 = arith.addf %554, %553 : vector<8x1xf32>
    %556 = arith.divf %554, %555 : vector<8x1xf32>
    %557 = vector.extract_strided_slice %544 {offsets = [16, 0], sizes = [8, 1], strides = [1, 1]} : vector<32x1xf32> to vector<8x1xf32>
    %558 = math.tanh %557 : vector<8x1xf32>
    %559 = vector.extract_strided_slice %544 {offsets = [24, 0], sizes = [8, 1], strides = [1, 1]} : vector<32x1xf32> to vector<8x1xf32>
    %560 = arith.negf %559 : vector<8x1xf32>
    %561 = math.exp %560 : vector<8x1xf32>
    %cst_304 = arith.constant 1.000000e+00 : f32
    %562 = vector.broadcast %cst_304 : f32 to vector<8x1xf32>
    %563 = arith.addf %562, %561 : vector<8x1xf32>
    %564 = arith.divf %562, %563 : vector<8x1xf32>
    %c0_305 = arith.constant 0 : index
    %c0_306 = arith.constant 0 : index
    %565 = vector.load %arg56[%c0_305, %c0_306] : memref<8x1xf32, #tpu.memory_space<vmem>>, vector<8x1xf32>
    %566 = arith.mulf %556, %565 : vector<8x1xf32>
    %567 = arith.mulf %550, %558 : vector<8x1xf32>
    %568 = arith.addf %566, %567 : vector<8x1xf32>
    %569 = math.tanh %568 : vector<8x1xf32>
    %570 = arith.mulf %564, %569 : vector<8x1xf32>
    %c0_307 = arith.constant 0 : index
    %c0_308 = arith.constant 0 : index
    %571 = vector.load %arg55[%c0_307, %c0_308] : memref<8x1xf32, #tpu.memory_space<vmem>>, vector<8x1xf32>
    tpu.vector_store %arg55[%c0_307, %c0_308], %570 {strides = array<i32>} : memref<8x1xf32, #tpu.memory_space<vmem>>, vector<8x1xf32>,
    %c0_309 = arith.constant 0 : index
    %c0_310 = arith.constant 0 : index
    %572 = vector.load %arg56[%c0_309, %c0_310] : memref<8x1xf32, #tpu.memory_space<vmem>>, vector<8x1xf32>
    tpu.vector_store %arg56[%c0_309, %c0_310], %568 {strides = array<i32>} : memref<8x1xf32, #tpu.memory_space<vmem>>, vector<8x1xf32>,
    %573 = vector.broadcast %570 : vector<8x1xf32> to vector<8x8xf32>
    %574 = arith.mulf %536, %573 : vector<8x8xf32>
    %c0_311 = arith.constant 0 : index
    %c16_312 = arith.constant 16 : index
    %575 = vector.load %arg54[%c0_311, %c16_312] : memref<8x32xf32, #tpu.memory_space<vmem>>, vector<8x8xf32>
    tpu.vector_store %arg54[%c0_311, %c16_312], %574 {strides = array<i32>} : memref<8x32xf32, #tpu.memory_space<vmem>>, vector<8x8xf32>,
    %c0_313 = arith.constant 0 : index
    %c24_314 = arith.constant 24 : index
    %576 = vector.load %arg54[%c0_313, %c24_314] : memref<8x32xf32, #tpu.memory_space<vmem>>, vector<8x8xf32>
    %cst_315 = arith.constant dense<0xFF800000> : vector<8xf32>
    %577 = vector.multi_reduction <maximumf>, %576, %cst_315 [1] : vector<8x8xf32> to vector<8xf32>
    %578 = vector.shape_cast %577 : vector<8xf32> to vector<8x1xf32>
    %cst_316 = arith.constant dense<0.000000e+00> : vector<32x1xf32>
    %579 = tpu.matmul %448, %578, %cst_316 {dimension_numbers = #tpu.dot_dimension_numbers<[1], [0], [0], [1], [0, 0, 1, 1], [], []>} : vector<32x8xf32>, vector<8x1xf32>, vector<32x1xf32> -> vector<32x1xf32>
    %580 = arith.addf %579, %450 : vector<32x1xf32>
    %c0_317 = arith.constant 0 : index
    %c0_318 = arith.constant 0 : index
    %581 = vector.load %arg55[%c0_317, %c0_318] : memref<8x1xf32, #tpu.memory_space<vmem>>, vector<8x1xf32>
    %cst_319 = arith.constant dense<0.000000e+00> : vector<32x1xf32>
    %582 = tpu.matmul %449, %581, %cst_319 {dimension_numbers = #tpu.dot_dimension_numbers<[1], [0], [0], [1], [0, 0, 1, 1], [], []>} : vector<32x8xf32>, vector<8x1xf32>, vector<32x1xf32> -> vector<32x1xf32>
    %583 = arith.addf %580, %582 : vector<32x1xf32>
    %584 = arith.addf %583, %451 : vector<32x1xf32>
    %585 = vector.extract_strided_slice %584 {offsets = [0, 0], sizes = [8, 1], strides = [1, 1]} : vector<32x1xf32> to vector<8x1xf32>
    %586 = arith.negf %585 : vector<8x1xf32>
    %587 = math.exp %586 : vector<8x1xf32>
    %cst_320 = arith.constant 1.000000e+00 : f32
    %588 = vector.broadcast %cst_320 : f32 to vector<8x1xf32>
    %589 = arith.addf %588, %587 : vector<8x1xf32>
    %590 = arith.divf %588, %589 : vector<8x1xf32>
    %591 = vector.extract_strided_slice %584 {offsets = [8, 0], sizes = [8, 1], strides = [1, 1]} : vector<32x1xf32> to vector<8x1xf32>
    %592 = arith.negf %591 : vector<8x1xf32>
    %593 = math.exp %592 : vector<8x1xf32>
    %cst_321 = arith.constant 1.000000e+00 : f32
    %594 = vector.broadcast %cst_321 : f32 to vector<8x1xf32>
    %595 = arith.addf %594, %593 : vector<8x1xf32>
    %596 = arith.divf %594, %595 : vector<8x1xf32>
    %597 = vector.extract_strided_slice %584 {offsets = [16, 0], sizes = [8, 1], strides = [1, 1]} : vector<32x1xf32> to vector<8x1xf32>
    %598 = math.tanh %597 : vector<8x1xf32>
    %599 = vector.extract_strided_slice %584 {offsets = [24, 0], sizes = [8, 1], strides = [1, 1]} : vector<32x1xf32> to vector<8x1xf32>
    %600 = arith.negf %599 : vector<8x1xf32>
    %601 = math.exp %600 : vector<8x1xf32>
    %cst_322 = arith.constant 1.000000e+00 : f32
    %602 = vector.broadcast %cst_322 : f32 to vector<8x1xf32>
    %603 = arith.addf %602, %601 : vector<8x1xf32>
    %604 = arith.divf %602, %603 : vector<8x1xf32>
    %c0_323 = arith.constant 0 : index
    %c0_324 = arith.constant 0 : index
    %605 = vector.load %arg56[%c0_323, %c0_324] : memref<8x1xf32, #tpu.memory_space<vmem>>, vector<8x1xf32>
    %606 = arith.mulf %596, %605 : vector<8x1xf32>
    %607 = arith.mulf %590, %598 : vector<8x1xf32>
    %608 = arith.addf %606, %607 : vector<8x1xf32>
    %609 = math.tanh %608 : vector<8x1xf32>
    %610 = arith.mulf %604, %609 : vector<8x1xf32>
    %c0_325 = arith.constant 0 : index
    %c0_326 = arith.constant 0 : index
    %611 = vector.load %arg55[%c0_325, %c0_326] : memref<8x1xf32, #tpu.memory_space<vmem>>, vector<8x1xf32>
    tpu.vector_store %arg55[%c0_325, %c0_326], %610 {strides = array<i32>} : memref<8x1xf32, #tpu.memory_space<vmem>>, vector<8x1xf32>,
    %c0_327 = arith.constant 0 : index
    %c0_328 = arith.constant 0 : index
    %612 = vector.load %arg56[%c0_327, %c0_328] : memref<8x1xf32, #tpu.memory_space<vmem>>, vector<8x1xf32>
    tpu.vector_store %arg56[%c0_327, %c0_328], %608 {strides = array<i32>} : memref<8x1xf32, #tpu.memory_space<vmem>>, vector<8x1xf32>,
    %613 = vector.broadcast %610 : vector<8x1xf32> to vector<8x8xf32>
    %614 = arith.mulf %576, %613 : vector<8x8xf32>
    %c0_329 = arith.constant 0 : index
    %c24_330 = arith.constant 24 : index
    %615 = vector.load %arg54[%c0_329, %c24_330] : memref<8x32xf32, #tpu.memory_space<vmem>>, vector<8x8xf32>
    tpu.vector_store %arg54[%c0_329, %c24_330], %614 {strides = array<i32>} : memref<8x32xf32, #tpu.memory_space<vmem>>, vector<8x8xf32>,
    %c0_331 = arith.constant 0 : index
    %c0_332 = arith.constant 0 : index
    %616 = vector.load %arg54[%c0_331, %c0_332] : memref<8x32xf32, #tpu.memory_space<vmem>>, vector<8x32xf32>
    %c0_333 = arith.constant 0 : index
    %c0_334 = arith.constant 0 : index
    %617 = vector.load %arg53[%c0_333, %c0_334] : memref<8x32xf32, #tpu.memory_space<vmem>>, vector<8x32xf32>
    %c0_335 = arith.constant 0 : index
    %c0_336 = arith.constant 0 : index
    %618 = vector.load %arg24[%c0_335, %c0_336] : memref<8x8xf32, #tpu.memory_space<vmem>>, vector<8x8xf32>
    %cst_337 = arith.constant dense<0.000000e+00> : vector<8x32xf32>
    %619 = tpu.matmul %618, %616, %cst_337 {dimension_numbers = #tpu.dot_dimension_numbers<[1], [0], [0], [1], [0, 0, 1, 1], [], []>} : vector<8x8xf32>, vector<8x32xf32>, vector<8x32xf32> -> vector<8x32xf32>
    %c0_338 = arith.constant 0 : index
    %c0_339 = arith.constant 0 : index
    %620 = vector.load %arg25[%c0_338, %c0_339] : memref<8x1xf32, #tpu.memory_space<vmem>>, vector<8x1xf32>
    %621 = vector.broadcast %620 : vector<8x1xf32> to vector<8x32xf32>
    %622 = arith.addf %619, %621 : vector<8x32xf32>
    %623 = arith.addf %622, %617 : vector<8x32xf32>
    %c0_340 = arith.constant 0 : index
    %c0_341 = arith.constant 0 : index
    %624 = vector.load %arg53[%c0_340, %c0_341] : memref<8x32xf32, #tpu.memory_space<vmem>>, vector<8x32xf32>
    tpu.vector_store %arg53[%c0_340, %c0_341], %623 {strides = array<i32>} : memref<8x32xf32, #tpu.memory_space<vmem>>, vector<8x32xf32>,
    %c0_342 = arith.constant 0 : index
    %c16_343 = arith.constant 16 : index
    %625 = vector.load %arg50[%c0_342, %c16_343] : memref<1x48xf32, #tpu.memory_space<vmem>>, vector<1x8xf32>
    %cst_344 = arith.constant dense<0.000000e+00> : vector<1x32xf32>
    %626 = tpu.matmul %625, %616, %cst_344 {dimension_numbers = #tpu.dot_dimension_numbers<[1], [0], [0], [1], [0, 0, 1, 1], [], []>} : vector<1x8xf32>, vector<8x32xf32>, vector<1x32xf32> -> vector<1x32xf32>
    %c0_345 = arith.constant 0 : index
    %c0_346 = arith.constant 0 : index
    %c0_347 = arith.constant 0 : index
    %627 = vector.load %arg52[%c0_345, %c0_346, %c0_347] : memref<1x1x32xf32, #tpu.memory_space<vmem>>, vector<1x1x32xf32>
    %628 = vector.shape_cast %627 : vector<1x1x32xf32> to vector<1x32xf32>
    %629 = arith.addf %628, %626 : vector<1x32xf32>
    %c0_348 = arith.constant 0 : index
    %c0_349 = arith.constant 0 : index
    %c0_350 = arith.constant 0 : index
    %630 = vector.load %arg52[%c0_348, %c0_349, %c0_350] : memref<1x1x32xf32, #tpu.memory_space<vmem>>, vector<1x1x32xf32>
    %631 = vector.shape_cast %630 : vector<1x1x32xf32> to vector<1x32xf32>
    %632 = vector.shape_cast %629 : vector<1x32xf32> to vector<1x1x32xf32>
    tpu.vector_store %arg52[%c0_348, %c0_349, %c0_350], %632 {strides = array<i32>} : memref<1x1x32xf32, #tpu.memory_space<vmem>>, vector<1x1x32xf32>,
    %c0_351 = arith.constant 0 : index
    %c0_352 = arith.constant 0 : index
    %633 = vector.load %arg53[%c0_351, %c0_352] : memref<8x32xf32, #tpu.memory_space<vmem>>, vector<8x30xf32>
    %c0_353 = arith.constant 0 : index
    %c1 = arith.constant 1 : index
    %634 = vector.load %arg53[%c0_353, %c1] : memref<8x32xf32, #tpu.memory_space<vmem>>, vector<8x30xf32>
    %c0_354 = arith.constant 0 : index
    %c2_355 = arith.constant 2 : index
    %635 = vector.load %arg53[%c0_354, %c2_355] : memref<8x32xf32, #tpu.memory_space<vmem>>, vector<8x30xf32>
    %636 = tpu.concatenate %633, %634, %635 in 0 : vector<8x30xf32>, vector<8x30xf32>, vector<8x30xf32> -> vector<24x30xf32>
    %c0_356 = arith.constant 0 : index
    %c0_357 = arith.constant 0 : index
    %637 = vector.load %arg26[%c0_356, %c0_357] : memref<16x24xf32, #tpu.memory_space<vmem>>, vector<16x24xf32>
    %cst_358 = arith.constant dense<0.000000e+00> : vector<16x30xf32>
    %638 = tpu.matmul %637, %636, %cst_358 {dimension_numbers = #tpu.dot_dimension_numbers<[1], [0], [0], [1], [0, 0, 1, 1], [], []>} : vector<16x24xf32>, vector<24x30xf32>, vector<16x30xf32> -> vector<16x30xf32>
    %c0_359 = arith.constant 0 : index
    %c0_360 = arith.constant 0 : index
    %639 = vector.load %arg27[%c0_359, %c0_360] : memref<16x1xf32, #tpu.memory_space<vmem>>, vector<16x1xf32>
    %640 = vector.broadcast %639 : vector<16x1xf32> to vector<16x30xf32>
    %641 = arith.addf %638, %640 : vector<16x30xf32>
    %642 = vector.extract_strided_slice %641 {offsets = [0, 0], sizes = [8, 30], strides = [1, 1]} : vector<16x30xf32> to vector<8x30xf32>
    %643 = math.tanh %642 : vector<8x30xf32>
    %644 = vector.extract_strided_slice %641 {offsets = [8, 0], sizes = [8, 30], strides = [1, 1]} : vector<16x30xf32> to vector<8x30xf32>
    %645 = arith.negf %644 : vector<8x30xf32>
    %646 = math.exp %645 : vector<8x30xf32>
    %cst_361 = arith.constant 1.000000e+00 : f32
    %647 = vector.broadcast %cst_361 : f32 to vector<8x30xf32>
    %648 = arith.addf %647, %646 : vector<8x30xf32>
    %649 = arith.divf %647, %648 : vector<8x30xf32>
    %650 = arith.mulf %643, %649 : vector<8x30xf32>
    %cst_362 = arith.constant 0.000000e+00 : f32
    %651 = vector.broadcast %cst_362 : f32 to vector<8x2xf32>
    %652 = tpu.concatenate %651, %650 in 1 : vector<8x2xf32>, vector<8x30xf32> -> vector<8x32xf32>
    %c0_363 = arith.constant 0 : index
    %c0_364 = arith.constant 0 : index
    %653 = vector.load %arg54[%c0_363, %c0_364] : memref<8x32xf32, #tpu.memory_space<vmem>>, vector<8x32xf32>
    tpu.vector_store %arg54[%c0_363, %c0_364], %652 {strides = array<i32>} : memref<8x32xf32, #tpu.memory_space<vmem>>, vector<8x32xf32>,
    %c0_365 = arith.constant 0 : index
    %c0_366 = arith.constant 0 : index
    %654 = vector.load %arg28[%c0_365, %c0_366] : memref<32x8xf32, #tpu.memory_space<vmem>>, vector<32x8xf32>
    %c0_367 = arith.constant 0 : index
    %c0_368 = arith.constant 0 : index
    %655 = vector.load %arg29[%c0_367, %c0_368] : memref<32x8xf32, #tpu.memory_space<vmem>>, vector<32x8xf32>
    %c0_369 = arith.constant 0 : index
    %c0_370 = arith.constant 0 : index
    %656 = vector.load %arg30[%c0_369, %c0_370] : memref<32x1xf32, #tpu.memory_space<vmem>>, vector<32x1xf32>
    %c0_371 = arith.constant 0 : index
    %c0_372 = arith.constant 0 : index
    %657 = vector.load %arg31[%c0_371, %c0_372] : memref<32x1xf32, #tpu.memory_space<vmem>>, vector<32x1xf32>
    %cst_373 = arith.constant 0.000000e+00 : f32
    %658 = vector.broadcast %cst_373 : f32 to vector<8x1xf32>
    %c0_374 = arith.constant 0 : index
    %c0_375 = arith.constant 0 : index
    %659 = vector.load %arg55[%c0_374, %c0_375] : memref<8x1xf32, #tpu.memory_space<vmem>>, vector<8x1xf32>
    tpu.vector_store %arg55[%c0_374, %c0_375], %658 {strides = array<i32>} : memref<8x1xf32, #tpu.memory_space<vmem>>, vector<8x1xf32>,
    %cst_376 = arith.constant 0.000000e+00 : f32
    %660 = vector.broadcast %cst_376 : f32 to vector<8x1xf32>
    %c0_377 = arith.constant 0 : index
    %c0_378 = arith.constant 0 : index
    %661 = vector.load %arg56[%c0_377, %c0_378] : memref<8x1xf32, #tpu.memory_space<vmem>>, vector<8x1xf32>
    tpu.vector_store %arg56[%c0_377, %c0_378], %660 {strides = array<i32>} : memref<8x1xf32, #tpu.memory_space<vmem>>, vector<8x1xf32>,
    %c0_379 = arith.constant 0 : index
    %c0_380 = arith.constant 0 : index
    %662 = vector.load %arg54[%c0_379, %c0_380] : memref<8x32xf32, #tpu.memory_space<vmem>>, vector<8x8xf32>
    %cst_381 = arith.constant dense<0xFF800000> : vector<8xf32>
    %663 = vector.multi_reduction <maximumf>, %662, %cst_381 [1] : vector<8x8xf32> to vector<8xf32>
    %664 = vector.shape_cast %663 : vector<8xf32> to vector<8x1xf32>
    %cst_382 = arith.constant dense<0.000000e+00> : vector<32x1xf32>
    %665 = tpu.matmul %654, %664, %cst_382 {dimension_numbers = #tpu.dot_dimension_numbers<[1], [0], [0], [1], [0, 0, 1, 1], [], []>} : vector<32x8xf32>, vector<8x1xf32>, vector<32x1xf32> -> vector<32x1xf32>
    %666 = arith.addf %665, %656 : vector<32x1xf32>
    %c0_383 = arith.constant 0 : index
    %c0_384 = arith.constant 0 : index
    %667 = vector.load %arg55[%c0_383, %c0_384] : memref<8x1xf32, #tpu.memory_space<vmem>>, vector<8x1xf32>
    %cst_385 = arith.constant dense<0.000000e+00> : vector<32x1xf32>
    %668 = tpu.matmul %655, %667, %cst_385 {dimension_numbers = #tpu.dot_dimension_numbers<[1], [0], [0], [1], [0, 0, 1, 1], [], []>} : vector<32x8xf32>, vector<8x1xf32>, vector<32x1xf32> -> vector<32x1xf32>
    %669 = arith.addf %666, %668 : vector<32x1xf32>
    %670 = arith.addf %669, %657 : vector<32x1xf32>
    %671 = vector.extract_strided_slice %670 {offsets = [0, 0], sizes = [8, 1], strides = [1, 1]} : vector<32x1xf32> to vector<8x1xf32>
    %672 = arith.negf %671 : vector<8x1xf32>
    %673 = math.exp %672 : vector<8x1xf32>
    %cst_386 = arith.constant 1.000000e+00 : f32
    %674 = vector.broadcast %cst_386 : f32 to vector<8x1xf32>
    %675 = arith.addf %674, %673 : vector<8x1xf32>
    %676 = arith.divf %674, %675 : vector<8x1xf32>
    %677 = vector.extract_strided_slice %670 {offsets = [8, 0], sizes = [8, 1], strides = [1, 1]} : vector<32x1xf32> to vector<8x1xf32>
    %678 = arith.negf %677 : vector<8x1xf32>
    %679 = math.exp %678 : vector<8x1xf32>
    %cst_387 = arith.constant 1.000000e+00 : f32
    %680 = vector.broadcast %cst_387 : f32 to vector<8x1xf32>
    %681 = arith.addf %680, %679 : vector<8x1xf32>
    %682 = arith.divf %680, %681 : vector<8x1xf32>
    %683 = vector.extract_strided_slice %670 {offsets = [16, 0], sizes = [8, 1], strides = [1, 1]} : vector<32x1xf32> to vector<8x1xf32>
    %684 = math.tanh %683 : vector<8x1xf32>
    %685 = vector.extract_strided_slice %670 {offsets = [24, 0], sizes = [8, 1], strides = [1, 1]} : vector<32x1xf32> to vector<8x1xf32>
    %686 = arith.negf %685 : vector<8x1xf32>
    %687 = math.exp %686 : vector<8x1xf32>
    %cst_388 = arith.constant 1.000000e+00 : f32
    %688 = vector.broadcast %cst_388 : f32 to vector<8x1xf32>
    %689 = arith.addf %688, %687 : vector<8x1xf32>
    %690 = arith.divf %688, %689 : vector<8x1xf32>
    %c0_389 = arith.constant 0 : index
    %c0_390 = arith.constant 0 : index
    %691 = vector.load %arg56[%c0_389, %c0_390] : memref<8x1xf32, #tpu.memory_space<vmem>>, vector<8x1xf32>
    %692 = arith.mulf %682, %691 : vector<8x1xf32>
    %693 = arith.mulf %676, %684 : vector<8x1xf32>
    %694 = arith.addf %692, %693 : vector<8x1xf32>
    %695 = math.tanh %694 : vector<8x1xf32>
    %696 = arith.mulf %690, %695 : vector<8x1xf32>
    %c0_391 = arith.constant 0 : index
    %c0_392 = arith.constant 0 : index
    %697 = vector.load %arg55[%c0_391, %c0_392] : memref<8x1xf32, #tpu.memory_space<vmem>>, vector<8x1xf32>
    tpu.vector_store %arg55[%c0_391, %c0_392], %696 {strides = array<i32>} : memref<8x1xf32, #tpu.memory_space<vmem>>, vector<8x1xf32>,
    %c0_393 = arith.constant 0 : index
    %c0_394 = arith.constant 0 : index
    %698 = vector.load %arg56[%c0_393, %c0_394] : memref<8x1xf32, #tpu.memory_space<vmem>>, vector<8x1xf32>
    tpu.vector_store %arg56[%c0_393, %c0_394], %694 {strides = array<i32>} : memref<8x1xf32, #tpu.memory_space<vmem>>, vector<8x1xf32>,
    %699 = vector.broadcast %696 : vector<8x1xf32> to vector<8x8xf32>
    %700 = arith.mulf %662, %699 : vector<8x8xf32>
    %c0_395 = arith.constant 0 : index
    %c0_396 = arith.constant 0 : index
    %701 = vector.load %arg54[%c0_395, %c0_396] : memref<8x32xf32, #tpu.memory_space<vmem>>, vector<8x8xf32>
    tpu.vector_store %arg54[%c0_395, %c0_396], %700 {strides = array<i32>} : memref<8x32xf32, #tpu.memory_space<vmem>>, vector<8x8xf32>,
    %c0_397 = arith.constant 0 : index
    %c8_398 = arith.constant 8 : index
    %702 = vector.load %arg54[%c0_397, %c8_398] : memref<8x32xf32, #tpu.memory_space<vmem>>, vector<8x8xf32>
    %cst_399 = arith.constant dense<0xFF800000> : vector<8xf32>
    %703 = vector.multi_reduction <maximumf>, %702, %cst_399 [1] : vector<8x8xf32> to vector<8xf32>
    %704 = vector.shape_cast %703 : vector<8xf32> to vector<8x1xf32>
    %cst_400 = arith.constant dense<0.000000e+00> : vector<32x1xf32>
    %705 = tpu.matmul %654, %704, %cst_400 {dimension_numbers = #tpu.dot_dimension_numbers<[1], [0], [0], [1], [0, 0, 1, 1], [], []>} : vector<32x8xf32>, vector<8x1xf32>, vector<32x1xf32> -> vector<32x1xf32>
    %706 = arith.addf %705, %656 : vector<32x1xf32>
    %c0_401 = arith.constant 0 : index
    %c0_402 = arith.constant 0 : index
    %707 = vector.load %arg55[%c0_401, %c0_402] : memref<8x1xf32, #tpu.memory_space<vmem>>, vector<8x1xf32>
    %cst_403 = arith.constant dense<0.000000e+00> : vector<32x1xf32>
    %708 = tpu.matmul %655, %707, %cst_403 {dimension_numbers = #tpu.dot_dimension_numbers<[1], [0], [0], [1], [0, 0, 1, 1], [], []>} : vector<32x8xf32>, vector<8x1xf32>, vector<32x1xf32> -> vector<32x1xf32>
    %709 = arith.addf %706, %708 : vector<32x1xf32>
    %710 = arith.addf %709, %657 : vector<32x1xf32>
    %711 = vector.extract_strided_slice %710 {offsets = [0, 0], sizes = [8, 1], strides = [1, 1]} : vector<32x1xf32> to vector<8x1xf32>
    %712 = arith.negf %711 : vector<8x1xf32>
    %713 = math.exp %712 : vector<8x1xf32>
    %cst_404 = arith.constant 1.000000e+00 : f32
    %714 = vector.broadcast %cst_404 : f32 to vector<8x1xf32>
    %715 = arith.addf %714, %713 : vector<8x1xf32>
    %716 = arith.divf %714, %715 : vector<8x1xf32>
    %717 = vector.extract_strided_slice %710 {offsets = [8, 0], sizes = [8, 1], strides = [1, 1]} : vector<32x1xf32> to vector<8x1xf32>
    %718 = arith.negf %717 : vector<8x1xf32>
    %719 = math.exp %718 : vector<8x1xf32>
    %cst_405 = arith.constant 1.000000e+00 : f32
    %720 = vector.broadcast %cst_405 : f32 to vector<8x1xf32>
    %721 = arith.addf %720, %719 : vector<8x1xf32>
    %722 = arith.divf %720, %721 : vector<8x1xf32>
    %723 = vector.extract_strided_slice %710 {offsets = [16, 0], sizes = [8, 1], strides = [1, 1]} : vector<32x1xf32> to vector<8x1xf32>
    %724 = math.tanh %723 : vector<8x1xf32>
    %725 = vector.extract_strided_slice %710 {offsets = [24, 0], sizes = [8, 1], strides = [1, 1]} : vector<32x1xf32> to vector<8x1xf32>
    %726 = arith.negf %725 : vector<8x1xf32>
    %727 = math.exp %726 : vector<8x1xf32>
    %cst_406 = arith.constant 1.000000e+00 : f32
    %728 = vector.broadcast %cst_406 : f32 to vector<8x1xf32>
    %729 = arith.addf %728, %727 : vector<8x1xf32>
    %730 = arith.divf %728, %729 : vector<8x1xf32>
    %c0_407 = arith.constant 0 : index
    %c0_408 = arith.constant 0 : index
    %731 = vector.load %arg56[%c0_407, %c0_408] : memref<8x1xf32, #tpu.memory_space<vmem>>, vector<8x1xf32>
    %732 = arith.mulf %722, %731 : vector<8x1xf32>
    %733 = arith.mulf %716, %724 : vector<8x1xf32>
    %734 = arith.addf %732, %733 : vector<8x1xf32>
    %735 = math.tanh %734 : vector<8x1xf32>
    %736 = arith.mulf %730, %735 : vector<8x1xf32>
    %c0_409 = arith.constant 0 : index
    %c0_410 = arith.constant 0 : index
    %737 = vector.load %arg55[%c0_409, %c0_410] : memref<8x1xf32, #tpu.memory_space<vmem>>, vector<8x1xf32>
    tpu.vector_store %arg55[%c0_409, %c0_410], %736 {strides = array<i32>} : memref<8x1xf32, #tpu.memory_space<vmem>>, vector<8x1xf32>,
    %c0_411 = arith.constant 0 : index
    %c0_412 = arith.constant 0 : index
    %738 = vector.load %arg56[%c0_411, %c0_412] : memref<8x1xf32, #tpu.memory_space<vmem>>, vector<8x1xf32>
    tpu.vector_store %arg56[%c0_411, %c0_412], %734 {strides = array<i32>} : memref<8x1xf32, #tpu.memory_space<vmem>>, vector<8x1xf32>,
    %739 = vector.broadcast %736 : vector<8x1xf32> to vector<8x8xf32>
    %740 = arith.mulf %702, %739 : vector<8x8xf32>
    %c0_413 = arith.constant 0 : index
    %c8_414 = arith.constant 8 : index
    %741 = vector.load %arg54[%c0_413, %c8_414] : memref<8x32xf32, #tpu.memory_space<vmem>>, vector<8x8xf32>
    tpu.vector_store %arg54[%c0_413, %c8_414], %740 {strides = array<i32>} : memref<8x32xf32, #tpu.memory_space<vmem>>, vector<8x8xf32>,
    %c0_415 = arith.constant 0 : index
    %c16_416 = arith.constant 16 : index
    %742 = vector.load %arg54[%c0_415, %c16_416] : memref<8x32xf32, #tpu.memory_space<vmem>>, vector<8x8xf32>
    %cst_417 = arith.constant dense<0xFF800000> : vector<8xf32>
    %743 = vector.multi_reduction <maximumf>, %742, %cst_417 [1] : vector<8x8xf32> to vector<8xf32>
    %744 = vector.shape_cast %743 : vector<8xf32> to vector<8x1xf32>
    %cst_418 = arith.constant dense<0.000000e+00> : vector<32x1xf32>
    %745 = tpu.matmul %654, %744, %cst_418 {dimension_numbers = #tpu.dot_dimension_numbers<[1], [0], [0], [1], [0, 0, 1, 1], [], []>} : vector<32x8xf32>, vector<8x1xf32>, vector<32x1xf32> -> vector<32x1xf32>
    %746 = arith.addf %745, %656 : vector<32x1xf32>
    %c0_419 = arith.constant 0 : index
    %c0_420 = arith.constant 0 : index
    %747 = vector.load %arg55[%c0_419, %c0_420] : memref<8x1xf32, #tpu.memory_space<vmem>>, vector<8x1xf32>
    %cst_421 = arith.constant dense<0.000000e+00> : vector<32x1xf32>
    %748 = tpu.matmul %655, %747, %cst_421 {dimension_numbers = #tpu.dot_dimension_numbers<[1], [0], [0], [1], [0, 0, 1, 1], [], []>} : vector<32x8xf32>, vector<8x1xf32>, vector<32x1xf32> -> vector<32x1xf32>
    %749 = arith.addf %746, %748 : vector<32x1xf32>
    %750 = arith.addf %749, %657 : vector<32x1xf32>
    %751 = vector.extract_strided_slice %750 {offsets = [0, 0], sizes = [8, 1], strides = [1, 1]} : vector<32x1xf32> to vector<8x1xf32>
    %752 = arith.negf %751 : vector<8x1xf32>
    %753 = math.exp %752 : vector<8x1xf32>
    %cst_422 = arith.constant 1.000000e+00 : f32
    %754 = vector.broadcast %cst_422 : f32 to vector<8x1xf32>
    %755 = arith.addf %754, %753 : vector<8x1xf32>
    %756 = arith.divf %754, %755 : vector<8x1xf32>
    %757 = vector.extract_strided_slice %750 {offsets = [8, 0], sizes = [8, 1], strides = [1, 1]} : vector<32x1xf32> to vector<8x1xf32>
    %758 = arith.negf %757 : vector<8x1xf32>
    %759 = math.exp %758 : vector<8x1xf32>
    %cst_423 = arith.constant 1.000000e+00 : f32
    %760 = vector.broadcast %cst_423 : f32 to vector<8x1xf32>
    %761 = arith.addf %760, %759 : vector<8x1xf32>
    %762 = arith.divf %760, %761 : vector<8x1xf32>
    %763 = vector.extract_strided_slice %750 {offsets = [16, 0], sizes = [8, 1], strides = [1, 1]} : vector<32x1xf32> to vector<8x1xf32>
    %764 = math.tanh %763 : vector<8x1xf32>
    %765 = vector.extract_strided_slice %750 {offsets = [24, 0], sizes = [8, 1], strides = [1, 1]} : vector<32x1xf32> to vector<8x1xf32>
    %766 = arith.negf %765 : vector<8x1xf32>
    %767 = math.exp %766 : vector<8x1xf32>
    %cst_424 = arith.constant 1.000000e+00 : f32
    %768 = vector.broadcast %cst_424 : f32 to vector<8x1xf32>
    %769 = arith.addf %768, %767 : vector<8x1xf32>
    %770 = arith.divf %768, %769 : vector<8x1xf32>
    %c0_425 = arith.constant 0 : index
    %c0_426 = arith.constant 0 : index
    %771 = vector.load %arg56[%c0_425, %c0_426] : memref<8x1xf32, #tpu.memory_space<vmem>>, vector<8x1xf32>
    %772 = arith.mulf %762, %771 : vector<8x1xf32>
    %773 = arith.mulf %756, %764 : vector<8x1xf32>
    %774 = arith.addf %772, %773 : vector<8x1xf32>
    %775 = math.tanh %774 : vector<8x1xf32>
    %776 = arith.mulf %770, %775 : vector<8x1xf32>
    %c0_427 = arith.constant 0 : index
    %c0_428 = arith.constant 0 : index
    %777 = vector.load %arg55[%c0_427, %c0_428] : memref<8x1xf32, #tpu.memory_space<vmem>>, vector<8x1xf32>
    tpu.vector_store %arg55[%c0_427, %c0_428], %776 {strides = array<i32>} : memref<8x1xf32, #tpu.memory_space<vmem>>, vector<8x1xf32>,
    %c0_429 = arith.constant 0 : index
    %c0_430 = arith.constant 0 : index
    %778 = vector.load %arg56[%c0_429, %c0_430] : memref<8x1xf32, #tpu.memory_space<vmem>>, vector<8x1xf32>
    tpu.vector_store %arg56[%c0_429, %c0_430], %774 {strides = array<i32>} : memref<8x1xf32, #tpu.memory_space<vmem>>, vector<8x1xf32>,
    %779 = vector.broadcast %776 : vector<8x1xf32> to vector<8x8xf32>
    %780 = arith.mulf %742, %779 : vector<8x8xf32>
    %c0_431 = arith.constant 0 : index
    %c16_432 = arith.constant 16 : index
    %781 = vector.load %arg54[%c0_431, %c16_432] : memref<8x32xf32, #tpu.memory_space<vmem>>, vector<8x8xf32>
    tpu.vector_store %arg54[%c0_431, %c16_432], %780 {strides = array<i32>} : memref<8x32xf32, #tpu.memory_space<vmem>>, vector<8x8xf32>,
    %c0_433 = arith.constant 0 : index
    %c24_434 = arith.constant 24 : index
    %782 = vector.load %arg54[%c0_433, %c24_434] : memref<8x32xf32, #tpu.memory_space<vmem>>, vector<8x8xf32>
    %cst_435 = arith.constant dense<0xFF800000> : vector<8xf32>
    %783 = vector.multi_reduction <maximumf>, %782, %cst_435 [1] : vector<8x8xf32> to vector<8xf32>
    %784 = vector.shape_cast %783 : vector<8xf32> to vector<8x1xf32>
    %cst_436 = arith.constant dense<0.000000e+00> : vector<32x1xf32>
    %785 = tpu.matmul %654, %784, %cst_436 {dimension_numbers = #tpu.dot_dimension_numbers<[1], [0], [0], [1], [0, 0, 1, 1], [], []>} : vector<32x8xf32>, vector<8x1xf32>, vector<32x1xf32> -> vector<32x1xf32>
    %786 = arith.addf %785, %656 : vector<32x1xf32>
    %c0_437 = arith.constant 0 : index
    %c0_438 = arith.constant 0 : index
    %787 = vector.load %arg55[%c0_437, %c0_438] : memref<8x1xf32, #tpu.memory_space<vmem>>, vector<8x1xf32>
    %cst_439 = arith.constant dense<0.000000e+00> : vector<32x1xf32>
    %788 = tpu.matmul %655, %787, %cst_439 {dimension_numbers = #tpu.dot_dimension_numbers<[1], [0], [0], [1], [0, 0, 1, 1], [], []>} : vector<32x8xf32>, vector<8x1xf32>, vector<32x1xf32> -> vector<32x1xf32>
    %789 = arith.addf %786, %788 : vector<32x1xf32>
    %790 = arith.addf %789, %657 : vector<32x1xf32>
    %791 = vector.extract_strided_slice %790 {offsets = [0, 0], sizes = [8, 1], strides = [1, 1]} : vector<32x1xf32> to vector<8x1xf32>
    %792 = arith.negf %791 : vector<8x1xf32>
    %793 = math.exp %792 : vector<8x1xf32>
    %cst_440 = arith.constant 1.000000e+00 : f32
    %794 = vector.broadcast %cst_440 : f32 to vector<8x1xf32>
    %795 = arith.addf %794, %793 : vector<8x1xf32>
    %796 = arith.divf %794, %795 : vector<8x1xf32>
    %797 = vector.extract_strided_slice %790 {offsets = [8, 0], sizes = [8, 1], strides = [1, 1]} : vector<32x1xf32> to vector<8x1xf32>
    %798 = arith.negf %797 : vector<8x1xf32>
    %799 = math.exp %798 : vector<8x1xf32>
    %cst_441 = arith.constant 1.000000e+00 : f32
    %800 = vector.broadcast %cst_441 : f32 to vector<8x1xf32>
    %801 = arith.addf %800, %799 : vector<8x1xf32>
    %802 = arith.divf %800, %801 : vector<8x1xf32>
    %803 = vector.extract_strided_slice %790 {offsets = [16, 0], sizes = [8, 1], strides = [1, 1]} : vector<32x1xf32> to vector<8x1xf32>
    %804 = math.tanh %803 : vector<8x1xf32>
    %805 = vector.extract_strided_slice %790 {offsets = [24, 0], sizes = [8, 1], strides = [1, 1]} : vector<32x1xf32> to vector<8x1xf32>
    %806 = arith.negf %805 : vector<8x1xf32>
    %807 = math.exp %806 : vector<8x1xf32>
    %cst_442 = arith.constant 1.000000e+00 : f32
    %808 = vector.broadcast %cst_442 : f32 to vector<8x1xf32>
    %809 = arith.addf %808, %807 : vector<8x1xf32>
    %810 = arith.divf %808, %809 : vector<8x1xf32>
    %c0_443 = arith.constant 0 : index
    %c0_444 = arith.constant 0 : index
    %811 = vector.load %arg56[%c0_443, %c0_444] : memref<8x1xf32, #tpu.memory_space<vmem>>, vector<8x1xf32>
    %812 = arith.mulf %802, %811 : vector<8x1xf32>
    %813 = arith.mulf %796, %804 : vector<8x1xf32>
    %814 = arith.addf %812, %813 : vector<8x1xf32>
    %815 = math.tanh %814 : vector<8x1xf32>
    %816 = arith.mulf %810, %815 : vector<8x1xf32>
    %c0_445 = arith.constant 0 : index
    %c0_446 = arith.constant 0 : index
    %817 = vector.load %arg55[%c0_445, %c0_446] : memref<8x1xf32, #tpu.memory_space<vmem>>, vector<8x1xf32>
    tpu.vector_store %arg55[%c0_445, %c0_446], %816 {strides = array<i32>} : memref<8x1xf32, #tpu.memory_space<vmem>>, vector<8x1xf32>,
    %c0_447 = arith.constant 0 : index
    %c0_448 = arith.constant 0 : index
    %818 = vector.load %arg56[%c0_447, %c0_448] : memref<8x1xf32, #tpu.memory_space<vmem>>, vector<8x1xf32>
    tpu.vector_store %arg56[%c0_447, %c0_448], %814 {strides = array<i32>} : memref<8x1xf32, #tpu.memory_space<vmem>>, vector<8x1xf32>,
    %819 = vector.broadcast %816 : vector<8x1xf32> to vector<8x8xf32>
    %820 = arith.mulf %782, %819 : vector<8x8xf32>
    %c0_449 = arith.constant 0 : index
    %c24_450 = arith.constant 24 : index
    %821 = vector.load %arg54[%c0_449, %c24_450] : memref<8x32xf32, #tpu.memory_space<vmem>>, vector<8x8xf32>
    tpu.vector_store %arg54[%c0_449, %c24_450], %820 {strides = array<i32>} : memref<8x32xf32, #tpu.memory_space<vmem>>, vector<8x8xf32>,
    %c0_451 = arith.constant 0 : index
    %c0_452 = arith.constant 0 : index
    %822 = vector.load %arg54[%c0_451, %c0_452] : memref<8x32xf32, #tpu.memory_space<vmem>>, vector<8x32xf32>
    %c0_453 = arith.constant 0 : index
    %c0_454 = arith.constant 0 : index
    %823 = vector.load %arg53[%c0_453, %c0_454] : memref<8x32xf32, #tpu.memory_space<vmem>>, vector<8x32xf32>
    %c0_455 = arith.constant 0 : index
    %c0_456 = arith.constant 0 : index
    %824 = vector.load %arg32[%c0_455, %c0_456] : memref<8x8xf32, #tpu.memory_space<vmem>>, vector<8x8xf32>
    %cst_457 = arith.constant dense<0.000000e+00> : vector<8x32xf32>
    %825 = tpu.matmul %824, %822, %cst_457 {dimension_numbers = #tpu.dot_dimension_numbers<[1], [0], [0], [1], [0, 0, 1, 1], [], []>} : vector<8x8xf32>, vector<8x32xf32>, vector<8x32xf32> -> vector<8x32xf32>
    %c0_458 = arith.constant 0 : index
    %c0_459 = arith.constant 0 : index
    %826 = vector.load %arg33[%c0_458, %c0_459] : memref<8x1xf32, #tpu.memory_space<vmem>>, vector<8x1xf32>
    %827 = vector.broadcast %826 : vector<8x1xf32> to vector<8x32xf32>
    %828 = arith.addf %825, %827 : vector<8x32xf32>
    %829 = arith.addf %828, %823 : vector<8x32xf32>
    %c0_460 = arith.constant 0 : index
    %c0_461 = arith.constant 0 : index
    %830 = vector.load %arg53[%c0_460, %c0_461] : memref<8x32xf32, #tpu.memory_space<vmem>>, vector<8x32xf32>
    tpu.vector_store %arg53[%c0_460, %c0_461], %829 {strides = array<i32>} : memref<8x32xf32, #tpu.memory_space<vmem>>, vector<8x32xf32>,
    %c0_462 = arith.constant 0 : index
    %c24_463 = arith.constant 24 : index
    %831 = vector.load %arg50[%c0_462, %c24_463] : memref<1x48xf32, #tpu.memory_space<vmem>>, vector<1x8xf32>
    %cst_464 = arith.constant dense<0.000000e+00> : vector<1x32xf32>
    %832 = tpu.matmul %831, %822, %cst_464 {dimension_numbers = #tpu.dot_dimension_numbers<[1], [0], [0], [1], [0, 0, 1, 1], [], []>} : vector<1x8xf32>, vector<8x32xf32>, vector<1x32xf32> -> vector<1x32xf32>
    %c0_465 = arith.constant 0 : index
    %c0_466 = arith.constant 0 : index
    %c0_467 = arith.constant 0 : index
    %833 = vector.load %arg52[%c0_465, %c0_466, %c0_467] : memref<1x1x32xf32, #tpu.memory_space<vmem>>, vector<1x1x32xf32>
    %834 = vector.shape_cast %833 : vector<1x1x32xf32> to vector<1x32xf32>
    %835 = arith.addf %834, %832 : vector<1x32xf32>
    %c0_468 = arith.constant 0 : index
    %c0_469 = arith.constant 0 : index
    %c0_470 = arith.constant 0 : index
    %836 = vector.load %arg52[%c0_468, %c0_469, %c0_470] : memref<1x1x32xf32, #tpu.memory_space<vmem>>, vector<1x1x32xf32>
    %837 = vector.shape_cast %836 : vector<1x1x32xf32> to vector<1x32xf32>
    %838 = vector.shape_cast %835 : vector<1x32xf32> to vector<1x1x32xf32>
    tpu.vector_store %arg52[%c0_468, %c0_469, %c0_470], %838 {strides = array<i32>} : memref<1x1x32xf32, #tpu.memory_space<vmem>>, vector<1x1x32xf32>,
    %c0_471 = arith.constant 0 : index
    %c0_472 = arith.constant 0 : index
    %839 = vector.load %arg53[%c0_471, %c0_472] : memref<8x32xf32, #tpu.memory_space<vmem>>, vector<8x28xf32>
    %c0_473 = arith.constant 0 : index
    %c2_474 = arith.constant 2 : index
    %840 = vector.load %arg53[%c0_473, %c2_474] : memref<8x32xf32, #tpu.memory_space<vmem>>, vector<8x28xf32>
    %c0_475 = arith.constant 0 : index
    %c4_476 = arith.constant 4 : index
    %841 = vector.load %arg53[%c0_475, %c4_476] : memref<8x32xf32, #tpu.memory_space<vmem>>, vector<8x28xf32>
    %842 = tpu.concatenate %839, %840, %841 in 0 : vector<8x28xf32>, vector<8x28xf32>, vector<8x28xf32> -> vector<24x28xf32>
    %c0_477 = arith.constant 0 : index
    %c0_478 = arith.constant 0 : index
    %843 = vector.load %arg34[%c0_477, %c0_478] : memref<16x24xf32, #tpu.memory_space<vmem>>, vector<16x24xf32>
    %cst_479 = arith.constant dense<0.000000e+00> : vector<16x28xf32>
    %844 = tpu.matmul %843, %842, %cst_479 {dimension_numbers = #tpu.dot_dimension_numbers<[1], [0], [0], [1], [0, 0, 1, 1], [], []>} : vector<16x24xf32>, vector<24x28xf32>, vector<16x28xf32> -> vector<16x28xf32>
    %c0_480 = arith.constant 0 : index
    %c0_481 = arith.constant 0 : index
    %845 = vector.load %arg35[%c0_480, %c0_481] : memref<16x1xf32, #tpu.memory_space<vmem>>, vector<16x1xf32>
    %846 = vector.broadcast %845 : vector<16x1xf32> to vector<16x28xf32>
    %847 = arith.addf %844, %846 : vector<16x28xf32>
    %848 = vector.extract_strided_slice %847 {offsets = [0, 0], sizes = [8, 28], strides = [1, 1]} : vector<16x28xf32> to vector<8x28xf32>
    %849 = math.tanh %848 : vector<8x28xf32>
    %850 = vector.extract_strided_slice %847 {offsets = [8, 0], sizes = [8, 28], strides = [1, 1]} : vector<16x28xf32> to vector<8x28xf32>
    %851 = arith.negf %850 : vector<8x28xf32>
    %852 = math.exp %851 : vector<8x28xf32>
    %cst_482 = arith.constant 1.000000e+00 : f32
    %853 = vector.broadcast %cst_482 : f32 to vector<8x28xf32>
    %854 = arith.addf %853, %852 : vector<8x28xf32>
    %855 = arith.divf %853, %854 : vector<8x28xf32>
    %856 = arith.mulf %849, %855 : vector<8x28xf32>
    %cst_483 = arith.constant 0.000000e+00 : f32
    %857 = vector.broadcast %cst_483 : f32 to vector<8x4xf32>
    %858 = tpu.concatenate %857, %856 in 1 : vector<8x4xf32>, vector<8x28xf32> -> vector<8x32xf32>
    %c0_484 = arith.constant 0 : index
    %c0_485 = arith.constant 0 : index
    %859 = vector.load %arg54[%c0_484, %c0_485] : memref<8x32xf32, #tpu.memory_space<vmem>>, vector<8x32xf32>
    tpu.vector_store %arg54[%c0_484, %c0_485], %858 {strides = array<i32>} : memref<8x32xf32, #tpu.memory_space<vmem>>, vector<8x32xf32>,
    %c0_486 = arith.constant 0 : index
    %c0_487 = arith.constant 0 : index
    %860 = vector.load %arg36[%c0_486, %c0_487] : memref<32x8xf32, #tpu.memory_space<vmem>>, vector<32x8xf32>
    %c0_488 = arith.constant 0 : index
    %c0_489 = arith.constant 0 : index
    %861 = vector.load %arg37[%c0_488, %c0_489] : memref<32x8xf32, #tpu.memory_space<vmem>>, vector<32x8xf32>
    %c0_490 = arith.constant 0 : index
    %c0_491 = arith.constant 0 : index
    %862 = vector.load %arg38[%c0_490, %c0_491] : memref<32x1xf32, #tpu.memory_space<vmem>>, vector<32x1xf32>
    %c0_492 = arith.constant 0 : index
    %c0_493 = arith.constant 0 : index
    %863 = vector.load %arg39[%c0_492, %c0_493] : memref<32x1xf32, #tpu.memory_space<vmem>>, vector<32x1xf32>
    %cst_494 = arith.constant 0.000000e+00 : f32
    %864 = vector.broadcast %cst_494 : f32 to vector<8x1xf32>
    %c0_495 = arith.constant 0 : index
    %c0_496 = arith.constant 0 : index
    %865 = vector.load %arg55[%c0_495, %c0_496] : memref<8x1xf32, #tpu.memory_space<vmem>>, vector<8x1xf32>
    tpu.vector_store %arg55[%c0_495, %c0_496], %864 {strides = array<i32>} : memref<8x1xf32, #tpu.memory_space<vmem>>, vector<8x1xf32>,
    %cst_497 = arith.constant 0.000000e+00 : f32
    %866 = vector.broadcast %cst_497 : f32 to vector<8x1xf32>
    %c0_498 = arith.constant 0 : index
    %c0_499 = arith.constant 0 : index
    %867 = vector.load %arg56[%c0_498, %c0_499] : memref<8x1xf32, #tpu.memory_space<vmem>>, vector<8x1xf32>
    tpu.vector_store %arg56[%c0_498, %c0_499], %866 {strides = array<i32>} : memref<8x1xf32, #tpu.memory_space<vmem>>, vector<8x1xf32>,
    %c0_500 = arith.constant 0 : index
    %c0_501 = arith.constant 0 : index
    %868 = vector.load %arg54[%c0_500, %c0_501] : memref<8x32xf32, #tpu.memory_space<vmem>>, vector<8x8xf32>
    %cst_502 = arith.constant dense<0xFF800000> : vector<8xf32>
    %869 = vector.multi_reduction <maximumf>, %868, %cst_502 [1] : vector<8x8xf32> to vector<8xf32>
    %870 = vector.shape_cast %869 : vector<8xf32> to vector<8x1xf32>
    %cst_503 = arith.constant dense<0.000000e+00> : vector<32x1xf32>
    %871 = tpu.matmul %860, %870, %cst_503 {dimension_numbers = #tpu.dot_dimension_numbers<[1], [0], [0], [1], [0, 0, 1, 1], [], []>} : vector<32x8xf32>, vector<8x1xf32>, vector<32x1xf32> -> vector<32x1xf32>
    %872 = arith.addf %871, %862 : vector<32x1xf32>
    %c0_504 = arith.constant 0 : index
    %c0_505 = arith.constant 0 : index
    %873 = vector.load %arg55[%c0_504, %c0_505] : memref<8x1xf32, #tpu.memory_space<vmem>>, vector<8x1xf32>
    %cst_506 = arith.constant dense<0.000000e+00> : vector<32x1xf32>
    %874 = tpu.matmul %861, %873, %cst_506 {dimension_numbers = #tpu.dot_dimension_numbers<[1], [0], [0], [1], [0, 0, 1, 1], [], []>} : vector<32x8xf32>, vector<8x1xf32>, vector<32x1xf32> -> vector<32x1xf32>
    %875 = arith.addf %872, %874 : vector<32x1xf32>
    %876 = arith.addf %875, %863 : vector<32x1xf32>
    %877 = vector.extract_strided_slice %876 {offsets = [0, 0], sizes = [8, 1], strides = [1, 1]} : vector<32x1xf32> to vector<8x1xf32>
    %878 = arith.negf %877 : vector<8x1xf32>
    %879 = math.exp %878 : vector<8x1xf32>
    %cst_507 = arith.constant 1.000000e+00 : f32
    %880 = vector.broadcast %cst_507 : f32 to vector<8x1xf32>
    %881 = arith.addf %880, %879 : vector<8x1xf32>
    %882 = arith.divf %880, %881 : vector<8x1xf32>
    %883 = vector.extract_strided_slice %876 {offsets = [8, 0], sizes = [8, 1], strides = [1, 1]} : vector<32x1xf32> to vector<8x1xf32>
    %884 = arith.negf %883 : vector<8x1xf32>
    %885 = math.exp %884 : vector<8x1xf32>
    %cst_508 = arith.constant 1.000000e+00 : f32
    %886 = vector.broadcast %cst_508 : f32 to vector<8x1xf32>
    %887 = arith.addf %886, %885 : vector<8x1xf32>
    %888 = arith.divf %886, %887 : vector<8x1xf32>
    %889 = vector.extract_strided_slice %876 {offsets = [16, 0], sizes = [8, 1], strides = [1, 1]} : vector<32x1xf32> to vector<8x1xf32>
    %890 = math.tanh %889 : vector<8x1xf32>
    %891 = vector.extract_strided_slice %876 {offsets = [24, 0], sizes = [8, 1], strides = [1, 1]} : vector<32x1xf32> to vector<8x1xf32>
    %892 = arith.negf %891 : vector<8x1xf32>
    %893 = math.exp %892 : vector<8x1xf32>
    %cst_509 = arith.constant 1.000000e+00 : f32
    %894 = vector.broadcast %cst_509 : f32 to vector<8x1xf32>
    %895 = arith.addf %894, %893 : vector<8x1xf32>
    %896 = arith.divf %894, %895 : vector<8x1xf32>
    %c0_510 = arith.constant 0 : index
    %c0_511 = arith.constant 0 : index
    %897 = vector.load %arg56[%c0_510, %c0_511] : memref<8x1xf32, #tpu.memory_space<vmem>>, vector<8x1xf32>
    %898 = arith.mulf %888, %897 : vector<8x1xf32>
    %899 = arith.mulf %882, %890 : vector<8x1xf32>
    %900 = arith.addf %898, %899 : vector<8x1xf32>
    %901 = math.tanh %900 : vector<8x1xf32>
    %902 = arith.mulf %896, %901 : vector<8x1xf32>
    %c0_512 = arith.constant 0 : index
    %c0_513 = arith.constant 0 : index
    %903 = vector.load %arg55[%c0_512, %c0_513] : memref<8x1xf32, #tpu.memory_space<vmem>>, vector<8x1xf32>
    tpu.vector_store %arg55[%c0_512, %c0_513], %902 {strides = array<i32>} : memref<8x1xf32, #tpu.memory_space<vmem>>, vector<8x1xf32>,
    %c0_514 = arith.constant 0 : index
    %c0_515 = arith.constant 0 : index
    %904 = vector.load %arg56[%c0_514, %c0_515] : memref<8x1xf32, #tpu.memory_space<vmem>>, vector<8x1xf32>
    tpu.vector_store %arg56[%c0_514, %c0_515], %900 {strides = array<i32>} : memref<8x1xf32, #tpu.memory_space<vmem>>, vector<8x1xf32>,
    %905 = vector.broadcast %902 : vector<8x1xf32> to vector<8x8xf32>
    %906 = arith.mulf %868, %905 : vector<8x8xf32>
    %c0_516 = arith.constant 0 : index
    %c0_517 = arith.constant 0 : index
    %907 = vector.load %arg54[%c0_516, %c0_517] : memref<8x32xf32, #tpu.memory_space<vmem>>, vector<8x8xf32>
    tpu.vector_store %arg54[%c0_516, %c0_517], %906 {strides = array<i32>} : memref<8x32xf32, #tpu.memory_space<vmem>>, vector<8x8xf32>,
    %c0_518 = arith.constant 0 : index
    %c8_519 = arith.constant 8 : index
    %908 = vector.load %arg54[%c0_518, %c8_519] : memref<8x32xf32, #tpu.memory_space<vmem>>, vector<8x8xf32>
    %cst_520 = arith.constant dense<0xFF800000> : vector<8xf32>
    %909 = vector.multi_reduction <maximumf>, %908, %cst_520 [1] : vector<8x8xf32> to vector<8xf32>
    %910 = vector.shape_cast %909 : vector<8xf32> to vector<8x1xf32>
    %cst_521 = arith.constant dense<0.000000e+00> : vector<32x1xf32>
    %911 = tpu.matmul %860, %910, %cst_521 {dimension_numbers = #tpu.dot_dimension_numbers<[1], [0], [0], [1], [0, 0, 1, 1], [], []>} : vector<32x8xf32>, vector<8x1xf32>, vector<32x1xf32> -> vector<32x1xf32>
    %912 = arith.addf %911, %862 : vector<32x1xf32>
    %c0_522 = arith.constant 0 : index
    %c0_523 = arith.constant 0 : index
    %913 = vector.load %arg55[%c0_522, %c0_523] : memref<8x1xf32, #tpu.memory_space<vmem>>, vector<8x1xf32>
    %cst_524 = arith.constant dense<0.000000e+00> : vector<32x1xf32>
    %914 = tpu.matmul %861, %913, %cst_524 {dimension_numbers = #tpu.dot_dimension_numbers<[1], [0], [0], [1], [0, 0, 1, 1], [], []>} : vector<32x8xf32>, vector<8x1xf32>, vector<32x1xf32> -> vector<32x1xf32>
    %915 = arith.addf %912, %914 : vector<32x1xf32>
    %916 = arith.addf %915, %863 : vector<32x1xf32>
    %917 = vector.extract_strided_slice %916 {offsets = [0, 0], sizes = [8, 1], strides = [1, 1]} : vector<32x1xf32> to vector<8x1xf32>
    %918 = arith.negf %917 : vector<8x1xf32>
    %919 = math.exp %918 : vector<8x1xf32>
    %cst_525 = arith.constant 1.000000e+00 : f32
    %920 = vector.broadcast %cst_525 : f32 to vector<8x1xf32>
    %921 = arith.addf %920, %919 : vector<8x1xf32>
    %922 = arith.divf %920, %921 : vector<8x1xf32>
    %923 = vector.extract_strided_slice %916 {offsets = [8, 0], sizes = [8, 1], strides = [1, 1]} : vector<32x1xf32> to vector<8x1xf32>
    %924 = arith.negf %923 : vector<8x1xf32>
    %925 = math.exp %924 : vector<8x1xf32>
    %cst_526 = arith.constant 1.000000e+00 : f32
    %926 = vector.broadcast %cst_526 : f32 to vector<8x1xf32>
    %927 = arith.addf %926, %925 : vector<8x1xf32>
    %928 = arith.divf %926, %927 : vector<8x1xf32>
    %929 = vector.extract_strided_slice %916 {offsets = [16, 0], sizes = [8, 1], strides = [1, 1]} : vector<32x1xf32> to vector<8x1xf32>
    %930 = math.tanh %929 : vector<8x1xf32>
    %931 = vector.extract_strided_slice %916 {offsets = [24, 0], sizes = [8, 1], strides = [1, 1]} : vector<32x1xf32> to vector<8x1xf32>
    %932 = arith.negf %931 : vector<8x1xf32>
    %933 = math.exp %932 : vector<8x1xf32>
    %cst_527 = arith.constant 1.000000e+00 : f32
    %934 = vector.broadcast %cst_527 : f32 to vector<8x1xf32>
    %935 = arith.addf %934, %933 : vector<8x1xf32>
    %936 = arith.divf %934, %935 : vector<8x1xf32>
    %c0_528 = arith.constant 0 : index
    %c0_529 = arith.constant 0 : index
    %937 = vector.load %arg56[%c0_528, %c0_529] : memref<8x1xf32, #tpu.memory_space<vmem>>, vector<8x1xf32>
    %938 = arith.mulf %928, %937 : vector<8x1xf32>
    %939 = arith.mulf %922, %930 : vector<8x1xf32>
    %940 = arith.addf %938, %939 : vector<8x1xf32>
    %941 = math.tanh %940 : vector<8x1xf32>
    %942 = arith.mulf %936, %941 : vector<8x1xf32>
    %c0_530 = arith.constant 0 : index
    %c0_531 = arith.constant 0 : index
    %943 = vector.load %arg55[%c0_530, %c0_531] : memref<8x1xf32, #tpu.memory_space<vmem>>, vector<8x1xf32>
    tpu.vector_store %arg55[%c0_530, %c0_531], %942 {strides = array<i32>} : memref<8x1xf32, #tpu.memory_space<vmem>>, vector<8x1xf32>,
    %c0_532 = arith.constant 0 : index
    %c0_533 = arith.constant 0 : index
    %944 = vector.load %arg56[%c0_532, %c0_533] : memref<8x1xf32, #tpu.memory_space<vmem>>, vector<8x1xf32>
    tpu.vector_store %arg56[%c0_532, %c0_533], %940 {strides = array<i32>} : memref<8x1xf32, #tpu.memory_space<vmem>>, vector<8x1xf32>,
    %945 = vector.broadcast %942 : vector<8x1xf32> to vector<8x8xf32>
    %946 = arith.mulf %908, %945 : vector<8x8xf32>
    %c0_534 = arith.constant 0 : index
    %c8_535 = arith.constant 8 : index
    %947 = vector.load %arg54[%c0_534, %c8_535] : memref<8x32xf32, #tpu.memory_space<vmem>>, vector<8x8xf32>
    tpu.vector_store %arg54[%c0_534, %c8_535], %946 {strides = array<i32>} : memref<8x32xf32, #tpu.memory_space<vmem>>, vector<8x8xf32>,
    %c0_536 = arith.constant 0 : index
    %c16_537 = arith.constant 16 : index
    %948 = vector.load %arg54[%c0_536, %c16_537] : memref<8x32xf32, #tpu.memory_space<vmem>>, vector<8x8xf32>
    %cst_538 = arith.constant dense<0xFF800000> : vector<8xf32>
    %949 = vector.multi_reduction <maximumf>, %948, %cst_538 [1] : vector<8x8xf32> to vector<8xf32>
    %950 = vector.shape_cast %949 : vector<8xf32> to vector<8x1xf32>
    %cst_539 = arith.constant dense<0.000000e+00> : vector<32x1xf32>
    %951 = tpu.matmul %860, %950, %cst_539 {dimension_numbers = #tpu.dot_dimension_numbers<[1], [0], [0], [1], [0, 0, 1, 1], [], []>} : vector<32x8xf32>, vector<8x1xf32>, vector<32x1xf32> -> vector<32x1xf32>
    %952 = arith.addf %951, %862 : vector<32x1xf32>
    %c0_540 = arith.constant 0 : index
    %c0_541 = arith.constant 0 : index
    %953 = vector.load %arg55[%c0_540, %c0_541] : memref<8x1xf32, #tpu.memory_space<vmem>>, vector<8x1xf32>
    %cst_542 = arith.constant dense<0.000000e+00> : vector<32x1xf32>
    %954 = tpu.matmul %861, %953, %cst_542 {dimension_numbers = #tpu.dot_dimension_numbers<[1], [0], [0], [1], [0, 0, 1, 1], [], []>} : vector<32x8xf32>, vector<8x1xf32>, vector<32x1xf32> -> vector<32x1xf32>
    %955 = arith.addf %952, %954 : vector<32x1xf32>
    %956 = arith.addf %955, %863 : vector<32x1xf32>
    %957 = vector.extract_strided_slice %956 {offsets = [0, 0], sizes = [8, 1], strides = [1, 1]} : vector<32x1xf32> to vector<8x1xf32>
    %958 = arith.negf %957 : vector<8x1xf32>
    %959 = math.exp %958 : vector<8x1xf32>
    %cst_543 = arith.constant 1.000000e+00 : f32
    %960 = vector.broadcast %cst_543 : f32 to vector<8x1xf32>
    %961 = arith.addf %960, %959 : vector<8x1xf32>
    %962 = arith.divf %960, %961 : vector<8x1xf32>
    %963 = vector.extract_strided_slice %956 {offsets = [8, 0], sizes = [8, 1], strides = [1, 1]} : vector<32x1xf32> to vector<8x1xf32>
    %964 = arith.negf %963 : vector<8x1xf32>
    %965 = math.exp %964 : vector<8x1xf32>
    %cst_544 = arith.constant 1.000000e+00 : f32
    %966 = vector.broadcast %cst_544 : f32 to vector<8x1xf32>
    %967 = arith.addf %966, %965 : vector<8x1xf32>
    %968 = arith.divf %966, %967 : vector<8x1xf32>
    %969 = vector.extract_strided_slice %956 {offsets = [16, 0], sizes = [8, 1], strides = [1, 1]} : vector<32x1xf32> to vector<8x1xf32>
    %970 = math.tanh %969 : vector<8x1xf32>
    %971 = vector.extract_strided_slice %956 {offsets = [24, 0], sizes = [8, 1], strides = [1, 1]} : vector<32x1xf32> to vector<8x1xf32>
    %972 = arith.negf %971 : vector<8x1xf32>
    %973 = math.exp %972 : vector<8x1xf32>
    %cst_545 = arith.constant 1.000000e+00 : f32
    %974 = vector.broadcast %cst_545 : f32 to vector<8x1xf32>
    %975 = arith.addf %974, %973 : vector<8x1xf32>
    %976 = arith.divf %974, %975 : vector<8x1xf32>
    %c0_546 = arith.constant 0 : index
    %c0_547 = arith.constant 0 : index
    %977 = vector.load %arg56[%c0_546, %c0_547] : memref<8x1xf32, #tpu.memory_space<vmem>>, vector<8x1xf32>
    %978 = arith.mulf %968, %977 : vector<8x1xf32>
    %979 = arith.mulf %962, %970 : vector<8x1xf32>
    %980 = arith.addf %978, %979 : vector<8x1xf32>
    %981 = math.tanh %980 : vector<8x1xf32>
    %982 = arith.mulf %976, %981 : vector<8x1xf32>
    %c0_548 = arith.constant 0 : index
    %c0_549 = arith.constant 0 : index
    %983 = vector.load %arg55[%c0_548, %c0_549] : memref<8x1xf32, #tpu.memory_space<vmem>>, vector<8x1xf32>
    tpu.vector_store %arg55[%c0_548, %c0_549], %982 {strides = array<i32>} : memref<8x1xf32, #tpu.memory_space<vmem>>, vector<8x1xf32>,
    %c0_550 = arith.constant 0 : index
    %c0_551 = arith.constant 0 : index
    %984 = vector.load %arg56[%c0_550, %c0_551] : memref<8x1xf32, #tpu.memory_space<vmem>>, vector<8x1xf32>
    tpu.vector_store %arg56[%c0_550, %c0_551], %980 {strides = array<i32>} : memref<8x1xf32, #tpu.memory_space<vmem>>, vector<8x1xf32>,
    %985 = vector.broadcast %982 : vector<8x1xf32> to vector<8x8xf32>
    %986 = arith.mulf %948, %985 : vector<8x8xf32>
    %c0_552 = arith.constant 0 : index
    %c16_553 = arith.constant 16 : index
    %987 = vector.load %arg54[%c0_552, %c16_553] : memref<8x32xf32, #tpu.memory_space<vmem>>, vector<8x8xf32>
    tpu.vector_store %arg54[%c0_552, %c16_553], %986 {strides = array<i32>} : memref<8x32xf32, #tpu.memory_space<vmem>>, vector<8x8xf32>,
    %c0_554 = arith.constant 0 : index
    %c24_555 = arith.constant 24 : index
    %988 = vector.load %arg54[%c0_554, %c24_555] : memref<8x32xf32, #tpu.memory_space<vmem>>, vector<8x8xf32>
    %cst_556 = arith.constant dense<0xFF800000> : vector<8xf32>
    %989 = vector.multi_reduction <maximumf>, %988, %cst_556 [1] : vector<8x8xf32> to vector<8xf32>
    %990 = vector.shape_cast %989 : vector<8xf32> to vector<8x1xf32>
    %cst_557 = arith.constant dense<0.000000e+00> : vector<32x1xf32>
    %991 = tpu.matmul %860, %990, %cst_557 {dimension_numbers = #tpu.dot_dimension_numbers<[1], [0], [0], [1], [0, 0, 1, 1], [], []>} : vector<32x8xf32>, vector<8x1xf32>, vector<32x1xf32> -> vector<32x1xf32>
    %992 = arith.addf %991, %862 : vector<32x1xf32>
    %c0_558 = arith.constant 0 : index
    %c0_559 = arith.constant 0 : index
    %993 = vector.load %arg55[%c0_558, %c0_559] : memref<8x1xf32, #tpu.memory_space<vmem>>, vector<8x1xf32>
    %cst_560 = arith.constant dense<0.000000e+00> : vector<32x1xf32>
    %994 = tpu.matmul %861, %993, %cst_560 {dimension_numbers = #tpu.dot_dimension_numbers<[1], [0], [0], [1], [0, 0, 1, 1], [], []>} : vector<32x8xf32>, vector<8x1xf32>, vector<32x1xf32> -> vector<32x1xf32>
    %995 = arith.addf %992, %994 : vector<32x1xf32>
    %996 = arith.addf %995, %863 : vector<32x1xf32>
    %997 = vector.extract_strided_slice %996 {offsets = [0, 0], sizes = [8, 1], strides = [1, 1]} : vector<32x1xf32> to vector<8x1xf32>
    %998 = arith.negf %997 : vector<8x1xf32>
    %999 = math.exp %998 : vector<8x1xf32>
    %cst_561 = arith.constant 1.000000e+00 : f32
    %1000 = vector.broadcast %cst_561 : f32 to vector<8x1xf32>
    %1001 = arith.addf %1000, %999 : vector<8x1xf32>
    %1002 = arith.divf %1000, %1001 : vector<8x1xf32>
    %1003 = vector.extract_strided_slice %996 {offsets = [8, 0], sizes = [8, 1], strides = [1, 1]} : vector<32x1xf32> to vector<8x1xf32>
    %1004 = arith.negf %1003 : vector<8x1xf32>
    %1005 = math.exp %1004 : vector<8x1xf32>
    %cst_562 = arith.constant 1.000000e+00 : f32
    %1006 = vector.broadcast %cst_562 : f32 to vector<8x1xf32>
    %1007 = arith.addf %1006, %1005 : vector<8x1xf32>
    %1008 = arith.divf %1006, %1007 : vector<8x1xf32>
    %1009 = vector.extract_strided_slice %996 {offsets = [16, 0], sizes = [8, 1], strides = [1, 1]} : vector<32x1xf32> to vector<8x1xf32>
    %1010 = math.tanh %1009 : vector<8x1xf32>
    %1011 = vector.extract_strided_slice %996 {offsets = [24, 0], sizes = [8, 1], strides = [1, 1]} : vector<32x1xf32> to vector<8x1xf32>
    %1012 = arith.negf %1011 : vector<8x1xf32>
    %1013 = math.exp %1012 : vector<8x1xf32>
    %cst_563 = arith.constant 1.000000e+00 : f32
    %1014 = vector.broadcast %cst_563 : f32 to vector<8x1xf32>
    %1015 = arith.addf %1014, %1013 : vector<8x1xf32>
    %1016 = arith.divf %1014, %1015 : vector<8x1xf32>
    %c0_564 = arith.constant 0 : index
    %c0_565 = arith.constant 0 : index
    %1017 = vector.load %arg56[%c0_564, %c0_565] : memref<8x1xf32, #tpu.memory_space<vmem>>, vector<8x1xf32>
    %1018 = arith.mulf %1008, %1017 : vector<8x1xf32>
    %1019 = arith.mulf %1002, %1010 : vector<8x1xf32>
    %1020 = arith.addf %1018, %1019 : vector<8x1xf32>
    %1021 = math.tanh %1020 : vector<8x1xf32>
    %1022 = arith.mulf %1016, %1021 : vector<8x1xf32>
    %c0_566 = arith.constant 0 : index
    %c0_567 = arith.constant 0 : index
    %1023 = vector.load %arg55[%c0_566, %c0_567] : memref<8x1xf32, #tpu.memory_space<vmem>>, vector<8x1xf32>
    tpu.vector_store %arg55[%c0_566, %c0_567], %1022 {strides = array<i32>} : memref<8x1xf32, #tpu.memory_space<vmem>>, vector<8x1xf32>,
    %c0_568 = arith.constant 0 : index
    %c0_569 = arith.constant 0 : index
    %1024 = vector.load %arg56[%c0_568, %c0_569] : memref<8x1xf32, #tpu.memory_space<vmem>>, vector<8x1xf32>
    tpu.vector_store %arg56[%c0_568, %c0_569], %1020 {strides = array<i32>} : memref<8x1xf32, #tpu.memory_space<vmem>>, vector<8x1xf32>,
    %1025 = vector.broadcast %1022 : vector<8x1xf32> to vector<8x8xf32>
    %1026 = arith.mulf %988, %1025 : vector<8x8xf32>
    %c0_570 = arith.constant 0 : index
    %c24_571 = arith.constant 24 : index
    %1027 = vector.load %arg54[%c0_570, %c24_571] : memref<8x32xf32, #tpu.memory_space<vmem>>, vector<8x8xf32>
    tpu.vector_store %arg54[%c0_570, %c24_571], %1026 {strides = array<i32>} : memref<8x32xf32, #tpu.memory_space<vmem>>, vector<8x8xf32>,
    %c0_572 = arith.constant 0 : index
    %c0_573 = arith.constant 0 : index
    %1028 = vector.load %arg54[%c0_572, %c0_573] : memref<8x32xf32, #tpu.memory_space<vmem>>, vector<8x32xf32>
    %c0_574 = arith.constant 0 : index
    %c0_575 = arith.constant 0 : index
    %1029 = vector.load %arg53[%c0_574, %c0_575] : memref<8x32xf32, #tpu.memory_space<vmem>>, vector<8x32xf32>
    %c0_576 = arith.constant 0 : index
    %c0_577 = arith.constant 0 : index
    %1030 = vector.load %arg40[%c0_576, %c0_577] : memref<8x8xf32, #tpu.memory_space<vmem>>, vector<8x8xf32>
    %cst_578 = arith.constant dense<0.000000e+00> : vector<8x32xf32>
    %1031 = tpu.matmul %1030, %1028, %cst_578 {dimension_numbers = #tpu.dot_dimension_numbers<[1], [0], [0], [1], [0, 0, 1, 1], [], []>} : vector<8x8xf32>, vector<8x32xf32>, vector<8x32xf32> -> vector<8x32xf32>
    %c0_579 = arith.constant 0 : index
    %c0_580 = arith.constant 0 : index
    %1032 = vector.load %arg41[%c0_579, %c0_580] : memref<8x1xf32, #tpu.memory_space<vmem>>, vector<8x1xf32>
    %1033 = vector.broadcast %1032 : vector<8x1xf32> to vector<8x32xf32>
    %1034 = arith.addf %1031, %1033 : vector<8x32xf32>
    %1035 = arith.addf %1034, %1029 : vector<8x32xf32>
    %c0_581 = arith.constant 0 : index
    %c0_582 = arith.constant 0 : index
    %1036 = vector.load %arg53[%c0_581, %c0_582] : memref<8x32xf32, #tpu.memory_space<vmem>>, vector<8x32xf32>
    tpu.vector_store %arg53[%c0_581, %c0_582], %1035 {strides = array<i32>} : memref<8x32xf32, #tpu.memory_space<vmem>>, vector<8x32xf32>,
    %c0_583 = arith.constant 0 : index
    %c32 = arith.constant 32 : index
    %1037 = vector.load %arg50[%c0_583, %c32] : memref<1x48xf32, #tpu.memory_space<vmem>>, vector<1x8xf32>
    %cst_584 = arith.constant dense<0.000000e+00> : vector<1x32xf32>
    %1038 = tpu.matmul %1037, %1028, %cst_584 {dimension_numbers = #tpu.dot_dimension_numbers<[1], [0], [0], [1], [0, 0, 1, 1], [], []>} : vector<1x8xf32>, vector<8x32xf32>, vector<1x32xf32> -> vector<1x32xf32>
    %c0_585 = arith.constant 0 : index
    %c0_586 = arith.constant 0 : index
    %c0_587 = arith.constant 0 : index
    %1039 = vector.load %arg52[%c0_585, %c0_586, %c0_587] : memref<1x1x32xf32, #tpu.memory_space<vmem>>, vector<1x1x32xf32>
    %1040 = vector.shape_cast %1039 : vector<1x1x32xf32> to vector<1x32xf32>
    %1041 = arith.addf %1040, %1038 : vector<1x32xf32>
    %c0_588 = arith.constant 0 : index
    %c0_589 = arith.constant 0 : index
    %c0_590 = arith.constant 0 : index
    %1042 = vector.load %arg52[%c0_588, %c0_589, %c0_590] : memref<1x1x32xf32, #tpu.memory_space<vmem>>, vector<1x1x32xf32>
    %1043 = vector.shape_cast %1042 : vector<1x1x32xf32> to vector<1x32xf32>
    %1044 = vector.shape_cast %1041 : vector<1x32xf32> to vector<1x1x32xf32>
    tpu.vector_store %arg52[%c0_588, %c0_589, %c0_590], %1044 {strides = array<i32>} : memref<1x1x32xf32, #tpu.memory_space<vmem>>, vector<1x1x32xf32>,
    %c0_591 = arith.constant 0 : index
    %c0_592 = arith.constant 0 : index
    %1045 = vector.load %arg53[%c0_591, %c0_592] : memref<8x32xf32, #tpu.memory_space<vmem>>, vector<8x24xf32>
    %c0_593 = arith.constant 0 : index
    %c4_594 = arith.constant 4 : index
    %1046 = vector.load %arg53[%c0_593, %c4_594] : memref<8x32xf32, #tpu.memory_space<vmem>>, vector<8x24xf32>
    %c0_595 = arith.constant 0 : index
    %c8_596 = arith.constant 8 : index
    %1047 = vector.load %arg53[%c0_595, %c8_596] : memref<8x32xf32, #tpu.memory_space<vmem>>, vector<8x24xf32>
    %1048 = tpu.concatenate %1045, %1046, %1047 in 0 : vector<8x24xf32>, vector<8x24xf32>, vector<8x24xf32> -> vector<24x24xf32>
    %c0_597 = arith.constant 0 : index
    %c0_598 = arith.constant 0 : index
    %1049 = vector.load %arg42[%c0_597, %c0_598] : memref<16x24xf32, #tpu.memory_space<vmem>>, vector<16x24xf32>
    %cst_599 = arith.constant dense<0.000000e+00> : vector<16x24xf32>
    %1050 = tpu.matmul %1049, %1048, %cst_599 {dimension_numbers = #tpu.dot_dimension_numbers<[1], [0], [0], [1], [0, 0, 1, 1], [], []>} : vector<16x24xf32>, vector<24x24xf32>, vector<16x24xf32> -> vector<16x24xf32>
    %c0_600 = arith.constant 0 : index
    %c0_601 = arith.constant 0 : index
    %1051 = vector.load %arg43[%c0_600, %c0_601] : memref<16x1xf32, #tpu.memory_space<vmem>>, vector<16x1xf32>
    %1052 = vector.broadcast %1051 : vector<16x1xf32> to vector<16x24xf32>
    %1053 = arith.addf %1050, %1052 : vector<16x24xf32>
    %1054 = vector.extract_strided_slice %1053 {offsets = [0, 0], sizes = [8, 24], strides = [1, 1]} : vector<16x24xf32> to vector<8x24xf32>
    %1055 = math.tanh %1054 : vector<8x24xf32>
    %1056 = vector.extract_strided_slice %1053 {offsets = [8, 0], sizes = [8, 24], strides = [1, 1]} : vector<16x24xf32> to vector<8x24xf32>
    %1057 = arith.negf %1056 : vector<8x24xf32>
    %1058 = math.exp %1057 : vector<8x24xf32>
    %cst_602 = arith.constant 1.000000e+00 : f32
    %1059 = vector.broadcast %cst_602 : f32 to vector<8x24xf32>
    %1060 = arith.addf %1059, %1058 : vector<8x24xf32>
    %1061 = arith.divf %1059, %1060 : vector<8x24xf32>
    %1062 = arith.mulf %1055, %1061 : vector<8x24xf32>
    %cst_603 = arith.constant 0.000000e+00 : f32
    %1063 = vector.broadcast %cst_603 : f32 to vector<8x8xf32>
    %1064 = tpu.concatenate %1063, %1062 in 1 : vector<8x8xf32>, vector<8x24xf32> -> vector<8x32xf32>
    %c0_604 = arith.constant 0 : index
    %c0_605 = arith.constant 0 : index
    %1065 = vector.load %arg54[%c0_604, %c0_605] : memref<8x32xf32, #tpu.memory_space<vmem>>, vector<8x32xf32>
    tpu.vector_store %arg54[%c0_604, %c0_605], %1064 {strides = array<i32>} : memref<8x32xf32, #tpu.memory_space<vmem>>, vector<8x32xf32>,
    %c0_606 = arith.constant 0 : index
    %c0_607 = arith.constant 0 : index
    %1066 = vector.load %arg44[%c0_606, %c0_607] : memref<32x8xf32, #tpu.memory_space<vmem>>, vector<32x8xf32>
    %c0_608 = arith.constant 0 : index
    %c0_609 = arith.constant 0 : index
    %1067 = vector.load %arg45[%c0_608, %c0_609] : memref<32x8xf32, #tpu.memory_space<vmem>>, vector<32x8xf32>
    %c0_610 = arith.constant 0 : index
    %c0_611 = arith.constant 0 : index
    %1068 = vector.load %arg46[%c0_610, %c0_611] : memref<32x1xf32, #tpu.memory_space<vmem>>, vector<32x1xf32>
    %c0_612 = arith.constant 0 : index
    %c0_613 = arith.constant 0 : index
    %1069 = vector.load %arg47[%c0_612, %c0_613] : memref<32x1xf32, #tpu.memory_space<vmem>>, vector<32x1xf32>
    %cst_614 = arith.constant 0.000000e+00 : f32
    %1070 = vector.broadcast %cst_614 : f32 to vector<8x1xf32>
    %c0_615 = arith.constant 0 : index
    %c0_616 = arith.constant 0 : index
    %1071 = vector.load %arg55[%c0_615, %c0_616] : memref<8x1xf32, #tpu.memory_space<vmem>>, vector<8x1xf32>
    tpu.vector_store %arg55[%c0_615, %c0_616], %1070 {strides = array<i32>} : memref<8x1xf32, #tpu.memory_space<vmem>>, vector<8x1xf32>,
    %cst_617 = arith.constant 0.000000e+00 : f32
    %1072 = vector.broadcast %cst_617 : f32 to vector<8x1xf32>
    %c0_618 = arith.constant 0 : index
    %c0_619 = arith.constant 0 : index
    %1073 = vector.load %arg56[%c0_618, %c0_619] : memref<8x1xf32, #tpu.memory_space<vmem>>, vector<8x1xf32>
    tpu.vector_store %arg56[%c0_618, %c0_619], %1072 {strides = array<i32>} : memref<8x1xf32, #tpu.memory_space<vmem>>, vector<8x1xf32>,
    %c0_620 = arith.constant 0 : index
    %c0_621 = arith.constant 0 : index
    %1074 = vector.load %arg54[%c0_620, %c0_621] : memref<8x32xf32, #tpu.memory_space<vmem>>, vector<8x8xf32>
    %cst_622 = arith.constant dense<0xFF800000> : vector<8xf32>
    %1075 = vector.multi_reduction <maximumf>, %1074, %cst_622 [1] : vector<8x8xf32> to vector<8xf32>
    %1076 = vector.shape_cast %1075 : vector<8xf32> to vector<8x1xf32>
    %cst_623 = arith.constant dense<0.000000e+00> : vector<32x1xf32>
    %1077 = tpu.matmul %1066, %1076, %cst_623 {dimension_numbers = #tpu.dot_dimension_numbers<[1], [0], [0], [1], [0, 0, 1, 1], [], []>} : vector<32x8xf32>, vector<8x1xf32>, vector<32x1xf32> -> vector<32x1xf32>
    %1078 = arith.addf %1077, %1068 : vector<32x1xf32>
    %c0_624 = arith.constant 0 : index
    %c0_625 = arith.constant 0 : index
    %1079 = vector.load %arg55[%c0_624, %c0_625] : memref<8x1xf32, #tpu.memory_space<vmem>>, vector<8x1xf32>
    %cst_626 = arith.constant dense<0.000000e+00> : vector<32x1xf32>
    %1080 = tpu.matmul %1067, %1079, %cst_626 {dimension_numbers = #tpu.dot_dimension_numbers<[1], [0], [0], [1], [0, 0, 1, 1], [], []>} : vector<32x8xf32>, vector<8x1xf32>, vector<32x1xf32> -> vector<32x1xf32>
    %1081 = arith.addf %1078, %1080 : vector<32x1xf32>
    %1082 = arith.addf %1081, %1069 : vector<32x1xf32>
    %1083 = vector.extract_strided_slice %1082 {offsets = [0, 0], sizes = [8, 1], strides = [1, 1]} : vector<32x1xf32> to vector<8x1xf32>
    %1084 = arith.negf %1083 : vector<8x1xf32>
    %1085 = math.exp %1084 : vector<8x1xf32>
    %cst_627 = arith.constant 1.000000e+00 : f32
    %1086 = vector.broadcast %cst_627 : f32 to vector<8x1xf32>
    %1087 = arith.addf %1086, %1085 : vector<8x1xf32>
    %1088 = arith.divf %1086, %1087 : vector<8x1xf32>
    %1089 = vector.extract_strided_slice %1082 {offsets = [8, 0], sizes = [8, 1], strides = [1, 1]} : vector<32x1xf32> to vector<8x1xf32>
    %1090 = arith.negf %1089 : vector<8x1xf32>
    %1091 = math.exp %1090 : vector<8x1xf32>
    %cst_628 = arith.constant 1.000000e+00 : f32
    %1092 = vector.broadcast %cst_628 : f32 to vector<8x1xf32>
    %1093 = arith.addf %1092, %1091 : vector<8x1xf32>
    %1094 = arith.divf %1092, %1093 : vector<8x1xf32>
    %1095 = vector.extract_strided_slice %1082 {offsets = [16, 0], sizes = [8, 1], strides = [1, 1]} : vector<32x1xf32> to vector<8x1xf32>
    %1096 = math.tanh %1095 : vector<8x1xf32>
    %1097 = vector.extract_strided_slice %1082 {offsets = [24, 0], sizes = [8, 1], strides = [1, 1]} : vector<32x1xf32> to vector<8x1xf32>
    %1098 = arith.negf %1097 : vector<8x1xf32>
    %1099 = math.exp %1098 : vector<8x1xf32>
    %cst_629 = arith.constant 1.000000e+00 : f32
    %1100 = vector.broadcast %cst_629 : f32 to vector<8x1xf32>
    %1101 = arith.addf %1100, %1099 : vector<8x1xf32>
    %1102 = arith.divf %1100, %1101 : vector<8x1xf32>
    %c0_630 = arith.constant 0 : index
    %c0_631 = arith.constant 0 : index
    %1103 = vector.load %arg56[%c0_630, %c0_631] : memref<8x1xf32, #tpu.memory_space<vmem>>, vector<8x1xf32>
    %1104 = arith.mulf %1094, %1103 : vector<8x1xf32>
    %1105 = arith.mulf %1088, %1096 : vector<8x1xf32>
    %1106 = arith.addf %1104, %1105 : vector<8x1xf32>
    %1107 = math.tanh %1106 : vector<8x1xf32>
    %1108 = arith.mulf %1102, %1107 : vector<8x1xf32>
    %c0_632 = arith.constant 0 : index
    %c0_633 = arith.constant 0 : index
    %1109 = vector.load %arg55[%c0_632, %c0_633] : memref<8x1xf32, #tpu.memory_space<vmem>>, vector<8x1xf32>
    tpu.vector_store %arg55[%c0_632, %c0_633], %1108 {strides = array<i32>} : memref<8x1xf32, #tpu.memory_space<vmem>>, vector<8x1xf32>,
    %c0_634 = arith.constant 0 : index
    %c0_635 = arith.constant 0 : index
    %1110 = vector.load %arg56[%c0_634, %c0_635] : memref<8x1xf32, #tpu.memory_space<vmem>>, vector<8x1xf32>
    tpu.vector_store %arg56[%c0_634, %c0_635], %1106 {strides = array<i32>} : memref<8x1xf32, #tpu.memory_space<vmem>>, vector<8x1xf32>,
    %1111 = vector.broadcast %1108 : vector<8x1xf32> to vector<8x8xf32>
    %1112 = arith.mulf %1074, %1111 : vector<8x8xf32>
    %c0_636 = arith.constant 0 : index
    %c0_637 = arith.constant 0 : index
    %1113 = vector.load %arg54[%c0_636, %c0_637] : memref<8x32xf32, #tpu.memory_space<vmem>>, vector<8x8xf32>
    tpu.vector_store %arg54[%c0_636, %c0_637], %1112 {strides = array<i32>} : memref<8x32xf32, #tpu.memory_space<vmem>>, vector<8x8xf32>,
    %c0_638 = arith.constant 0 : index
    %c8_639 = arith.constant 8 : index
    %1114 = vector.load %arg54[%c0_638, %c8_639] : memref<8x32xf32, #tpu.memory_space<vmem>>, vector<8x8xf32>
    %cst_640 = arith.constant dense<0xFF800000> : vector<8xf32>
    %1115 = vector.multi_reduction <maximumf>, %1114, %cst_640 [1] : vector<8x8xf32> to vector<8xf32>
    %1116 = vector.shape_cast %1115 : vector<8xf32> to vector<8x1xf32>
    %cst_641 = arith.constant dense<0.000000e+00> : vector<32x1xf32>
    %1117 = tpu.matmul %1066, %1116, %cst_641 {dimension_numbers = #tpu.dot_dimension_numbers<[1], [0], [0], [1], [0, 0, 1, 1], [], []>} : vector<32x8xf32>, vector<8x1xf32>, vector<32x1xf32> -> vector<32x1xf32>
    %1118 = arith.addf %1117, %1068 : vector<32x1xf32>
    %c0_642 = arith.constant 0 : index
    %c0_643 = arith.constant 0 : index
    %1119 = vector.load %arg55[%c0_642, %c0_643] : memref<8x1xf32, #tpu.memory_space<vmem>>, vector<8x1xf32>
    %cst_644 = arith.constant dense<0.000000e+00> : vector<32x1xf32>
    %1120 = tpu.matmul %1067, %1119, %cst_644 {dimension_numbers = #tpu.dot_dimension_numbers<[1], [0], [0], [1], [0, 0, 1, 1], [], []>} : vector<32x8xf32>, vector<8x1xf32>, vector<32x1xf32> -> vector<32x1xf32>
    %1121 = arith.addf %1118, %1120 : vector<32x1xf32>
    %1122 = arith.addf %1121, %1069 : vector<32x1xf32>
    %1123 = vector.extract_strided_slice %1122 {offsets = [0, 0], sizes = [8, 1], strides = [1, 1]} : vector<32x1xf32> to vector<8x1xf32>
    %1124 = arith.negf %1123 : vector<8x1xf32>
    %1125 = math.exp %1124 : vector<8x1xf32>
    %cst_645 = arith.constant 1.000000e+00 : f32
    %1126 = vector.broadcast %cst_645 : f32 to vector<8x1xf32>
    %1127 = arith.addf %1126, %1125 : vector<8x1xf32>
    %1128 = arith.divf %1126, %1127 : vector<8x1xf32>
    %1129 = vector.extract_strided_slice %1122 {offsets = [8, 0], sizes = [8, 1], strides = [1, 1]} : vector<32x1xf32> to vector<8x1xf32>
    %1130 = arith.negf %1129 : vector<8x1xf32>
    %1131 = math.exp %1130 : vector<8x1xf32>
    %cst_646 = arith.constant 1.000000e+00 : f32
    %1132 = vector.broadcast %cst_646 : f32 to vector<8x1xf32>
    %1133 = arith.addf %1132, %1131 : vector<8x1xf32>
    %1134 = arith.divf %1132, %1133 : vector<8x1xf32>
    %1135 = vector.extract_strided_slice %1122 {offsets = [16, 0], sizes = [8, 1], strides = [1, 1]} : vector<32x1xf32> to vector<8x1xf32>
    %1136 = math.tanh %1135 : vector<8x1xf32>
    %1137 = vector.extract_strided_slice %1122 {offsets = [24, 0], sizes = [8, 1], strides = [1, 1]} : vector<32x1xf32> to vector<8x1xf32>
    %1138 = arith.negf %1137 : vector<8x1xf32>
    %1139 = math.exp %1138 : vector<8x1xf32>
    %cst_647 = arith.constant 1.000000e+00 : f32
    %1140 = vector.broadcast %cst_647 : f32 to vector<8x1xf32>
    %1141 = arith.addf %1140, %1139 : vector<8x1xf32>
    %1142 = arith.divf %1140, %1141 : vector<8x1xf32>
    %c0_648 = arith.constant 0 : index
    %c0_649 = arith.constant 0 : index
    %1143 = vector.load %arg56[%c0_648, %c0_649] : memref<8x1xf32, #tpu.memory_space<vmem>>, vector<8x1xf32>
    %1144 = arith.mulf %1134, %1143 : vector<8x1xf32>
    %1145 = arith.mulf %1128, %1136 : vector<8x1xf32>
    %1146 = arith.addf %1144, %1145 : vector<8x1xf32>
    %1147 = math.tanh %1146 : vector<8x1xf32>
    %1148 = arith.mulf %1142, %1147 : vector<8x1xf32>
    %c0_650 = arith.constant 0 : index
    %c0_651 = arith.constant 0 : index
    %1149 = vector.load %arg55[%c0_650, %c0_651] : memref<8x1xf32, #tpu.memory_space<vmem>>, vector<8x1xf32>
    tpu.vector_store %arg55[%c0_650, %c0_651], %1148 {strides = array<i32>} : memref<8x1xf32, #tpu.memory_space<vmem>>, vector<8x1xf32>,
    %c0_652 = arith.constant 0 : index
    %c0_653 = arith.constant 0 : index
    %1150 = vector.load %arg56[%c0_652, %c0_653] : memref<8x1xf32, #tpu.memory_space<vmem>>, vector<8x1xf32>
    tpu.vector_store %arg56[%c0_652, %c0_653], %1146 {strides = array<i32>} : memref<8x1xf32, #tpu.memory_space<vmem>>, vector<8x1xf32>,
    %1151 = vector.broadcast %1148 : vector<8x1xf32> to vector<8x8xf32>
    %1152 = arith.mulf %1114, %1151 : vector<8x8xf32>
    %c0_654 = arith.constant 0 : index
    %c8_655 = arith.constant 8 : index
    %1153 = vector.load %arg54[%c0_654, %c8_655] : memref<8x32xf32, #tpu.memory_space<vmem>>, vector<8x8xf32>
    tpu.vector_store %arg54[%c0_654, %c8_655], %1152 {strides = array<i32>} : memref<8x32xf32, #tpu.memory_space<vmem>>, vector<8x8xf32>,
    %c0_656 = arith.constant 0 : index
    %c16_657 = arith.constant 16 : index
    %1154 = vector.load %arg54[%c0_656, %c16_657] : memref<8x32xf32, #tpu.memory_space<vmem>>, vector<8x8xf32>
    %cst_658 = arith.constant dense<0xFF800000> : vector<8xf32>
    %1155 = vector.multi_reduction <maximumf>, %1154, %cst_658 [1] : vector<8x8xf32> to vector<8xf32>
    %1156 = vector.shape_cast %1155 : vector<8xf32> to vector<8x1xf32>
    %cst_659 = arith.constant dense<0.000000e+00> : vector<32x1xf32>
    %1157 = tpu.matmul %1066, %1156, %cst_659 {dimension_numbers = #tpu.dot_dimension_numbers<[1], [0], [0], [1], [0, 0, 1, 1], [], []>} : vector<32x8xf32>, vector<8x1xf32>, vector<32x1xf32> -> vector<32x1xf32>
    %1158 = arith.addf %1157, %1068 : vector<32x1xf32>
    %c0_660 = arith.constant 0 : index
    %c0_661 = arith.constant 0 : index
    %1159 = vector.load %arg55[%c0_660, %c0_661] : memref<8x1xf32, #tpu.memory_space<vmem>>, vector<8x1xf32>
    %cst_662 = arith.constant dense<0.000000e+00> : vector<32x1xf32>
    %1160 = tpu.matmul %1067, %1159, %cst_662 {dimension_numbers = #tpu.dot_dimension_numbers<[1], [0], [0], [1], [0, 0, 1, 1], [], []>} : vector<32x8xf32>, vector<8x1xf32>, vector<32x1xf32> -> vector<32x1xf32>
    %1161 = arith.addf %1158, %1160 : vector<32x1xf32>
    %1162 = arith.addf %1161, %1069 : vector<32x1xf32>
    %1163 = vector.extract_strided_slice %1162 {offsets = [0, 0], sizes = [8, 1], strides = [1, 1]} : vector<32x1xf32> to vector<8x1xf32>
    %1164 = arith.negf %1163 : vector<8x1xf32>
    %1165 = math.exp %1164 : vector<8x1xf32>
    %cst_663 = arith.constant 1.000000e+00 : f32
    %1166 = vector.broadcast %cst_663 : f32 to vector<8x1xf32>
    %1167 = arith.addf %1166, %1165 : vector<8x1xf32>
    %1168 = arith.divf %1166, %1167 : vector<8x1xf32>
    %1169 = vector.extract_strided_slice %1162 {offsets = [8, 0], sizes = [8, 1], strides = [1, 1]} : vector<32x1xf32> to vector<8x1xf32>
    %1170 = arith.negf %1169 : vector<8x1xf32>
    %1171 = math.exp %1170 : vector<8x1xf32>
    %cst_664 = arith.constant 1.000000e+00 : f32
    %1172 = vector.broadcast %cst_664 : f32 to vector<8x1xf32>
    %1173 = arith.addf %1172, %1171 : vector<8x1xf32>
    %1174 = arith.divf %1172, %1173 : vector<8x1xf32>
    %1175 = vector.extract_strided_slice %1162 {offsets = [16, 0], sizes = [8, 1], strides = [1, 1]} : vector<32x1xf32> to vector<8x1xf32>
    %1176 = math.tanh %1175 : vector<8x1xf32>
    %1177 = vector.extract_strided_slice %1162 {offsets = [24, 0], sizes = [8, 1], strides = [1, 1]} : vector<32x1xf32> to vector<8x1xf32>
    %1178 = arith.negf %1177 : vector<8x1xf32>
    %1179 = math.exp %1178 : vector<8x1xf32>
    %cst_665 = arith.constant 1.000000e+00 : f32
    %1180 = vector.broadcast %cst_665 : f32 to vector<8x1xf32>
    %1181 = arith.addf %1180, %1179 : vector<8x1xf32>
    %1182 = arith.divf %1180, %1181 : vector<8x1xf32>
    %c0_666 = arith.constant 0 : index
    %c0_667 = arith.constant 0 : index
    %1183 = vector.load %arg56[%c0_666, %c0_667] : memref<8x1xf32, #tpu.memory_space<vmem>>, vector<8x1xf32>
    %1184 = arith.mulf %1174, %1183 : vector<8x1xf32>
    %1185 = arith.mulf %1168, %1176 : vector<8x1xf32>
    %1186 = arith.addf %1184, %1185 : vector<8x1xf32>
    %1187 = math.tanh %1186 : vector<8x1xf32>
    %1188 = arith.mulf %1182, %1187 : vector<8x1xf32>
    %c0_668 = arith.constant 0 : index
    %c0_669 = arith.constant 0 : index
    %1189 = vector.load %arg55[%c0_668, %c0_669] : memref<8x1xf32, #tpu.memory_space<vmem>>, vector<8x1xf32>
    tpu.vector_store %arg55[%c0_668, %c0_669], %1188 {strides = array<i32>} : memref<8x1xf32, #tpu.memory_space<vmem>>, vector<8x1xf32>,
    %c0_670 = arith.constant 0 : index
    %c0_671 = arith.constant 0 : index
    %1190 = vector.load %arg56[%c0_670, %c0_671] : memref<8x1xf32, #tpu.memory_space<vmem>>, vector<8x1xf32>
    tpu.vector_store %arg56[%c0_670, %c0_671], %1186 {strides = array<i32>} : memref<8x1xf32, #tpu.memory_space<vmem>>, vector<8x1xf32>,
    %1191 = vector.broadcast %1188 : vector<8x1xf32> to vector<8x8xf32>
    %1192 = arith.mulf %1154, %1191 : vector<8x8xf32>
    %c0_672 = arith.constant 0 : index
    %c16_673 = arith.constant 16 : index
    %1193 = vector.load %arg54[%c0_672, %c16_673] : memref<8x32xf32, #tpu.memory_space<vmem>>, vector<8x8xf32>
    tpu.vector_store %arg54[%c0_672, %c16_673], %1192 {strides = array<i32>} : memref<8x32xf32, #tpu.memory_space<vmem>>, vector<8x8xf32>,
    %c0_674 = arith.constant 0 : index
    %c24_675 = arith.constant 24 : index
    %1194 = vector.load %arg54[%c0_674, %c24_675] : memref<8x32xf32, #tpu.memory_space<vmem>>, vector<8x8xf32>
    %cst_676 = arith.constant dense<0xFF800000> : vector<8xf32>
    %1195 = vector.multi_reduction <maximumf>, %1194, %cst_676 [1] : vector<8x8xf32> to vector<8xf32>
    %1196 = vector.shape_cast %1195 : vector<8xf32> to vector<8x1xf32>
    %cst_677 = arith.constant dense<0.000000e+00> : vector<32x1xf32>
    %1197 = tpu.matmul %1066, %1196, %cst_677 {dimension_numbers = #tpu.dot_dimension_numbers<[1], [0], [0], [1], [0, 0, 1, 1], [], []>} : vector<32x8xf32>, vector<8x1xf32>, vector<32x1xf32> -> vector<32x1xf32>
    %1198 = arith.addf %1197, %1068 : vector<32x1xf32>
    %c0_678 = arith.constant 0 : index
    %c0_679 = arith.constant 0 : index
    %1199 = vector.load %arg55[%c0_678, %c0_679] : memref<8x1xf32, #tpu.memory_space<vmem>>, vector<8x1xf32>
    %cst_680 = arith.constant dense<0.000000e+00> : vector<32x1xf32>
    %1200 = tpu.matmul %1067, %1199, %cst_680 {dimension_numbers = #tpu.dot_dimension_numbers<[1], [0], [0], [1], [0, 0, 1, 1], [], []>} : vector<32x8xf32>, vector<8x1xf32>, vector<32x1xf32> -> vector<32x1xf32>
    %1201 = arith.addf %1198, %1200 : vector<32x1xf32>
    %1202 = arith.addf %1201, %1069 : vector<32x1xf32>
    %1203 = vector.extract_strided_slice %1202 {offsets = [0, 0], sizes = [8, 1], strides = [1, 1]} : vector<32x1xf32> to vector<8x1xf32>
    %1204 = arith.negf %1203 : vector<8x1xf32>
    %1205 = math.exp %1204 : vector<8x1xf32>
    %cst_681 = arith.constant 1.000000e+00 : f32
    %1206 = vector.broadcast %cst_681 : f32 to vector<8x1xf32>
    %1207 = arith.addf %1206, %1205 : vector<8x1xf32>
    %1208 = arith.divf %1206, %1207 : vector<8x1xf32>
    %1209 = vector.extract_strided_slice %1202 {offsets = [8, 0], sizes = [8, 1], strides = [1, 1]} : vector<32x1xf32> to vector<8x1xf32>
    %1210 = arith.negf %1209 : vector<8x1xf32>
    %1211 = math.exp %1210 : vector<8x1xf32>
    %cst_682 = arith.constant 1.000000e+00 : f32
    %1212 = vector.broadcast %cst_682 : f32 to vector<8x1xf32>
    %1213 = arith.addf %1212, %1211 : vector<8x1xf32>
    %1214 = arith.divf %1212, %1213 : vector<8x1xf32>
    %1215 = vector.extract_strided_slice %1202 {offsets = [16, 0], sizes = [8, 1], strides = [1, 1]} : vector<32x1xf32> to vector<8x1xf32>
    %1216 = math.tanh %1215 : vector<8x1xf32>
    %1217 = vector.extract_strided_slice %1202 {offsets = [24, 0], sizes = [8, 1], strides = [1, 1]} : vector<32x1xf32> to vector<8x1xf32>
    %1218 = arith.negf %1217 : vector<8x1xf32>
    %1219 = math.exp %1218 : vector<8x1xf32>
    %cst_683 = arith.constant 1.000000e+00 : f32
    %1220 = vector.broadcast %cst_683 : f32 to vector<8x1xf32>
    %1221 = arith.addf %1220, %1219 : vector<8x1xf32>
    %1222 = arith.divf %1220, %1221 : vector<8x1xf32>
    %c0_684 = arith.constant 0 : index
    %c0_685 = arith.constant 0 : index
    %1223 = vector.load %arg56[%c0_684, %c0_685] : memref<8x1xf32, #tpu.memory_space<vmem>>, vector<8x1xf32>
    %1224 = arith.mulf %1214, %1223 : vector<8x1xf32>
    %1225 = arith.mulf %1208, %1216 : vector<8x1xf32>
    %1226 = arith.addf %1224, %1225 : vector<8x1xf32>
    %1227 = math.tanh %1226 : vector<8x1xf32>
    %1228 = arith.mulf %1222, %1227 : vector<8x1xf32>
    %c0_686 = arith.constant 0 : index
    %c0_687 = arith.constant 0 : index
    %1229 = vector.load %arg55[%c0_686, %c0_687] : memref<8x1xf32, #tpu.memory_space<vmem>>, vector<8x1xf32>
    tpu.vector_store %arg55[%c0_686, %c0_687], %1228 {strides = array<i32>} : memref<8x1xf32, #tpu.memory_space<vmem>>, vector<8x1xf32>,
    %c0_688 = arith.constant 0 : index
    %c0_689 = arith.constant 0 : index
    %1230 = vector.load %arg56[%c0_688, %c0_689] : memref<8x1xf32, #tpu.memory_space<vmem>>, vector<8x1xf32>
    tpu.vector_store %arg56[%c0_688, %c0_689], %1226 {strides = array<i32>} : memref<8x1xf32, #tpu.memory_space<vmem>>, vector<8x1xf32>,
    %1231 = vector.broadcast %1228 : vector<8x1xf32> to vector<8x8xf32>
    %1232 = arith.mulf %1194, %1231 : vector<8x8xf32>
    %c0_690 = arith.constant 0 : index
    %c24_691 = arith.constant 24 : index
    %1233 = vector.load %arg54[%c0_690, %c24_691] : memref<8x32xf32, #tpu.memory_space<vmem>>, vector<8x8xf32>
    tpu.vector_store %arg54[%c0_690, %c24_691], %1232 {strides = array<i32>} : memref<8x32xf32, #tpu.memory_space<vmem>>, vector<8x8xf32>,
    %c0_692 = arith.constant 0 : index
    %c0_693 = arith.constant 0 : index
    %1234 = vector.load %arg54[%c0_692, %c0_693] : memref<8x32xf32, #tpu.memory_space<vmem>>, vector<8x32xf32>
    %c0_694 = arith.constant 0 : index
    %c0_695 = arith.constant 0 : index
    %1235 = vector.load %arg53[%c0_694, %c0_695] : memref<8x32xf32, #tpu.memory_space<vmem>>, vector<8x32xf32>
    %c0_696 = arith.constant 0 : index
    %c0_697 = arith.constant 0 : index
    %1236 = vector.load %arg48[%c0_696, %c0_697] : memref<8x8xf32, #tpu.memory_space<vmem>>, vector<8x8xf32>
    %cst_698 = arith.constant dense<0.000000e+00> : vector<8x32xf32>
    %1237 = tpu.matmul %1236, %1234, %cst_698 {dimension_numbers = #tpu.dot_dimension_numbers<[1], [0], [0], [1], [0, 0, 1, 1], [], []>} : vector<8x8xf32>, vector<8x32xf32>, vector<8x32xf32> -> vector<8x32xf32>
    %c0_699 = arith.constant 0 : index
    %c0_700 = arith.constant 0 : index
    %1238 = vector.load %arg49[%c0_699, %c0_700] : memref<8x1xf32, #tpu.memory_space<vmem>>, vector<8x1xf32>
    %1239 = vector.broadcast %1238 : vector<8x1xf32> to vector<8x32xf32>
    %1240 = arith.addf %1237, %1239 : vector<8x32xf32>
    %1241 = arith.addf %1240, %1235 : vector<8x32xf32>
    %c0_701 = arith.constant 0 : index
    %c0_702 = arith.constant 0 : index
    %1242 = vector.load %arg53[%c0_701, %c0_702] : memref<8x32xf32, #tpu.memory_space<vmem>>, vector<8x32xf32>
    tpu.vector_store %arg53[%c0_701, %c0_702], %1241 {strides = array<i32>} : memref<8x32xf32, #tpu.memory_space<vmem>>, vector<8x32xf32>,
    %c0_703 = arith.constant 0 : index
    %c40 = arith.constant 40 : index
    %1243 = vector.load %arg50[%c0_703, %c40] : memref<1x48xf32, #tpu.memory_space<vmem>>, vector<1x8xf32>
    %cst_704 = arith.constant dense<0.000000e+00> : vector<1x32xf32>
    %1244 = tpu.matmul %1243, %1234, %cst_704 {dimension_numbers = #tpu.dot_dimension_numbers<[1], [0], [0], [1], [0, 0, 1, 1], [], []>} : vector<1x8xf32>, vector<8x32xf32>, vector<1x32xf32> -> vector<1x32xf32>
    %c0_705 = arith.constant 0 : index
    %c0_706 = arith.constant 0 : index
    %c0_707 = arith.constant 0 : index
    %1245 = vector.load %arg52[%c0_705, %c0_706, %c0_707] : memref<1x1x32xf32, #tpu.memory_space<vmem>>, vector<1x1x32xf32>
    %1246 = vector.shape_cast %1245 : vector<1x1x32xf32> to vector<1x32xf32>
    %1247 = arith.addf %1246, %1244 : vector<1x32xf32>
    %c0_708 = arith.constant 0 : index
    %c0_709 = arith.constant 0 : index
    %c0_710 = arith.constant 0 : index
    %1248 = vector.load %arg52[%c0_708, %c0_709, %c0_710] : memref<1x1x32xf32, #tpu.memory_space<vmem>>, vector<1x1x32xf32>
    %1249 = vector.shape_cast %1248 : vector<1x1x32xf32> to vector<1x32xf32>
    %1250 = vector.shape_cast %1247 : vector<1x32xf32> to vector<1x1x32xf32>
    tpu.vector_store %arg52[%c0_708, %c0_709, %c0_710], %1250 {strides = array<i32>} : memref<1x1x32xf32, #tpu.memory_space<vmem>>, vector<1x1x32xf32>,
    %c0_711 = arith.constant 0 : index
    %c0_712 = arith.constant 0 : index
    %c0_713 = arith.constant 0 : index
    %1251 = vector.load %arg52[%c0_711, %c0_712, %c0_713] : memref<1x1x32xf32, #tpu.memory_space<vmem>>, vector<1x1x32xf32>
    %1252 = vector.shape_cast %1251 : vector<1x1x32xf32> to vector<1x32xf32>
    %c0_714 = arith.constant 0 : index
    %c0_715 = arith.constant 0 : index
    %1253 = vector.load %arg51[%c0_714, %c0_715] : memref<1x1xf32, #tpu.memory_space<vmem>>, vector<1x1xf32>
    %1254 = vector.broadcast %1253 : vector<1x1xf32> to vector<1x32xf32>
    %1255 = arith.addf %1252, %1254 : vector<1x32xf32>
    %c0_716 = arith.constant 0 : index
    %c0_717 = arith.constant 0 : index
    %c0_718 = arith.constant 0 : index
    %1256 = vector.load %arg52[%c0_716, %c0_717, %c0_718] : memref<1x1x32xf32, #tpu.memory_space<vmem>>, vector<1x1x32xf32>
    %1257 = vector.shape_cast %1256 : vector<1x1x32xf32> to vector<1x32xf32>
    %1258 = vector.shape_cast %1255 : vector<1x32xf32> to vector<1x1x32xf32>
    tpu.vector_store %arg52[%c0_716, %c0_717, %c0_718], %1258 {strides = array<i32>} : memref<1x1x32xf32, #tpu.memory_space<vmem>>, vector<1x1x32xf32>,
    return
  }
  func.func @transform_0(%arg0: i32) -> (i32, i32, i32) {
    %c0_i32 = arith.constant 0 : i32
    %c0_i32_0 = arith.constant 0 : i32
    %c0_i32_1 = arith.constant 0 : i32
    return %arg0, %c0_i32, %c0_i32_0 : i32, i32, i32
  }
  func.func @transform_1(%arg0: i32) -> (i32, i32) {
    %c0_i32 = arith.constant 0 : i32
    %c0_i32_0 = arith.constant 0 : i32
    %c0_i32_1 = arith.constant 0 : i32
    return %c0_i32, %c0_i32_0 : i32, i32
  }
  func.func @transform_2(%arg0: i32) -> (i32, i32) {
    %c0_i32 = arith.constant 0 : i32
    %c0_i32_0 = arith.constant 0 : i32
    %c0_i32_1 = arith.constant 0 : i32
    return %c0_i32, %c0_i32_0 : i32, i32
  }
  func.func @transform_3(%arg0: i32) -> (i32, i32) {
    %c0_i32 = arith.constant 0 : i32
    %c0_i32_0 = arith.constant 0 : i32
    %c0_i32_1 = arith.constant 0 : i32
    return %c0_i32, %c0_i32_0 : i32, i32
  }
  func.func @transform_4(%arg0: i32) -> (i32, i32) {
    %c0_i32 = arith.constant 0 : i32
    %c0_i32_0 = arith.constant 0 : i32
    %c0_i32_1 = arith.constant 0 : i32
    return %c0_i32, %c0_i32_0 : i32, i32
  }
  func.func @transform_5(%arg0: i32) -> (i32, i32) {
    %c0_i32 = arith.constant 0 : i32
    %c0_i32_0 = arith.constant 0 : i32
    %c0_i32_1 = arith.constant 0 : i32
    return %c0_i32, %c0_i32_0 : i32, i32
  }
  func.func @transform_6(%arg0: i32) -> (i32, i32) {
    %c0_i32 = arith.constant 0 : i32
    %c0_i32_0 = arith.constant 0 : i32
    %c0_i32_1 = arith.constant 0 : i32
    return %c0_i32, %c0_i32_0 : i32, i32
  }
  func.func @transform_7(%arg0: i32) -> (i32, i32) {
    %c0_i32 = arith.constant 0 : i32
    %c0_i32_0 = arith.constant 0 : i32
    %c0_i32_1 = arith.constant 0 : i32
    return %c0_i32, %c0_i32_0 : i32, i32
  }
  func.func @transform_8(%arg0: i32) -> (i32, i32) {
    %c0_i32 = arith.constant 0 : i32
    %c0_i32_0 = arith.constant 0 : i32
    %c0_i32_1 = arith.constant 0 : i32
    return %c0_i32, %c0_i32_0 : i32, i32
  }
  func.func @transform_9(%arg0: i32) -> (i32, i32) {
    %c0_i32 = arith.constant 0 : i32
    %c0_i32_0 = arith.constant 0 : i32
    %c0_i32_1 = arith.constant 0 : i32
    return %c0_i32, %c0_i32_0 : i32, i32
  }
  func.func @transform_10(%arg0: i32) -> (i32, i32) {
    %c0_i32 = arith.constant 0 : i32
    %c0_i32_0 = arith.constant 0 : i32
    %c0_i32_1 = arith.constant 0 : i32
    return %c0_i32, %c0_i32_0 : i32, i32
  }
  func.func @transform_11(%arg0: i32) -> (i32, i32) {
    %c0_i32 = arith.constant 0 : i32
    %c0_i32_0 = arith.constant 0 : i32
    %c0_i32_1 = arith.constant 0 : i32
    return %c0_i32, %c0_i32_0 : i32, i32
  }
  func.func @transform_12(%arg0: i32) -> (i32, i32) {
    %c0_i32 = arith.constant 0 : i32
    %c0_i32_0 = arith.constant 0 : i32
    %c0_i32_1 = arith.constant 0 : i32
    return %c0_i32, %c0_i32_0 : i32, i32
  }
  func.func @transform_13(%arg0: i32) -> (i32, i32) {
    %c0_i32 = arith.constant 0 : i32
    %c0_i32_0 = arith.constant 0 : i32
    %c0_i32_1 = arith.constant 0 : i32
    return %c0_i32, %c0_i32_0 : i32, i32
  }
  func.func @transform_14(%arg0: i32) -> (i32, i32) {
    %c0_i32 = arith.constant 0 : i32
    %c0_i32_0 = arith.constant 0 : i32
    %c0_i32_1 = arith.constant 0 : i32
    return %c0_i32, %c0_i32_0 : i32, i32
  }
  func.func @transform_15(%arg0: i32) -> (i32, i32) {
    %c0_i32 = arith.constant 0 : i32
    %c0_i32_0 = arith.constant 0 : i32
    %c0_i32_1 = arith.constant 0 : i32
    return %c0_i32, %c0_i32_0 : i32, i32
  }
  func.func @transform_16(%arg0: i32) -> (i32, i32) {
    %c0_i32 = arith.constant 0 : i32
    %c0_i32_0 = arith.constant 0 : i32
    %c0_i32_1 = arith.constant 0 : i32
    return %c0_i32, %c0_i32_0 : i32, i32
  }
  func.func @transform_17(%arg0: i32) -> (i32, i32) {
    %c0_i32 = arith.constant 0 : i32
    %c0_i32_0 = arith.constant 0 : i32
    %c0_i32_1 = arith.constant 0 : i32
    return %c0_i32, %c0_i32_0 : i32, i32
  }
  func.func @transform_18(%arg0: i32) -> (i32, i32) {
    %c0_i32 = arith.constant 0 : i32
    %c0_i32_0 = arith.constant 0 : i32
    %c0_i32_1 = arith.constant 0 : i32
    return %c0_i32, %c0_i32_0 : i32, i32
  }
  func.func @transform_19(%arg0: i32) -> (i32, i32) {
    %c0_i32 = arith.constant 0 : i32
    %c0_i32_0 = arith.constant 0 : i32
    %c0_i32_1 = arith.constant 0 : i32
    return %c0_i32, %c0_i32_0 : i32, i32
  }
  func.func @transform_20(%arg0: i32) -> (i32, i32) {
    %c0_i32 = arith.constant 0 : i32
    %c0_i32_0 = arith.constant 0 : i32
    %c0_i32_1 = arith.constant 0 : i32
    return %c0_i32, %c0_i32_0 : i32, i32
  }
  func.func @transform_21(%arg0: i32) -> (i32, i32) {
    %c0_i32 = arith.constant 0 : i32
    %c0_i32_0 = arith.constant 0 : i32
    %c0_i32_1 = arith.constant 0 : i32
    return %c0_i32, %c0_i32_0 : i32, i32
  }
  func.func @transform_22(%arg0: i32) -> (i32, i32) {
    %c0_i32 = arith.constant 0 : i32
    %c0_i32_0 = arith.constant 0 : i32
    %c0_i32_1 = arith.constant 0 : i32
    return %c0_i32, %c0_i32_0 : i32, i32
  }
  func.func @transform_23(%arg0: i32) -> (i32, i32) {
    %c0_i32 = arith.constant 0 : i32
    %c0_i32_0 = arith.constant 0 : i32
    %c0_i32_1 = arith.constant 0 : i32
    return %c0_i32, %c0_i32_0 : i32, i32
  }
  func.func @transform_24(%arg0: i32) -> (i32, i32) {
    %c0_i32 = arith.constant 0 : i32
    %c0_i32_0 = arith.constant 0 : i32
    %c0_i32_1 = arith.constant 0 : i32
    return %c0_i32, %c0_i32_0 : i32, i32
  }
  func.func @transform_25(%arg0: i32) -> (i32, i32) {
    %c0_i32 = arith.constant 0 : i32
    %c0_i32_0 = arith.constant 0 : i32
    %c0_i32_1 = arith.constant 0 : i32
    return %c0_i32, %c0_i32_0 : i32, i32
  }
  func.func @transform_26(%arg0: i32) -> (i32, i32) {
    %c0_i32 = arith.constant 0 : i32
    %c0_i32_0 = arith.constant 0 : i32
    %c0_i32_1 = arith.constant 0 : i32
    return %c0_i32, %c0_i32_0 : i32, i32
  }
  func.func @transform_27(%arg0: i32) -> (i32, i32) {
    %c0_i32 = arith.constant 0 : i32
    %c0_i32_0 = arith.constant 0 : i32
    %c0_i32_1 = arith.constant 0 : i32
    return %c0_i32, %c0_i32_0 : i32, i32
  }
  func.func @transform_28(%arg0: i32) -> (i32, i32) {
    %c0_i32 = arith.constant 0 : i32
    %c0_i32_0 = arith.constant 0 : i32
    %c0_i32_1 = arith.constant 0 : i32
    return %c0_i32, %c0_i32_0 : i32, i32
  }
  func.func @transform_29(%arg0: i32) -> (i32, i32) {
    %c0_i32 = arith.constant 0 : i32
    %c0_i32_0 = arith.constant 0 : i32
    %c0_i32_1 = arith.constant 0 : i32
    return %c0_i32, %c0_i32_0 : i32, i32
  }
  func.func @transform_30(%arg0: i32) -> (i32, i32) {
    %c0_i32 = arith.constant 0 : i32
    %c0_i32_0 = arith.constant 0 : i32
    %c0_i32_1 = arith.constant 0 : i32
    return %c0_i32, %c0_i32_0 : i32, i32
  }
  func.func @transform_31(%arg0: i32) -> (i32, i32) {
    %c0_i32 = arith.constant 0 : i32
    %c0_i32_0 = arith.constant 0 : i32
    %c0_i32_1 = arith.constant 0 : i32
    return %c0_i32, %c0_i32_0 : i32, i32
  }
  func.func @transform_32(%arg0: i32) -> (i32, i32) {
    %c0_i32 = arith.constant 0 : i32
    %c0_i32_0 = arith.constant 0 : i32
    %c0_i32_1 = arith.constant 0 : i32
    return %c0_i32, %c0_i32_0 : i32, i32
  }
  func.func @transform_33(%arg0: i32) -> (i32, i32) {
    %c0_i32 = arith.constant 0 : i32
    %c0_i32_0 = arith.constant 0 : i32
    %c0_i32_1 = arith.constant 0 : i32
    return %c0_i32, %c0_i32_0 : i32, i32
  }
  func.func @transform_34(%arg0: i32) -> (i32, i32) {
    %c0_i32 = arith.constant 0 : i32
    %c0_i32_0 = arith.constant 0 : i32
    %c0_i32_1 = arith.constant 0 : i32
    return %c0_i32, %c0_i32_0 : i32, i32
  }
  func.func @transform_35(%arg0: i32) -> (i32, i32) {
    %c0_i32 = arith.constant 0 : i32
    %c0_i32_0 = arith.constant 0 : i32
    %c0_i32_1 = arith.constant 0 : i32
    return %c0_i32, %c0_i32_0 : i32, i32
  }
  func.func @transform_36(%arg0: i32) -> (i32, i32) {
    %c0_i32 = arith.constant 0 : i32
    %c0_i32_0 = arith.constant 0 : i32
    %c0_i32_1 = arith.constant 0 : i32
    return %c0_i32, %c0_i32_0 : i32, i32
  }
  func.func @transform_37(%arg0: i32) -> (i32, i32) {
    %c0_i32 = arith.constant 0 : i32
    %c0_i32_0 = arith.constant 0 : i32
    %c0_i32_1 = arith.constant 0 : i32
    return %c0_i32, %c0_i32_0 : i32, i32
  }
  func.func @transform_38(%arg0: i32) -> (i32, i32) {
    %c0_i32 = arith.constant 0 : i32
    %c0_i32_0 = arith.constant 0 : i32
    %c0_i32_1 = arith.constant 0 : i32
    return %c0_i32, %c0_i32_0 : i32, i32
  }
  func.func @transform_39(%arg0: i32) -> (i32, i32) {
    %c0_i32 = arith.constant 0 : i32
    %c0_i32_0 = arith.constant 0 : i32
    %c0_i32_1 = arith.constant 0 : i32
    return %c0_i32, %c0_i32_0 : i32, i32
  }
  func.func @transform_40(%arg0: i32) -> (i32, i32) {
    %c0_i32 = arith.constant 0 : i32
    %c0_i32_0 = arith.constant 0 : i32
    %c0_i32_1 = arith.constant 0 : i32
    return %c0_i32, %c0_i32_0 : i32, i32
  }
  func.func @transform_41(%arg0: i32) -> (i32, i32) {
    %c0_i32 = arith.constant 0 : i32
    %c0_i32_0 = arith.constant 0 : i32
    %c0_i32_1 = arith.constant 0 : i32
    return %c0_i32, %c0_i32_0 : i32, i32
  }
  func.func @transform_42(%arg0: i32) -> (i32, i32) {
    %c0_i32 = arith.constant 0 : i32
    %c0_i32_0 = arith.constant 0 : i32
    %c0_i32_1 = arith.constant 0 : i32
    return %c0_i32, %c0_i32_0 : i32, i32
  }
  func.func @transform_43(%arg0: i32) -> (i32, i32) {
    %c0_i32 = arith.constant 0 : i32
    %c0_i32_0 = arith.constant 0 : i32
    %c0_i32_1 = arith.constant 0 : i32
    return %c0_i32, %c0_i32_0 : i32, i32
  }
  func.func @transform_44(%arg0: i32) -> (i32, i32) {
    %c0_i32 = arith.constant 0 : i32
    %c0_i32_0 = arith.constant 0 : i32
    %c0_i32_1 = arith.constant 0 : i32
    return %c0_i32, %c0_i32_0 : i32, i32
  }
  func.func @transform_45(%arg0: i32) -> (i32, i32) {
    %c0_i32 = arith.constant 0 : i32
    %c0_i32_0 = arith.constant 0 : i32
    %c0_i32_1 = arith.constant 0 : i32
    return %c0_i32, %c0_i32_0 : i32, i32
  }
  func.func @transform_46(%arg0: i32) -> (i32, i32) {
    %c0_i32 = arith.constant 0 : i32
    %c0_i32_0 = arith.constant 0 : i32
    %c0_i32_1 = arith.constant 0 : i32
    return %c0_i32, %c0_i32_0 : i32, i32
  }
  func.func @transform_47(%arg0: i32) -> (i32, i32) {
    %c0_i32 = arith.constant 0 : i32
    %c0_i32_0 = arith.constant 0 : i32
    %c0_i32_1 = arith.constant 0 : i32
    return %c0_i32, %c0_i32_0 : i32, i32
  }
  func.func @transform_48(%arg0: i32) -> (i32, i32) {
    %c0_i32 = arith.constant 0 : i32
    %c0_i32_0 = arith.constant 0 : i32
    %c0_i32_1 = arith.constant 0 : i32
    return %c0_i32, %c0_i32_0 : i32, i32
  }
  func.func @transform_49(%arg0: i32) -> (i32, i32) {
    %c0_i32 = arith.constant 0 : i32
    %c0_i32_0 = arith.constant 0 : i32
    %c0_i32_1 = arith.constant 0 : i32
    return %c0_i32, %c0_i32_0 : i32, i32
  }
  func.func @transform_50(%arg0: i32) -> (i32, i32) {
    %c0_i32 = arith.constant 0 : i32
    %c0_i32_0 = arith.constant 0 : i32
    %c0_i32_1 = arith.constant 0 : i32
    return %c0_i32, %c0_i32_0 : i32, i32
  }
  func.func @transform_51(%arg0: i32) -> (i32, i32, i32) {
    %c0_i32 = arith.constant 0 : i32
    %c0_i32_0 = arith.constant 0 : i32
    %c0_i32_1 = arith.constant 0 : i32
    return %arg0, %c0_i32, %c0_i32_0 : i32, i32, i32
  }
}

</mosaic_0001>

<bundles_post_ra>
// kernel: tpu_custom_call.1
= control target key start
LH: loop header
LB: loop body
LE: loop exit
PB: predicated region body
PF: predicated region fallthrough
CT: control target
= control target key end

     0   :  { %s7134_s6 = smov 1   ;;  %s7135_s10 = smov 2   ;;  %s8760_s0 = inlined_call_operand.smem [shape: u32[52], index: -1, kind: input, shape index: {}] }
   0x1   :  { %s7208_s5 = sld [smem:[%s8760_s0]]   ;;  %s7136_s14 = smov 3  }
   0x2   :  { %s7213_s9 = sld [smem:[%s8760_s0 + %s7134_s6]]   ;;  %s7137_s18 = smov 4  }
   0x3   :  { %s7218_s13 = sld [smem:[%s8760_s0 + %s7135_s10]]   ;;  %s7138_s22 = smov 5  }
   0x4   :  { %s7223_s17 = sld [smem:[%s8760_s0 + %s7136_s14]]   ;;  %s7139_s26 = smov 6  }
   0x5   :  { %s7228_s21 = sld [smem:[%s8760_s0 + %s7137_s18]]   ;;  %s7140_s30 = smov 7  }
   0x6   :  { %s7233_s25 = sld [smem:[%s8760_s0 + %s7138_s22]]   ;;  %s7141_s4 = smov 8  }
   0x7   :  { %8823 = sst [smem:[#allocation10_spill]] %s7208_s5  ;;  %s7142_s10 = smov 9  }
   0x8   :  { %s7238_s29 = sld [smem:[%s8760_s0 + %s7139_s26]]   ;;  %s7143_s15 = smov 10  }
   0x9   :  { %s7243_s3 = sld [smem:[%s8760_s0 + %s7140_s30]]   ;;  %s7144_s20 = smov 11  }
   0xa   :  { %s7248_s8 = sld [smem:[%s8760_s0 + %s7141_s4]]   ;;  %s7145_s26 = smov 12  }
   0xb   :  { %s7253_s14 = sld [smem:[%s8760_s0 + %s7142_s10]]   ;;  %s7146_s1 = smov 13  }
   0xc   :  { %s7258_s19 = sld [smem:[%s8760_s0 + %s7143_s15]]   ;;  %s7147_s7 = smov 14  }
   0xd   :  { %s7263_s24 = sld [smem:[%s8760_s0 + %s7144_s20]]   ;;  %s7148_s15 = smov 15  }
   0xe   :  { %s7268_s30 = sld [smem:[%s8760_s0 + %s7145_s26]]   ;;  %s7149_s22 = smov 16  }
   0xf   :  { %8824 = sst [smem:[#allocation11_spill]] %s7243_s3  ;;  %s7150_s28 = smov 17  }
  0x10   :  { %8825 = sst [smem:[#allocation12_spill]] %s7248_s8  ;;  %s7184_s16 = smov 51  }
  0x11   :  { %s7273_s6 = sld [smem:[%s8760_s0 + %s7146_s1]]  }
  0x12   :  { %s7278_s12 = sld [smem:[%s8760_s0 + %s7147_s7]]   ;;  %s7151_s7 = smov 18  }
  0x13   :  { %s7283_s20 = sld [smem:[%s8760_s0 + %s7148_s15]]   ;;  %s7152_s15 = smov 19  }
  0x14   :  { %s7288_s27 = sld [smem:[%s8760_s0 + %s7149_s22]]   ;;  %s7153_s22 = smov 20  }
  0x15   :  { %s7293_s4 = sld [smem:[%s8760_s0 + %s7150_s28]]   ;;  %s7154_s28 = smov 21  }
  0x17   :  { %8826 = sst [smem:[#allocation13_spill]] %s7273_s6 }
  0x18   :  { %8827 = sst [smem:[#allocation14_spill]] %s7278_s12 }
  0x19   :  { %8828 = sst [smem:[#allocation15_spill]] %s7283_s20 }
  0x1a   :  { %8829 = sst [smem:[#allocation16_spill]] %s7288_s27 }
  0x1b   :  { %8830 = sst [smem:[#allocation17_spill]] %s7293_s4 }
  0x1c   :  { %s7298_s12 = sld [smem:[%s8760_s0 + %s7151_s7]]   ;;  %s7155_s7 = smov 22  }
  0x1d   :  { %s7303_s20 = sld [smem:[%s8760_s0 + %s7152_s15]]   ;;  %s7156_s15 = smov 23  }
  0x1e   :  { %s7308_s27 = sld [smem:[%s8760_s0 + %s7153_s22]]   ;;  %s7157_s22 = smov 24  }
  0x1f   :  { %s7313_s4 = sld [smem:[%s8760_s0 + %s7154_s28]]   ;;  %s7158_s28 = smov 25  }
  0x22   :  { %8831 = sst [smem:[#allocation18_spill]] %s7298_s12 }
  0x23   :  { %8832 = sst [smem:[#allocation19_spill]] %s7303_s20 }
  0x24   :  { %8833 = sst [smem:[#allocation20_spill]] %s7308_s27 }
  0x25   :  { %8834 = sst [smem:[#allocation21_spill]] %s7313_s4 }
  0x26   :  { %s7318_s12 = sld [smem:[%s8760_s0 + %s7155_s7]]   ;;  %s7159_s7 = smov 26  }
  0x27   :  { %s7323_s20 = sld [smem:[%s8760_s0 + %s7156_s15]]   ;;  %s7160_s15 = smov 27  }
  0x28   :  { %s7328_s27 = sld [smem:[%s8760_s0 + %s7157_s22]]   ;;  %s7161_s22 = smov 28  }
  0x29   :  { %s7333_s4 = sld [smem:[%s8760_s0 + %s7158_s28]]   ;;  %s7162_s28 = smov 29  }
  0x2c   :  { %8835 = sst [smem:[#allocation22_spill]] %s7318_s12 }
  0x2d   :  { %8836 = sst [smem:[#allocation23_spill]] %s7323_s20 }
  0x2e   :  { %8837 = sst [smem:[#allocation24_spill]] %s7328_s27 }
  0x2f   :  { %8838 = sst [smem:[#allocation25_spill]] %s7333_s4 }
  0x30   :  { %s7338_s12 = sld [smem:[%s8760_s0 + %s7159_s7]]   ;;  %s7163_s7 = smov 30  }
  0x31   :  { %s7343_s20 = sld [smem:[%s8760_s0 + %s7160_s15]]   ;;  %s7164_s15 = smov 31  }
  0x32   :  { %s7348_s27 = sld [smem:[%s8760_s0 + %s7161_s22]]   ;;  %s7165_s22 = smov 32  }
  0x33   :  { %s7353_s4 = sld [smem:[%s8760_s0 + %s7162_s28]]   ;;  %s7166_s28 = smov 33  }
  0x36   :  { %8839 = sst [smem:[#allocation26_spill]] %s7338_s12 }
  0x37   :  { %8840 = sst [smem:[#allocation27_spill]] %s7343_s20 }
  0x38   :  { %8841 = sst [smem:[#allocation28_spill]] %s7348_s27 }
  0x39   :  { %8842 = sst [smem:[#allocation29_spill]] %s7353_s4 }
  0x3a   :  { %s7358_s12 = sld [smem:[%s8760_s0 + %s7163_s7]]   ;;  %s7167_s7 = smov 34  }
  0x3b   :  { %s7363_s20 = sld [smem:[%s8760_s0 + %s7164_s15]]   ;;  %s7168_s15 = smov 35  }
  0x3c   :  { %s7368_s27 = sld [smem:[%s8760_s0 + %s7165_s22]]   ;;  %s7169_s22 = smov 36  }
  0x3d   :  { %s7373_s4 = sld [smem:[%s8760_s0 + %s7166_s28]]   ;;  %s7170_s28 = smov 37  }
  0x40   :  { %8843 = sst [smem:[#allocation30_spill]] %s7358_s12 }
  0x41   :  { %8844 = sst [smem:[#allocation31_spill]] %s7363_s20 }
  0x42   :  { %8845 = sst [smem:[#allocation32_spill]] %s7368_s27 }
  0x43   :  { %8846 = sst [smem:[#allocation33_spill]] %s7373_s4 }
  0x44   :  { %s7378_s12 = sld [smem:[%s8760_s0 + %s7167_s7]]   ;;  %s7171_s7 = smov 38  }
  0x45   :  { %s7383_s20 = sld [smem:[%s8760_s0 + %s7168_s15]]   ;;  %s7172_s15 = smov 39  }
  0x46   :  { %s7388_s27 = sld [smem:[%s8760_s0 + %s7169_s22]]   ;;  %s7173_s22 = smov 40  }
  0x47   :  { %s7393_s4 = sld [smem:[%s8760_s0 + %s7170_s28]]   ;;  %s7174_s28 = smov 41  }
  0x4a   :  { %8847 = sst [smem:[#allocation34_spill]] %s7378_s12 }
  0x4b   :  { %8848 = sst [smem:[#allocation35_spill]] %s7383_s20 }
  0x4c   :  { %8849 = sst [smem:[#allocation36_spill]] %s7388_s27 }
  0x4d   :  { %8850 = sst [smem:[#allocation37_spill]] %s7393_s4 }
  0x4e   :  { %s7398_s12 = sld [smem:[%s8760_s0 + %s7171_s7]]   ;;  %s7175_s7 = smov 42  }
  0x4f   :  { %s7403_s20 = sld [smem:[%s8760_s0 + %s7172_s15]]   ;;  %s7176_s15 = smov 43  }
  0x50   :  { %s7408_s27 = sld [smem:[%s8760_s0 + %s7173_s22]]   ;;  %s7177_s22 = smov 44  }
  0x51   :  { %s7413_s4 = sld [smem:[%s8760_s0 + %s7174_s28]]   ;;  %s7178_s28 = smov 45  }
  0x54   :  { %8851 = sst [smem:[#allocation38_spill]] %s7398_s12 }
  0x55   :  { %8852 = sst [smem:[#allocation39_spill]] %s7403_s20 }
  0x56   :  { %8853 = sst [smem:[#allocation40_spill]] %s7408_s27 }
  0x57   :  { %8854 = sst [smem:[#allocation41_spill]] %s7413_s4 }
  0x58   :  { %s7418_s12 = sld [smem:[%s8760_s0 + %s7175_s7]]   ;;  %s7179_s7 = smov 46  }
  0x59   :  { %s7423_s20 = sld [smem:[%s8760_s0 + %s7176_s15]]   ;;  %s7180_s15 = smov 47  }
  0x5a   :  { %s7428_s27 = sld [smem:[%s8760_s0 + %s7177_s22]]   ;;  %s7181_s22 = smov 48  }
  0x5b   :  { %s7433_s4 = sld [smem:[%s8760_s0 + %s7178_s28]]   ;;  %s7182_s28 = smov 49  }
  0x5e   :  { %8855 = sst [smem:[#allocation42_spill]] %s7418_s12 }
  0x5f   :  { %8856 = sst [smem:[#allocation43_spill]] %s7423_s20 }
  0x60   :  { %8857 = sst [smem:[#allocation44_spill]] %s7428_s27 }
  0x61   :  { %8858 = sst [smem:[#allocation45_spill]] %s7433_s4 }
  0x62   :  { %s7438_s12 = sld [smem:[%s8760_s0 + %s7179_s7]]   ;;  %s7183_s7 = smov 50  }
  0x63   :  { %s7443_s20 = sld [smem:[%s8760_s0 + %s7180_s15]]  }
  0x64   :  { %s7448_s27 = sld [smem:[%s8760_s0 + %s7181_s22]]  }
  0x65   :  { %s7453_s4 = sld [smem:[%s8760_s0 + %s7182_s28]]  }
  0x68   :  { %8859 = sst [smem:[#allocation46_spill]] %s7438_s12 }
  0x69   :  { %8860 = sst [smem:[#allocation47_spill]] %s7443_s20 }
  0x6a   :  { %s6226_s12 = sld [smem:[%s8760_s0 + %s7183_s7]]  }
  0x6b   :  { %8861 = sst [smem:[#allocation48_spill]] %s7453_s4 }
  0x6c   :  { %s7461_s20 = sld [smem:[%s8760_s0 + %s7184_s16]]  }
  0x70   :  { %v108_v0 = vstv %s6226_s12 }
  0x71   :  { %109 = vst [vmem:[#allocation6] sm:$0x1] %v108_v0 }
  0x72   :  { %110 = vsyncpa [#allocation8], 0 }
  0x73   :  { %112 = vsyncpa [#allocation8 + $0x1], 0  ;;  %s7463_s22 = smov 0   ;;  %s7465_s23 = smov 0  }
  0x74   :  { %s7467_s26 = smov 0   ;;  %s7469_s28 = smov 0  }
  0x75 LB: > { %s8862_s4 = sld [smem:[#allocation48_spill]]  ;;  %s7484_s0 = sadd.s32 4294967295, %s7132_s28   ;;  %s7124_s23 = sphi %s7465_s23, %s8914_s23   ;;  %s7120_s22 = sphi %s7463_s22, %s8913_s22   ;;  %s7132_s28 = sphi %s7469_s28, %s8916_s28   ;;  %s7128_s26 = sphi %s7467_s26, %s8915_s26  }
  0x76   : > { %s8863_s6 = sld [smem:[#allocation13_spill]]  ;;  %s6229_s12 = sadd.s32 4294967294, %s7132_s28  }
  0x77   : > { %s7488_s1 = sadd.s32 1, %s7132_s28   ;;  %s1201_s2 = sadd.s32 1, %s7128_s26 }
  0x78   : > { %s1198_s7 = ssub.s32 %s7132_s28, %s7488_s1  ;;  %p1211_p0 = scmp.ne.s32.totalorder %s7128_s26, %s7124_s23 }
  0x79   : > { %p1199_p1 = scmp.eq.s32.totalorder %s1198_s7, 0  ;;  %p1212_p2 = scmp.eq.s32.totalorder %s7484_s0, 1 }
  0x7a   : > { %p1217_p3 = scmp.ne.s32.totalorder %s7124_s23, %s7120_s22  ;;  %p1218_p4 = scmp.eq.s32.totalorder %s6229_s12, 1 }
  0x7b   : > { %s7499_s10 = scalar_select %p1199_p1, %s7128_s26, %s1201_s2  }
  0x7c   : > { %p7501_p5 = por %p1212_p2, %p1211_p0  ;;  %p7505_p6 = por %p1218_p4, %p1217_p3 }
  0x7d   : > { %p6232_p7 = scmp.ge.s32.totalorder %s7132_s28, 1  ;;  %p1392_p8 = scmp.lt.s32.totalorder %s7132_s28, 3 }
  0x7f   : > { %p1393_p9 = pnand %p6232_p7, %p1392_p8 }
  0x80   : > { %s8866_s5 = sld [smem:[#allocation10_spill]] (!%p1393_p9)  ;;  %p1509_p10 = scmp.lt.s32.totalorder (!%p1393_p9), %s7484_s0, 1 }
  0x81   : > { %1396 = sbr.rel (%p1393_p9) target bundleno = 13656 (0x3558), region = 224  ;;  %s8789_s12 = smov (!%p1393_p9), 127  }
  0x82   : > { %s8792_s2 = smov (!%p1393_p9), 126   ;;  %s8788_s7 = smov (!%p1393_p9), 2  }
  0x83   : > { %s8867_s8 = sld [smem:[#allocation12_spill]] (!%p1393_p9) }
  0x84   : > { %s8868_s3 = sld [smem:[#allocation11_spill]] (!%p1393_p9) }
  0x86   : > { %v1514_v1 = vld [vmem:[%s7213_s9 + $0x8] sm:$0xff]  ;;  %v1513_v2 = vld [vmem:[%s7213_s9] sm:$0xff]  ;;  %v7185_v3 = vmov 1   ;;  %s1510_s15 = scalar_select %p1509_p10, %s7484_s0, 1  ;;  %v7186_v4 = vmov 0   ;;  %v7187_v5 = vmov 2  }
  0x87   : > { %6632 = vset.pattern.permute.xlu0 %v7185_v3  ;;  %6634 = vset.pattern.permute.xlu1 %v7185_v3  ;;  %v1573_v10 = vld [vmem:[%s7218_s13 + $0x8] sm:$0xff]  ;;  %v1572_v16 = vld [vmem:[%s7218_s13] sm:$0xff]  ;;  %vm8790_vm4 = vcmask 15360   ;;  %vm1613_vm5 = vcmask 261120   ;;  %vm1635_vm6 = vcmask 64512   ;;  %vm1631_vm7 = vcmask 7168  }
  0x88   : > { %1537 = vperm.xlu0 %6632, %v1514_v1   ;;  %1533 = vperm.xlu1 %6634, %v1513_v2   ;;  %s7516_s18 = scalar_lea.vmem %s8866_s5, %s1510_s15  ;;  %v7191_v52 = vmov 0.0   ;;  %v7537_v54 = vld [vmem:[%s7228_s21] sm:$0xff]  ;;  %v7542_v55 = vld [vmem:[%s7228_s21 + $0x8] sm:$0xff]  ;;  %v7547_v56 = vld [vmem:[%s7228_s21 + $0x10] sm:$0xff]  ;;  %s8794_s15 = smov 124  }
  0x89   : > { %6636 = vset.pattern.permute.xlu2 %v7186_v4  ;;  %v6639_v6 = vld [vmem:[%s7516_s18] ss:$0 sm:$0xff]  ;;  %1632 = vst.msk [vmem:[#allocation4] sm:$0xff] %vm1631_vm7, %v7191_v52  ;;  %v7552_v57 = vld [vmem:[%s7228_s21 + $0x18] sm:$0xff]  ;;  %v7562_v60 = vld [vmem:[%s7223_s17 + $0x8] sm:$0xff]  ;;  %s8800_s5 = smov 8  }
  0x8a   : > { %1522 = vperm.xlu2 %6636, %v1514_v1   ;;  %1633 = vst.msk [vmem:[#allocation5] sm:$0xff] %vm1631_vm7, %v7191_v52  ;;  %v7557_v58 = vld [vmem:[%s7223_s17] sm:$0xff]  ;;  %v7567_v61 = vld [vmem:[%s7223_s17 + $0x10] sm:$0xff]  ;;  %v7572_v62 = vld [vmem:[%s7223_s17 + $0x18] sm:$0xff] }
  0x8b   : > { %v7577_v0 = vld [vmem:[%s7233_s25] sm:$0xff] }
  0x8c   : > { %v7581_v3 = vld [vmem:[%s7238_s29] sm:$0xff] }
  0x90   : > { %6633 = vset.pattern.permute.xlu0 %v7187_v5  ;;  %6635 = vset.pattern.permute.xlu1 %v7187_v5  ;;  %v1680_v53 = vld [vmem:[#allocation4] sm:$0xff] }
  0x91   : > { %1557 = vperm.xlu0 %6633, %v1514_v1   ;;  %1553 = vperm.xlu1 %6635, %v1513_v2  }
  0x92   : > { %1708 = vmatpush.msra.mxu1 %v1680_v53 }
  0x93   : > { %6238 = vmatmul.msk.f32.vlgmr.msra.gmra.mxu1 %vm1635_vm6, %v7537_v54 }
  0x99   : > { %6637 = vset.pattern.permute.xlu0 %v7186_v4  ;;  %6638 = vset.pattern.permute.xlu1 %v7186_v4 }
  0x9a   : > { %1517 = vperm.xlu0 %6637, %v1513_v2  }
  0x9b   : > { %6239 = vmatmul.msk.f32.gmra.mxu1 %vm1635_vm6, %v7542_v55 }
  0xa3   : > { %6240 = vmatmul.msk.f32.gmra.mxu1 %vm1635_vm6, %v7547_v56 }
  0xab   : > { %6241 = vmatmul.msk.f32.gmra.mxu1 %vm1635_vm6, %v7552_v57 }
  0xe4   : > { %v1523_v17 = vpop.permute.xlu2 %1522 }
  0xe5   : > { %v1529_v19 = vmul.f32 %v6639_v6, %v1523_v17 }
  0xfa   : > { %v1538_v7 = vpop.permute.xlu0 %1537  ;;  %v1534_v9 = vpop.permute.xlu1 %1533 }
  0xfb   : > { %v1541_v8 = vmul.f32 %v6639_v6, %v1538_v7  ;;  %v1540_v15 = vmul.f32 %v6639_v6, %v1534_v9  ;;  %v7585_v7 = vld [vmem:[%s7233_s25 + $0x8] sm:$0xff] }
  0xfd   : > { %1546 = vrot.lane.b32.xlu2 %v1541_v8, %s8789_s12 }
 0x103   : > { %v1558_v11 = vpop.permute.xlu0 %1557  ;;  %v1554_v13 = vpop.permute.xlu1 %1553 }
 0x104   : > { %v1561_v12 = vmul.f32 %v6639_v6, %v1558_v11  ;;  %v1560_v14 = vmul.f32 %v6639_v6, %v1554_v13  ;;  %v7589_v11 = vld [vmem:[%s7238_s29 + $0x8] sm:$0xff] }
 0x105   : > { %1581 = vperm.xlu2 %6636, %v1573_v10  }
 0x106   : > { %1566 = vrot.lane.b32.xlu1 %v1561_v12, %s8792_s2 }
 0x10c   : > { %v1518_v26 = vpop.permute.xlu0 %1517 }
 0x10d   : > { %1564 = vrot.lane.b32.xlu2 %v1560_v14, %s8792_s2  ;;  %v1528_v28 = vmul.f32 %v6639_v6, %v1518_v26 }
 0x10e   : > { %1544 = vrot.lane.b32.xlu1 %v1540_v15, %s8789_s12 }
 0x110   : > { %v1710_v63 = vpop.f32.mrf.mxu1 }
 0x116   : > { %1576 = vperm.xlu1 %6638, %v1572_v16  }
 0x118   : > { %v1713_v5 = vpop.f32.mrf.mxu1 }
 0x120   : > { %v1716_v14 = vpop.f32.mrf.mxu1 }
 0x128   : > { %v1719_v26 = vpop.f32.mrf.mxu1 }
 0x157   : > { %v1547_v18 = vpop.permute.xlu2 %1546 }
 0x158   : > { %v1551_v20 = vadd.f32 %v1547_v18, %v1529_v19  ;;  %v7593_v19 = vld [vmem:[%s7233_s25 + $0x10] sm:$0xff] }
 0x15f   : > { %v1582_v23 = vpop.permute.xlu2 %1581 }
 0x167   : > { %v1565_v32 = vpop.permute.xlu2 %1564 }
 0x178   : > { %v1567_v21 = vpop.permute.xlu1 %1566 }
 0x179   : > { %v1571_v22 = vadd.f32 %v1567_v21, %v1551_v20  ;;  %v7596_v20 = vld [vmem:[%s7233_s25 + $0x18] sm:$0xff] }
 0x17b   : > { %v1585_v24 = vadd.f32 %v1582_v23, %v1571_v22 }
 0x17d   : > { %v6233_v25 = vmul.f32 -1.442695, %v1585_v24 }
 0x17f   : > { %6646 = vpow2.f32 %v6233_v25 }
 0x180   : > { %v1545_v27 = vpop.permute.xlu1 %1544 }
 0x181   : > { %v1550_v31 = vadd.f32 %v1545_v27, %v1528_v28 }
 0x183   : > { %v1570_v33 = vadd.f32 %v1565_v32, %v1550_v31 }
 0x185   : > { %v6647_v29 = vpop.eup %6646 }
 0x186   : > { %v1590_v30 = vadd.f32 1.0, %v6647_v29  ;;  %v7601_v29 = vld [vmem:[%s7238_s29 + $0x18] sm:$0xff] }
 0x188   : > { %6648 = vrcp.f32 %v1590_v30  ;;  %v1577_v34 = vpop.permute.xlu1 %1576  ;;  %v1602_v39 = vand.u32 2147483648, %v1590_v30  ;;  %v1600_v41 = vand.u32 2147483647, %v1590_v30  ;;  %vm1596_vm1 = vweird.f32 %v1590_v30 }
 0x189   : > { %v1584_v36 = vadd.f32 %v1577_v34, %v1570_v33  ;;  %v7604_v33 = vld [vmem:[%s7238_s29 + $0x10] sm:$0xff] }
 0x18a   : > { %v1603_v43 = vor.u32 1.1754944e-38, %v1602_v39  ;;  %vm1601_vm3 = vcmp.eq.f32.partialorder %v1600_v41, 8.507059e+37 }
 0x18b   : > { %6650 = vtanh.f32 %v1584_v36 }
 0x18e   : > { %v6649_v35 = vpop.eup %6648 }
 0x18f   : > { %v1592_v37 = vmul.f32 %v6649_v35, %v1590_v30  ;;  %vm1597_vm0 = vweird.f32 %v6649_v35 }
 0x190   : > { %vm1598_vm2 = vmor %vm1596_vm1, %vm1597_vm0 }
 0x191   : > { %v1593_v38 = vsub.f32 1.0, %v1592_v37  ;;  %v6651_v45 = vpop.eup %6650 }
 0x193   : > { %v1594_v40 = vmul.f32 %v6649_v35, %v1593_v38 }
 0x195   : > { %v1595_v42 = vadd.f32 %v6649_v35, %v1594_v40 }
 0x197   : > { %v1599_v44 = vsel %vm1598_vm2, %v6649_v35, %v1595_v42 }
 0x198   : > { %v1604_v46 = vsel %vm1601_vm3, %v1603_v43, %v1599_v44 }
 0x199   : > { %v1606_v47 = vmul.f32 %v6651_v45, %v1604_v46 }
 0x19b   : > { %1608 = vrot.lane.b32.xlu2 %v1606_v47, %s8788_s7  ;;  %s8791_s7 = sand.u32 1, %s7124_s23  }
 0x19c   : > { %s7825_s12 = scalar_lea.vmem [#allocation7], %s8791_s7  ;;  %s8870_s7 = sld [smem:[#allocation16_spill]] }
 0x1f5   : > { %v1609_v48 = vpop.permute.xlu2 %1608 }
 0x1f6   : > { %v1612_v49 = vsel %vm8790_vm4, 0.0, %v1609_v48 }
 0x1f7   : > { %1614 = vst.msk [vmem:[#allocation3] sm:$0xff] %vm1613_vm5, %v1612_v49 }
 0x1fe   : > { %v7528_v50 = vld [vmem:[#allocation3] sm:$0xff] }
 0x1ff   : > { %v1636_v51 = vsel %vm1635_vm6, %v7528_v50, -inf }
 0x200   : > { %1637 = vmax.xlane.f32.xlu0 %v1636_v51 }
 0x273   : > { %v1638_v59 = vpop.xlane.xlu0 %1637 }
 0x274   : > { %1666 = vmatpush.msra.mxu0 %v1638_v59 }
 0x275   : > { %6234 = vmatmul.msk.f32.vlgmr.msra.gmra.mxu0 %vm1635_vm6, %v7557_v58 }
 0x27d   : > { %6235 = vmatmul.msk.f32.gmra.mxu0 %vm1635_vm6, %v7562_v60 }
 0x285   : > { %6236 = vmatmul.msk.f32.gmra.mxu0 %vm1635_vm6, %v7567_v61 }
 0x28d   : > { %6237 = vmatmul.msk.f32.gmra.mxu0 %vm1635_vm6, %v7572_v62 }
 0x2f2   : > { %v1668_v1 = vpop.f32.mrf.mxu0 }
 0x2f3   : > { %v1669_v2 = vadd.f32 %v1668_v1, %v7577_v0  ;;  %v1788_v1 = vld [vmem:[#allocation5] sm:$0xff] }
 0x2f5   : > { %v1722_v4 = vadd.f32 %v1710_v63, %v1669_v2 }
 0x2f7   : > { %v1726_v6 = vadd.f32 %v1722_v4, %v7581_v3 }
 0x2f9   : > { %v6242_v8 = vmul.f32 -1.442695, %v1726_v6 }
 0x2fa   : > { %v1671_v9 = vpop.f32.mrf.mxu0 }
 0x2fb   : > { %6652 = vpow2.f32 %v6242_v8  ;;  %v1672_v10 = vadd.f32 %v1671_v9, %v7585_v7 }
 0x2fd   : > { %v1723_v12 = vadd.f32 %v1713_v5, %v1672_v10 }
 0x2ff   : > { %v1727_v13 = vadd.f32 %v1723_v12, %v7589_v11 }
 0x301   : > { %v6653_v15 = vpop.eup %6652  ;;  %v6243_v16 = vmul.f32 -1.442695, %v1727_v13 }
 0x302   : > { %v1733_v17 = vadd.f32 1.0, %v6653_v15  ;;  %v1674_v18 = vpop.f32.mrf.mxu0 }
 0x303   : > { %6654 = vpow2.f32 %v6243_v16  ;;  %v1675_v24 = vadd.f32 %v1674_v18, %v7593_v19 }
 0x304   : > { %6656 = vrcp.f32 %v1733_v17  ;;  %v1745_v41 = vand.u32 2147483648, %v1733_v17  ;;  %vm1739_vm9 = vweird.f32 %v1733_v17  ;;  %v1743_v43 = vand.u32 2147483647, %v1733_v17 }
 0x305   : > { %v1724_v32 = vadd.f32 %v1716_v14, %v1675_v24 }
 0x306   : > { %v1746_v48 = vor.u32 1.1754944e-38, %v1745_v41  ;;  %vm1744_vm13 = vcmp.eq.f32.partialorder %v1743_v43, 8.507059e+37 }
 0x307   : > { %v1728_v38 = vadd.f32 %v1724_v32, %v7604_v33 }
 0x309   : > { %v6655_v21 = vpop.eup %6654 }
 0x30a   : > { %v6657_v22 = vpop.eup %6656  ;;  %v1752_v23 = vadd.f32 1.0, %v6655_v21  ;;  %v1677_v25 = vpop.f32.mrf.mxu0 }
 0x30b   : > { %v1735_v27 = vmul.f32 %v6657_v22, %v1733_v17  ;;  %v1678_v28 = vadd.f32 %v1677_v25, %v7596_v20  ;;  %vm1740_vm8 = vweird.f32 %v6657_v22 }
 0x30c   : > { %6658 = vrcp.f32 %v1752_v23  ;;  %v1764_v44 = vand.u32 2147483648, %v1752_v23  ;;  %vm1741_vm10 = vmor %vm1739_vm9, %vm1740_vm8  ;;  %v1762_v47 = vand.u32 2147483647, %v1752_v23  ;;  %vm1758_vm12 = vweird.f32 %v1752_v23 }
 0x30d   : > { %v1736_v30 = vsub.f32 1.0, %v1735_v27  ;;  %v1725_v31 = vadd.f32 %v1719_v26, %v1678_v28  ;;  %vm1804_vm8 = vcmask 130112  }
 0x30e   : > { %v1765_v53 = vor.u32 1.1754944e-38, %v1764_v44  ;;  %vm1763_vm15 = vcmp.eq.f32.partialorder %v1762_v47, 8.507059e+37 }
 0x30f   : > { %v1737_v34 = vmul.f32 %v6657_v22, %v1736_v30  ;;  %v1729_v35 = vadd.f32 %v1725_v31, %v7601_v29 }
 0x311   : > { %v6244_v36 = vmul.f32 -1.442695, %v1729_v35  ;;  %v1738_v40 = vadd.f32 %v6657_v22, %v1737_v34 }
 0x312   : > { %v6659_v37 = vpop.eup %6658 }
 0x313   : > { %v1754_v39 = vmul.f32 %v6659_v37, %v1752_v23  ;;  %6660 = vpow2.f32 %v6244_v36  ;;  %vm1759_vm11 = vweird.f32 %v6659_v37  ;;  %v1742_v46 = vsel %vm1741_vm10, %v6657_v22, %v1738_v40 }
 0x314   : > { %6662 = vtanh.f32 %v1728_v38  ;;  %vm1760_vm14 = vmor %vm1758_vm12, %vm1759_vm11  ;;  %v1747_v59 = vsel %vm1744_vm13, %v1746_v48, %v1742_v46 }
 0x315   : > { %v1755_v42 = vsub.f32 1.0, %v1754_v39 }
 0x317   : > { %v1756_v45 = vmul.f32 %v6659_v37, %v1755_v42 }
 0x319   : > { %v6661_v49 = vpop.eup %6660  ;;  %v1757_v51 = vadd.f32 %v6659_v37, %v1756_v45 }
 0x31a   : > { %v1772_v63 = vadd.f32 1.0, %v6661_v49  ;;  %v6663_v4 = vpop.eup %6662 }
 0x31b   : > { %v1761_v2 = vsel %vm1760_vm14, %v6659_v37, %v1757_v51  ;;  %v1790_v6 = vmul.f32 %v6663_v4, %v1747_v59 }
 0x31c   : > { %6664 = vrcp.f32 %v1772_v63  ;;  %v1766_v5 = vsel %vm1763_vm15, %v1765_v53, %v1761_v2  ;;  %v1784_v14 = vand.u32 2147483648, %v1772_v63  ;;  %v1782_v16 = vand.u32 2147483647, %v1772_v63 }
 0x31d   : > { %v1789_v8 = vmul.f32 %v1788_v1, %v1766_v5  ;;  %vm1778_vm1 = vweird.f32 %v1772_v63 }
 0x31e   : > { %v1785_v18 = vor.u32 1.1754944e-38, %v1784_v14  ;;  %vm1783_vm3 = vcmp.eq.f32.partialorder %v1782_v16, 8.507059e+37 }
 0x31f   : > { %v1791_v9 = vadd.f32 %v1790_v6, %v1789_v8 }
 0x321   : > { %1795 = vst.msk [vmem:[#allocation5] sm:$0xff] %vm1631_vm7, %v1791_v9  ;;  %6666 = vtanh.f32 %v1791_v9 }
 0x322   : > { %v6665_v10 = vpop.eup %6664 }
 0x323   : > { %v1774_v12 = vmul.f32 %v6665_v10, %v1772_v63  ;;  %vm1779_vm0 = vweird.f32 %v6665_v10 }
 0x324   : > { %vm1780_vm2 = vmor %vm1778_vm1, %vm1779_vm0 }
 0x325   : > { %v1775_v13 = vsub.f32 1.0, %v1774_v12 }
 0x327   : > { %v1776_v15 = vmul.f32 %v6665_v10, %v1775_v13  ;;  %v6667_v22 = vpop.eup %6666 }
 0x329   : > { %v1777_v17 = vadd.f32 %v6665_v10, %v1776_v15 }
 0x32b   : > { %v1781_v21 = vsel %vm1780_vm2, %v6665_v10, %v1777_v17 }
 0x32c   : > { %v1786_v23 = vsel %vm1783_vm3, %v1785_v18, %v1781_v21 }
 0x32d   : > { %v1793_v24 = vmul.f32 %v6667_v22, %v1786_v23 }
 0x32f   : > { %1798 = vperm.xlu1 %6638, %v1793_v24   ;;  %1794 = vst.msk [vmem:[#allocation4] sm:$0xff] %vm1631_vm7, %v1793_v24 }
 0x336   : > { %v1837_v25 = vld [vmem:[#allocation4] sm:$0xff] }
 0x337   : > { %1853 = vmatpush.msra.mxu3 %v1837_v25 }
 0x338   : > { %6249 = vmatmul.msk.f32.vlgmr.msra.gmra.mxu3 %vm1635_vm6, %v7537_v54 }
 0x340   : > { %6250 = vmatmul.msk.f32.gmra.mxu3 %vm1635_vm6, %v7542_v55 }
 0x348   : > { %6251 = vmatmul.msk.f32.gmra.mxu3 %vm1635_vm6, %v7547_v56 }
 0x350   : > { %6252 = vmatmul.msk.f32.gmra.mxu3 %vm1635_vm6, %v7552_v57 }
 0x3a1   : > { %v1799_v26 = vpop.permute.xlu1 %1798 }
 0x3a2   : > { %v1801_v27 = vmul.f32 %v1799_v26, %v7528_v50 }
 0x3a4   : > { %1802 = vst.msk [vmem:[#allocation3] sm:$0xff] %vm1635_vm6, %v1801_v27 }
 0x3ab   : > { %v7620_v28 = vld [vmem:[#allocation3] sm:$0xff] }
 0x3ac   : > { %v1805_v30 = vsel %vm1804_vm8, %v7620_v28, -inf }
 0x3ad   : > { %1806 = vmax.xlane.f32.xlu2 %v1805_v30 }
 0x3bb   : > { %v1855_v50 = vpop.f32.mrf.mxu3 }
 0x3c3   : > { %v1858_v36 = vpop.f32.mrf.mxu3 }
 0x3cb   : > { %v1861_v43 = vpop.f32.mrf.mxu3 }
 0x3d3   : > { %v1864_v63 = vpop.f32.mrf.mxu3 }
 0x420   : > { %v1807_v31 = vpop.xlane.xlu2 %1806 }
 0x421   : > { %1823 = vmatpush.msra.mxu2 %v1807_v31 }
 0x422   : > { %6245 = vmatmul.msk.f32.vlgmr.msra.gmra.mxu2 %vm1635_vm6, %v7557_v58 }
 0x42a   : > { %6246 = vmatmul.msk.f32.gmra.mxu2 %vm1635_vm6, %v7562_v60 }
 0x432   : > { %6247 = vmatmul.msk.f32.gmra.mxu2 %vm1635_vm6, %v7567_v61 }
 0x43a   : > { %6248 = vmatmul.msk.f32.gmra.mxu2 %vm1635_vm6, %v7572_v62 }
 0x4a5   : > { %v1825_v32 = vpop.f32.mrf.mxu2 }
 0x4a6   : > { %v1826_v34 = vadd.f32 %v1825_v32, %v7577_v0 }
 0x4a8   : > { %v1867_v35 = vadd.f32 %v1855_v50, %v1826_v34 }
 0x4aa   : > { %v1871_v37 = vadd.f32 %v1867_v35, %v7581_v3 }
 0x4ac   : > { %v6253_v38 = vmul.f32 -1.442695, %v1871_v37 }
 0x4ad   : > { %v1828_v39 = vpop.f32.mrf.mxu2 }
 0x4ae   : > { %6668 = vpow2.f32 %v6253_v38  ;;  %v1829_v40 = vadd.f32 %v1828_v39, %v7585_v7 }
 0x4b0   : > { %v1868_v41 = vadd.f32 %v1858_v36, %v1829_v40  ;;  %v1933_v36 = vld [vmem:[#allocation5] sm:$0xff] }
 0x4b2   : > { %v1872_v42 = vadd.f32 %v1868_v41, %v7589_v11 }
 0x4b4   : > { %v6669_v44 = vpop.eup %6668  ;;  %v6254_v45 = vmul.f32 -1.442695, %v1872_v42 }
 0x4b5   : > { %v1878_v46 = vadd.f32 1.0, %v6669_v44  ;;  %v1831_v47 = vpop.f32.mrf.mxu2 }
 0x4b6   : > { %6670 = vpow2.f32 %v6254_v45  ;;  %v1832_v53 = vadd.f32 %v1831_v47, %v7593_v19 }
 0x4b7   : > { %6672 = vrcp.f32 %v1878_v46  ;;  %v1890_v16 = vand.u32 2147483648, %v1878_v46  ;;  %vm1884_vm10 = vweird.f32 %v1878_v46  ;;  %v1888_v18 = vand.u32 2147483647, %v1878_v46 }
 0x4b8   : > { %v1869_v6 = vadd.f32 %v1861_v43, %v1832_v53 }
 0x4b9   : > { %v1891_v25 = vor.u32 1.1754944e-38, %v1890_v16  ;;  %vm1889_vm14 = vcmp.eq.f32.partialorder %v1888_v18, 8.507059e+37 }
 0x4ba   : > { %v1873_v13 = vadd.f32 %v1869_v6, %v7604_v33 }
 0x4bc   : > { %v6671_v48 = vpop.eup %6670 }
 0x4bd   : > { %v6673_v49 = vpop.eup %6672  ;;  %v1897_v51 = vadd.f32 1.0, %v6671_v48  ;;  %v1834_v59 = vpop.f32.mrf.mxu2 }
 0x4be   : > { %v1880_v1 = vmul.f32 %v6673_v49, %v1878_v46  ;;  %v1835_v2 = vadd.f32 %v1834_v59, %v7596_v20  ;;  %vm1885_vm9 = vweird.f32 %v6673_v49 }
 0x4bf   : > { %6674 = vrcp.f32 %v1897_v51  ;;  %v1909_v21 = vand.u32 2147483648, %v1897_v51  ;;  %vm1886_vm11 = vmor %vm1884_vm10, %vm1885_vm9  ;;  %v1907_v24 = vand.u32 2147483647, %v1897_v51  ;;  %vm1903_vm13 = vweird.f32 %v1897_v51 }
 0x4c0   : > { %v1881_v4 = vsub.f32 1.0, %v1880_v1  ;;  %v1870_v5 = vadd.f32 %v1864_v63, %v1835_v2  ;;  %vm1949_vm10 = vcmask 195712  }
 0x4c1   : > { %v1910_v30 = vor.u32 1.1754944e-38, %v1909_v21  ;;  %vm1908_vm0 = vcmp.eq.f32.partialorder %v1907_v24, 8.507059e+37 }
 0x4c2   : > { %v1882_v8 = vmul.f32 %v6673_v49, %v1881_v4  ;;  %v1874_v9 = vadd.f32 %v1870_v5, %v7601_v29  ;;  %v2241_v5 = vld [vmem:[%s8867_s8] sm:$0xff]  ;;  %s8885_s8 = smov 127  }
 0x4c4   : > { %v6255_v10 = vmul.f32 -1.442695, %v1874_v9  ;;  %v1883_v15 = vadd.f32 %v6673_v49, %v1882_v8 }
 0x4c5   : > { %v6675_v12 = vpop.eup %6674 }
 0x4c6   : > { %v1899_v14 = vmul.f32 %v6675_v12, %v1897_v51  ;;  %6676 = vpow2.f32 %v6255_v10  ;;  %vm1904_vm12 = vweird.f32 %v6675_v12  ;;  %v1887_v23 = vsel %vm1886_vm11, %v6673_v49, %v1883_v15 }
 0x4c7   : > { %6678 = vtanh.f32 %v1873_v13  ;;  %vm1905_vm15 = vmor %vm1903_vm13, %vm1904_vm12  ;;  %v1892_v31 = vsel %vm1889_vm14, %v1891_v25, %v1887_v23 }
 0x4c8   : > { %v1900_v17 = vsub.f32 1.0, %v1899_v14 }
 0x4ca   : > { %v1901_v22 = vmul.f32 %v6675_v12, %v1900_v17 }
 0x4cc   : > { %v6677_v26 = vpop.eup %6676  ;;  %v1902_v27 = vadd.f32 %v6675_v12, %v1901_v22 }
 0x4cd   : > { %v1917_v50 = vadd.f32 1.0, %v6677_v26  ;;  %v6679_v34 = vpop.eup %6678 }
 0x4ce   : > { %v1906_v32 = vsel %vm1905_vm15, %v6675_v12, %v1902_v27  ;;  %v1935_v37 = vmul.f32 %v6679_v34, %v1892_v31 }
 0x4cf   : > { %6680 = vrcp.f32 %v1917_v50  ;;  %v1911_v35 = vsel %vm1908_vm0, %v1910_v30, %v1906_v32  ;;  %v1929_v43 = vand.u32 2147483648, %v1917_v50  ;;  %v1927_v45 = vand.u32 2147483647, %v1917_v50 }
 0x4d0   : > { %v1934_v38 = vmul.f32 %v1933_v36, %v1911_v35  ;;  %vm1923_vm2 = vweird.f32 %v1917_v50 }
 0x4d1   : > { %v1930_v47 = vor.u32 1.1754944e-38, %v1929_v43  ;;  %vm1928_vm9 = vcmp.eq.f32.partialorder %v1927_v45, 8.507059e+37 }
 0x4d2   : > { %v1936_v39 = vadd.f32 %v1935_v37, %v1934_v38 }
 0x4d4   : > { %1940 = vst.msk [vmem:[#allocation5] sm:$0xff] %vm1631_vm7, %v1936_v39  ;;  %6682 = vtanh.f32 %v1936_v39 }
 0x4d5   : > { %v6681_v40 = vpop.eup %6680 }
 0x4d6   : > { %v1919_v41 = vmul.f32 %v6681_v40, %v1917_v50  ;;  %vm1924_vm1 = vweird.f32 %v6681_v40 }
 0x4d7   : > { %vm1925_vm3 = vmor %vm1923_vm2, %vm1924_vm1 }
 0x4d8   : > { %v1920_v42 = vsub.f32 1.0, %v1919_v41 }
 0x4da   : > { %v1921_v44 = vmul.f32 %v6681_v40, %v1920_v42  ;;  %v6683_v49 = vpop.eup %6682 }
 0x4dc   : > { %v1922_v46 = vadd.f32 %v6681_v40, %v1921_v44 }
 0x4de   : > { %v1926_v48 = vsel %vm1925_vm3, %v6681_v40, %v1922_v46 }
 0x4df   : > { %v1931_v51 = vsel %vm1928_vm9, %v1930_v47, %v1926_v48 }
 0x4e0   : > { %v1938_v53 = vmul.f32 %v6683_v49, %v1931_v51 }
 0x4e2   : > { %1943 = vperm.xlu1 %6638, %v1938_v53   ;;  %1939 = vst.msk [vmem:[#allocation4] sm:$0xff] %vm1631_vm7, %v1938_v53 }
 0x4e9   : > { %v1982_v59 = vld [vmem:[#allocation4] sm:$0xff] }
 0x4ea   : > { %1998 = vmatpush.msrb.mxu1 %v1982_v59 }
 0x4eb   : > { %6260 = vmatmul.msk.f32.vlgmr.msrb.gmra.mxu1 %vm1635_vm6, %v7537_v54 }
 0x4f3   : > { %6261 = vmatmul.msk.f32.gmra.mxu1 %vm1635_vm6, %v7542_v55 }
 0x4fb   : > { %6262 = vmatmul.msk.f32.gmra.mxu1 %vm1635_vm6, %v7547_v56 }
 0x503   : > { %6263 = vmatmul.msk.f32.gmra.mxu1 %vm1635_vm6, %v7552_v57 }
 0x554   : > { %v1944_v63 = vpop.permute.xlu1 %1943 }
 0x555   : > { %v1946_v1 = vmul.f32 %v1944_v63, %v7620_v28 }
 0x557   : > { %1947 = vst.msk [vmem:[#allocation3] sm:$0xff] %vm1804_vm8, %v1946_v1 }
 0x55e   : > { %v7652_v2 = vld [vmem:[#allocation3] sm:$0xff] }
 0x55f   : > { %v1950_v4 = vsel %vm1949_vm10, %v7652_v2, -inf }
 0x560   : > { %1951 = vmax.xlane.f32.xlu1 %v1950_v4 }
 0x568   : > { %v2000_v28 = vpop.f32.mrf.mxu1 }
 0x570   : > { %v2003_v12 = vpop.f32.mrf.mxu1 }
 0x578   : > { %v2006_v21 = vpop.f32.mrf.mxu1 }
 0x579   : > { %2244 = vperm.xlu1 %6638, %v2241_v5  }
 0x580   : > { %v2009_v32 = vpop.f32.mrf.mxu1 }
 0x5d3   : > { %v1952_v6 = vpop.xlane.xlu1 %1951 }
 0x5d4   : > { %1968 = vmatpush.msrb.mxu0 %v1952_v6 }
 0x5d5   : > { %6256 = vmatmul.msk.f32.vlgmr.msrb.gmra.mxu0 %vm1635_vm6, %v7557_v58 }
 0x5dd   : > { %6257 = vmatmul.msk.f32.gmra.mxu0 %vm1635_vm6, %v7562_v60 }
 0x5e5   : > { %6258 = vmatmul.msk.f32.gmra.mxu0 %vm1635_vm6, %v7567_v61 }
 0x5ed   : > { %6259 = vmatmul.msk.f32.gmra.mxu0 %vm1635_vm6, %v7572_v62 }
 0x652   : > { %v1970_v8 = vpop.f32.mrf.mxu0 }
 0x653   : > { %v1971_v9 = vadd.f32 %v1970_v8, %v7577_v0 }
 0x655   : > { %v2012_v10 = vadd.f32 %v2000_v28, %v1971_v9 }
 0x657   : > { %v2016_v13 = vadd.f32 %v2012_v10, %v7581_v3 }
 0x659   : > { %v6264_v14 = vmul.f32 -1.442695, %v2016_v13 }
 0x65a   : > { %v1973_v15 = vpop.f32.mrf.mxu0 }
 0x65b   : > { %6684 = vpow2.f32 %v6264_v14  ;;  %v1974_v16 = vadd.f32 %v1973_v15, %v7585_v7 }
 0x65d   : > { %v2013_v17 = vadd.f32 %v2003_v12, %v1974_v16  ;;  %v2078_v12 = vld [vmem:[#allocation5] sm:$0xff] }
 0x65f   : > { %v2017_v18 = vadd.f32 %v2013_v17, %v7589_v11 }
 0x661   : > { %v6685_v22 = vpop.eup %6684  ;;  %v6265_v23 = vmul.f32 -1.442695, %v2017_v18 }
 0x662   : > { %v2023_v24 = vadd.f32 1.0, %v6685_v22  ;;  %v1976_v25 = vpop.f32.mrf.mxu0 }
 0x663   : > { %6686 = vpow2.f32 %v6265_v23  ;;  %v1977_v31 = vadd.f32 %v1976_v25, %v7593_v19 }
 0x664   : > { %6688 = vrcp.f32 %v2023_v24  ;;  %v2035_v46 = vand.u32 2147483648, %v2023_v24  ;;  %vm2029_vm12 = vweird.f32 %v2023_v24  ;;  %v2033_v48 = vand.u32 2147483647, %v2023_v24 }
 0x665   : > { %v2014_v38 = vadd.f32 %v2006_v21, %v1977_v31 }
 0x666   : > { %v2036_v63 = vor.u32 1.1754944e-38, %v2035_v46  ;;  %vm2034_vm0 = vcmp.eq.f32.partialorder %v2033_v48, 8.507059e+37 }
 0x667   : > { %v2018_v43 = vadd.f32 %v2014_v38, %v7604_v33 }
 0x669   : > { %v6687_v26 = vpop.eup %6686 }
 0x66a   : > { %v6689_v27 = vpop.eup %6688  ;;  %v2042_v30 = vadd.f32 1.0, %v6687_v26  ;;  %v1979_v50 = vpop.f32.mrf.mxu0 }
 0x66b   : > { %v2025_v34 = vmul.f32 %v6689_v27, %v2023_v24  ;;  %v1980_v35 = vadd.f32 %v1979_v50, %v7596_v20  ;;  %vm2030_vm11 = vweird.f32 %v6689_v27 }
 0x66c   : > { %6690 = vrcp.f32 %v2042_v30  ;;  %v2054_v49 = vand.u32 2147483648, %v2042_v30  ;;  %vm2031_vm13 = vmor %vm2029_vm12, %vm2030_vm11  ;;  %v2052_v59 = vand.u32 2147483647, %v2042_v30  ;;  %vm2048_vm15 = vweird.f32 %v2042_v30 }
 0x66d   : > { %v2026_v36 = vsub.f32 1.0, %v2025_v34  ;;  %v2015_v37 = vadd.f32 %v2009_v32, %v1980_v35 }
 0x66e   : > { %v2055_v5 = vor.u32 1.1754944e-38, %v2054_v49  ;;  %vm2053_vm2 = vcmp.eq.f32.partialorder %v2052_v59, 8.507059e+37 }
 0x66f   : > { %v2027_v39 = vmul.f32 %v6689_v27, %v2026_v36  ;;  %v2019_v40 = vadd.f32 %v2015_v37, %v7601_v29 }
 0x671   : > { %v6266_v41 = vmul.f32 -1.442695, %v2019_v40  ;;  %v2028_v45 = vadd.f32 %v6689_v27, %v2027_v39 }
 0x672   : > { %v6691_v42 = vpop.eup %6690 }
 0x673   : > { %v2044_v44 = vmul.f32 %v6691_v42, %v2042_v30  ;;  %6692 = vpow2.f32 %v6266_v41  ;;  %vm2049_vm14 = vweird.f32 %v6691_v42  ;;  %v2032_v53 = vsel %vm2031_vm13, %v6689_v27, %v2028_v45 }
 0x674   : > { %6694 = vtanh.f32 %v2018_v43  ;;  %vm2050_vm1 = vmor %vm2048_vm15, %vm2049_vm14  ;;  %v2037_v6 = vsel %vm2034_vm0, %v2036_v63, %v2032_v53  ;;  %vm2094_vm13 = vcmask 261312  }
 0x675   : > { %v2045_v47 = vsub.f32 1.0, %v2044_v44 }
 0x677   : > { %v2046_v51 = vmul.f32 %v6691_v42, %v2045_v47 }
 0x679   : > { %v6693_v1 = vpop.eup %6692  ;;  %v2047_v4 = vadd.f32 %v6691_v42, %v2046_v51 }
 0x67a   : > { %v2062_v28 = vadd.f32 1.0, %v6693_v1  ;;  %v6695_v9 = vpop.eup %6694 }
 0x67b   : > { %v2051_v8 = vsel %vm2050_vm1, %v6691_v42, %v2047_v4  ;;  %v2080_v13 = vmul.f32 %v6695_v9, %v2037_v6 }
 0x67c   : > { %6696 = vrcp.f32 %v2062_v28  ;;  %v2056_v10 = vsel %vm2053_vm2, %v2055_v5, %v2051_v8  ;;  %v2074_v21 = vand.u32 2147483648, %v2062_v28  ;;  %v2072_v23 = vand.u32 2147483647, %v2062_v28 }
 0x67d   : > { %v2079_v14 = vmul.f32 %v2078_v12, %v2056_v10  ;;  %vm2068_vm9 = vweird.f32 %v2062_v28 }
 0x67e   : > { %v2075_v25 = vor.u32 1.1754944e-38, %v2074_v21  ;;  %vm2073_vm12 = vcmp.eq.f32.partialorder %v2072_v23, 8.507059e+37 }
 0x67f   : > { %v2081_v15 = vadd.f32 %v2080_v13, %v2079_v14 }
 0x681   : > { %2085 = vst.msk [vmem:[#allocation5] sm:$0xff] %vm1631_vm7, %v2081_v15  ;;  %6698 = vtanh.f32 %v2081_v15 }
 0x682   : > { %v6697_v16 = vpop.eup %6696 }
 0x683   : > { %v2064_v17 = vmul.f32 %v6697_v16, %v2062_v28  ;;  %vm2069_vm3 = vweird.f32 %v6697_v16 }
 0x684   : > { %vm2070_vm11 = vmor %vm2068_vm9, %vm2069_vm3 }
 0x685   : > { %v2065_v18 = vsub.f32 1.0, %v2064_v17 }
 0x687   : > { %v2066_v22 = vmul.f32 %v6697_v16, %v2065_v18  ;;  %v6699_v27 = vpop.eup %6698 }
 0x688   : > { %v2223_v23 = vld [vmem:[#allocation5] sm:$0xff] }
 0x689   : > { %v2067_v24 = vadd.f32 %v6697_v16, %v2066_v22 }
 0x68b   : > { %v2071_v26 = vsel %vm2070_vm11, %v6697_v16, %v2067_v24 }
 0x68c   : > { %v2076_v30 = vsel %vm2073_vm12, %v2075_v25, %v2071_v26 }
 0x68d   : > { %v2083_v31 = vmul.f32 %v6699_v27, %v2076_v30 }
 0x68f   : > { %2088 = vperm.xlu2 %6636, %v2083_v31   ;;  %2084 = vst.msk [vmem:[#allocation4] sm:$0xff] %vm1631_vm7, %v2083_v31 }
 0x696   : > { %v2127_v50 = vld [vmem:[#allocation4] sm:$0xff] }
 0x697   : > { %2143 = vmatpush.msrb.mxu3 %v2127_v50 }
 0x698   : > { %6271 = vmatmul.msk.f32.vlgmr.msrb.gmra.mxu3 %vm1635_vm6, %v7537_v54 }
 0x6a0   : > { %6272 = vmatmul.msk.f32.gmra.mxu3 %vm1635_vm6, %v7542_v55 }
 0x6a8   : > { %6273 = vmatmul.msk.f32.gmra.mxu3 %vm1635_vm6, %v7547_v56 }
 0x6b0   : > { %6274 = vmatmul.msk.f32.gmra.mxu3 %vm1635_vm6, %v7552_v57 }
 0x6e9   : > { %v2089_v32 = vpop.permute.xlu2 %2088 }
 0x6ea   : > { %v2091_v34 = vmul.f32 %v2089_v32, %v7652_v2 }
 0x6ec   : > { %2092 = vst.msk [vmem:[#allocation3] sm:$0xff] %vm1949_vm10, %v2091_v34 }
 0x6f3   : > { %v7685_v35 = vld [vmem:[#allocation3] sm:$0xff] }
 0x6f4   : > { %v2095_v54 = vsel %vm2094_vm13, %v7685_v35, -inf }
 0x6f5   : > { %2096 = vmax.xlane.f32.xlu0 %v2095_v54 }
 0x71b   : > { %v2145_v55 = vpop.f32.mrf.mxu3 }
 0x723   : > { %v2148_v37 = vpop.f32.mrf.mxu3 }
 0x768   : > { %v2097_v36 = vpop.xlane.xlu0 %2096 }
 0x769   : > { %2113 = vmatpush.msrb.mxu2 %v2097_v36 }
 0x76a   : > { %6267 = vmatmul.msk.f32.vlgmr.msrb.gmra.mxu2 %vm1635_vm6, %v7557_v58 }
 0x772   : > { %6268 = vmatmul.msk.f32.gmra.mxu2 %vm1635_vm6, %v7562_v60 }
 0x77a   : > { %6269 = vmatmul.msk.f32.gmra.mxu2 %vm1635_vm6, %v7567_v61  ;;  %v2151_v61 = vpop.f32.mrf.mxu3 }
 0x782   : > { %6270 = vmatmul.msk.f32.gmra.mxu2 %vm1635_vm6, %v7572_v62  ;;  %v2154_v48 = vpop.f32.mrf.mxu3 }
 0x7ed   : > { %v2115_v56 = vpop.f32.mrf.mxu2 }
 0x7ee   : > { %v2116_v57 = vadd.f32 %v2115_v56, %v7577_v0 }
 0x7f0   : > { %v2157_v2 = vadd.f32 %v2145_v55, %v2116_v57 }
 0x7f2   : > { %v2161_v38 = vadd.f32 %v2157_v2, %v7581_v3 }
 0x7f4   : > { %v6275_v39 = vmul.f32 -1.442695, %v2161_v38 }
 0x7f5   : > { %v2118_v40 = vpop.f32.mrf.mxu2 }
 0x7f6   : > { %6700 = vpow2.f32 %v6275_v39  ;;  %v2119_v58 = vadd.f32 %v2118_v40, %v7585_v7  ;;  %v2240_v39 = vld [vmem:[%s8868_s3] sm:$0xff]  ;;  %s8876_s3 = sld [smem:[#allocation20_spill]] }
 0x7f8   : > { %v2158_v60 = vadd.f32 %v2148_v37, %v2119_v58  ;;  %v6640_v58 = vld [vmem:[%s7516_s18] ss:$0 sm:$0xff]  ;;  %s8786_s18 = smov 4  }
 0x7fa   : > { %v2162_v41 = vadd.f32 %v2158_v60, %v7589_v11  ;;  %v2245_v60 = vpop.permute.xlu1 %2244 }
 0x7fc   : > { %v6701_v42 = vpop.eup %6700  ;;  %v6276_v43 = vmul.f32 -1.442695, %v2162_v41 }
 0x7fd   : > { %v2168_v62 = vadd.f32 1.0, %v6701_v42  ;;  %v2121_v44 = vpop.f32.mrf.mxu2 }
 0x7fe   : > { %6702 = vpow2.f32 %v6276_v43  ;;  %v2122_v3 = vadd.f32 %v2121_v44, %v7593_v19 }
 0x7ff   : > { %6704 = vrcp.f32 %v2168_v62  ;;  %v2180_v19 = vand.u32 2147483648, %v2168_v62  ;;  %vm2174_vm15 = vweird.f32 %v2168_v62  ;;  %v2178_v9 = vand.u32 2147483647, %v2168_v62 }
 0x800   : > { %v2159_v53 = vadd.f32 %v2151_v61, %v2122_v3 }
 0x801   : > { %vm2179_vm3 = vcmp.eq.f32.partialorder %v2178_v9, 8.507059e+37 }
 0x802   : > { %v2163_v5 = vadd.f32 %v2159_v53, %v7604_v33 }
 0x804   : > { %v6703_v0 = vpop.eup %6702 }
 0x805   : > { %v6705_v45 = vpop.eup %6704  ;;  %v2187_v46 = vadd.f32 1.0, %v6703_v0  ;;  %v2124_v47 = vpop.f32.mrf.mxu2 }
 0x806   : > { %v2170_v49 = vmul.f32 %v6705_v45, %v2168_v62  ;;  %v2125_v7 = vadd.f32 %v2124_v47, %v7596_v20  ;;  %vm2175_vm14 = vweird.f32 %v6705_v45  ;;  %v2312_v62 = vld [vmem:[%s7258_s19 + $0x8] sm:$0xff] }
 0x807   : > { %6706 = vrcp.f32 %v2187_v46  ;;  %v2199_v20 = vand.u32 2147483648, %v2187_v46  ;;  %vm2176_vm0 = vmor %vm2174_vm15, %vm2175_vm14  ;;  %v2197_v13 = vand.u32 2147483647, %v2187_v46  ;;  %vm2193_vm2 = vweird.f32 %v2187_v46 }
 0x808   : > { %v2171_v51 = vsub.f32 1.0, %v2170_v49  ;;  %v2160_v11 = vadd.f32 %v2154_v48, %v2125_v7 }
 0x809   : > { %v2200_v15 = vor.u32 1.1754944e-38, %v2199_v20  ;;  %vm2198_vm11 = vcmp.eq.f32.partialorder %v2197_v13, 8.507059e+37 }
 0x80a   : > { %v2172_v59 = vmul.f32 %v6705_v45, %v2171_v51  ;;  %v2164_v63 = vadd.f32 %v2160_v11, %v7601_v29  ;;  %v2181_v29 = vor.u32 1.1754944e-38, %v2180_v19 }
 0x80c   : > { %v6277_v1 = vmul.f32 -1.442695, %v2164_v63  ;;  %v2173_v28 = vadd.f32 %v6705_v45, %v2172_v59 }
 0x80d   : > { %v6707_v4 = vpop.eup %6706 }
 0x80e   : > { %v2189_v6 = vmul.f32 %v6707_v4, %v2187_v46  ;;  %6708 = vpow2.f32 %v6277_v1  ;;  %vm2194_vm1 = vweird.f32 %v6707_v4  ;;  %v2177_v12 = vsel %vm2176_vm0, %v6705_v45, %v2173_v28  ;;  %v2309_v45 = vld [vmem:[%s7253_s14] sm:$0xff]  ;;  %v2310_v46 = vld [vmem:[%s7253_s14 + $0x8] sm:$0xff] }
 0x80f   : > { %6710 = vtanh.f32 %v2163_v5  ;;  %vm2195_vm9 = vmor %vm2193_vm2, %vm2194_vm1  ;;  %v2182_v16 = vsel %vm2179_vm3, %v2181_v29, %v2177_v12  ;;  %vm2323_vm1 = vcmask 195584  }
 0x810   : > { %v2190_v8 = vsub.f32 1.0, %v2189_v6 }
 0x812   : > { %v2191_v10 = vmul.f32 %v6707_v4, %v2190_v8 }
 0x814   : > { %v6709_v14 = vpop.eup %6708  ;;  %v2192_v33 = vadd.f32 %v6707_v4, %v2191_v10 }
 0x815   : > { %v2207_v17 = vadd.f32 1.0, %v6709_v14  ;;  %v6711_v21 = vpop.eup %6710 }
 0x816   : > { %v2196_v18 = vsel %vm2195_vm9, %v6707_v4, %v2192_v33  ;;  %v2225_v24 = vmul.f32 %v6711_v21, %v2182_v16  ;;  %v7733_v16 = vld [vmem:[%s7268_s30] sm:$0xff] }
 0x817   : > { %6712 = vrcp.f32 %v2207_v17  ;;  %v2201_v22 = vsel %vm2198_vm11, %v2200_v15, %v2196_v18  ;;  %v2219_v50 = vand.u32 2147483648, %v2207_v17  ;;  %v2217_v34 = vand.u32 2147483647, %v2207_v17  ;;  %v7743_v18 = vld [vmem:[%s7268_s30 + $0x10] sm:$0xff]  ;;  %v7748_v21 = vld [vmem:[%s7263_s24] sm:$0xff] }
 0x818   : > { %v2224_v25 = vmul.f32 %v2223_v23, %v2201_v22  ;;  %vm2213_vm14 = vweird.f32 %v2207_v17  ;;  %v7751_v23 = vld [vmem:[%s7268_s30 + $0x18] sm:$0xff] }
 0x819   : > { %v2220_v36 = vor.u32 1.1754944e-38, %v2219_v50  ;;  %vm2218_vm0 = vcmp.eq.f32.partialorder %v2217_v34, 8.507059e+37 }
 0x81a   : > { %v2226_v26 = vadd.f32 %v2225_v24, %v2224_v25  ;;  %v7758_v24 = vld [vmem:[%s7263_s24 + $0x8] sm:$0xff]  ;;  %v7763_v25 = vld [vmem:[%s7263_s24 + $0x10] sm:$0xff] }
 0x81c   : > { %2230 = vst.msk [vmem:[#allocation5] sm:$0xff] %vm1631_vm7, %v2226_v26  ;;  %6714 = vtanh.f32 %v2226_v26  ;;  %v7768_v26 = vld [vmem:[%s7263_s24 + $0x18] sm:$0xff] }
 0x81d   : > { %v6713_v27 = vpop.eup %6712  ;;  %2398 = vst.msk [vmem:[#allocation5] sm:$0xff] %vm1631_vm7, %v7191_v52 }
 0x81e   : > { %v2209_v30 = vmul.f32 %v6713_v27, %v2207_v17  ;;  %vm2214_vm12 = vweird.f32 %v6713_v27  ;;  %v7738_v17 = vld [vmem:[%s7268_s30 + $0x8] sm:$0xff] }
 0x81f   : > { %vm2215_vm15 = vmor %vm2213_vm14, %vm2214_vm12  ;;  %vm8787_vm12 = vcmask 31744  }
 0x820   : > { %v2210_v31 = vsub.f32 1.0, %v2209_v30  ;;  %v7773_v30 = vld [vmem:[%s8863_s6] sm:$0xff] }
 0x822   : > { %v2211_v32 = vmul.f32 %v6713_v27, %v2210_v31  ;;  %v6715_v56 = vpop.eup %6714 }
 0x824   : > { %v2212_v54 = vadd.f32 %v6713_v27, %v2211_v32 }
 0x826   : > { %v2216_v55 = vsel %vm2215_vm15, %v6713_v27, %v2212_v54 }
 0x827   : > { %v2221_v57 = vsel %vm2218_vm0, %v2220_v36, %v2216_v55  ;;  %v7781_v55 = vld [vmem:[%s8863_s6 + $0x8] sm:$0xff] }
 0x828   : > { %v2228_v2 = vmul.f32 %v6715_v56, %v2221_v57 }
 0x82a   : > { %2233 = vperm.xlu0 %6637, %v2228_v2   ;;  %2229 = vst.msk [vmem:[#allocation4] sm:$0xff] %vm1631_vm7, %v2228_v2 }
 0x82b   : > { %2397 = vst.msk [vmem:[#allocation4] sm:$0xff] %vm1631_vm7, %v7191_v52 }
 0x832   : > { %v2444_v15 = vld [vmem:[#allocation4] sm:$0xff] }
 0x89c   : > { %v2234_v37 = vpop.permute.xlu0 %2233 }
 0x89d   : > { %v2236_v38 = vmul.f32 %v2234_v37, %v7685_v35  ;;  %v2311_v35 = vld [vmem:[%s7258_s19] sm:$0xff] }
 0x89f   : > { %2237 = vst.msk [vmem:[#allocation3] sm:$0xff] %vm2094_vm13, %v2236_v38 }
 0x8a6   : > { %v2238_v40 = vld [vmem:[#allocation3] sm:$0xff] }
 0x8a7   : > { %2265 = vmatpush.msra.mxu0 %v2238_v40  ;;  %2294 = vmatpush.msra.mxu1 %v2238_v40 }
 0x8a8   : > { %6278 = vmatmul.msk.f32.vlgmr.msra.gmra.mxu0 %vm1635_vm6, %v2240_v39 }
 0x8a9   : > { %2472 = vmatpush.msrb.mxu0 %v2444_v15 }
 0x8b0   : > { %6287 = vmatmul.msk.f32.vlgmr.msrb.gmra.mxu0 %vm1635_vm6, %v7733_v16 }
 0x8b8   : > { %6288 = vmatmul.msk.f32.gmra.mxu0 %vm1635_vm6, %v7738_v17 }
 0x8c0   : > { %6289 = vmatmul.msk.f32.gmra.mxu0 %vm1635_vm6, %v7743_v18 }
 0x8c8   : > { %6290 = vmatmul.msk.f32.gmra.mxu0 %vm1635_vm6, %v7751_v23 }
 0x925   : > { %v2267_v41 = vpop.f32.mrf.mxu0 }
 0x926   : > { %v2268_v61 = vadd.f32 %v2267_v41, %v2245_v60 }
 0x928   : > { %v2273_v42 = vadd.f32 %v6640_v58, %v2268_v61 }
 0x92a   : > { %2274 = vst.msk [vmem:[#allocation2] sm:$0xff] %vm1613_vm5, %v2273_v42  ;;  %v7789_v42 = vld [vmem:[%s8863_s6 + $0x10] sm:$0xff] }
 0x92d   : > { %v2474_v27 = vpop.f32.mrf.mxu0 }
 0x931   : > { %v2301_v43 = vld [vmem:[#allocation2] sm:$0xff] }
 0x932   : > { %2303 = vrot.lane.b32.xlu0 %v2301_v43, %s8792_s2  ;;  %2306 = vrot.lane.b32.xlu2 %v2301_v43, %s8794_s15  ;;  %s8871_s2 = sld [smem:[#allocation18_spill]] }
 0x933   : > { %s8872_s15 = sld [smem:[#allocation15_spill]] }
 0x935   : > { %v2477_v54 = vpop.f32.mrf.mxu0 }
 0x93a   : > { %2315 = vperm.xlu0 %6637, %v2311_v35   ;;  %2320 = vperm.xlu2 %6636, %v2312_v62  }
 0x93d   : > { %v2480_v40 = vpop.f32.mrf.mxu0 }
 0x98c   : > { %v2307_v44 = vpop.permute.xlu2 %2306 }
 0x98d   : > { %2343 = vmatpush.msra.mxu2 %v2307_v44 }
 0x994   : > { %v2321_v47 = vpop.permute.xlu2 %2320 }
 0x9a4   : > { %v2304_v0 = vpop.permute.xlu0 %2303 }
 0x9a5   : > { %2344 = vmatpush.msra.mxu2 %v2304_v0 }
 0x9a7   : > { %2345 = vmatpush.msra.mxu2 %v2301_v43  ;;  %v7792_v43 = vld [vmem:[%s8863_s6 + $0x18] sm:$0xff]  ;;  %s8877_s6 = sld [smem:[#allocation19_spill]] }
 0x9a8   : > { %6280 = vmatmul.msk.f32.vlgmr.msra.gmra.mxu2 %vm2323_vm1, %v2309_v45 }
 0x9ac   : > { %v2316_v53 = vpop.permute.xlu0 %2315 }
 0x9b0   : > { %6281 = vmatmul.msk.f32.gmra.mxu2 %vm2323_vm1, %v2310_v46  ;;  %v2483_v46 = vpop.f32.mrf.mxu0 }
 0xa2b   : > { %v2347_v3 = vpop.f32.mrf.mxu2 }
 0xa2c   : > { %v2348_v63 = vadd.f32 %v2347_v3, %v2316_v53 }
 0xa33   : > { %v2350_v48 = vpop.f32.mrf.mxu2 }
 0xa34   : > { %v2351_v49 = vadd.f32 %v2350_v48, %v2321_v47 }
 0xa36   : > { %v6282_v7 = vmul.f32 -1.442695, %v2351_v49 }
 0xa38   : > { %6716 = vpow2.f32 %v6282_v7 }
 0xa3e   : > { %v6717_v51 = vpop.eup %6716 }
 0xa3f   : > { %v2357_v11 = vadd.f32 1.0, %v6717_v51 }
 0xa41   : > { %6718 = vrcp.f32 %v2357_v11  ;;  %v2369_v5 = vand.u32 2147483648, %v2357_v11  ;;  %v2367_v28 = vand.u32 2147483647, %v2357_v11  ;;  %vm2363_vm3 = vweird.f32 %v2357_v11 }
 0xa42   : > { %6720 = vtanh.f32 %v2348_v63 }
 0xa43   : > { %v2370_v8 = vor.u32 1.1754944e-38, %v2369_v5  ;;  %vm2368_vm11 = vcmp.eq.f32.partialorder %v2367_v28, 8.507059e+37 }
 0xa47   : > { %v6719_v59 = vpop.eup %6718 }
 0xa48   : > { %v2359_v1 = vmul.f32 %v6719_v59, %v2357_v11  ;;  %vm2364_vm2 = vweird.f32 %v6719_v59  ;;  %v6721_v20 = vpop.eup %6720 }
 0xa49   : > { %vm2365_vm9 = vmor %vm2363_vm3, %vm2364_vm2 }
 0xa4a   : > { %v2360_v4 = vsub.f32 1.0, %v2359_v1 }
 0xa4c   : > { %v2361_v6 = vmul.f32 %v6719_v59, %v2360_v4 }
 0xa4e   : > { %v2362_v19 = vadd.f32 %v6719_v59, %v2361_v6 }
 0xa50   : > { %v2366_v9 = vsel %vm2365_vm9, %v6719_v59, %v2362_v19 }
 0xa51   : > { %v2371_v10 = vsel %vm2368_vm11, %v2370_v8, %v2366_v9 }
 0xa52   : > { %v2373_v12 = vmul.f32 %v6721_v20, %v2371_v10 }
 0xa54   : > { %2375 = vrot.lane.b32.xlu2 %v2373_v12, %s8786_s18  ;;  %s8869_s18 = sld [smem:[#allocation14_spill]] }
 0xa5a   : > { %v7777_v32 = vld [vmem:[%s8869_s18] sm:$0xff]  ;;  %v7785_v37 = vld [vmem:[%s8869_s18 + $0x8] sm:$0xff]  ;;  %v7797_v48 = vld [vmem:[%s8869_s18 + $0x18] sm:$0xff] }
 0xa5b   : > { %v7800_v11 = vld [vmem:[%s8869_s18 + $0x10] sm:$0xff] }
 0xaae   : > { %v2376_v13 = vpop.permute.xlu2 %2375 }
 0xaaf   : > { %v2379_v29 = vsel %vm8787_vm12, 0.0, %v2376_v13 }
 0xab0   : > { %2380 = vst.msk [vmem:[#allocation3] sm:$0xff] %vm1613_vm5, %v2379_v29 }
 0xab7   : > { %v7728_v14 = vld [vmem:[#allocation3] sm:$0xff] }
 0xab8   : > { %v2400_v33 = vsel %vm1635_vm6, %v7728_v14, -inf }
 0xab9   : > { %2401 = vmax.xlane.f32.xlu1 %v2400_v33 }
 0xb2c   : > { %v2402_v22 = vpop.xlane.xlu1 %2401 }
 0xb2d   : > { %2430 = vmatpush.msra.mxu3 %v2402_v22 }
 0xb2e   : > { %6283 = vmatmul.msk.f32.vlgmr.msra.gmra.mxu3 %vm1635_vm6, %v7748_v21 }
 0xb36   : > { %6284 = vmatmul.msk.f32.gmra.mxu3 %vm1635_vm6, %v7758_v24 }
 0xb3e   : > { %6285 = vmatmul.msk.f32.gmra.mxu3 %vm1635_vm6, %v7763_v25 }
 0xb46   : > { %6286 = vmatmul.msk.f32.gmra.mxu3 %vm1635_vm6, %v7768_v26 }
 0xbb1   : > { %v2432_v31 = vpop.f32.mrf.mxu3 }
 0xbb2   : > { %v2433_v50 = vadd.f32 %v2432_v31, %v7773_v30  ;;  %v2552_v31 = vld [vmem:[#allocation5] sm:$0xff] }
 0xbb4   : > { %v2486_v34 = vadd.f32 %v2474_v27, %v2433_v50 }
 0xbb6   : > { %v2490_v36 = vadd.f32 %v2486_v34, %v7777_v32 }
 0xbb8   : > { %v6291_v56 = vmul.f32 -1.442695, %v2490_v36 }
 0xbb9   : > { %v2435_v57 = vpop.f32.mrf.mxu3 }
 0xbba   : > { %6722 = vpow2.f32 %v6291_v56  ;;  %v2436_v2 = vadd.f32 %v2435_v57, %v7781_v55 }
 0xbbc   : > { %v2487_v38 = vadd.f32 %v2477_v54, %v2436_v2 }
 0xbbe   : > { %v2491_v39 = vadd.f32 %v2487_v38, %v7785_v37 }
 0xbc0   : > { %v6723_v58 = vpop.eup %6722  ;;  %v6292_v60 = vmul.f32 -1.442695, %v2491_v39 }
 0xbc1   : > { %v2497_v41 = vadd.f32 1.0, %v6723_v58  ;;  %v2438_v61 = vpop.f32.mrf.mxu3 }
 0xbc2   : > { %6724 = vpow2.f32 %v6292_v60  ;;  %v2439_v0 = vadd.f32 %v2438_v61, %v7789_v42 }
 0xbc3   : > { %6726 = vrcp.f32 %v2497_v41  ;;  %v2509_v28 = vand.u32 2147483648, %v2497_v41  ;;  %vm2503_vm15 = vweird.f32 %v2497_v41  ;;  %v2507_v8 = vand.u32 2147483647, %v2497_v41 }
 0xbc4   : > { %v2488_v51 = vadd.f32 %v2480_v40, %v2439_v0 }
 0xbc5   : > { %v2510_v13 = vor.u32 1.1754944e-38, %v2509_v28  ;;  %vm2508_vm9 = vcmp.eq.f32.partialorder %v2507_v8, 8.507059e+37 }
 0xbc6   : > { %v2492_v4 = vadd.f32 %v2488_v51, %v7800_v11 }
 0xbc8   : > { %v6725_v35 = vpop.eup %6724 }
 0xbc9   : > { %v6727_v62 = vpop.eup %6726  ;;  %v2516_v44 = vadd.f32 1.0, %v6725_v35  ;;  %v2441_v45 = vpop.f32.mrf.mxu3 }
 0xbca   : > { %v2499_v3 = vmul.f32 %v6727_v62, %v2497_v41  ;;  %v2442_v47 = vadd.f32 %v2441_v45, %v7792_v43  ;;  %vm2504_vm14 = vweird.f32 %v6727_v62 }
 0xbcb   : > { %6728 = vrcp.f32 %v2516_v44  ;;  %v2528_v9 = vand.u32 2147483648, %v2516_v44  ;;  %vm2505_vm0 = vmor %vm2503_vm15, %vm2504_vm14  ;;  %v2526_v12 = vand.u32 2147483647, %v2516_v44  ;;  %vm2522_vm3 = vweird.f32 %v2516_v44 }
 0xbcc   : > { %v2500_v49 = vsub.f32 1.0, %v2499_v3  ;;  %v2489_v7 = vadd.f32 %v2483_v46, %v2442_v47  ;;  %v2275_v46 = vld [vmem:[%s8862_s4] sm:$0x1] }
 0xbcd   : > { %v2529_v15 = vor.u32 1.1754944e-38, %v2528_v9  ;;  %vm2527_vm12 = vcmp.eq.f32.partialorder %v2526_v12, 8.507059e+37  ;;  %6279 = vmatmul.msk.f32.vlgmr.msra.gmra.mxu1 %vm1635_vm6, %v2275_v46 }
 0xbce   : > { %v2501_v53 = vmul.f32 %v6727_v62, %v2500_v49  ;;  %v2493_v59 = vadd.f32 %v2489_v7, %v7797_v48 }
 0xbd0   : > { %v6293_v63 = vmul.f32 -1.442695, %v2493_v59  ;;  %v2502_v6 = vadd.f32 %v6727_v62, %v2501_v53 }
 0xbd1   : > { %v6729_v1 = vpop.eup %6728 }
 0xbd2   : > { %v2518_v5 = vmul.f32 %v6729_v1, %v2516_v44  ;;  %6730 = vpow2.f32 %v6293_v63  ;;  %vm2523_vm2 = vweird.f32 %v6729_v1  ;;  %v2506_v10 = vsel %vm2505_vm0, %v6727_v62, %v2502_v6 }
 0xbd3   : > { %6732 = vtanh.f32 %v2492_v4  ;;  %vm2524_vm11 = vmor %vm2522_vm3, %vm2523_vm2  ;;  %v2511_v22 = vsel %vm2508_vm9, %v2510_v13, %v2506_v10  ;;  %vm2299_vm2 = vcmask 253952  }
 0xbd4   : > { %v2519_v19 = vsub.f32 1.0, %v2518_v5 }
 0xbd6   : > { %v2520_v20 = vmul.f32 %v6729_v1, %v2519_v19 }
 0xbd8   : > { %v6731_v29 = vpop.eup %6730  ;;  %v2521_v33 = vadd.f32 %v6729_v1, %v2520_v20 }
 0xbd9   : > { %v2536_v27 = vadd.f32 1.0, %v6731_v29  ;;  %v6733_v34 = vpop.eup %6732 }
 0xbda   : > { %v2525_v50 = vsel %vm2524_vm11, %v6729_v1, %v2521_v33  ;;  %v2554_v36 = vmul.f32 %v6733_v34, %v2511_v22 }
 0xbdb   : > { %6734 = vrcp.f32 %v2536_v27  ;;  %v2530_v54 = vsel %vm2527_vm12, %v2529_v15, %v2525_v50  ;;  %v2548_v40 = vand.u32 2147483648, %v2536_v27  ;;  %v2546_v60 = vand.u32 2147483647, %v2536_v27 }
 0xbdc   : > { %v2553_v56 = vmul.f32 %v2552_v31, %v2530_v54  ;;  %vm2542_vm15 = vweird.f32 %v2536_v27 }
 0xbdd   : > { %v2549_v61 = vor.u32 1.1754944e-38, %v2548_v40  ;;  %vm2547_vm12 = vcmp.eq.f32.partialorder %v2546_v60, 8.507059e+37 }
 0xbde   : > { %v2555_v57 = vadd.f32 %v2554_v36, %v2553_v56 }
 0xbe0   : > { %2559 = vst.msk [vmem:[#allocation5] sm:$0xff] %vm1631_vm7, %v2555_v57  ;;  %6736 = vtanh.f32 %v2555_v57 }
 0xbe1   : > { %v6735_v2 = vpop.eup %6734 }
 0xbe2   : > { %v2538_v38 = vmul.f32 %v6735_v2, %v2536_v27  ;;  %vm2543_vm14 = vweird.f32 %v6735_v2 }
 0xbe3   : > { %vm2544_vm0 = vmor %vm2542_vm15, %vm2543_vm14 }
 0xbe4   : > { %v2539_v39 = vsub.f32 1.0, %v2538_v38 }
 0xbe6   : > { %v2540_v58 = vmul.f32 %v6735_v2, %v2539_v39  ;;  %v6737_v62 = vpop.eup %6736 }
 0xbe8   : > { %v2541_v41 = vadd.f32 %v6735_v2, %v2540_v58 }
 0xbea   : > { %v2545_v35 = vsel %vm2544_vm0, %v6735_v2, %v2541_v41 }
 0xbeb   : > { %v2550_v44 = vsel %vm2547_vm12, %v2549_v61, %v2545_v35 }
 0xbec   : > { %v2557_v0 = vmul.f32 %v6737_v62, %v2550_v44 }
 0xbee   : > { %2562 = vperm.xlu0 %6637, %v2557_v0   ;;  %2558 = vst.msk [vmem:[#allocation4] sm:$0xff] %vm1631_vm7, %v2557_v0 }
 0xbf5   : > { %v2600_v45 = vld [vmem:[#allocation4] sm:$0xff] }
 0xbf6   : > { %2616 = vmatpush.msrb.mxu2 %v2600_v45 }
 0xbf7   : > { %6298 = vmatmul.msk.f32.vlgmr.msrb.gmra.mxu2 %vm1635_vm6, %v7733_v16 }
 0xbff   : > { %6299 = vmatmul.msk.f32.gmra.mxu2 %vm1635_vm6, %v7738_v17 }
 0xc07   : > { %6300 = vmatmul.msk.f32.gmra.mxu2 %vm1635_vm6, %v7743_v18 }
 0xc0f   : > { %6301 = vmatmul.msk.f32.gmra.mxu2 %vm1635_vm6, %v7751_v23 }
 0xc4a   : > { %v2296_v51 = vpop.f32.mrf.mxu1 }
 0xc4b   : > { %2300 = vst.msk [vmem:[%s7825_s12] sm:$0x1] %vm2299_vm2, %v2296_v51 }
 0xc60   : > { %v2563_v3 = vpop.permute.xlu0 %2562 }
 0xc61   : > { %v2565_v47 = vmul.f32 %v2563_v3, %v7728_v14 }
 0xc63   : > { %2566 = vst.msk [vmem:[#allocation3] sm:$0xff] %vm1635_vm6, %v2565_v47 }
 0xc6a   : > { %v7818_v49 = vld [vmem:[#allocation3] sm:$0xff] }
 0xc6b   : > { %v2568_v7 = vsel %vm1804_vm8, %v7818_v49, -inf }
 0xc6c   : > { %2569 = vmax.xlane.f32.xlu2 %v2568_v7 }
 0xc7a   : > { %v2618_v14 = vpop.f32.mrf.mxu2 }
 0xc82   : > { %v2621_v4 = vpop.f32.mrf.mxu2 }
 0xc8a   : > { %v2624_v20 = vpop.f32.mrf.mxu2 }
 0xc92   : > { %v2627_v50 = vpop.f32.mrf.mxu2 }
 0xcdf   : > { %v2570_v53 = vpop.xlane.xlu2 %2569 }
 0xce0   : > { %2586 = vmatpush.msrb.mxu1 %v2570_v53 }
 0xce1   : > { %6294 = vmatmul.msk.f32.vlgmr.msrb.gmra.mxu1 %vm1635_vm6, %v7748_v21 }
 0xce9   : > { %6295 = vmatmul.msk.f32.gmra.mxu1 %vm1635_vm6, %v7758_v24 }
 0xcf1   : > { %6296 = vmatmul.msk.f32.gmra.mxu1 %vm1635_vm6, %v7763_v25 }
 0xcf9   : > { %6297 = vmatmul.msk.f32.gmra.mxu1 %vm1635_vm6, %v7768_v26 }
 0xd5e   : > { %v2588_v59 = vpop.f32.mrf.mxu1 }
 0xd5f   : > { %v2589_v63 = vadd.f32 %v2588_v59, %v7773_v30 }
 0xd61   : > { %v2630_v1 = vadd.f32 %v2618_v14, %v2589_v63 }
 0xd63   : > { %v2634_v5 = vadd.f32 %v2630_v1, %v7777_v32 }
 0xd65   : > { %v6302_v6 = vmul.f32 -1.442695, %v2634_v5 }
 0xd66   : > { %v2591_v28 = vpop.f32.mrf.mxu1 }
 0xd67   : > { %6738 = vpow2.f32 %v6302_v6  ;;  %v2592_v19 = vadd.f32 %v2591_v28, %v7781_v55 }
 0xd69   : > { %v2631_v8 = vadd.f32 %v2621_v4, %v2592_v19  ;;  %v2696_v4 = vld [vmem:[#allocation5] sm:$0xff] }
 0xd6b   : > { %v2635_v9 = vadd.f32 %v2631_v8, %v7785_v37 }
 0xd6d   : > { %v6739_v10 = vpop.eup %6738  ;;  %v6303_v12 = vmul.f32 -1.442695, %v2635_v9 }
 0xd6e   : > { %v2641_v13 = vadd.f32 1.0, %v6739_v10  ;;  %v2594_v29 = vpop.f32.mrf.mxu1 }
 0xd6f   : > { %6740 = vpow2.f32 %v6303_v12  ;;  %v2595_v27 = vadd.f32 %v2594_v29, %v7789_v42 }
 0xd70   : > { %6742 = vrcp.f32 %v2641_v13  ;;  %v2653_v61 = vand.u32 2147483648, %v2641_v13  ;;  %vm2647_vm9 = vweird.f32 %v2641_v13  ;;  %v2651_v62 = vand.u32 2147483647, %v2641_v13 }
 0xd71   : > { %v2632_v57 = vadd.f32 %v2624_v20, %v2595_v27 }
 0xd72   : > { %v2654_v3 = vor.u32 1.1754944e-38, %v2653_v61  ;;  %vm2652_vm0 = vcmp.eq.f32.partialorder %v2651_v62, 8.507059e+37 }
 0xd73   : > { %v2636_v58 = vadd.f32 %v2632_v57, %v7800_v11  ;;  %v3073_v57 = vld [vmem:[%s8871_s2] sm:$0xff] }
 0xd75   : > { %v6741_v33 = vpop.eup %6740 }
 0xd76   : > { %v6743_v15 = vpop.eup %6742  ;;  %v2660_v22 = vadd.f32 1.0, %v6741_v33  ;;  %v2597_v31 = vpop.f32.mrf.mxu1 }
 0xd77   : > { %v2643_v34 = vmul.f32 %v6743_v15, %v2641_v13  ;;  %v2598_v54 = vadd.f32 %v2597_v31, %v7792_v43  ;;  %vm2648_vm3 = vweird.f32 %v6743_v15 }
 0xd78   : > { %6744 = vrcp.f32 %v2660_v22  ;;  %v2672_v44 = vand.u32 2147483648, %v2660_v22  ;;  %vm2649_vm11 = vmor %vm2647_vm9, %vm2648_vm3  ;;  %v2670_v46 = vand.u32 2147483647, %v2660_v22  ;;  %vm2666_vm15 = vweird.f32 %v2660_v22 }
 0xd79   : > { %v2644_v36 = vsub.f32 1.0, %v2643_v34  ;;  %v2633_v56 = vadd.f32 %v2627_v50, %v2598_v54 }
 0xd7a   : > { %v2673_v51 = vor.u32 1.1754944e-38, %v2672_v44  ;;  %vm2671_vm4 = vcmp.eq.f32.partialorder %v2670_v46, 8.507059e+37 }
 0xd7b   : > { %v2645_v2 = vmul.f32 %v6743_v15, %v2644_v36  ;;  %v2637_v38 = vadd.f32 %v2633_v56, %v7797_v48  ;;  %v3002_v56 = vld [vmem:[%s8870_s7] sm:$0xff]  ;;  %s8796_s7 = smov 120  }
 0xd7d   : > { %v6304_v39 = vmul.f32 -1.442695, %v2637_v38  ;;  %v2646_v41 = vadd.f32 %v6743_v15, %v2645_v2 }
 0xd7e   : > { %v6745_v40 = vpop.eup %6744 }
 0xd7f   : > { %v2662_v60 = vmul.f32 %v6745_v40, %v2660_v22  ;;  %6746 = vpow2.f32 %v6304_v39  ;;  %vm2667_vm14 = vweird.f32 %v6745_v40  ;;  %v2650_v45 = vsel %vm2649_vm11, %v6743_v15, %v2646_v41 }
 0xd80   : > { %6748 = vtanh.f32 %v2636_v58  ;;  %vm2668_vm12 = vmor %vm2666_vm15, %vm2667_vm14  ;;  %v2655_v53 = vsel %vm2652_vm0, %v2654_v3, %v2650_v45 }
 0xd81   : > { %v2663_v35 = vsub.f32 1.0, %v2662_v60 }
 0xd83   : > { %v2664_v0 = vmul.f32 %v6745_v40, %v2663_v35 }
 0xd85   : > { %v6747_v47 = vpop.eup %6746  ;;  %v2665_v7 = vadd.f32 %v6745_v40, %v2664_v0 }
 0xd86   : > { %v2680_v14 = vadd.f32 1.0, %v6747_v47  ;;  %v6749_v63 = vpop.eup %6748 }
 0xd87   : > { %v2669_v59 = vsel %vm2668_vm12, %v6745_v40, %v2665_v7  ;;  %v2698_v5 = vmul.f32 %v6749_v63, %v2655_v53 }
 0xd88   : > { %6750 = vrcp.f32 %v2680_v14  ;;  %v2674_v1 = vsel %vm2671_vm4, %v2673_v51, %v2669_v59  ;;  %v2692_v20 = vand.u32 2147483648, %v2680_v14  ;;  %v2690_v12 = vand.u32 2147483647, %v2680_v14 }
 0xd89   : > { %v2697_v6 = vmul.f32 %v2696_v4, %v2674_v1  ;;  %vm2686_vm9 = vweird.f32 %v2680_v14 }
 0xd8a   : > { %v2693_v29 = vor.u32 1.1754944e-38, %v2692_v20  ;;  %vm2691_vm4 = vcmp.eq.f32.partialorder %v2690_v12, 8.507059e+37 }
 0xd8b   : > { %v2699_v28 = vadd.f32 %v2698_v5, %v2697_v6 }
 0xd8d   : > { %2703 = vst.msk [vmem:[#allocation5] sm:$0xff] %vm1631_vm7, %v2699_v28  ;;  %6752 = vtanh.f32 %v2699_v28 }
 0xd8e   : > { %v6751_v19 = vpop.eup %6750 }
 0xd8f   : > { %v2682_v8 = vmul.f32 %v6751_v19, %v2680_v14  ;;  %vm2687_vm3 = vweird.f32 %v6751_v19 }
 0xd90   : > { %vm2688_vm11 = vmor %vm2686_vm9, %vm2687_vm3 }
 0xd91   : > { %v2683_v9 = vsub.f32 1.0, %v2682_v8 }
 0xd93   : > { %v2684_v10 = vmul.f32 %v6751_v19, %v2683_v9  ;;  %v6753_v15 = vpop.eup %6752 }
 0xd95   : > { %v2685_v13 = vadd.f32 %v6751_v19, %v2684_v10 }
 0xd97   : > { %v2689_v33 = vsel %vm2688_vm11, %v6751_v19, %v2685_v13 }
 0xd98   : > { %v2694_v22 = vsel %vm2691_vm4, %v2693_v29, %v2689_v33 }
 0xd99   : > { %v2701_v27 = vmul.f32 %v6753_v15, %v2694_v22 }
 0xd9b   : > { %2706 = vperm.xlu0 %6637, %v2701_v27   ;;  %2702 = vst.msk [vmem:[#allocation4] sm:$0xff] %vm1631_vm7, %v2701_v27 }
 0xda2   : > { %v2744_v31 = vld [vmem:[#allocation4] sm:$0xff] }
 0xda3   : > { %2760 = vmatpush.msra.mxu0 %v2744_v31 }
 0xda4   : > { %6309 = vmatmul.msk.f32.vlgmr.msra.gmra.mxu0 %vm1635_vm6, %v7733_v16 }
 0xdac   : > { %6310 = vmatmul.msk.f32.gmra.mxu0 %vm1635_vm6, %v7738_v17 }
 0xdb4   : > { %6311 = vmatmul.msk.f32.gmra.mxu0 %vm1635_vm6, %v7743_v18 }
 0xdbc   : > { %6312 = vmatmul.msk.f32.gmra.mxu0 %vm1635_vm6, %v7751_v23 }
 0xe0d   : > { %v2707_v50 = vpop.permute.xlu0 %2706 }
 0xe0e   : > { %v2709_v34 = vmul.f32 %v2707_v50, %v7818_v49 }
 0xe10   : > { %2710 = vst.msk [vmem:[#allocation3] sm:$0xff] %vm1804_vm8, %v2709_v34 }
 0xe17   : > { %v7857_v54 = vld [vmem:[#allocation3] sm:$0xff] }
 0xe18   : > { %v2712_v36 = vsel %vm1949_vm10, %v7857_v54, -inf }
 0xe19   : > { %2713 = vmax.xlane.f32.xlu0 %v2712_v36 }
 0xe21   : > { %v2762_v49 = vpop.f32.mrf.mxu0 }
 0xe29   : > { %v2765_v58 = vpop.f32.mrf.mxu0 }
 0xe2d   : > { %3005 = vperm.xlu0 %6637, %v3002_v56  }
 0xe31   : > { %v2768_v0 = vpop.f32.mrf.mxu0 }
 0xe35   : > { %3077 = vperm.xlu0 %6637, %v3073_v57  }
 0xe39   : > { %v2771_v63 = vpop.f32.mrf.mxu0 }
 0xe8c   : > { %v2714_v2 = vpop.xlane.xlu0 %2713 }
 0xe8d   : > { %2730 = vmatpush.msrb.mxu3 %v2714_v2 }
 0xe8e   : > { %6305 = vmatmul.msk.f32.vlgmr.msrb.gmra.mxu3 %vm1635_vm6, %v7748_v21 }
 0xe96   : > { %6306 = vmatmul.msk.f32.gmra.mxu3 %vm1635_vm6, %v7758_v24 }
 0xe9e   : > { %6307 = vmatmul.msk.f32.gmra.mxu3 %vm1635_vm6, %v7763_v25 }
 0xea6   : > { %6308 = vmatmul.msk.f32.gmra.mxu3 %vm1635_vm6, %v7768_v26 }
 0xf11   : > { %v2732_v38 = vpop.f32.mrf.mxu3 }
 0xf12   : > { %v2733_v39 = vadd.f32 %v2732_v38, %v7773_v30 }
 0xf14   : > { %v2774_v40 = vadd.f32 %v2762_v49, %v2733_v39 }
 0xf16   : > { %v2778_v60 = vadd.f32 %v2774_v40, %v7777_v32 }
 0xf18   : > { %v6313_v41 = vmul.f32 -1.442695, %v2778_v60 }
 0xf19   : > { %v2735_v61 = vpop.f32.mrf.mxu3 }
 0xf1a   : > { %6754 = vpow2.f32 %v6313_v41  ;;  %v2736_v35 = vadd.f32 %v2735_v61, %v7781_v55 }
 0xf1c   : > { %v2775_v62 = vadd.f32 %v2765_v58, %v2736_v35  ;;  %v2840_v58 = vld [vmem:[#allocation5] sm:$0xff] }
 0xf1e   : > { %v2779_v44 = vadd.f32 %v2775_v62, %v7785_v37 }
 0xf20   : > { %v6755_v45 = vpop.eup %6754  ;;  %v6314_v46 = vmul.f32 -1.442695, %v2779_v44 }
 0xf21   : > { %v2785_v3 = vadd.f32 1.0, %v6755_v45  ;;  %v2738_v47 = vpop.f32.mrf.mxu3 }
 0xf22   : > { %6756 = vpow2.f32 %v6314_v46  ;;  %v2739_v14 = vadd.f32 %v2738_v47, %v7789_v42 }
 0xf23   : > { %6758 = vrcp.f32 %v2785_v3  ;;  %v2797_v29 = vand.u32 2147483648, %v2785_v3  ;;  %vm2791_vm15 = vweird.f32 %v2785_v3  ;;  %v2795_v15 = vand.u32 2147483647, %v2785_v3 }
 0xf24   : > { %v2776_v28 = vadd.f32 %v2768_v0, %v2739_v14 }
 0xf25   : > { %v2798_v34 = vor.u32 1.1754944e-38, %v2797_v29  ;;  %vm2796_vm9 = vcmp.eq.f32.partialorder %v2795_v15, 8.507059e+37 }
 0xf26   : > { %v2780_v10 = vadd.f32 %v2776_v28, %v7800_v11 }
 0xf28   : > { %v6757_v7 = vpop.eup %6756 }
 0xf29   : > { %v6759_v51 = vpop.eup %6758  ;;  %v2804_v53 = vadd.f32 1.0, %v6757_v7  ;;  %v2741_v59 = vpop.f32.mrf.mxu3 }
 0xf2a   : > { %v2787_v1 = vmul.f32 %v6759_v51, %v2785_v3  ;;  %v2742_v4 = vadd.f32 %v2741_v59, %v7792_v43  ;;  %vm2792_vm14 = vweird.f32 %v6759_v51 }
 0xf2b   : > { %6760 = vrcp.f32 %v2804_v53  ;;  %v2816_v22 = vand.u32 2147483648, %v2804_v53  ;;  %vm2793_vm0 = vmor %vm2791_vm15, %vm2792_vm14  ;;  %v2814_v50 = vand.u32 2147483647, %v2804_v53  ;;  %vm2810_vm3 = vweird.f32 %v2804_v53 }
 0xf2c   : > { %v2788_v5 = vsub.f32 1.0, %v2787_v1  ;;  %v2777_v6 = vadd.f32 %v2771_v63, %v2742_v4 }
 0xf2d   : > { %v2817_v57 = vor.u32 1.1754944e-38, %v2816_v22  ;;  %vm2815_vm4 = vcmp.eq.f32.partialorder %v2814_v50, 8.507059e+37 }
 0xf2e   : > { %v2789_v19 = vmul.f32 %v6759_v51, %v2788_v5  ;;  %v2781_v8 = vadd.f32 %v2777_v6, %v7797_v48 }
 0xf30   : > { %v6315_v9 = vmul.f32 -1.442695, %v2781_v8  ;;  %v2790_v13 = vadd.f32 %v6759_v51, %v2789_v19 }
 0xf31   : > { %v6761_v20 = vpop.eup %6760 }
 0xf32   : > { %v2806_v12 = vmul.f32 %v6761_v20, %v2804_v53  ;;  %6762 = vpow2.f32 %v6315_v9  ;;  %vm2811_vm12 = vweird.f32 %v6761_v20  ;;  %v2794_v31 = vsel %vm2793_vm0, %v6759_v51, %v2790_v13 }
 0xf33   : > { %6764 = vtanh.f32 %v2780_v10  ;;  %vm2812_vm11 = vmor %vm2810_vm3, %vm2811_vm12  ;;  %v2799_v2 = vsel %vm2796_vm9, %v2798_v34, %v2794_v31 }
 0xf34   : > { %v2807_v33 = vsub.f32 1.0, %v2806_v12 }
 0xf36   : > { %v2808_v27 = vmul.f32 %v6761_v20, %v2807_v33 }
 0xf38   : > { %v6763_v36 = vpop.eup %6762  ;;  %v2809_v56 = vadd.f32 %v6761_v20, %v2808_v27 }
 0xf39   : > { %v2824_v49 = vadd.f32 1.0, %v6763_v36  ;;  %v6765_v39 = vpop.eup %6764 }
 0xf3a   : > { %v2813_v38 = vsel %vm2812_vm11, %v6761_v20, %v2809_v56  ;;  %v2842_v60 = vmul.f32 %v6765_v39, %v2799_v2 }
 0xf3b   : > { %6766 = vrcp.f32 %v2824_v49  ;;  %v2818_v40 = vsel %vm2815_vm4, %v2817_v57, %v2813_v38  ;;  %v2836_v0 = vand.u32 2147483648, %v2824_v49  ;;  %v2834_v46 = vand.u32 2147483647, %v2824_v49 }
 0xf3c   : > { %v2841_v41 = vmul.f32 %v2840_v58, %v2818_v40  ;;  %vm2830_vm15 = vweird.f32 %v2824_v49 }
 0xf3d   : > { %v2837_v47 = vor.u32 1.1754944e-38, %v2836_v0  ;;  %vm2835_vm12 = vcmp.eq.f32.partialorder %v2834_v46, 8.507059e+37 }
 0xf3e   : > { %v2843_v61 = vadd.f32 %v2842_v60, %v2841_v41 }
 0xf40   : > { %2847 = vst.msk [vmem:[#allocation5] sm:$0xff] %vm1631_vm7, %v2843_v61  ;;  %6768 = vtanh.f32 %v2843_v61 }
 0xf41   : > { %v6767_v35 = vpop.eup %6766 }
 0xf42   : > { %v2826_v62 = vmul.f32 %v6767_v35, %v2824_v49  ;;  %vm2831_vm14 = vweird.f32 %v6767_v35 }
 0xf43   : > { %vm2832_vm0 = vmor %vm2830_vm15, %vm2831_vm14 }
 0xf44   : > { %v2827_v44 = vsub.f32 1.0, %v2826_v62 }
 0xf46   : > { %v2828_v45 = vmul.f32 %v6767_v35, %v2827_v44  ;;  %v6769_v51 = vpop.eup %6768 }
 0xf48   : > { %v2829_v3 = vadd.f32 %v6767_v35, %v2828_v45 }
 0xf4a   : > { %v2833_v7 = vsel %vm2832_vm0, %v6767_v35, %v2829_v3  ;;  %v2984_v3 = vld [vmem:[#allocation5] sm:$0xff] }
 0xf4b   : > { %v2838_v53 = vsel %vm2835_vm12, %v2837_v47, %v2833_v7 }
 0xf4c   : > { %v2845_v14 = vmul.f32 %v6769_v51, %v2838_v53 }
 0xf4e   : > { %2850 = vperm.xlu1 %6638, %v2845_v14   ;;  %2846 = vst.msk [vmem:[#allocation4] sm:$0xff] %vm1631_vm7, %v2845_v14 }
 0xf55   : > { %v2888_v59 = vld [vmem:[#allocation4] sm:$0xff] }
 0xf56   : > { %2904 = vmatpush.msra.mxu2 %v2888_v59 }
 0xf57   : > { %6320 = vmatmul.msk.f32.vlgmr.msra.gmra.mxu2 %vm1635_vm6, %v7733_v16 }
 0xf5f   : > { %6321 = vmatmul.msk.f32.gmra.mxu2 %vm1635_vm6, %v7738_v17 }
 0xf67   : > { %6322 = vmatmul.msk.f32.gmra.mxu2 %vm1635_vm6, %v7743_v18 }
 0xf6f   : > { %6323 = vmatmul.msk.f32.gmra.mxu2 %vm1635_vm6, %v7751_v23 }
 0xfc0   : > { %v2851_v63 = vpop.permute.xlu1 %2850 }
 0xfc1   : > { %v2853_v1 = vmul.f32 %v2851_v63, %v7857_v54 }
 0xfc3   : > { %2854 = vst.msk [vmem:[#allocation3] sm:$0xff] %vm1949_vm10, %v2853_v1 }
 0xfca   : > { %v7891_v4 = vld [vmem:[#allocation3] sm:$0xff] }
 0xfcb   : > { %v2856_v5 = vsel %vm2094_vm13, %v7891_v4, -inf }
 0xfcc   : > { %2857 = vmax.xlane.f32.xlu2 %v2856_v5 }
 0xfda   : > { %v2906_v17 = vpop.f32.mrf.mxu2 }
 0xfe2   : > { %v2909_v6 = vpop.f32.mrf.mxu2 }
0x103f   : > { %v2858_v16 = vpop.xlane.xlu2 %2857 }
0x1040   : > { %2874 = vmatpush.msra.mxu1 %v2858_v16 }
0x1041   : > { %6316 = vmatmul.msk.f32.vlgmr.msra.gmra.mxu1 %vm1635_vm6, %v7748_v21 }
0x1049   : > { %6317 = vmatmul.msk.f32.gmra.mxu1 %vm1635_vm6, %v7758_v24  ;;  %v6641_v24 = vld [vmem:[%s8862_s4] ss:$0 sm:$0xff] }
0x104a   : > { %3036 = vrot.lane.b32.xlu0 %v6641_v24, %s8796_s7  ;;  %s8873_s7 = sld [smem:[#allocation17_spill]] }
0x1051   : > { %6318 = vmatmul.msk.f32.gmra.mxu1 %vm1635_vm6, %v7763_v25 }
0x1059   : > { %6319 = vmatmul.msk.f32.gmra.mxu1 %vm1635_vm6, %v7768_v26  ;;  %v2912_v26 = vpop.f32.mrf.mxu2 }
0x1061   : > { %v2915_v15 = vpop.f32.mrf.mxu2 }
0x10be   : > { %v2876_v18 = vpop.f32.mrf.mxu1 }
0x10bf   : > { %v2877_v23 = vadd.f32 %v2876_v18, %v7773_v30 }
0x10c1   : > { %v2918_v54 = vadd.f32 %v2906_v17, %v2877_v23 }
0x10c3   : > { %v2922_v28 = vadd.f32 %v2918_v54, %v7777_v32 }
0x10c5   : > { %v6324_v19 = vmul.f32 -1.442695, %v2922_v28  ;;  %v3074_v28 = vld [vmem:[%s8871_s2 + $0x8] sm:$0xff]  ;;  %s8875_s2 = smov 124  }
0x10c6   : > { %v2879_v8 = vpop.f32.mrf.mxu1 }
0x10c7   : > { %6770 = vpow2.f32 %v6324_v19  ;;  %v2880_v21 = vadd.f32 %v2879_v8, %v7781_v55  ;;  %v3006_v19 = vpop.permute.xlu0 %3005 }
0x10c9   : > { %v2919_v9 = vadd.f32 %v2909_v6, %v2880_v21 }
0x10cb   : > { %v2923_v25 = vadd.f32 %v2919_v9, %v7785_v37 }
0x10cd   : > { %v6771_v20 = vpop.eup %6770  ;;  %v6325_v10 = vmul.f32 -1.442695, %v2923_v25  ;;  %v3001_v25 = vld [vmem:[%s8872_s15] sm:$0xff]  ;;  %s8874_s15 = smov 120  }
0x10ce   : > { %v2929_v30 = vadd.f32 1.0, %v6771_v20  ;;  %v2882_v12 = vpop.f32.mrf.mxu1 }
0x10cf   : > { %6772 = vpow2.f32 %v6325_v10  ;;  %v2883_v33 = vadd.f32 %v2882_v12, %v7789_v42  ;;  %v3078_v21 = vpop.permute.xlu0 %3077  ;;  %v3060_v10 = vld [vmem:[%s7825_s12] sm:$0x1] }
0x10d0   : > { %6774 = vrcp.f32 %v2929_v30  ;;  %v2941_v42 = vand.u32 2147483648, %v2929_v30  ;;  %vm2935_vm9 = vweird.f32 %v2929_v30  ;;  %v2939_v40 = vand.u32 2147483647, %v2929_v30 }
0x10d1   : > { %v2920_v50 = vadd.f32 %v2912_v26, %v2883_v33 }
0x10d2   : > { %vm2940_vm15 = vcmp.eq.f32.partialorder %v2939_v40, 8.507059e+37 }
0x10d3   : > { %v2924_v2 = vadd.f32 %v2920_v50, %v7800_v11 }
0x10d5   : > { %v6773_v32 = vpop.eup %6772 }
0x10d6   : > { %v6775_v13 = vpop.eup %6774  ;;  %v2948_v29 = vadd.f32 1.0, %v6773_v32  ;;  %v2885_v55 = vpop.f32.mrf.mxu1  ;;  %v7066_v32 = vld [vmem:[#allocation2] sm:$0xff] }
0x10d7   : > { %v2931_v22 = vmul.f32 %v6775_v13, %v2929_v30  ;;  %v2886_v27 = vadd.f32 %v2885_v55, %v7792_v43  ;;  %vm2936_vm3 = vweird.f32 %v6775_v13  ;;  %v3037_v9 = vpop.permute.xlu0 %3036 }
0x10d8   : > { %6776 = vrcp.f32 %v2948_v29  ;;  %v2960_v43 = vand.u32 2147483648, %v2948_v29  ;;  %vm2937_vm11 = vmor %vm2935_vm9, %vm2936_vm3  ;;  %v2958_v41 = vand.u32 2147483647, %v2948_v29  ;;  %vm2954_vm14 = vweird.f32 %v2948_v29 }
0x10d9   : > { %v2932_v31 = vsub.f32 1.0, %v2931_v22  ;;  %v2921_v37 = vadd.f32 %v2915_v15, %v2886_v27  ;;  %v3071_v15 = vld [vmem:[%s8873_s7] sm:$0xff]  ;;  %v3072_v22 = vld [vmem:[%s8873_s7 + $0x8] sm:$0xff]  ;;  %s8879_s7 = sld [smem:[#allocation22_spill]] }
0x10da   : > { %v2961_v35 = vor.u32 1.1754944e-38, %v2960_v43  ;;  %vm2959_vm12 = vcmp.eq.f32.partialorder %v2958_v41, 8.507059e+37 }
0x10db   : > { %v2933_v34 = vmul.f32 %v6775_v13, %v2932_v31  ;;  %v2925_v36 = vadd.f32 %v2921_v37, %v7797_v48  ;;  %v2942_v48 = vor.u32 1.1754944e-38, %v2941_v42 }
0x10dd   : > { %v6326_v56 = vmul.f32 -1.442695, %v2925_v36  ;;  %v2934_v38 = vadd.f32 %v6775_v13, %v2933_v34 }
0x10de   : > { %v6777_v57 = vpop.eup %6776 }
0x10df   : > { %v2950_v49 = vmul.f32 %v6777_v57, %v2948_v29  ;;  %6778 = vpow2.f32 %v6326_v56  ;;  %vm2955_vm4 = vweird.f32 %v6777_v57  ;;  %v2938_v60 = vsel %vm2937_vm11, %v6775_v13, %v2934_v38 }
0x10e0   : > { %6780 = vtanh.f32 %v2924_v2  ;;  %vm2956_vm0 = vmor %vm2954_vm14, %vm2955_vm4  ;;  %v2943_v62 = vsel %vm2940_vm15, %v2942_v48, %v2938_v60 }
0x10e1   : > { %v2951_v39 = vsub.f32 1.0, %v2950_v49 }
0x10e3   : > { %v2952_v58 = vmul.f32 %v6777_v57, %v2951_v39 }
0x10e5   : > { %v6779_v61 = vpop.eup %6778  ;;  %v2953_v11 = vadd.f32 %v6777_v57, %v2952_v58 }
0x10e6   : > { %v2968_v44 = vadd.f32 1.0, %v6779_v61  ;;  %v6781_v45 = vpop.eup %6780 }
0x10e7   : > { %v2957_v0 = vsel %vm2956_vm0, %v6777_v57, %v2953_v11  ;;  %v2986_v47 = vmul.f32 %v6781_v45, %v2943_v62  ;;  %v7948_v45 = vld [vmem:[%s8876_s3] sm:$0xff] }
0x10e8   : > { %6782 = vrcp.f32 %v2968_v44  ;;  %v2962_v46 = vsel %vm2959_vm12, %v2961_v35, %v2957_v0  ;;  %v2980_v63 = vand.u32 2147483648, %v2968_v44  ;;  %v2978_v5 = vand.u32 2147483647, %v2968_v44 }
0x10e9   : > { %v2985_v7 = vmul.f32 %v2984_v3, %v2962_v46  ;;  %vm2974_vm9 = vweird.f32 %v2968_v44  ;;  %v7953_v46 = vld [vmem:[%s8876_s3 + $0x8] sm:$0xff]  ;;  %v7958_v3 = vld [vmem:[%s8876_s3 + $0x10] sm:$0xff] }
0x10ea   : > { %v2981_v17 = vor.u32 1.1754944e-38, %v2980_v63  ;;  %vm2979_vm4 = vcmp.eq.f32.partialorder %v2978_v5, 8.507059e+37 }
0x10eb   : > { %v2987_v51 = vadd.f32 %v2986_v47, %v2985_v7  ;;  %v7963_v47 = vld [vmem:[%s8877_s6] sm:$0xff] }
0x10ed   : > { %2991 = vst.msk [vmem:[#allocation5] sm:$0xff] %vm1631_vm7, %v2987_v51  ;;  %6784 = vtanh.f32 %v2987_v51  ;;  %v7966_v51 = vld [vmem:[%s8876_s3 + $0x18] sm:$0xff]  ;;  %s8880_s3 = sld [smem:[#allocation24_spill]] }
0x10ee   : > { %v6783_v53 = vpop.eup %6782  ;;  %3158 = vst.msk [vmem:[#allocation5] sm:$0xff] %vm1631_vm7, %v7191_v52 }
0x10ef   : > { %v2970_v14 = vmul.f32 %v6783_v53, %v2968_v44  ;;  %vm2975_vm3 = vweird.f32 %v6783_v53 }
0x10f0   : > { %vm2976_vm11 = vmor %vm2974_vm9, %vm2975_vm3 }
0x10f1   : > { %v2971_v59 = vsub.f32 1.0, %v2970_v14  ;;  %v7978_v14 = vld [vmem:[%s8877_s6 + $0x10] sm:$0xff] }
0x10f3   : > { %v2972_v1 = vmul.f32 %v6783_v53, %v2971_v59  ;;  %v6785_v23 = vpop.eup %6784  ;;  %v7983_v59 = vld [vmem:[%s8877_s6 + $0x18] sm:$0xff] }
0x10f5   : > { %v2973_v16 = vadd.f32 %v6783_v53, %v2972_v1 }
0x10f7   : > { %v2977_v18 = vsel %vm2976_vm11, %v6783_v53, %v2973_v16  ;;  %v7973_v53 = vld [vmem:[%s8877_s6 + $0x8] sm:$0xff]  ;;  %s8883_s6 = sld [smem:[#allocation25_spill]] }
0x10f8   : > { %v2982_v54 = vsel %vm2979_vm4, %v2981_v17, %v2977_v18  ;;  %v7992_v17 = vld [vmem:[%s8879_s7] sm:$0xff] }
0x10f9   : > { %v2989_v6 = vmul.f32 %v6785_v23, %v2982_v54 }
0x10fb   : > { %2994 = vperm.xlu2 %6636, %v2989_v6   ;;  %2990 = vst.msk [vmem:[#allocation4] sm:$0xff] %vm1631_vm7, %v2989_v6 }
0x10fc   : > { %3157 = vst.msk [vmem:[#allocation4] sm:$0xff] %vm1631_vm7, %v7191_v52 }
0x1103   : > { %3082 = vperm.xlu2 %6636, %v3074_v28   ;;  %v3204_v0 = vld [vmem:[#allocation4] sm:$0xff] }
0x1155   : > { %v2995_v8 = vpop.permute.xlu2 %2994 }
0x1156   : > { %v2997_v24 = vmul.f32 %v2995_v8, %v7891_v4 }
0x1158   : > { %2998 = vst.msk [vmem:[#allocation3] sm:$0xff] %vm2094_vm13, %v2997_v24 }
0x115d   : > { %v3083_v31 = vpop.permute.xlu2 %3082 }
0x115f   : > { %v2999_v26 = vld [vmem:[#allocation3] sm:$0xff] }
0x1160   : > { %3026 = vmatpush.msra.mxu3 %v2999_v26  ;;  %3055 = vmatpush.msrb.mxu0 %v2999_v26 }
0x1161   : > { %6327 = vmatmul.msk.f32.vlgmr.msra.gmra.mxu3 %vm1635_vm6, %v3001_v25  ;;  %6328 = vmatmul.msk.f32.vlgmr.msrb.gmra.mxu0 %vm1635_vm6, %v3037_v9 }
0x1162   : > { %3232 = vmatpush.msra.mxu0 %v3204_v0 }
0x1169   : > { %6336 = vmatmul.msk.f32.vlgmr.msra.gmra.mxu0 %vm1635_vm6, %v7948_v45 }
0x1171   : > { %6337 = vmatmul.msk.f32.gmra.mxu0 %vm1635_vm6, %v7953_v46 }
0x1179   : > { %6338 = vmatmul.msk.f32.gmra.mxu0 %vm1635_vm6, %v7958_v3 }
0x1181   : > { %6339 = vmatmul.msk.f32.gmra.mxu0 %vm1635_vm6, %v7966_v51 }
0x11de   : > { %v3057_v20 = vpop.f32.mrf.mxu0 }
0x11df   : > { %v3061_v30 = vadd.f32 %v3060_v10, %v3057_v20 }
0x11e1   : > { %3062 = vst.msk [vmem:[%s7825_s12] sm:$0x1] %vm2299_vm2, %v3061_v30 }
0x11e4   : > { %v3028_v12 = vpop.f32.mrf.mxu3 }
0x11e5   : > { %v3029_v4 = vadd.f32 %v3028_v12, %v3006_v19 }
0x11e6   : > { %v3234_v63 = vpop.f32.mrf.mxu0 }
0x11e7   : > { %v3031_v13 = vadd.f32 %v7066_v32, %v3029_v4 }
0x11e9   : > { %3032 = vst.msk [vmem:[#allocation2] sm:$0xff] %vm1613_vm5, %v3031_v13 }
0x11ee   : > { %v3237_v23 = vpop.f32.mrf.mxu0 }
0x11f0   : > { %v7929_v29 = vld [vmem:[#allocation2] sm:$0xff] }
0x11f1   : > { %3068 = vrot.lane.b32.xlu1 %v7929_v29, %s8874_s15 }
0x11f6   : > { %v3240_v25 = vpop.f32.mrf.mxu0 }
0x11f9   : > { %3065 = vrot.lane.b32.xlu1 %v7929_v29, %s8875_s2 }
0x1263   : > { %v3069_v33 = vpop.permute.xlu1 %3068 }
0x1264   : > { %3104 = vmatpush.msrb.mxu1 %v3069_v33 }
0x126b   : > { %v3066_v55 = vpop.permute.xlu1 %3065 }
0x126c   : > { %3105 = vmatpush.msrb.mxu1 %v3066_v55 }
0x126e   : > { %3106 = vmatpush.msrb.mxu1 %v7929_v29 }
0x126f   : > { %6329 = vmatmul.msk.f32.vlgmr.msrb.gmra.mxu1 %vm2323_vm1, %v3071_v15 }
0x1277   : > { %6330 = vmatmul.msk.f32.gmra.mxu1 %vm2323_vm1, %v3072_v22  ;;  %v3243_v22 = vpop.f32.mrf.mxu0 }
0x12ec   : > { %v3108_v27 = vpop.f32.mrf.mxu1 }
0x12ed   : > { %v3109_v2 = vadd.f32 %v3108_v27, %v3078_v21  ;;  %v8000_v21 = vld [vmem:[%s8879_s7 + $0x8] sm:$0xff] }
0x12f4   : > { %v3111_v37 = vpop.f32.mrf.mxu1 }
0x12f5   : > { %v3112_v50 = vadd.f32 %v3111_v37, %v3083_v31  ;;  %v8012_v37 = vld [vmem:[%s8879_s7 + $0x18] sm:$0xff] }
0x12f7   : > { %v6331_v34 = vmul.f32 -1.442695, %v3112_v50 }
0x12f9   : > { %6786 = vpow2.f32 %v6331_v34 }
0x12ff   : > { %v6787_v36 = vpop.eup %6786 }
0x1300   : > { %v3118_v56 = vadd.f32 1.0, %v6787_v36 }
0x1302   : > { %6788 = vrcp.f32 %v3118_v56  ;;  %v3130_v42 = vand.u32 2147483648, %v3118_v56  ;;  %v3128_v40 = vand.u32 2147483647, %v3118_v56  ;;  %vm3124_vm15 = vweird.f32 %v3118_v56 }
0x1303   : > { %6790 = vtanh.f32 %v3109_v2 }
0x1304   : > { %v3131_v58 = vor.u32 1.1754944e-38, %v3130_v42  ;;  %vm3129_vm12 = vcmp.eq.f32.partialorder %v3128_v40, 8.507059e+37 }
0x1308   : > { %v6789_v57 = vpop.eup %6788 }
0x1309   : > { %v3120_v49 = vmul.f32 %v6789_v57, %v3118_v56  ;;  %vm3125_vm14 = vweird.f32 %v6789_v57  ;;  %v6791_v41 = vpop.eup %6790  ;;  %v8015_v56 = vld [vmem:[%s8879_s7 + $0x10] sm:$0xff]  ;;  %s8884_s7 = smov 126  }
0x130a   : > { %vm3126_vm0 = vmor %vm3124_vm15, %vm3125_vm14 }
0x130b   : > { %v3121_v38 = vsub.f32 1.0, %v3120_v49 }
0x130d   : > { %v3122_v39 = vmul.f32 %v6789_v57, %v3121_v38 }
0x130f   : > { %v3123_v43 = vadd.f32 %v6789_v57, %v3122_v39 }
0x1311   : > { %v3127_v60 = vsel %vm3126_vm0, %v6789_v57, %v3123_v43 }
0x1312   : > { %v3132_v48 = vsel %vm3129_vm12, %v3131_v58, %v3127_v60 }
0x1313   : > { %v3134_v61 = vmul.f32 %v6791_v41, %v3132_v48 }
0x1315   : > { %3136 = vrot.lane.b32.xlu1 %v3134_v61, %s8800_s5  ;;  %s8878_s5 = sld [smem:[#allocation21_spill]] }
0x131b   : > { %v7988_v1 = vld [vmem:[%s8878_s5] sm:$0xff]  ;;  %v7996_v6 = vld [vmem:[%s8878_s5 + $0x8] sm:$0xff]  ;;  %v8004_v12 = vld [vmem:[%s8878_s5 + $0x10] sm:$0xff] }
0x131c   : > { %v8007_v4 = vld [vmem:[%s8878_s5 + $0x18] sm:$0xff]  ;;  %s8882_s5 = sld [smem:[#allocation23_spill]] }
0x1387   : > { %v3137_v11 = vpop.permute.xlu1 %3136 }
0x1388   : > { %v3139_v35 = vsel %vm1635_vm6, 0.0, %v3137_v11 }
0x1389   : > { %3140 = vst.msk [vmem:[#allocation3] sm:$0xff] %vm1613_vm5, %v3139_v35 }
0x1390   : > { %v7943_v62 = vld [vmem:[#allocation3] sm:$0xff] }
0x1391   : > { %v3160_v44 = vsel %vm1635_vm6, %v7943_v62, -inf }
0x1392   : > { %3161 = vmax.xlane.f32.xlu2 %v3160_v44 }
0x1405   : > { %v3162_v7 = vpop.xlane.xlu2 %3161 }
0x1406   : > { %3190 = vmatpush.msrb.mxu3 %v3162_v7 }
0x1407   : > { %6332 = vmatmul.msk.f32.vlgmr.msrb.gmra.mxu3 %vm1635_vm6, %v7963_v47 }
0x140f   : > { %6333 = vmatmul.msk.f32.gmra.mxu3 %vm1635_vm6, %v7973_v53 }
0x1417   : > { %6334 = vmatmul.msk.f32.gmra.mxu3 %vm1635_vm6, %v7978_v14 }
0x141f   : > { %6335 = vmatmul.msk.f32.gmra.mxu3 %vm1635_vm6, %v7983_v59 }
0x148a   : > { %v3192_v5 = vpop.f32.mrf.mxu3 }
0x148b   : > { %v3193_v16 = vadd.f32 %v3192_v5, %v7988_v1 }
0x148d   : > { %v3246_v18 = vadd.f32 %v3234_v63, %v3193_v16  ;;  %v3312_v16 = vld [vmem:[#allocation5] sm:$0xff] }
0x148f   : > { %v3250_v54 = vadd.f32 %v3246_v18, %v7992_v17 }
0x1491   : > { %v6340_v28 = vmul.f32 -1.442695, %v3250_v54 }
0x1492   : > { %v3195_v19 = vpop.f32.mrf.mxu3 }
0x1493   : > { %6792 = vpow2.f32 %v6340_v28  ;;  %v3196_v8 = vadd.f32 %v3195_v19, %v7996_v6 }
0x1495   : > { %v3247_v24 = vadd.f32 %v3237_v23, %v3196_v8 }
0x1497   : > { %v3251_v9 = vadd.f32 %v3247_v24, %v8000_v21 }
0x1499   : > { %v6793_v26 = vpop.eup %6792  ;;  %v6341_v20 = vmul.f32 -1.442695, %v3251_v9 }
0x149a   : > { %v3257_v10 = vadd.f32 1.0, %v6793_v26  ;;  %v3198_v30 = vpop.f32.mrf.mxu3 }
0x149b   : > { %6794 = vpow2.f32 %v6341_v20  ;;  %v3199_v55 = vadd.f32 %v3198_v30, %v8004_v12 }
0x149c   : > { %6796 = vrcp.f32 %v3257_v10  ;;  %v3269_v43 = vand.u32 2147483648, %v3257_v10  ;;  %vm3263_vm9 = vweird.f32 %v3257_v10  ;;  %v3267_v60 = vand.u32 2147483647, %v3257_v10 }
0x149d   : > { %v3248_v36 = vadd.f32 %v3240_v25, %v3199_v55 }
0x149e   : > { %v3270_v35 = vor.u32 1.1754944e-38, %v3269_v43  ;;  %vm3268_vm15 = vcmp.eq.f32.partialorder %v3267_v60, 8.507059e+37 }
0x149f   : > { %v3252_v42 = vadd.f32 %v3248_v36, %v8015_v56 }
0x14a1   : > { %v6795_v32 = vpop.eup %6794 }
0x14a2   : > { %v6797_v13 = vpop.eup %6796  ;;  %v3276_v33 = vadd.f32 1.0, %v6795_v32  ;;  %v3201_v15 = vpop.f32.mrf.mxu3 }
0x14a3   : > { %v3259_v27 = vmul.f32 %v6797_v13, %v3257_v10  ;;  %v3202_v31 = vadd.f32 %v3201_v15, %v8007_v4  ;;  %vm3264_vm3 = vweird.f32 %v6797_v13 }
0x14a4   : > { %6798 = vrcp.f32 %v3276_v33  ;;  %v3288_v41 = vand.u32 2147483648, %v3276_v33  ;;  %vm3265_vm11 = vmor %vm3263_vm9, %vm3264_vm3  ;;  %v3286_v11 = vand.u32 2147483647, %v3276_v33  ;;  %vm3282_vm14 = vweird.f32 %v3276_v33 }
0x14a5   : > { %v3260_v50 = vsub.f32 1.0, %v3259_v27  ;;  %v3249_v34 = vadd.f32 %v3243_v22, %v3202_v31 }
0x14a6   : > { %v3289_v7 = vor.u32 1.1754944e-38, %v3288_v41  ;;  %vm3287_vm12 = vcmp.eq.f32.partialorder %v3286_v11, 8.507059e+37 }
0x14a7   : > { %v3261_v57 = vmul.f32 %v6797_v13, %v3260_v50  ;;  %v3253_v2 = vadd.f32 %v3249_v34, %v8012_v37 }
0x14a9   : > { %v6342_v49 = vmul.f32 -1.442695, %v3253_v2  ;;  %v3262_v40 = vadd.f32 %v6797_v13, %v3261_v57 }
0x14aa   : > { %v6799_v38 = vpop.eup %6798 }
0x14ab   : > { %v3278_v39 = vmul.f32 %v6799_v38, %v3276_v33  ;;  %6800 = vpow2.f32 %v6342_v49  ;;  %vm3283_vm4 = vweird.f32 %v6799_v38  ;;  %v3266_v61 = vsel %vm3265_vm11, %v6797_v13, %v3262_v40 }
0x14ac   : > { %6802 = vtanh.f32 %v3252_v42  ;;  %vm3284_vm0 = vmor %vm3282_vm14, %vm3283_vm4  ;;  %v3271_v63 = vsel %vm3268_vm15, %v3270_v35, %v3266_v61 }
0x14ad   : > { %v3279_v58 = vsub.f32 1.0, %v3278_v39 }
0x14af   : > { %v3280_v48 = vmul.f32 %v6799_v38, %v3279_v58 }
0x14b1   : > { %v6801_v44 = vpop.eup %6800  ;;  %v3281_v0 = vadd.f32 %v6799_v38, %v3280_v48 }
0x14b2   : > { %v3296_v5 = vadd.f32 1.0, %v6801_v44  ;;  %v6803_v23 = vpop.eup %6802 }
0x14b3   : > { %v3285_v18 = vsel %vm3284_vm0, %v6799_v38, %v3281_v0  ;;  %v3314_v28 = vmul.f32 %v6803_v23, %v3271_v63 }
0x14b4   : > { %6804 = vrcp.f32 %v3296_v5  ;;  %v3290_v54 = vsel %vm3287_vm12, %v3289_v7, %v3285_v18  ;;  %v3308_v26 = vand.u32 2147483648, %v3296_v5  ;;  %v3306_v10 = vand.u32 2147483647, %v3296_v5 }
0x14b5   : > { %v3313_v19 = vmul.f32 %v3312_v16, %v3290_v54  ;;  %vm3302_vm9 = vweird.f32 %v3296_v5 }
0x14b6   : > { %v3309_v32 = vor.u32 1.1754944e-38, %v3308_v26  ;;  %vm3307_vm4 = vcmp.eq.f32.partialorder %v3306_v10, 8.507059e+37 }
0x14b7   : > { %v3315_v8 = vadd.f32 %v3314_v28, %v3313_v19 }
0x14b9   : > { %3319 = vst.msk [vmem:[#allocation5] sm:$0xff] %vm1631_vm7, %v3315_v8  ;;  %6806 = vtanh.f32 %v3315_v8 }
0x14ba   : > { %v6805_v24 = vpop.eup %6804 }
0x14bb   : > { %v3298_v9 = vmul.f32 %v6805_v24, %v3296_v5  ;;  %vm3303_vm3 = vweird.f32 %v6805_v24 }
0x14bc   : > { %vm3304_vm11 = vmor %vm3302_vm9, %vm3303_vm3 }
0x14bd   : > { %v3299_v25 = vsub.f32 1.0, %v3298_v9 }
0x14bf   : > { %v3300_v20 = vmul.f32 %v6805_v24, %v3299_v25  ;;  %v6807_v33 = vpop.eup %6806 }
0x14c1   : > { %v3301_v30 = vadd.f32 %v6805_v24, %v3300_v20 }
0x14c3   : > { %v3305_v13 = vsel %vm3304_vm11, %v6805_v24, %v3301_v30 }
0x14c4   : > { %v3310_v55 = vsel %vm3307_vm4, %v3309_v32, %v3305_v13 }
0x14c5   : > { %v3317_v15 = vmul.f32 %v6807_v33, %v3310_v55 }
0x14c7   : > { %3322 = vperm.xlu1 %6638, %v3317_v15   ;;  %3318 = vst.msk [vmem:[#allocation4] sm:$0xff] %vm1631_vm7, %v3317_v15 }
0x14ce   : > { %v3360_v22 = vld [vmem:[#allocation4] sm:$0xff] }
0x14cf   : > { %3376 = vmatpush.msra.mxu1 %v3360_v22 }
0x14d0   : > { %6347 = vmatmul.msk.f32.vlgmr.msra.gmra.mxu1 %vm1635_vm6, %v7948_v45 }
0x14d8   : > { %6348 = vmatmul.msk.f32.gmra.mxu1 %vm1635_vm6, %v7953_v46 }
0x14e0   : > { %6349 = vmatmul.msk.f32.gmra.mxu1 %vm1635_vm6, %v7958_v3 }
0x14e8   : > { %6350 = vmatmul.msk.f32.gmra.mxu1 %vm1635_vm6, %v7966_v51 }
0x1539   : > { %v3323_v27 = vpop.permute.xlu1 %3322 }
0x153a   : > { %v3325_v31 = vmul.f32 %v3323_v27, %v7943_v62 }
0x153c   : > { %3326 = vst.msk [vmem:[#allocation3] sm:$0xff] %vm1635_vm6, %v3325_v31 }
0x1543   : > { %v8031_v50 = vld [vmem:[#allocation3] sm:$0xff] }
0x1544   : > { %v3328_v34 = vsel %vm1804_vm8, %v8031_v50, -inf }
0x1545   : > { %3329 = vmax.xlane.f32.xlu0 %v3328_v34 }
0x154d   : > { %v3378_v62 = vpop.f32.mrf.mxu1 }
0x1555   : > { %v3381_v38 = vpop.f32.mrf.mxu1 }
0x155d   : > { %v3384_v41 = vpop.f32.mrf.mxu1 }
0x1565   : > { %v3387_v16 = vpop.f32.mrf.mxu1 }
0x15b8   : > { %v3330_v36 = vpop.xlane.xlu0 %3329 }
0x15b9   : > { %3346 = vmatpush.msrb.mxu2 %v3330_v36 }
0x15ba   : > { %6343 = vmatmul.msk.f32.vlgmr.msrb.gmra.mxu2 %vm1635_vm6, %v7963_v47 }
0x15c2   : > { %6344 = vmatmul.msk.f32.gmra.mxu2 %vm1635_vm6, %v7973_v53 }
0x15ca   : > { %6345 = vmatmul.msk.f32.gmra.mxu2 %vm1635_vm6, %v7978_v14 }
0x15d2   : > { %6346 = vmatmul.msk.f32.gmra.mxu2 %vm1635_vm6, %v7983_v59 }
0x163d   : > { %v3348_v57 = vpop.f32.mrf.mxu2 }
0x163e   : > { %v3349_v2 = vadd.f32 %v3348_v57, %v7988_v1 }
0x1640   : > { %v3390_v49 = vadd.f32 %v3378_v62, %v3349_v2 }
0x1642   : > { %v3394_v42 = vadd.f32 %v3390_v49, %v7992_v17 }
0x1644   : > { %v6351_v39 = vmul.f32 -1.442695, %v3394_v42  ;;  %v3456_v42 = vld [vmem:[#allocation5] sm:$0xff] }
0x1645   : > { %v3351_v40 = vpop.f32.mrf.mxu2 }
0x1646   : > { %6808 = vpow2.f32 %v6351_v39  ;;  %v3352_v43 = vadd.f32 %v3351_v40, %v7996_v6 }
0x1648   : > { %v3391_v58 = vadd.f32 %v3381_v38, %v3352_v43 }
0x164a   : > { %v3395_v60 = vadd.f32 %v3391_v58, %v8000_v21 }
0x164c   : > { %v6809_v48 = vpop.eup %6808  ;;  %v6352_v61 = vmul.f32 -1.442695, %v3395_v60 }
0x164d   : > { %v3401_v11 = vadd.f32 1.0, %v6809_v48  ;;  %v3354_v35 = vpop.f32.mrf.mxu2 }
0x164e   : > { %6810 = vpow2.f32 %v6352_v61  ;;  %v3355_v63 = vadd.f32 %v3354_v35, %v8004_v12 }
0x164f   : > { %6812 = vrcp.f32 %v3401_v11  ;;  %v3413_v30 = vand.u32 2147483648, %v3401_v11  ;;  %vm3407_vm15 = vweird.f32 %v3401_v11  ;;  %v3411_v13 = vand.u32 2147483647, %v3401_v11 }
0x1650   : > { %v3392_v19 = vadd.f32 %v3384_v41, %v3355_v63 }
0x1651   : > { %v3414_v27 = vor.u32 1.1754944e-38, %v3413_v30  ;;  %vm3412_vm9 = vcmp.eq.f32.partialorder %v3411_v13, 8.507059e+37 }
0x1652   : > { %v3396_v26 = vadd.f32 %v3392_v19, %v8015_v56  ;;  %v3762_v19 = vld [vmem:[%s8880_s3] sm:$0xff]  ;;  %s8881_s3 = sld [smem:[#allocation26_spill]] }
0x1654   : > { %v6811_v44 = vpop.eup %6810 }
0x1655   : > { %v6813_v0 = vpop.eup %6812  ;;  %v3420_v7 = vadd.f32 1.0, %v6811_v44  ;;  %v3357_v5 = vpop.f32.mrf.mxu2 }
0x1656   : > { %v3403_v18 = vmul.f32 %v6813_v0, %v3401_v11  ;;  %v3358_v23 = vadd.f32 %v3357_v5, %v8007_v4  ;;  %vm3408_vm14 = vweird.f32 %v6813_v0 }
0x1657   : > { %6814 = vrcp.f32 %v3420_v7  ;;  %v3432_v33 = vand.u32 2147483648, %v3420_v7  ;;  %vm3409_vm0 = vmor %vm3407_vm15, %vm3408_vm14  ;;  %v3430_v22 = vand.u32 2147483647, %v3420_v7  ;;  %vm3426_vm3 = vweird.f32 %v3420_v7 }
0x1658   : > { %v3404_v54 = vsub.f32 1.0, %v3403_v18  ;;  %v3393_v28 = vadd.f32 %v3387_v16, %v3358_v23 }
0x1659   : > { %v3433_v36 = vor.u32 1.1754944e-38, %v3432_v33  ;;  %vm3431_vm4 = vcmp.eq.f32.partialorder %v3430_v22, 8.507059e+37 }
0x165a   : > { %v3405_v8 = vmul.f32 %v6813_v0, %v3404_v54  ;;  %v3397_v24 = vadd.f32 %v3393_v28, %v8012_v37 }
0x165c   : > { %v6353_v9 = vmul.f32 -1.442695, %v3397_v24  ;;  %v3406_v10 = vadd.f32 %v6813_v0, %v3405_v8 }
0x165d   : > { %v6815_v25 = vpop.eup %6814 }
0x165e   : > { %v3422_v20 = vmul.f32 %v6815_v25, %v3420_v7  ;;  %6816 = vpow2.f32 %v6353_v9  ;;  %vm3427_vm12 = vweird.f32 %v6815_v25  ;;  %v3410_v15 = vsel %vm3409_vm0, %v6813_v0, %v3406_v10 }
0x165f   : > { %6818 = vtanh.f32 %v3396_v26  ;;  %vm3428_vm11 = vmor %vm3426_vm3, %vm3427_vm12  ;;  %v3415_v62 = vsel %vm3412_vm9, %v3414_v27, %v3410_v15 }
0x1660   : > { %v3423_v32 = vsub.f32 1.0, %v3422_v20 }
0x1662   : > { %v3424_v55 = vmul.f32 %v6815_v25, %v3423_v32 }
0x1664   : > { %v6817_v31 = vpop.eup %6816  ;;  %v3425_v34 = vadd.f32 %v6815_v25, %v3424_v55 }
0x1665   : > { %v3440_v57 = vadd.f32 1.0, %v6817_v31  ;;  %v6819_v49 = vpop.eup %6818 }
0x1666   : > { %v3429_v2 = vsel %vm3428_vm11, %v6815_v25, %v3425_v34  ;;  %v3458_v39 = vmul.f32 %v6819_v49, %v3415_v62 }
0x1667   : > { %6820 = vrcp.f32 %v3440_v57  ;;  %v3434_v38 = vsel %vm3431_vm4, %v3433_v36, %v3429_v2  ;;  %v3452_v48 = vand.u32 2147483648, %v3440_v57  ;;  %v3450_v11 = vand.u32 2147483647, %v3440_v57 }
0x1668   : > { %v3457_v40 = vmul.f32 %v3456_v42, %v3434_v38  ;;  %vm3446_vm15 = vweird.f32 %v3440_v57 }
0x1669   : > { %v3453_v44 = vor.u32 1.1754944e-38, %v3452_v48  ;;  %vm3451_vm12 = vcmp.eq.f32.partialorder %v3450_v11, 8.507059e+37 }
0x166a   : > { %v3459_v43 = vadd.f32 %v3458_v39, %v3457_v40 }
0x166c   : > { %3463 = vst.msk [vmem:[#allocation5] sm:$0xff] %vm1631_vm7, %v3459_v43  ;;  %6822 = vtanh.f32 %v3459_v43 }
0x166d   : > { %v6821_v58 = vpop.eup %6820 }
0x166e   : > { %v3442_v60 = vmul.f32 %v6821_v58, %v3440_v57  ;;  %vm3447_vm14 = vweird.f32 %v6821_v58 }
0x166f   : > { %vm3448_vm0 = vmor %vm3446_vm15, %vm3447_vm14 }
0x1670   : > { %v3443_v41 = vsub.f32 1.0, %v3442_v60 }
0x1672   : > { %v3444_v61 = vmul.f32 %v6821_v58, %v3443_v41  ;;  %v6823_v7 = vpop.eup %6822 }
0x1674   : > { %v3445_v35 = vadd.f32 %v6821_v58, %v3444_v61 }
0x1676   : > { %v3449_v0 = vsel %vm3448_vm0, %v6821_v58, %v3445_v35 }
0x1677   : > { %v3454_v63 = vsel %vm3451_vm12, %v3453_v44, %v3449_v0 }
0x1678   : > { %v3461_v5 = vmul.f32 %v6823_v7, %v3454_v63 }
0x167a   : > { %3466 = vperm.xlu1 %6638, %v3461_v5   ;;  %3462 = vst.msk [vmem:[#allocation4] sm:$0xff] %vm1631_vm7, %v3461_v5 }
0x1681   : > { %v3504_v16 = vld [vmem:[#allocation4] sm:$0xff] }
0x1682   : > { %3520 = vmatpush.msrb.mxu0 %v3504_v16 }
0x1683   : > { %6358 = vmatmul.msk.f32.vlgmr.msrb.gmra.mxu0 %vm1635_vm6, %v7948_v45 }
0x168b   : > { %6359 = vmatmul.msk.f32.gmra.mxu0 %vm1635_vm6, %v7953_v46 }
0x1693   : > { %6360 = vmatmul.msk.f32.gmra.mxu0 %vm1635_vm6, %v7958_v3 }
0x169b   : > { %6361 = vmatmul.msk.f32.gmra.mxu0 %vm1635_vm6, %v7966_v51 }
0x16ec   : > { %v3467_v18 = vpop.permute.xlu1 %3466 }
0x16ed   : > { %v3469_v23 = vmul.f32 %v3467_v18, %v8031_v50 }
0x16ef   : > { %3470 = vst.msk [vmem:[#allocation3] sm:$0xff] %vm1804_vm8, %v3469_v23 }
0x16f6   : > { %v8063_v54 = vld [vmem:[#allocation3] sm:$0xff] }
0x16f7   : > { %v3472_v28 = vsel %vm1949_vm10, %v8063_v54, -inf }
0x16f8   : > { %3473 = vmax.xlane.f32.xlu1 %v3472_v28 }
0x1700   : > { %v3522_v50 = vpop.f32.mrf.mxu0 }
0x1708   : > { %v3525_v26 = vpop.f32.mrf.mxu0 }
0x1710   : > { %v3528_v55 = vpop.f32.mrf.mxu0 }
0x1711   : > { %3765 = vperm.xlu1 %6638, %v3762_v19  }
0x1718   : > { %v3531_v49 = vpop.f32.mrf.mxu0 }
0x176b   : > { %v3474_v8 = vpop.xlane.xlu1 %3473 }
0x176c   : > { %3490 = vmatpush.msra.mxu3 %v3474_v8 }
0x176d   : > { %6354 = vmatmul.msk.f32.vlgmr.msra.gmra.mxu3 %vm1635_vm6, %v7963_v47 }
0x1775   : > { %6355 = vmatmul.msk.f32.gmra.mxu3 %vm1635_vm6, %v7973_v53 }
0x177d   : > { %6356 = vmatmul.msk.f32.gmra.mxu3 %vm1635_vm6, %v7978_v14 }
0x1785   : > { %6357 = vmatmul.msk.f32.gmra.mxu3 %vm1635_vm6, %v7983_v59 }
0x17f0   : > { %v3492_v24 = vpop.f32.mrf.mxu3 }
0x17f1   : > { %v3493_v9 = vadd.f32 %v3492_v24, %v7988_v1 }
0x17f3   : > { %v3534_v25 = vadd.f32 %v3522_v50, %v3493_v9 }
0x17f5   : > { %v3538_v20 = vadd.f32 %v3534_v25, %v7992_v17 }
0x17f7   : > { %v6362_v10 = vmul.f32 -1.442695, %v3538_v20  ;;  %v3600_v20 = vld [vmem:[#allocation5] sm:$0xff] }
0x17f8   : > { %v3495_v30 = vpop.f32.mrf.mxu3 }
0x17f9   : > { %6824 = vpow2.f32 %v6362_v10  ;;  %v3496_v32 = vadd.f32 %v3495_v30, %v7996_v6 }
0x17fb   : > { %v3535_v13 = vadd.f32 %v3525_v26, %v3496_v32 }
0x17fd   : > { %v3539_v33 = vadd.f32 %v3535_v13, %v8000_v21 }
0x17ff   : > { %v6825_v15 = vpop.eup %6824  ;;  %v6363_v22 = vmul.f32 -1.442695, %v3539_v33 }
0x1800   : > { %v3545_v27 = vadd.f32 1.0, %v6825_v15  ;;  %v3498_v31 = vpop.f32.mrf.mxu3 }
0x1801   : > { %6826 = vpow2.f32 %v6363_v22  ;;  %v3499_v57 = vadd.f32 %v3498_v31, %v8004_v12 }
0x1802   : > { %6828 = vrcp.f32 %v3545_v27  ;;  %v3557_v44 = vand.u32 2147483648, %v3545_v27  ;;  %vm3551_vm9 = vweird.f32 %v3545_v27  ;;  %v3555_v7 = vand.u32 2147483647, %v3545_v27 }
0x1803   : > { %v3536_v43 = vadd.f32 %v3528_v55, %v3499_v57 }
0x1804   : > { %v3558_v23 = vor.u32 1.1754944e-38, %v3557_v44  ;;  %vm3556_vm15 = vcmp.eq.f32.partialorder %v3555_v7, 8.507059e+37 }
0x1805   : > { %v3540_v61 = vadd.f32 %v3536_v43, %v8015_v56 }
0x1807   : > { %v6827_v34 = vpop.eup %6826 }
0x1808   : > { %v6829_v36 = vpop.eup %6828  ;;  %v3564_v62 = vadd.f32 1.0, %v6827_v34  ;;  %v3501_v2 = vpop.f32.mrf.mxu3 }
0x1809   : > { %v3547_v38 = vmul.f32 %v6829_v36, %v3545_v27  ;;  %v3502_v42 = vadd.f32 %v3501_v2, %v8007_v4  ;;  %vm3552_vm3 = vweird.f32 %v6829_v36 }
0x180a   : > { %6830 = vrcp.f32 %v3564_v62  ;;  %v3576_v63 = vand.u32 2147483648, %v3564_v62  ;;  %vm3553_vm11 = vmor %vm3551_vm9, %vm3552_vm3  ;;  %v3574_v18 = vand.u32 2147483647, %v3564_v62  ;;  %vm3570_vm14 = vweird.f32 %v3564_v62 }
0x180b   : > { %v3548_v39 = vsub.f32 1.0, %v3547_v38  ;;  %v3537_v40 = vadd.f32 %v3531_v49, %v3502_v42 }
0x180c   : > { %v3577_v8 = vor.u32 1.1754944e-38, %v3576_v63  ;;  %vm3575_vm12 = vcmp.eq.f32.partialorder %v3574_v18, 8.507059e+37 }
0x180d   : > { %v3549_v58 = vmul.f32 %v6829_v36, %v3548_v39  ;;  %v3541_v60 = vadd.f32 %v3537_v40, %v8012_v37 }
0x180f   : > { %v6364_v41 = vmul.f32 -1.442695, %v3541_v60  ;;  %v3550_v35 = vadd.f32 %v6829_v36, %v3549_v58 }
0x1810   : > { %v6831_v48 = vpop.eup %6830 }
0x1811   : > { %v3566_v11 = vmul.f32 %v6831_v48, %v3564_v62  ;;  %6832 = vpow2.f32 %v6364_v41  ;;  %vm3571_vm4 = vweird.f32 %v6831_v48  ;;  %v3554_v16 = vsel %vm3553_vm11, %v6829_v36, %v3550_v35 }
0x1812   : > { %6834 = vtanh.f32 %v3540_v61  ;;  %vm3572_vm0 = vmor %vm3570_vm14, %vm3571_vm4  ;;  %v3559_v50 = vsel %vm3556_vm15, %v3558_v23, %v3554_v16 }
0x1813   : > { %v3567_v0 = vsub.f32 1.0, %v3566_v11 }
0x1815   : > { %v3568_v5 = vmul.f32 %v6831_v48, %v3567_v0 }
0x1817   : > { %v6833_v28 = vpop.eup %6832  ;;  %v3569_v19 = vadd.f32 %v6831_v48, %v3568_v5 }
0x1818   : > { %v3584_v24 = vadd.f32 1.0, %v6833_v28  ;;  %v6835_v25 = vpop.eup %6834 }
0x1819   : > { %v3573_v9 = vsel %vm3572_vm0, %v6831_v48, %v3569_v19  ;;  %v3602_v10 = vmul.f32 %v6835_v25, %v3559_v50 }
0x181a   : > { %6836 = vrcp.f32 %v3584_v24  ;;  %v3578_v26 = vsel %vm3575_vm12, %v3577_v8, %v3573_v9  ;;  %v3596_v15 = vand.u32 2147483648, %v3584_v24  ;;  %v3594_v27 = vand.u32 2147483647, %v3584_v24 }
0x181b   : > { %v3601_v30 = vmul.f32 %v3600_v20, %v3578_v26  ;;  %vm3590_vm9 = vweird.f32 %v3584_v24 }
0x181c   : > { %v3597_v34 = vor.u32 1.1754944e-38, %v3596_v15  ;;  %vm3595_vm4 = vcmp.eq.f32.partialorder %v3594_v27, 8.507059e+37 }
0x181d   : > { %v3603_v32 = vadd.f32 %v3602_v10, %v3601_v30 }
0x181f   : > { %3607 = vst.msk [vmem:[#allocation5] sm:$0xff] %vm1631_vm7, %v3603_v32  ;;  %6838 = vtanh.f32 %v3603_v32 }
0x1820   : > { %v6837_v13 = vpop.eup %6836 }
0x1821   : > { %v3586_v33 = vmul.f32 %v6837_v13, %v3584_v24  ;;  %vm3591_vm3 = vweird.f32 %v6837_v13 }
0x1822   : > { %vm3592_vm11 = vmor %vm3590_vm9, %vm3591_vm3 }
0x1823   : > { %v3587_v55 = vsub.f32 1.0, %v3586_v33 }
0x1825   : > { %v3588_v22 = vmul.f32 %v6837_v13, %v3587_v55  ;;  %v6839_v62 = vpop.eup %6838 }
0x1827   : > { %v3589_v31 = vadd.f32 %v6837_v13, %v3588_v22 }
0x1829   : > { %v3593_v36 = vsel %vm3592_vm11, %v6837_v13, %v3589_v31  ;;  %v3744_v31 = vld [vmem:[#allocation5] sm:$0xff] }
0x182a   : > { %v3598_v57 = vsel %vm3595_vm4, %v3597_v34, %v3593_v36 }
0x182b   : > { %v3605_v2 = vmul.f32 %v6839_v62, %v3598_v57 }
0x182d   : > { %3610 = vperm.xlu2 %6636, %v3605_v2   ;;  %3606 = vst.msk [vmem:[#allocation4] sm:$0xff] %vm1631_vm7, %v3605_v2 }
0x1834   : > { %v3648_v49 = vld [vmem:[#allocation4] sm:$0xff] }
0x1835   : > { %3664 = vmatpush.msrb.mxu1 %v3648_v49 }
0x1836   : > { %6369 = vmatmul.msk.f32.vlgmr.msrb.gmra.mxu1 %vm1635_vm6, %v7948_v45 }
0x183e   : > { %6370 = vmatmul.msk.f32.gmra.mxu1 %vm1635_vm6, %v7953_v46 }
0x1846   : > { %6371 = vmatmul.msk.f32.gmra.mxu1 %vm1635_vm6, %v7958_v3 }
0x184e   : > { %6372 = vmatmul.msk.f32.gmra.mxu1 %vm1635_vm6, %v7966_v51 }
0x1887   : > { %v3611_v38 = vpop.permute.xlu2 %3610 }
0x1888   : > { %v3613_v42 = vmul.f32 %v3611_v38, %v8063_v54 }
0x188a   : > { %3614 = vst.msk [vmem:[#allocation3] sm:$0xff] %vm1949_vm10, %v3613_v42 }
0x1891   : > { %v8096_v39 = vld [vmem:[#allocation3] sm:$0xff] }
0x1892   : > { %v3616_v40 = vsel %vm2094_vm13, %v8096_v39, -inf }
0x1893   : > { %3617 = vmax.xlane.f32.xlu0 %v3616_v40 }
0x18b3   : > { %v3666_v46 = vpop.f32.mrf.mxu1 }
0x18bb   : > { %v3669_v43 = vpop.f32.mrf.mxu1 }
0x1906   : > { %v3618_v45 = vpop.xlane.xlu0 %3617 }
0x1907   : > { %3634 = vmatpush.msra.mxu2 %v3618_v45 }
0x1908   : > { %6365 = vmatmul.msk.f32.vlgmr.msra.gmra.mxu2 %vm1635_vm6, %v7963_v47 }
0x1910   : > { %6366 = vmatmul.msk.f32.gmra.mxu2 %vm1635_vm6, %v7973_v53 }
0x1918   : > { %6367 = vmatmul.msk.f32.gmra.mxu2 %vm1635_vm6, %v7978_v14  ;;  %v3672_v14 = vpop.f32.mrf.mxu1 }
0x1920   : > { %6368 = vmatmul.msk.f32.gmra.mxu2 %vm1635_vm6, %v7983_v59  ;;  %v3675_v63 = vpop.f32.mrf.mxu1 }
0x198b   : > { %v3636_v3 = vpop.f32.mrf.mxu2 }
0x198c   : > { %v3637_v51 = vadd.f32 %v3636_v3, %v7988_v1 }
0x198e   : > { %v3678_v54 = vadd.f32 %v3666_v46, %v3637_v51 }
0x1990   : > { %v3682_v58 = vadd.f32 %v3678_v54, %v7992_v17 }
0x1992   : > { %v6373_v60 = vmul.f32 -1.442695, %v3682_v58  ;;  %v3834_v58 = vld [vmem:[%s8881_s3 + $0x8] sm:$0xff] }
0x1993   : > { %v3639_v41 = vpop.f32.mrf.mxu2 }
0x1994   : > { %6840 = vpow2.f32 %v6373_v60  ;;  %v3640_v47 = vadd.f32 %v3639_v41, %v7996_v6 }
0x1996   : > { %v3679_v53 = vadd.f32 %v3669_v43, %v3640_v47  ;;  %v3761_v47 = vld [vmem:[%s8882_s5] sm:$0xff]  ;;  %s7196_s5 = smov 112  }
0x1998   : > { %v3683_v48 = vadd.f32 %v3679_v53, %v8000_v21 }
0x199a   : > { %v6841_v61 = vpop.eup %6840  ;;  %v6374_v11 = vmul.f32 -1.442695, %v3683_v48  ;;  %v3766_v48 = vpop.permute.xlu1 %3765 }
0x199b   : > { %v3689_v59 = vadd.f32 1.0, %v6841_v61  ;;  %v3642_v35 = vpop.f32.mrf.mxu2 }
0x199c   : > { %6842 = vpow2.f32 %v6374_v11  ;;  %v3643_v17 = vadd.f32 %v3642_v35, %v8004_v12  ;;  %v6642_v35 = vld [vmem:[%s8862_s4] ss:$0 sm:$0xff] }
0x199d   : > { %6844 = vrcp.f32 %v3689_v59  ;;  %v3701_v12 = vand.u32 2147483648, %v3689_v59  ;;  %vm3695_vm15 = vweird.f32 %v3689_v59  ;;  %v3699_v26 = vand.u32 2147483647, %v3689_v59 }
0x199e   : > { %v3680_v18 = vadd.f32 %v3672_v14, %v3643_v17  ;;  %v3832_v17 = vld [vmem:[%s8883_s6 + $0x8] sm:$0xff] }
0x199f   : > { %vm3700_vm9 = vcmp.eq.f32.partialorder %v3699_v26, 8.507059e+37 }
0x19a0   : > { %v3684_v50 = vadd.f32 %v3680_v18, %v8015_v56 }
0x19a2   : > { %v6843_v1 = vpop.eup %6842 }
0x19a3   : > { %v6845_v44 = vpop.eup %6844  ;;  %v3708_v0 = vadd.f32 1.0, %v6843_v1  ;;  %v3645_v7 = vpop.f32.mrf.mxu2 }
0x19a4   : > { %v3691_v5 = vmul.f32 %v6845_v44, %v3689_v59  ;;  %v3646_v6 = vadd.f32 %v3645_v7, %v8007_v4  ;;  %vm3696_vm14 = vweird.f32 %v6845_v44 }
0x19a5   : > { %6846 = vrcp.f32 %v3708_v0  ;;  %v3720_v4 = vand.u32 2147483648, %v3708_v0  ;;  %vm3697_vm0 = vmor %vm3695_vm15, %vm3696_vm14  ;;  %v3718_v30 = vand.u32 2147483647, %v3708_v0  ;;  %vm3714_vm3 = vweird.f32 %v3708_v0 }
0x19a6   : > { %v3692_v16 = vsub.f32 1.0, %v3691_v5  ;;  %v3681_v21 = vadd.f32 %v3675_v63, %v3646_v6  ;;  %v3820_v6 = vld [vmem:[%s7825_s12] sm:$0x1] }
0x19a7   : > { %v3721_v13 = vor.u32 1.1754944e-38, %v3720_v4  ;;  %vm3719_vm4 = vcmp.eq.f32.partialorder %v3718_v30, 8.507059e+37 }
0x19a8   : > { %v3693_v23 = vmul.f32 %v6845_v44, %v3692_v16  ;;  %v3685_v28 = vadd.f32 %v3681_v21, %v8012_v37  ;;  %v3702_v37 = vor.u32 1.1754944e-38, %v3701_v12 }
0x19aa   : > { %v6375_v19 = vmul.f32 -1.442695, %v3685_v28  ;;  %v3694_v9 = vadd.f32 %v6845_v44, %v3693_v23 }
0x19ab   : > { %v6847_v8 = vpop.eup %6846 }
0x19ac   : > { %v3710_v24 = vmul.f32 %v6847_v8, %v3708_v0  ;;  %6848 = vpow2.f32 %v6375_v19  ;;  %vm3715_vm12 = vweird.f32 %v6847_v8  ;;  %v3698_v10 = vsel %vm3697_vm0, %v6845_v44, %v3694_v9 }
0x19ad   : > { %6850 = vtanh.f32 %v3684_v50  ;;  %vm3716_vm11 = vmor %vm3714_vm3, %vm3715_vm12  ;;  %v3703_v33 = vsel %vm3700_vm9, %v3702_v37, %v3698_v10 }
0x19ae   : > { %v3711_v25 = vsub.f32 1.0, %v3710_v24 }
0x19b0   : > { %v3712_v20 = vmul.f32 %v6847_v8, %v3711_v25 }
0x19b2   : > { %v6849_v32 = vpop.eup %6848  ;;  %v3713_v56 = vadd.f32 %v6847_v8, %v3712_v20 }
0x19b3   : > { %v3728_v55 = vadd.f32 1.0, %v6849_v32  ;;  %v6851_v22 = vpop.eup %6850 }
0x19b4   : > { %v3717_v15 = vsel %vm3716_vm11, %v6847_v8, %v3713_v56  ;;  %v3746_v34 = vmul.f32 %v6851_v22, %v3703_v33 }
0x19b5   : > { %6852 = vrcp.f32 %v3728_v55  ;;  %v3722_v27 = vsel %vm3719_vm4, %v3721_v13, %v3717_v15  ;;  %v3740_v38 = vand.u32 2147483648, %v3728_v55  ;;  %v3738_v40 = vand.u32 2147483647, %v3728_v55 }
0x19b6   : > { %v3745_v36 = vmul.f32 %v3744_v31, %v3722_v27  ;;  %vm3734_vm15 = vweird.f32 %v3728_v55 }
0x19b7   : > { %v3741_v46 = vor.u32 1.1754944e-38, %v3740_v38  ;;  %vm3739_vm12 = vcmp.eq.f32.partialorder %v3738_v40, 8.507059e+37 }
0x19b8   : > { %v3747_v62 = vadd.f32 %v3746_v34, %v3745_v36 }
0x19ba   : > { %3751 = vst.msk [vmem:[#allocation5] sm:$0xff] %vm1631_vm7, %v3747_v62  ;;  %6854 = vtanh.f32 %v3747_v62 }
0x19bb   : > { %v6853_v57 = vpop.eup %6852  ;;  %3918 = vst.msk [vmem:[#allocation5] sm:$0xff] %vm1631_vm7, %v7191_v52 }
0x19bc   : > { %v3730_v2 = vmul.f32 %v6853_v57, %v3728_v55  ;;  %vm3735_vm14 = vweird.f32 %v6853_v57 }
0x19bd   : > { %vm3736_vm0 = vmor %vm3734_vm15, %vm3735_vm14  ;;  %vm8889_vm14 = vcmask 15360  }
0x19be   : > { %v3731_v49 = vsub.f32 1.0, %v3730_v2 }
0x19c0   : > { %v3732_v42 = vmul.f32 %v6853_v57, %v3731_v49  ;;  %v6855_v51 = vpop.eup %6854 }
0x19c2   : > { %v3733_v45 = vadd.f32 %v6853_v57, %v3732_v42 }
0x19c4   : > { %v3737_v3 = vsel %vm3736_vm0, %v6853_v57, %v3733_v45 }
0x19c5   : > { %v3742_v54 = vsel %vm3739_vm12, %v3741_v46, %v3737_v3 }
0x19c6   : > { %v3749_v43 = vmul.f32 %v6855_v51, %v3742_v54 }
0x19c8   : > { %3754 = vperm.xlu0 %6637, %v3749_v43   ;;  %3750 = vst.msk [vmem:[#allocation4] sm:$0xff] %vm1631_vm7, %v3749_v43 }
0x19c9   : > { %3917 = vst.msk [vmem:[#allocation4] sm:$0xff] %vm1631_vm7, %v7191_v52 }
0x19d0   : > { %3842 = vperm.xlu0 %6637, %v3834_v58   ;;  %v3964_v22 = vld [vmem:[#allocation4] sm:$0xff] }
0x1a3a   : > { %v3755_v60 = vpop.permute.xlu0 %3754 }
0x1a3b   : > { %v3757_v41 = vmul.f32 %v3755_v60, %v8096_v39  ;;  %v3833_v39 = vld [vmem:[%s8881_s3] sm:$0xff]  ;;  %s8888_s3 = sld [smem:[#allocation27_spill]] }
0x1a3d   : > { %3758 = vst.msk [vmem:[#allocation3] sm:$0xff] %vm2094_vm13, %v3757_v41 }
0x1a41   : > { %v8164_v36 = vld [vmem:[%s8888_s3] sm:$0xff]  ;;  %v8174_v2 = vld [vmem:[%s8888_s3 + $0x8] sm:$0xff]  ;;  %v8179_v49 = vld [vmem:[%s8888_s3 + $0x10] sm:$0xff] }
0x1a42   : > { %v3843_v16 = vpop.permute.xlu0 %3842  ;;  %v8184_v38 = vld [vmem:[%s8888_s3 + $0x18] sm:$0xff]  ;;  %s8892_s3 = sld [smem:[#allocation32_spill]] }
0x1a44   : > { %v3759_v53 = vld [vmem:[#allocation3] sm:$0xff] }
0x1a45   : > { %3786 = vmatpush.msrb.mxu3 %v3759_v53  ;;  %3815 = vmatpush.msra.mxu0 %v3759_v53 }
0x1a46   : > { %6376 = vmatmul.msk.f32.vlgmr.msrb.gmra.mxu3 %vm1635_vm6, %v3761_v47 }
0x1a47   : > { %3992 = vmatpush.msrb.mxu0 %v3964_v22 }
0x1ac9   : > { %v3788_v14 = vpop.f32.mrf.mxu3 }
0x1aca   : > { %v3789_v61 = vadd.f32 %v3788_v14, %v3766_v48 }
0x1acc   : > { %v3791_v11 = vadd.f32 %v3789_v61, %v7929_v29  ;;  %v3831_v29 = vld [vmem:[%s8883_s6] sm:$0xff]  ;;  %s8891_s6 = sld [smem:[#allocation30_spill]] }
0x1ace   : > { %3792 = vst.msk [vmem:[#allocation2] sm:$0xff] %vm1613_vm5, %v3791_v11 }
0x1ad2   : > { %v8193_v3 = vld [vmem:[%s8891_s6] sm:$0xff]  ;;  %v8201_v53 = vld [vmem:[%s8891_s6 + $0x8] sm:$0xff] }
0x1ad5   : > { %v3823_v59 = vld [vmem:[#allocation2] sm:$0xff] }
0x1ad6   : > { %3828 = vrot.lane.b32.xlu2 %v3823_v59, %s8884_s7 }
0x1ade   : > { %3825 = vrot.lane.b32.xlu2 %v3823_v59, %s8885_s8  ;;  %s8886_s8 = sld [smem:[#allocation28_spill]] }
0x1ae4   : > { %v8149_v27 = vld [vmem:[%s8886_s8] sm:$0xff]  ;;  %v8154_v31 = vld [vmem:[%s8886_s8 + $0x8] sm:$0xff]  ;;  %v8159_v34 = vld [vmem:[%s8886_s8 + $0x10] sm:$0xff] }
0x1ae5   : > { %v8167_v57 = vld [vmem:[%s8886_s8 + $0x18] sm:$0xff] }
0x1ae6   : > { %3837 = vperm.xlu2 %6636, %v3833_v39  }
0x1aee   : > { %3796 = vrot.lane.b32.xlu2 %v6642_v35, %s7196_s5  ;;  %s8887_s5 = smov 2  }
0x1b30   : > { %v3829_v1 = vpop.permute.xlu2 %3828 }
0x1b31   : > { %3864 = vmatpush.msrb.mxu2 %v3829_v1 }
0x1b38   : > { %v3826_v44 = vpop.permute.xlu2 %3825 }
0x1b39   : > { %3865 = vmatpush.msrb.mxu2 %v3826_v44 }
0x1b3b   : > { %3866 = vmatpush.msrb.mxu2 %v3823_v59 }
0x1b3c   : > { %6378 = vmatmul.msk.f32.vlgmr.msrb.gmra.mxu2 %vm2323_vm1, %v3831_v29 }
0x1b40   : > { %v3838_v0 = vpop.permute.xlu2 %3837 }
0x1b44   : > { %6379 = vmatmul.msk.f32.gmra.mxu2 %vm2323_vm1, %v3832_v17 }
0x1b48   : > { %v3797_v7 = vpop.permute.xlu2 %3796 }
0x1b49   : > { %6377 = vmatmul.msk.f32.vlgmr.msra.gmra.mxu0 %vm1635_vm6, %v3797_v7 }
0x1b51   : > { %6385 = vmatmul.msk.f32.vlgmr.msrb.gmra.mxu0 %vm1635_vm6, %v8149_v27 }
0x1b59   : > { %6386 = vmatmul.msk.f32.gmra.mxu0 %vm1635_vm6, %v8154_v31 }
0x1b61   : > { %6387 = vmatmul.msk.f32.gmra.mxu0 %vm1635_vm6, %v8159_v34 }
0x1b69   : > { %6388 = vmatmul.msk.f32.gmra.mxu0 %vm1635_vm6, %v8167_v57 }
0x1bbf   : > { %v3868_v63 = vpop.f32.mrf.mxu2 }
0x1bc0   : > { %v3869_v24 = vadd.f32 %v3868_v63, %v3838_v0 }
0x1bc6   : > { %v3817_v5 = vpop.f32.mrf.mxu0 }
0x1bc7   : > { %v3821_v21 = vadd.f32 %v3820_v6, %v3817_v5  ;;  %v3871_v18 = vpop.f32.mrf.mxu2 }
0x1bc8   : > { %v3872_v23 = vadd.f32 %v3871_v18, %v3843_v16 }
0x1bc9   : > { %3822 = vst.msk [vmem:[%s7825_s12] sm:$0x1] %vm2299_vm2, %v3821_v21  ;;  %v8213_v21 = vld [vmem:[%s8891_s6 + $0x18] sm:$0xff] }
0x1bca   : > { %v6380_v28 = vmul.f32 -1.442695, %v3872_v23 }
0x1bcc   : > { %6856 = vpow2.f32 %v6380_v28 }
0x1bce   : > { %v3994_v42 = vpop.f32.mrf.mxu0 }
0x1bd2   : > { %v6857_v19 = vpop.eup %6856 }
0x1bd3   : > { %v3878_v8 = vadd.f32 1.0, %v6857_v19  ;;  %v8216_v19 = vld [vmem:[%s8891_s6 + $0x10] sm:$0xff]  ;;  %s7197_s6 = smov 104  }
0x1bd5   : > { %6858 = vrcp.f32 %v3878_v8  ;;  %v3890_v25 = vand.u32 2147483648, %v3878_v8  ;;  %v3888_v4 = vand.u32 2147483647, %v3878_v8  ;;  %vm3884_vm9 = vweird.f32 %v3878_v8 }
0x1bd6   : > { %6860 = vtanh.f32 %v3869_v24  ;;  %v3997_v54 = vpop.f32.mrf.mxu0 }
0x1bd7   : > { %v3891_v10 = vor.u32 1.1754944e-38, %v3890_v25  ;;  %vm3889_vm4 = vcmp.eq.f32.partialorder %v3888_v4, 8.507059e+37 }
0x1bdb   : > { %v6859_v50 = vpop.eup %6858 }
0x1bdc   : > { %v3880_v9 = vmul.f32 %v6859_v50, %v3878_v8  ;;  %vm3885_vm3 = vweird.f32 %v6859_v50  ;;  %v6861_v37 = vpop.eup %6860 }
0x1bdd   : > { %vm3886_vm11 = vmor %vm3884_vm9, %vm3885_vm3 }
0x1bde   : > { %v3881_v12 = vsub.f32 1.0, %v3880_v9  ;;  %v4000_v61 = vpop.f32.mrf.mxu0 }
0x1be0   : > { %v3882_v26 = vmul.f32 %v6859_v50, %v3881_v12 }
0x1be2   : > { %v3883_v20 = vadd.f32 %v6859_v50, %v3882_v26 }
0x1be4   : > { %v3887_v30 = vsel %vm3886_vm11, %v6859_v50, %v3883_v20 }
0x1be5   : > { %v3892_v32 = vsel %vm3889_vm4, %v3891_v10, %v3887_v30 }
0x1be6   : > { %v3894_v56 = vmul.f32 %v6861_v37, %v3892_v32  ;;  %v4003_v5 = vpop.f32.mrf.mxu0 }
0x1be8   : > { %3896 = vrot.lane.b32.xlu1 %v3894_v56, %s8887_s5  ;;  %s8890_s5 = sld [smem:[#allocation29_spill]] }
0x1bee   : > { %v8189_v40 = vld [vmem:[%s8890_s5] sm:$0xff]  ;;  %v8197_v58 = vld [vmem:[%s8890_s5 + $0x8] sm:$0xff]  ;;  %v8205_v1 = vld [vmem:[%s8890_s5 + $0x10] sm:$0xff] }
0x1bef   : > { %v8208_v44 = vld [vmem:[%s8890_s5 + $0x18] sm:$0xff]  ;;  %s8894_s5 = sld [smem:[#allocation31_spill]] }
0x1c5a   : > { %v3897_v13 = vpop.permute.xlu1 %3896 }
0x1c5b   : > { %v3899_v33 = vsel %vm8889_vm14, 0.0, %v3897_v13 }
0x1c5c   : > { %3900 = vst.msk [vmem:[#allocation3] sm:$0xff] %vm1613_vm5, %v3899_v33 }
0x1c63   : > { %v8144_v55 = vld [vmem:[#allocation3] sm:$0xff] }
0x1c64   : > { %v3920_v15 = vsel %vm1635_vm6, %v8144_v55, -inf }
0x1c65   : > { %3921 = vmax.xlane.f32.xlu0 %v3920_v15 }
0x1cd8   : > { %v3922_v62 = vpop.xlane.xlu0 %3921 }
0x1cd9   : > { %3950 = vmatpush.msra.mxu3 %v3922_v62 }
0x1cda   : > { %6381 = vmatmul.msk.f32.vlgmr.msra.gmra.mxu3 %vm1635_vm6, %v8164_v36 }
0x1ce2   : > { %6382 = vmatmul.msk.f32.gmra.mxu3 %vm1635_vm6, %v8174_v2 }
0x1cea   : > { %6383 = vmatmul.msk.f32.gmra.mxu3 %vm1635_vm6, %v8179_v49 }
0x1cf2   : > { %6384 = vmatmul.msk.f32.gmra.mxu3 %vm1635_vm6, %v8184_v38 }
0x1d5d   : > { %v3952_v45 = vpop.f32.mrf.mxu3 }
0x1d5e   : > { %v3953_v46 = vadd.f32 %v3952_v45, %v8189_v40  ;;  %v4072_v45 = vld [vmem:[#allocation5] sm:$0xff] }
0x1d60   : > { %v4006_v51 = vadd.f32 %v3994_v42, %v3953_v46 }
0x1d62   : > { %v4010_v43 = vadd.f32 %v4006_v51, %v8193_v3 }
0x1d64   : > { %v6389_v60 = vmul.f32 -1.442695, %v4010_v43 }
0x1d65   : > { %v3955_v41 = vpop.f32.mrf.mxu3 }
0x1d66   : > { %6862 = vpow2.f32 %v6389_v60  ;;  %v3956_v47 = vadd.f32 %v3955_v41, %v8197_v58 }
0x1d68   : > { %v4007_v48 = vadd.f32 %v3997_v54, %v3956_v47 }
0x1d6a   : > { %v4011_v14 = vadd.f32 %v4007_v48, %v8201_v53 }
0x1d6c   : > { %v6863_v11 = vpop.eup %6862  ;;  %v6390_v59 = vmul.f32 -1.442695, %v4011_v14 }
0x1d6d   : > { %v4017_v39 = vadd.f32 1.0, %v6863_v11  ;;  %v3958_v35 = vpop.f32.mrf.mxu3 }
0x1d6e   : > { %6864 = vpow2.f32 %v6390_v59  ;;  %v3959_v7 = vadd.f32 %v3958_v35, %v8205_v1 }
0x1d6f   : > { %6866 = vrcp.f32 %v4017_v39  ;;  %v4029_v4 = vand.u32 2147483648, %v4017_v39  ;;  %vm4023_vm0 = vweird.f32 %v4017_v39  ;;  %v4027_v10 = vand.u32 2147483647, %v4017_v39 }
0x1d70   : > { %v4008_v28 = vadd.f32 %v4000_v61, %v3959_v7 }
0x1d71   : > { %v4030_v13 = vor.u32 1.1754944e-38, %v4029_v4  ;;  %vm4028_vm11 = vcmp.eq.f32.partialorder %v4027_v10, 8.507059e+37 }
0x1d72   : > { %v4012_v12 = vadd.f32 %v4008_v28, %v8216_v19 }
0x1d74   : > { %v6865_v29 = vpop.eup %6864 }
0x1d75   : > { %v6867_v0 = vpop.eup %6866  ;;  %v4036_v17 = vadd.f32 1.0, %v6865_v29  ;;  %v3961_v63 = vpop.f32.mrf.mxu3 }
0x1d76   : > { %v4019_v6 = vmul.f32 %v6867_v0, %v4017_v39  ;;  %v3962_v16 = vadd.f32 %v3961_v63, %v8208_v44  ;;  %vm4024_vm15 = vweird.f32 %v6867_v0 }
0x1d77   : > { %6868 = vrcp.f32 %v4036_v17  ;;  %v4048_v30 = vand.u32 2147483648, %v4036_v17  ;;  %vm4025_vm12 = vmor %vm4023_vm0, %vm4024_vm15  ;;  %v4046_v56 = vand.u32 2147483647, %v4036_v17  ;;  %vm4042_vm9 = vweird.f32 %v4036_v17 }
0x1d78   : > { %v4020_v18 = vsub.f32 1.0, %v4019_v6  ;;  %v4009_v23 = vadd.f32 %v4003_v5, %v3962_v16 }
0x1d79   : > { %v4049_v22 = vor.u32 1.1754944e-38, %v4048_v30  ;;  %vm4047_vm14 = vcmp.eq.f32.partialorder %v4046_v56, 8.507059e+37 }
0x1d7a   : > { %v4021_v8 = vmul.f32 %v6867_v0, %v4020_v18  ;;  %v4013_v50 = vadd.f32 %v4009_v23, %v8213_v21 }
0x1d7c   : > { %v6391_v24 = vmul.f32 -1.442695, %v4013_v50  ;;  %v4022_v26 = vadd.f32 %v6867_v0, %v4021_v8 }
0x1d7d   : > { %v6869_v9 = vpop.eup %6868 }
0x1d7e   : > { %v4038_v25 = vmul.f32 %v6869_v9, %v4036_v17  ;;  %6870 = vpow2.f32 %v6391_v24  ;;  %vm4043_vm3 = vweird.f32 %v6869_v9  ;;  %v4026_v32 = vsel %vm4025_vm12, %v6867_v0, %v4022_v26 }
0x1d7f   : > { %6872 = vtanh.f32 %v4012_v12  ;;  %vm4044_vm4 = vmor %vm4042_vm9, %vm4043_vm3  ;;  %v4031_v62 = vsel %vm4028_vm11, %v4030_v13, %v4026_v32 }
0x1d80   : > { %v4039_v20 = vsub.f32 1.0, %v4038_v25 }
0x1d82   : > { %v4040_v37 = vmul.f32 %v6869_v9, %v4039_v20 }
0x1d84   : > { %v6871_v33 = vpop.eup %6870  ;;  %v4041_v15 = vadd.f32 %v6869_v9, %v4040_v37 }
0x1d85   : > { %v4056_v42 = vadd.f32 1.0, %v6871_v33  ;;  %v6873_v51 = vpop.eup %6872 }
0x1d86   : > { %v4045_v46 = vsel %vm4044_vm4, %v6869_v9, %v4041_v15  ;;  %v4074_v43 = vmul.f32 %v6873_v51, %v4031_v62 }
0x1d87   : > { %6874 = vrcp.f32 %v4056_v42  ;;  %v4050_v54 = vsel %vm4047_vm14, %v4049_v22, %v4045_v46  ;;  %v4068_v61 = vand.u32 2147483648, %v4056_v42  ;;  %v4066_v59 = vand.u32 2147483647, %v4056_v42 }
0x1d88   : > { %v4073_v60 = vmul.f32 %v4072_v45, %v4050_v54  ;;  %vm4062_vm0 = vweird.f32 %v4056_v42 }
0x1d89   : > { %v4069_v35 = vor.u32 1.1754944e-38, %v4068_v61  ;;  %vm4067_vm3 = vcmp.eq.f32.partialorder %v4066_v59, 8.507059e+37 }
0x1d8a   : > { %v4075_v41 = vadd.f32 %v4074_v43, %v4073_v60 }
0x1d8c   : > { %4079 = vst.msk [vmem:[#allocation5] sm:$0xff] %vm1631_vm7, %v4075_v41  ;;  %6876 = vtanh.f32 %v4075_v41 }
0x1d8d   : > { %v6875_v47 = vpop.eup %6874 }
0x1d8e   : > { %v4058_v48 = vmul.f32 %v6875_v47, %v4056_v42  ;;  %vm4063_vm15 = vweird.f32 %v6875_v47 }
0x1d8f   : > { %vm4064_vm12 = vmor %vm4062_vm0, %vm4063_vm15 }
0x1d90   : > { %v4059_v14 = vsub.f32 1.0, %v4058_v48 }
0x1d92   : > { %v4060_v11 = vmul.f32 %v6875_v47, %v4059_v14  ;;  %v6877_v0 = vpop.eup %6876 }
0x1d94   : > { %v4061_v39 = vadd.f32 %v6875_v47, %v4060_v11 }
0x1d96   : > { %v4065_v29 = vsel %vm4064_vm12, %v6875_v47, %v4061_v39 }
0x1d97   : > { %v4070_v17 = vsel %vm4067_vm3, %v4069_v35, %v4065_v29 }
0x1d98   : > { %v4077_v7 = vmul.f32 %v6877_v0, %v4070_v17 }
0x1d9a   : > { %4082 = vperm.xlu1 %6638, %v4077_v7   ;;  %4078 = vst.msk [vmem:[#allocation4] sm:$0xff] %vm1631_vm7, %v4077_v7 }
0x1da1   : > { %v4120_v63 = vld [vmem:[#allocation4] sm:$0xff] }
0x1da2   : > { %4136 = vmatpush.msra.mxu2 %v4120_v63 }
0x1da3   : > { %6396 = vmatmul.msk.f32.vlgmr.msra.gmra.mxu2 %vm1635_vm6, %v8149_v27 }
0x1dab   : > { %6397 = vmatmul.msk.f32.gmra.mxu2 %vm1635_vm6, %v8154_v31 }
0x1db3   : > { %6398 = vmatmul.msk.f32.gmra.mxu2 %vm1635_vm6, %v8159_v34 }
0x1dbb   : > { %6399 = vmatmul.msk.f32.gmra.mxu2 %vm1635_vm6, %v8167_v57 }
0x1e0c   : > { %v4083_v5 = vpop.permute.xlu1 %4082 }
0x1e0d   : > { %v4085_v6 = vmul.f32 %v4083_v5, %v8144_v55 }
0x1e0f   : > { %4086 = vst.msk [vmem:[#allocation3] sm:$0xff] %vm1635_vm6, %v4085_v6 }
0x1e16   : > { %v8232_v16 = vld [vmem:[#allocation3] sm:$0xff] }
0x1e17   : > { %v4088_v18 = vsel %vm1804_vm8, %v8232_v16, -inf }
0x1e18   : > { %4089 = vmax.xlane.f32.xlu2 %v4088_v18 }
0x1e26   : > { %v4138_v55 = vpop.f32.mrf.mxu2 }
0x1e2e   : > { %v4141_v24 = vpop.f32.mrf.mxu2 }
0x1e36   : > { %v4144_v10 = vpop.f32.mrf.mxu2 }
0x1e3e   : > { %v4147_v42 = vpop.f32.mrf.mxu2 }
0x1e8b   : > { %v4090_v23 = vpop.xlane.xlu2 %4089 }
0x1e8c   : > { %4106 = vmatpush.msra.mxu1 %v4090_v23 }
0x1e8d   : > { %6392 = vmatmul.msk.f32.vlgmr.msra.gmra.mxu1 %vm1635_vm6, %v8164_v36 }
0x1e95   : > { %6393 = vmatmul.msk.f32.gmra.mxu1 %vm1635_vm6, %v8174_v2 }
0x1e9d   : > { %6394 = vmatmul.msk.f32.gmra.mxu1 %vm1635_vm6, %v8179_v49 }
0x1ea5   : > { %6395 = vmatmul.msk.f32.gmra.mxu1 %vm1635_vm6, %v8184_v38 }
0x1f0a   : > { %v4108_v28 = vpop.f32.mrf.mxu1 }
0x1f0b   : > { %v4109_v8 = vadd.f32 %v4108_v28, %v8189_v40 }
0x1f0d   : > { %v4150_v50 = vadd.f32 %v4138_v55, %v4109_v8 }
0x1f0f   : > { %v4154_v9 = vadd.f32 %v4150_v50, %v8193_v3 }
0x1f11   : > { %v6400_v12 = vmul.f32 -1.442695, %v4154_v9 }
0x1f12   : > { %v4111_v25 = vpop.f32.mrf.mxu1 }
0x1f13   : > { %6878 = vpow2.f32 %v6400_v12  ;;  %v4112_v26 = vadd.f32 %v4111_v25, %v8197_v58 }
0x1f15   : > { %v4151_v4 = vadd.f32 %v4141_v24, %v4112_v26  ;;  %v4216_v24 = vld [vmem:[#allocation5] sm:$0xff] }
0x1f17   : > { %v4155_v20 = vadd.f32 %v4151_v4, %v8201_v53 }
0x1f19   : > { %v6879_v30 = vpop.eup %6878  ;;  %v6401_v37 = vmul.f32 -1.442695, %v4155_v20 }
0x1f1a   : > { %v4161_v32 = vadd.f32 1.0, %v6879_v30  ;;  %v4114_v56 = vpop.f32.mrf.mxu1 }
0x1f1b   : > { %6880 = vpow2.f32 %v6401_v37  ;;  %v4115_v22 = vadd.f32 %v4114_v56, %v8205_v1 }
0x1f1c   : > { %6882 = vrcp.f32 %v4161_v32  ;;  %v4173_v59 = vand.u32 2147483648, %v4161_v32  ;;  %vm4167_vm11 = vweird.f32 %v4161_v32  ;;  %v4171_v35 = vand.u32 2147483647, %v4161_v32 }
0x1f1d   : > { %v4152_v43 = vadd.f32 %v4144_v10, %v4115_v22 }
0x1f1e   : > { %v4174_v63 = vor.u32 1.1754944e-38, %v4173_v59  ;;  %vm4172_vm0 = vcmp.eq.f32.partialorder %v4171_v35, 8.507059e+37 }
0x1f1f   : > { %v4156_v14 = vadd.f32 %v4152_v43, %v8216_v19 }
0x1f21   : > { %v6881_v13 = vpop.eup %6880 }
0x1f22   : > { %v6883_v33 = vpop.eup %6882  ;;  %v4180_v15 = vadd.f32 1.0, %v6881_v13  ;;  %v4117_v62 = vpop.f32.mrf.mxu1 }
0x1f23   : > { %v4163_v45 = vmul.f32 %v6883_v33, %v4161_v32  ;;  %v4118_v46 = vadd.f32 %v4117_v62, %v8208_v44  ;;  %vm4168_vm9 = vweird.f32 %v6883_v33 }
0x1f24   : > { %6884 = vrcp.f32 %v4180_v15  ;;  %v4192_v29 = vand.u32 2147483648, %v4180_v15  ;;  %vm4169_vm4 = vmor %vm4167_vm11, %vm4168_vm9  ;;  %v4190_v7 = vand.u32 2147483647, %v4180_v15  ;;  %vm4186_vm15 = vweird.f32 %v4180_v15 }
0x1f25   : > { %v4164_v51 = vsub.f32 1.0, %v4163_v45  ;;  %v4153_v54 = vadd.f32 %v4147_v42, %v4118_v46 }
0x1f26   : > { %v4193_v23 = vor.u32 1.1754944e-38, %v4192_v29  ;;  %vm4191_vm3 = vcmp.eq.f32.partialorder %v4190_v7, 8.507059e+37 }
0x1f27   : > { %v4165_v60 = vmul.f32 %v6883_v33, %v4164_v51  ;;  %v4157_v41 = vadd.f32 %v4153_v54, %v8213_v21 }
0x1f29   : > { %v6402_v47 = vmul.f32 -1.442695, %v4157_v41  ;;  %v4166_v11 = vadd.f32 %v6883_v33, %v4165_v60 }
0x1f2a   : > { %v6885_v48 = vpop.eup %6884 }
0x1f2b   : > { %v4182_v61 = vmul.f32 %v6885_v48, %v4180_v15  ;;  %6886 = vpow2.f32 %v6402_v47  ;;  %v4170_v17 = vsel %vm4169_vm4, %v6883_v33, %v4166_v11  ;;  %vm4187_vm14 = vweird.f32 %v6885_v48 }
0x1f2c   : > { %6888 = vtanh.f32 %v4156_v14  ;;  %v4175_v18 = vsel %vm4172_vm0, %v4174_v63, %v4170_v17  ;;  %vm4188_vm12 = vmor %vm4186_vm15, %vm4187_vm14 }
0x1f2d   : > { %v4183_v39 = vsub.f32 1.0, %v4182_v61 }
0x1f2f   : > { %v4184_v0 = vmul.f32 %v6885_v48, %v4183_v39 }
0x1f31   : > { %v6887_v5 = vpop.eup %6886  ;;  %v4185_v6 = vadd.f32 %v6885_v48, %v4184_v0 }
0x1f32   : > { %v4200_v55 = vadd.f32 1.0, %v6887_v5  ;;  %v6889_v8 = vpop.eup %6888 }
0x1f33   : > { %v4189_v28 = vsel %vm4188_vm12, %v6885_v48, %v4185_v6  ;;  %v4218_v12 = vmul.f32 %v6889_v8, %v4175_v18 }
0x1f34   : > { %v4194_v50 = vsel %vm4191_vm3, %v4193_v23, %v4189_v28  ;;  %6890 = vrcp.f32 %v4200_v55  ;;  %v4212_v10 = vand.u32 2147483648, %v4200_v55  ;;  %v4210_v37 = vand.u32 2147483647, %v4200_v55 }
0x1f35   : > { %v4217_v9 = vmul.f32 %v4216_v24, %v4194_v50  ;;  %vm4206_vm11 = vweird.f32 %v4200_v55 }
0x1f36   : > { %v4213_v56 = vor.u32 1.1754944e-38, %v4212_v10  ;;  %vm4211_vm14 = vcmp.eq.f32.partialorder %v4210_v37, 8.507059e+37 }
0x1f37   : > { %v4219_v25 = vadd.f32 %v4218_v12, %v4217_v9 }
0x1f39   : > { %4223 = vst.msk [vmem:[#allocation5] sm:$0xff] %vm1631_vm7, %v4219_v25  ;;  %6892 = vtanh.f32 %v4219_v25 }
0x1f3a   : > { %v6891_v26 = vpop.eup %6890 }
0x1f3b   : > { %v4202_v4 = vmul.f32 %v6891_v26, %v4200_v55  ;;  %vm4207_vm9 = vweird.f32 %v6891_v26 }
0x1f3c   : > { %vm4208_vm4 = vmor %vm4206_vm11, %vm4207_vm9 }
0x1f3d   : > { %v4203_v20 = vsub.f32 1.0, %v4202_v4 }
0x1f3f   : > { %v4204_v30 = vmul.f32 %v6891_v26, %v4203_v20  ;;  %v6893_v33 = vpop.eup %6892 }
0x1f41   : > { %v4205_v32 = vadd.f32 %v6891_v26, %v4204_v30 }
0x1f43   : > { %v4209_v13 = vsel %vm4208_vm4, %v6891_v26, %v4205_v32 }
0x1f44   : > { %v4214_v15 = vsel %vm4211_vm14, %v4213_v56, %v4209_v13 }
0x1f45   : > { %v4221_v22 = vmul.f32 %v6893_v33, %v4214_v15 }
0x1f47   : > { %4226 = vperm.xlu1 %6638, %v4221_v22   ;;  %4222 = vst.msk [vmem:[#allocation4] sm:$0xff] %vm1631_vm7, %v4221_v22 }
0x1f4e   : > { %v4264_v62 = vld [vmem:[#allocation4] sm:$0xff] }
0x1f4f   : > { %4280 = vmatpush.msra.mxu0 %v4264_v62 }
0x1f50   : > { %6407 = vmatmul.msk.f32.vlgmr.msra.gmra.mxu0 %vm1635_vm6, %v8149_v27 }
0x1f58   : > { %6408 = vmatmul.msk.f32.gmra.mxu0 %vm1635_vm6, %v8154_v31 }
0x1f60   : > { %6409 = vmatmul.msk.f32.gmra.mxu0 %vm1635_vm6, %v8159_v34 }
0x1f68   : > { %6410 = vmatmul.msk.f32.gmra.mxu0 %vm1635_vm6, %v8167_v57 }
0x1fb9   : > { %v4227_v42 = vpop.permute.xlu1 %4226 }
0x1fba   : > { %v4229_v45 = vmul.f32 %v4227_v42, %v8232_v16 }
0x1fbc   : > { %4230 = vst.msk [vmem:[#allocation3] sm:$0xff] %vm1804_vm8, %v4229_v45 }
0x1fc3   : > { %v8264_v46 = vld [vmem:[#allocation3] sm:$0xff] }
0x1fc4   : > { %v4232_v51 = vsel %vm1949_vm10, %v8264_v46, -inf }
0x1fc5   : > { %4233 = vmax.xlane.f32.xlu1 %v4232_v51 }
0x1fcd   : > { %v4282_v16 = vpop.f32.mrf.mxu0 }
0x1fd5   : > { %v4285_v47 = vpop.f32.mrf.mxu0 }
0x1fdd   : > { %v4288_v35 = vpop.f32.mrf.mxu0 }
0x1fe5   : > { %v4291_v55 = vpop.f32.mrf.mxu0 }
0x2038   : > { %v4234_v54 = vpop.xlane.xlu1 %4233 }
0x2039   : > { %4250 = vmatpush.msrb.mxu3 %v4234_v54 }
0x203a   : > { %6403 = vmatmul.msk.f32.vlgmr.msrb.gmra.mxu3 %vm1635_vm6, %v8164_v36 }
0x2042   : > { %6404 = vmatmul.msk.f32.gmra.mxu3 %vm1635_vm6, %v8174_v2 }
0x204a   : > { %6405 = vmatmul.msk.f32.gmra.mxu3 %vm1635_vm6, %v8179_v49 }
0x2052   : > { %6406 = vmatmul.msk.f32.gmra.mxu3 %vm1635_vm6, %v8184_v38 }
0x20bd   : > { %v4252_v43 = vpop.f32.mrf.mxu3 }
0x20be   : > { %v4253_v60 = vadd.f32 %v4252_v43, %v8189_v40 }
0x20c0   : > { %v4294_v41 = vadd.f32 %v4282_v16, %v4253_v60 }
0x20c2   : > { %v4298_v48 = vadd.f32 %v4294_v41, %v8193_v3 }
0x20c4   : > { %v6411_v14 = vmul.f32 -1.442695, %v4298_v48 }
0x20c5   : > { %v4255_v61 = vpop.f32.mrf.mxu3 }
0x20c6   : > { %6894 = vpow2.f32 %v6411_v14  ;;  %v4256_v11 = vadd.f32 %v4255_v61, %v8197_v58 }
0x20c8   : > { %v4295_v59 = vadd.f32 %v4285_v47, %v4256_v11  ;;  %v4360_v47 = vld [vmem:[#allocation5] sm:$0xff] }
0x20ca   : > { %v4299_v39 = vadd.f32 %v4295_v59, %v8201_v53 }
0x20cc   : > { %v6895_v29 = vpop.eup %6894  ;;  %v6412_v0 = vmul.f32 -1.442695, %v4299_v39 }
0x20cd   : > { %v4305_v17 = vadd.f32 1.0, %v6895_v29  ;;  %v4258_v7 = vpop.f32.mrf.mxu3 }
0x20ce   : > { %6896 = vpow2.f32 %v6412_v0  ;;  %v4259_v18 = vadd.f32 %v4258_v7, %v8205_v1 }
0x20cf   : > { %6898 = vrcp.f32 %v4305_v17  ;;  %v4317_v37 = vand.u32 2147483648, %v4305_v17  ;;  %vm4311_vm0 = vweird.f32 %v4305_v17  ;;  %v4315_v56 = vand.u32 2147483647, %v4305_v17 }
0x20d0   : > { %v4296_v9 = vadd.f32 %v4288_v35, %v4259_v18 }
0x20d1   : > { %v4318_v62 = vor.u32 1.1754944e-38, %v4317_v37  ;;  %vm4316_vm11 = vcmp.eq.f32.partialorder %v4315_v56, 8.507059e+37 }
0x20d2   : > { %v4300_v20 = vadd.f32 %v4296_v9, %v8216_v19 }
0x20d4   : > { %v6897_v63 = vpop.eup %6896 }
0x20d5   : > { %v6899_v5 = vpop.eup %6898  ;;  %v4324_v6 = vadd.f32 1.0, %v6897_v63  ;;  %v4261_v23 = vpop.f32.mrf.mxu3 }
0x20d6   : > { %v4307_v28 = vmul.f32 %v6899_v5, %v4305_v17  ;;  %v4262_v8 = vadd.f32 %v4261_v23, %v8208_v44  ;;  %vm4312_vm15 = vweird.f32 %v6899_v5  ;;  %v4522_v23 = vld [vmem:[%s8892_s3] sm:$0xff]  ;;  %s8893_s3 = sld [smem:[#allocation34_spill]] }
0x20d7   : > { %6900 = vrcp.f32 %v4324_v6  ;;  %v4336_v13 = vand.u32 2147483648, %v4324_v6  ;;  %vm4313_vm12 = vmor %vm4311_vm0, %vm4312_vm15  ;;  %v4334_v22 = vand.u32 2147483647, %v4324_v6  ;;  %vm4330_vm9 = vweird.f32 %v4324_v6 }
0x20d8   : > { %v4308_v50 = vsub.f32 1.0, %v4307_v28  ;;  %v4297_v24 = vadd.f32 %v4291_v55, %v4262_v8 }
0x20d9   : > { %v4337_v51 = vor.u32 1.1754944e-38, %v4336_v13  ;;  %vm4335_vm14 = vcmp.eq.f32.partialorder %v4334_v22, 8.507059e+37 }
0x20da   : > { %v4309_v12 = vmul.f32 %v6899_v5, %v4308_v50  ;;  %v4301_v25 = vadd.f32 %v4297_v24, %v8213_v21 }
0x20dc   : > { %v6413_v26 = vmul.f32 -1.442695, %v4301_v25  ;;  %v4310_v30 = vadd.f32 %v6899_v5, %v4309_v12 }
0x20dd   : > { %v6901_v4 = vpop.eup %6900 }
0x20de   : > { %v4326_v10 = vmul.f32 %v6901_v4, %v4324_v6  ;;  %6902 = vpow2.f32 %v6413_v26  ;;  %vm4331_vm3 = vweird.f32 %v6901_v4  ;;  %v4314_v15 = vsel %vm4313_vm12, %v6899_v5, %v4310_v30 }
0x20df   : > { %6904 = vtanh.f32 %v4300_v20  ;;  %vm4332_vm4 = vmor %vm4330_vm9, %vm4331_vm3  ;;  %v4319_v54 = vsel %vm4316_vm11, %v4318_v62, %v4314_v15 }
0x20e0   : > { %v4327_v32 = vsub.f32 1.0, %v4326_v10 }
0x20e2   : > { %v4328_v33 = vmul.f32 %v6901_v4, %v4327_v32 }
0x20e4   : > { %v6903_v42 = vpop.eup %6902  ;;  %v4329_v45 = vadd.f32 %v6901_v4, %v4328_v33 }
0x20e5   : > { %v4344_v16 = vadd.f32 1.0, %v6903_v42  ;;  %v6905_v60 = vpop.eup %6904 }
0x20e6   : > { %v4333_v43 = vsel %vm4332_vm4, %v6901_v4, %v4329_v45  ;;  %v4362_v14 = vmul.f32 %v6905_v60, %v4319_v54 }
0x20e7   : > { %v4338_v41 = vsel %vm4335_vm14, %v4337_v51, %v4333_v43  ;;  %6906 = vrcp.f32 %v4344_v16  ;;  %v4356_v35 = vand.u32 2147483648, %v4344_v16  ;;  %v4354_v0 = vand.u32 2147483647, %v4344_v16 }
0x20e8   : > { %v4361_v48 = vmul.f32 %v4360_v47, %v4338_v41  ;;  %vm4350_vm0 = vweird.f32 %v4344_v16 }
0x20e9   : > { %v4357_v7 = vor.u32 1.1754944e-38, %v4356_v35  ;;  %vm4355_vm3 = vcmp.eq.f32.partialorder %v4354_v0, 8.507059e+37 }
0x20ea   : > { %v4363_v61 = vadd.f32 %v4362_v14, %v4361_v48 }
0x20ec   : > { %4367 = vst.msk [vmem:[#allocation5] sm:$0xff] %vm1631_vm7, %v4363_v61  ;;  %6908 = vtanh.f32 %v4363_v61 }
0x20ed   : > { %v6907_v11 = vpop.eup %6906 }
0x20ee   : > { %v4346_v59 = vmul.f32 %v6907_v11, %v4344_v16  ;;  %vm4351_vm15 = vweird.f32 %v6907_v11 }
0x20ef   : > { %vm4352_vm12 = vmor %vm4350_vm0, %vm4351_vm15 }
0x20f0   : > { %v4347_v39 = vsub.f32 1.0, %v4346_v59 }
0x20f2   : > { %v4348_v29 = vmul.f32 %v6907_v11, %v4347_v39  ;;  %v6909_v5 = vpop.eup %6908 }
0x20f4   : > { %v4349_v17 = vadd.f32 %v6907_v11, %v4348_v29 }
0x20f6   : > { %v4353_v63 = vsel %vm4352_vm12, %v6907_v11, %v4349_v17  ;;  %v4504_v17 = vld [vmem:[#allocation5] sm:$0xff] }
0x20f7   : > { %v4358_v6 = vsel %vm4355_vm3, %v4357_v7, %v4353_v63 }
0x20f8   : > { %v4365_v18 = vmul.f32 %v6909_v5, %v4358_v6 }
0x20fa   : > { %4370 = vperm.xlu0 %6637, %v4365_v18   ;;  %4366 = vst.msk [vmem:[#allocation4] sm:$0xff] %vm1631_vm7, %v4365_v18 }
0x2101   : > { %v4408_v55 = vld [vmem:[#allocation4] sm:$0xff] }
0x2102   : > { %4525 = vperm.xlu0 %6637, %v4522_v23   ;;  %4424 = vmatpush.msrb.mxu2 %v4408_v55 }
0x2103   : > { %6418 = vmatmul.msk.f32.vlgmr.msrb.gmra.mxu2 %vm1635_vm6, %v8149_v27 }
0x210b   : > { %6419 = vmatmul.msk.f32.gmra.mxu2 %vm1635_vm6, %v8154_v31 }
0x2113   : > { %6420 = vmatmul.msk.f32.gmra.mxu2 %vm1635_vm6, %v8159_v34 }
0x211b   : > { %6421 = vmatmul.msk.f32.gmra.mxu2 %vm1635_vm6, %v8167_v57 }
0x216c   : > { %v4371_v28 = vpop.permute.xlu0 %4370 }
0x216d   : > { %v4373_v8 = vmul.f32 %v4371_v28, %v8264_v46 }
0x216f   : > { %4374 = vst.msk [vmem:[#allocation3] sm:$0xff] %vm1949_vm10, %v4373_v8 }
0x2176   : > { %v8297_v50 = vld [vmem:[#allocation3] sm:$0xff] }
0x2177   : > { %v4376_v24 = vsel %vm2094_vm13, %v8297_v50, -inf }
0x2178   : > { %4377 = vmax.xlane.f32.xlu2 %v4376_v24 }
0x2186   : > { %v4426_v31 = vpop.f32.mrf.mxu2 }
0x218e   : > { %v4429_v9 = vpop.f32.mrf.mxu2 }
0x21eb   : > { %v4378_v27 = vpop.xlane.xlu2 %4377 }
0x21ec   : > { %4394 = vmatpush.msrb.mxu1 %v4378_v27 }
0x21ed   : > { %6414 = vmatmul.msk.f32.vlgmr.msrb.gmra.mxu1 %vm1635_vm6, %v8164_v36 }
0x21f5   : > { %6415 = vmatmul.msk.f32.gmra.mxu1 %vm1635_vm6, %v8174_v2 }
0x21fd   : > { %6416 = vmatmul.msk.f32.gmra.mxu1 %vm1635_vm6, %v8179_v49  ;;  %v4432_v49 = vpop.f32.mrf.mxu2 }
0x2205   : > { %6417 = vmatmul.msk.f32.gmra.mxu1 %vm1635_vm6, %v8184_v38  ;;  %v4435_v13 = vpop.f32.mrf.mxu2 }
0x226a   : > { %v4396_v34 = vpop.f32.mrf.mxu1 }
0x226b   : > { %v4397_v57 = vadd.f32 %v4396_v34, %v8189_v40 }
0x226d   : > { %v4438_v46 = vadd.f32 %v4426_v31, %v4397_v57 }
0x226f   : > { %v4442_v12 = vadd.f32 %v4438_v46, %v8193_v3 }
0x2271   : > { %v6422_v25 = vmul.f32 -1.442695, %v4442_v12  ;;  %v6643_v12 = vld [vmem:[%s8862_s4] ss:$0 sm:$0xff] }
0x2272   : > { %v4399_v26 = vpop.f32.mrf.mxu1 }
0x2273   : > { %6910 = vpow2.f32 %v6422_v25  ;;  %v4400_v36 = vadd.f32 %v4399_v26, %v8197_v58 }
0x2275   : > { %v4439_v2 = vadd.f32 %v4429_v9, %v4400_v36  ;;  %v4593_v9 = vld [vmem:[%s8893_s3] sm:$0xff] }
0x2277   : > { %v4443_v4 = vadd.f32 %v4439_v2, %v8201_v53  ;;  %v4521_v2 = vld [vmem:[%s8894_s5] sm:$0xff]  ;;  %s8897_s5 = smov 4  }
0x2279   : > { %v6911_v20 = vpop.eup %6910  ;;  %v6423_v10 = vmul.f32 -1.442695, %v4443_v4 }
0x227a   : > { %v4449_v38 = vadd.f32 1.0, %v6911_v20  ;;  %v4402_v30 = vpop.f32.mrf.mxu1 }
0x227b   : > { %6912 = vpow2.f32 %v6423_v10  ;;  %v4403_v3 = vadd.f32 %v4402_v30, %v8205_v1  ;;  %v4580_v10 = vld [vmem:[%s7825_s12] sm:$0x1] }
0x227c   : > { %6914 = vrcp.f32 %v4449_v38  ;;  %v4461_v1 = vand.u32 2147483648, %v4449_v38  ;;  %vm4455_vm11 = vweird.f32 %v4449_v38  ;;  %v4459_v41 = vand.u32 2147483647, %v4449_v38 }
0x227d   : > { %v4440_v22 = vadd.f32 %v4432_v49, %v4403_v3 }
0x227e   : > { %vm4460_vm0 = vcmp.eq.f32.partialorder %v4459_v41, 8.507059e+37 }
0x227f   : > { %v4444_v54 = vadd.f32 %v4440_v22, %v8216_v19 }
0x2281   : > { %v6913_v40 = vpop.eup %6912 }
0x2282   : > { %v6915_v37 = vpop.eup %6914  ;;  %v4468_v32 = vadd.f32 1.0, %v6913_v40  ;;  %v4405_v56 = vpop.f32.mrf.mxu1 }
0x2283   : > { %v4451_v33 = vmul.f32 %v6915_v37, %v4449_v38  ;;  %v4406_v58 = vadd.f32 %v4405_v56, %v8208_v44  ;;  %vm4456_vm9 = vweird.f32 %v6915_v37  ;;  %v4526_v38 = vpop.permute.xlu0 %4525  ;;  %v4594_v56 = vld [vmem:[%s8893_s3 + $0x8] sm:$0xff]  ;;  %s8898_s3 = sld [smem:[#allocation35_spill]] }
0x2284   : > { %6916 = vrcp.f32 %v4468_v32  ;;  %v4480_v44 = vand.u32 2147483648, %v4468_v32  ;;  %vm4457_vm4 = vmor %vm4455_vm11, %vm4456_vm9  ;;  %v4478_v14 = vand.u32 2147483647, %v4468_v32  ;;  %vm4474_vm15 = vweird.f32 %v4468_v32 }
0x2285   : > { %v4452_v15 = vsub.f32 1.0, %v4451_v33  ;;  %v4441_v53 = vadd.f32 %v4435_v13, %v4406_v58 }
0x2286   : > { %v4481_v11 = vor.u32 1.1754944e-38, %v4480_v44  ;;  %vm4479_vm3 = vcmp.eq.f32.partialorder %v4478_v14, 8.507059e+37 }
0x2287   : > { %v4453_v62 = vmul.f32 %v6915_v37, %v4452_v15  ;;  %v4445_v42 = vadd.f32 %v4441_v53, %v8213_v21  ;;  %v4462_v21 = vor.u32 1.1754944e-38, %v4461_v1 }
0x2289   : > { %v6424_v45 = vmul.f32 -1.442695, %v4445_v42  ;;  %v4454_v43 = vadd.f32 %v6915_v37, %v4453_v62 }
0x228a   : > { %v6917_v51 = vpop.eup %6916 }
0x228b   : > { %v4470_v16 = vmul.f32 %v6917_v51, %v4468_v32  ;;  %6918 = vpow2.f32 %v6424_v45  ;;  %vm4475_vm14 = vweird.f32 %v6917_v51  ;;  %v4458_v48 = vsel %vm4457_vm4, %v6915_v37, %v4454_v43  ;;  %v7067_v37 = vld [vmem:[#allocation2] sm:$0xff] }
0x228c   : > { %6920 = vtanh.f32 %v4444_v54  ;;  %vm4476_vm12 = vmor %vm4474_vm15, %vm4475_vm14  ;;  %v4463_v59 = vsel %vm4460_vm0, %v4462_v21, %v4458_v48 }
0x228d   : > { %v4471_v60 = vsub.f32 1.0, %v4470_v16 }
0x228f   : > { %v4472_v47 = vmul.f32 %v6917_v51, %v4471_v60 }
0x2291   : > { %v6919_v61 = vpop.eup %6918  ;;  %v4473_v19 = vadd.f32 %v6917_v51, %v4472_v47 }
0x2292   : > { %v4488_v39 = vadd.f32 1.0, %v6919_v61  ;;  %v6921_v29 = vpop.eup %6920 }
0x2293   : > { %v4477_v35 = vsel %vm4476_vm12, %v6917_v51, %v4473_v19  ;;  %v4506_v63 = vmul.f32 %v6921_v29, %v4463_v59 }
0x2294   : > { %v4482_v0 = vsel %vm4479_vm3, %v4481_v11, %v4477_v35  ;;  %6922 = vrcp.f32 %v4488_v39  ;;  %v4500_v55 = vand.u32 2147483648, %v4488_v39  ;;  %v4498_v8 = vand.u32 2147483647, %v4488_v39 }
0x2295   : > { %v4505_v7 = vmul.f32 %v4504_v17, %v4482_v0  ;;  %vm4494_vm11 = vweird.f32 %v4488_v39 }
0x2296   : > { %v4501_v27 = vor.u32 1.1754944e-38, %v4500_v55  ;;  %vm4499_vm14 = vcmp.eq.f32.partialorder %v4498_v8, 8.507059e+37  ;;  %v8379_v55 = vld [vmem:[%s8898_s3 + $0x10] sm:$0xff] }
0x2297   : > { %v4507_v5 = vadd.f32 %v4506_v63, %v4505_v7 }
0x2299   : > { %4511 = vst.msk [vmem:[#allocation5] sm:$0xff] %vm1631_vm7, %v4507_v5  ;;  %6924 = vtanh.f32 %v4507_v5  ;;  %v8364_v5 = vld [vmem:[%s8898_s3] sm:$0xff] }
0x229a   : > { %v6923_v6 = vpop.eup %6922  ;;  %4678 = vst.msk [vmem:[#allocation5] sm:$0xff] %vm1631_vm7, %v7191_v52 }
0x229b   : > { %v4490_v18 = vmul.f32 %v6923_v6, %v4488_v39  ;;  %vm4495_vm9 = vweird.f32 %v6923_v6 }
0x229c   : > { %vm4496_vm4 = vmor %vm4494_vm11, %vm4495_vm9  ;;  %vm8899_vm9 = vcmask 31744  }
0x229d   : > { %v4491_v23 = vsub.f32 1.0, %v4490_v18 }
0x229f   : > { %v4492_v28 = vmul.f32 %v6923_v6, %v4491_v23  ;;  %v6925_v34 = vpop.eup %6924  ;;  %v8374_v23 = vld [vmem:[%s8898_s3 + $0x8] sm:$0xff] }
0x22a1   : > { %v4493_v24 = vadd.f32 %v6923_v6, %v4492_v28  ;;  %v8384_v28 = vld [vmem:[%s8898_s3 + $0x18] sm:$0xff]  ;;  %s8902_s3 = sld [smem:[#allocation40_spill]] }
0x22a3   : > { %v4497_v31 = vsel %vm4496_vm4, %v6923_v6, %v4493_v24 }
0x22a4   : > { %v4502_v57 = vsel %vm4499_vm14, %v4501_v27, %v4497_v31 }
0x22a5   : > { %v4509_v46 = vmul.f32 %v6925_v34, %v4502_v57 }
0x22a7   : > { %4514 = vperm.xlu2 %6636, %v4509_v46   ;;  %4510 = vst.msk [vmem:[#allocation4] sm:$0xff] %vm1631_vm7, %v4509_v46 }
0x22a8   : > { %4677 = vst.msk [vmem:[#allocation4] sm:$0xff] %vm1631_vm7, %v7191_v52 }
0x22af   : > { %4597 = vperm.xlu2 %6636, %v4593_v9   ;;  %v4724_v0 = vld [vmem:[#allocation4] sm:$0xff] }
0x22b7   : > { %4556 = vrot.lane.b32.xlu2 %v6643_v12, %s7197_s6  ;;  %s8895_s6 = sld [smem:[#allocation33_spill]] }
0x22bd   : > { %v4591_v58 = vld [vmem:[%s8895_s6] sm:$0xff]  ;;  %v4592_v15 = vld [vmem:[%s8895_s6 + $0x8] sm:$0xff]  ;;  %s8901_s6 = sld [smem:[#allocation38_spill]] }
0x22c3   : > { %v8393_v34 = vld [vmem:[%s8901_s6] sm:$0xff] }
0x2301   : > { %v4515_v25 = vpop.permute.xlu2 %4514 }
0x2302   : > { %v4517_v26 = vmul.f32 %v4515_v25, %v8297_v50 }
0x2304   : > { %4518 = vst.msk [vmem:[#allocation3] sm:$0xff] %vm2094_vm13, %v4517_v26 }
0x2309   : > { %v4598_v36 = vpop.permute.xlu2 %4597 }
0x230b   : > { %v4519_v4 = vld [vmem:[#allocation3] sm:$0xff] }
0x230c   : > { %4546 = vmatpush.msra.mxu3 %v4519_v4  ;;  %4575 = vmatpush.msrb.mxu0 %v4519_v4 }
0x230d   : > { %6425 = vmatmul.msk.f32.vlgmr.msra.gmra.mxu3 %vm1635_vm6, %v4521_v2  ;;  %v8401_v2 = vld [vmem:[%s8901_s6 + $0x8] sm:$0xff] }
0x230e   : > { %4752 = vmatpush.msra.mxu0 %v4724_v0 }
0x2311   : > { %v4557_v49 = vpop.permute.xlu2 %4556 }
0x2312   : > { %6426 = vmatmul.msk.f32.vlgmr.msrb.gmra.mxu0 %vm1635_vm6, %v4557_v49 }
0x238f   : > { %v4577_v20 = vpop.f32.mrf.mxu0 }
0x2390   : > { %v4581_v30 = vadd.f32 %v4580_v10, %v4577_v20  ;;  %v4548_v50 = vpop.f32.mrf.mxu3 }
0x2391   : > { %v4549_v40 = vadd.f32 %v4548_v50, %v4526_v38 }
0x2392   : > { %4582 = vst.msk [vmem:[%s7825_s12] sm:$0x1] %vm2299_vm2, %v4581_v30 }
0x2393   : > { %v4551_v32 = vadd.f32 %v7067_v37, %v4549_v40 }
0x2395   : > { %4552 = vst.msk [vmem:[#allocation2] sm:$0xff] %vm1613_vm5, %v4551_v32 }
0x239c   : > { %v4583_v3 = vld [vmem:[#allocation2] sm:$0xff] }
0x239d   : > { %4585 = vrot.lane.b32.xlu0 %v4583_v3, %s8884_s7  ;;  %4588 = vrot.lane.b32.xlu1 %v4583_v3, %s8875_s2  ;;  %s8896_s7 = sld [smem:[#allocation36_spill]] }
0x23a3   : > { %v8349_v17 = vld [vmem:[%s8896_s7] sm:$0xff]  ;;  %v8354_v7 = vld [vmem:[%s8896_s7 + $0x8] sm:$0xff]  ;;  %v8359_v63 = vld [vmem:[%s8896_s7 + $0x10] sm:$0xff] }
0x23a4   : > { %6434 = vmatmul.msk.f32.vlgmr.msra.gmra.mxu0 %vm1635_vm6, %v8349_v17  ;;  %v8367_v18 = vld [vmem:[%s8896_s7 + $0x18] sm:$0xff] }
0x23a5   : > { %4602 = vperm.xlu0 %6637, %v4594_v56  }
0x23ac   : > { %6435 = vmatmul.msk.f32.gmra.mxu0 %vm1635_vm6, %v8354_v7 }
0x23b4   : > { %6436 = vmatmul.msk.f32.gmra.mxu0 %vm1635_vm6, %v8359_v63 }
0x23bc   : > { %6437 = vmatmul.msk.f32.gmra.mxu0 %vm1635_vm6, %v8367_v18 }
0x240f   : > { %v4589_v13 = vpop.permute.xlu1 %4588  ;;  %v4586_v33 = vpop.permute.xlu0 %4585 }
0x2410   : > { %4624 = vmatpush.msra.mxu1 %v4589_v13 }
0x2412   : > { %4625 = vmatpush.msra.mxu1 %v4586_v33 }
0x2414   : > { %4626 = vmatpush.msra.mxu1 %v4583_v3 }
0x2415   : > { %6427 = vmatmul.msk.f32.vlgmr.msra.gmra.mxu1 %vm2323_vm1, %v4591_v58 }
0x2417   : > { %v4603_v22 = vpop.permute.xlu0 %4602 }
0x241d   : > { %6428 = vmatmul.msk.f32.gmra.mxu1 %vm2323_vm1, %v4592_v15 }
0x2421   : > { %v4754_v8 = vpop.f32.mrf.mxu0 }
0x2429   : > { %v4757_v46 = vpop.f32.mrf.mxu0 }
0x2431   : > { %v4760_v20 = vpop.f32.mrf.mxu0 }
0x2439   : > { %v4763_v58 = vpop.f32.mrf.mxu0 }
0x2492   : > { %v4628_v53 = vpop.f32.mrf.mxu1 }
0x2493   : > { %v4629_v43 = vadd.f32 %v4628_v53, %v4598_v36 }
0x249a   : > { %v4631_v62 = vpop.f32.mrf.mxu1 }
0x249b   : > { %v4632_v42 = vadd.f32 %v4631_v62, %v4603_v22  ;;  %v8413_v22 = vld [vmem:[%s8901_s6 + $0x18] sm:$0xff] }
0x249d   : > { %v6429_v45 = vmul.f32 -1.442695, %v4632_v42 }
0x249f   : > { %6926 = vpow2.f32 %v6429_v45 }
0x24a5   : > { %v6927_v51 = vpop.eup %6926 }
0x24a6   : > { %v4638_v54 = vadd.f32 1.0, %v6927_v51  ;;  %v8416_v51 = vld [vmem:[%s8901_s6 + $0x10] sm:$0xff] }
0x24a8   : > { %6928 = vrcp.f32 %v4638_v54  ;;  %v4650_v41 = vand.u32 2147483648, %v4638_v54  ;;  %v4648_v47 = vand.u32 2147483647, %v4638_v54  ;;  %vm4644_vm0 = vweird.f32 %v4638_v54 }
0x24a9   : > { %6930 = vtanh.f32 %v4629_v43 }
0x24aa   : > { %v4651_v14 = vor.u32 1.1754944e-38, %v4650_v41  ;;  %vm4649_vm3 = vcmp.eq.f32.partialorder %v4648_v47, 8.507059e+37 }
0x24ae   : > { %v6929_v16 = vpop.eup %6928 }
0x24af   : > { %v4640_v1 = vmul.f32 %v6929_v16, %v4638_v54  ;;  %vm4645_vm15 = vweird.f32 %v6929_v16  ;;  %v6931_v61 = vpop.eup %6930 }
0x24b0   : > { %vm4646_vm12 = vmor %vm4644_vm0, %vm4645_vm15 }
0x24b1   : > { %v4641_v60 = vsub.f32 1.0, %v4640_v1 }
0x24b3   : > { %v4642_v44 = vmul.f32 %v6929_v16, %v4641_v60 }
0x24b5   : > { %v4643_v48 = vadd.f32 %v6929_v16, %v4642_v44 }
0x24b7   : > { %v4647_v21 = vsel %vm4646_vm12, %v6929_v16, %v4643_v48 }
0x24b8   : > { %v4652_v19 = vsel %vm4649_vm3, %v4651_v14, %v4647_v21 }
0x24b9   : > { %v4654_v11 = vmul.f32 %v6931_v61, %v4652_v19 }
0x24bb   : > { %4656 = vrot.lane.b32.xlu0 %v4654_v11, %s8897_s5  ;;  %s8900_s5 = sld [smem:[#allocation37_spill]] }
0x24c1   : > { %v8389_v24 = vld [vmem:[%s8900_s5] sm:$0xff]  ;;  %v8397_v12 = vld [vmem:[%s8900_s5 + $0x8] sm:$0xff]  ;;  %v8405_v40 = vld [vmem:[%s8900_s5 + $0x10] sm:$0xff] }
0x24c2   : > { %v8408_v37 = vld [vmem:[%s8900_s5 + $0x18] sm:$0xff]  ;;  %s8903_s5 = sld [smem:[#allocation42_spill]] }
0x252d   : > { %v4657_v59 = vpop.permute.xlu0 %4656 }
0x252e   : > { %v4659_v39 = vsel %vm8899_vm9, 0.0, %v4657_v59 }
0x252f   : > { %4660 = vst.msk [vmem:[#allocation3] sm:$0xff] %vm1613_vm5, %v4659_v39 }
0x2536   : > { %v8344_v35 = vld [vmem:[#allocation3] sm:$0xff] }
0x2537   : > { %v4680_v29 = vsel %vm1635_vm6, %v8344_v35, -inf }
0x2538   : > { %4681 = vmax.xlane.f32.xlu1 %v4680_v29 }
0x25ab   : > { %v4682_v6 = vpop.xlane.xlu1 %4681 }
0x25ac   : > { %4710 = vmatpush.msrb.mxu3 %v4682_v6 }
0x25ad   : > { %6430 = vmatmul.msk.f32.vlgmr.msrb.gmra.mxu3 %vm1635_vm6, %v8364_v5 }
0x25b5   : > { %6431 = vmatmul.msk.f32.gmra.mxu3 %vm1635_vm6, %v8374_v23 }
0x25bd   : > { %6432 = vmatmul.msk.f32.gmra.mxu3 %vm1635_vm6, %v8379_v55 }
0x25c5   : > { %6433 = vmatmul.msk.f32.gmra.mxu3 %vm1635_vm6, %v8384_v28 }
0x2630   : > { %v4712_v27 = vpop.f32.mrf.mxu3 }
0x2631   : > { %v4713_v31 = vadd.f32 %v4712_v27, %v8389_v24 }
0x2633   : > { %v4766_v57 = vadd.f32 %v4754_v8, %v4713_v31  ;;  %v4832_v8 = vld [vmem:[#allocation5] sm:$0xff] }
0x2635   : > { %v4770_v9 = vadd.f32 %v4766_v57, %v8393_v34 }
0x2637   : > { %v6438_v25 = vmul.f32 -1.442695, %v4770_v9 }
0x2638   : > { %v4715_v26 = vpop.f32.mrf.mxu3 }
0x2639   : > { %6932 = vpow2.f32 %v6438_v25  ;;  %v4716_v36 = vadd.f32 %v4715_v26, %v8397_v12 }
0x263b   : > { %v4767_v4 = vadd.f32 %v4757_v46, %v4716_v36 }
0x263d   : > { %v4771_v49 = vadd.f32 %v4767_v4, %v8401_v2 }
0x263f   : > { %v6933_v10 = vpop.eup %6932  ;;  %v6439_v38 = vmul.f32 -1.442695, %v4771_v49 }
0x2640   : > { %v4777_v30 = vadd.f32 1.0, %v6933_v10  ;;  %v4718_v50 = vpop.f32.mrf.mxu3 }
0x2641   : > { %6934 = vpow2.f32 %v6439_v38  ;;  %v4719_v13 = vadd.f32 %v4718_v50, %v8405_v40 }
0x2642   : > { %6936 = vrcp.f32 %v4777_v30  ;;  %v4789_v47 = vand.u32 2147483648, %v4777_v30  ;;  %vm4783_vm4 = vweird.f32 %v4777_v30  ;;  %v4787_v14 = vand.u32 2147483647, %v4777_v30 }
0x2643   : > { %v4768_v45 = vadd.f32 %v4760_v20, %v4719_v13 }
0x2644   : > { %v4790_v59 = vor.u32 1.1754944e-38, %v4789_v47  ;;  %vm4788_vm12 = vcmp.eq.f32.partialorder %v4787_v14, 8.507059e+37 }
0x2645   : > { %v4772_v60 = vadd.f32 %v4768_v45, %v8416_v51 }
0x2647   : > { %v6935_v32 = vpop.eup %6934 }
0x2648   : > { %v6937_v3 = vpop.eup %6936  ;;  %v4796_v56 = vadd.f32 1.0, %v6935_v32  ;;  %v4721_v33 = vpop.f32.mrf.mxu3 }
0x2649   : > { %v4779_v15 = vmul.f32 %v6937_v3, %v4777_v30  ;;  %v4722_v53 = vadd.f32 %v4721_v33, %v8408_v37  ;;  %vm4784_vm11 = vweird.f32 %v6937_v3 }
0x264a   : > { %6938 = vrcp.f32 %v4796_v56  ;;  %v4808_v21 = vand.u32 2147483648, %v4796_v56  ;;  %vm4785_vm14 = vmor %vm4783_vm4, %vm4784_vm11  ;;  %v4806_v11 = vand.u32 2147483647, %v4796_v56  ;;  %vm4802_vm0 = vweird.f32 %v4796_v56 }
0x264b   : > { %v4780_v62 = vsub.f32 1.0, %v4779_v15  ;;  %v4769_v42 = vadd.f32 %v4763_v58, %v4722_v53 }
0x264c   : > { %v4809_v0 = vor.u32 1.1754944e-38, %v4808_v21  ;;  %vm4807_vm9 = vcmp.eq.f32.partialorder %v4806_v11, 8.507059e+37 }
0x264d   : > { %v4781_v54 = vmul.f32 %v6937_v3, %v4780_v62  ;;  %v4773_v16 = vadd.f32 %v4769_v42, %v8413_v22 }
0x264f   : > { %v6440_v43 = vmul.f32 -1.442695, %v4773_v16  ;;  %v4782_v44 = vadd.f32 %v6937_v3, %v4781_v54 }
0x2650   : > { %v6939_v1 = vpop.eup %6938 }
0x2651   : > { %v4798_v41 = vmul.f32 %v6939_v1, %v4796_v56  ;;  %6940 = vpow2.f32 %v6440_v43  ;;  %vm4803_vm15 = vweird.f32 %v6939_v1  ;;  %v4786_v19 = vsel %vm4785_vm14, %v6937_v3, %v4782_v44 }
0x2652   : > { %6942 = vtanh.f32 %v4772_v60  ;;  %vm4804_vm3 = vmor %vm4802_vm0, %vm4803_vm15  ;;  %v4791_v6 = vsel %vm4788_vm12, %v4790_v59, %v4786_v19 }
0x2653   : > { %v4799_v48 = vsub.f32 1.0, %v4798_v41 }
0x2655   : > { %v4800_v61 = vmul.f32 %v6939_v1, %v4799_v48 }
0x2657   : > { %v6941_v39 = vpop.eup %6940  ;;  %v4801_v29 = vadd.f32 %v6939_v1, %v4800_v61 }
0x2658   : > { %v4816_v27 = vadd.f32 1.0, %v6941_v39  ;;  %v6943_v57 = vpop.eup %6942 }
0x2659   : > { %v4805_v31 = vsel %vm4804_vm3, %v6939_v1, %v4801_v29  ;;  %v4834_v25 = vmul.f32 %v6943_v57, %v4791_v6 }
0x265a   : > { %v4810_v46 = vsel %vm4807_vm9, %v4809_v0, %v4805_v31  ;;  %6944 = vrcp.f32 %v4816_v27  ;;  %v4828_v20 = vand.u32 2147483648, %v4816_v27  ;;  %v4826_v38 = vand.u32 2147483647, %v4816_v27 }
0x265b   : > { %v4833_v9 = vmul.f32 %v4832_v8, %v4810_v46  ;;  %vm4822_vm4 = vweird.f32 %v4816_v27 }
0x265c   : > { %v4829_v50 = vor.u32 1.1754944e-38, %v4828_v20  ;;  %vm4827_vm15 = vcmp.eq.f32.partialorder %v4826_v38, 8.507059e+37 }
0x265d   : > { %v4835_v26 = vadd.f32 %v4834_v25, %v4833_v9 }
0x265f   : > { %4839 = vst.msk [vmem:[#allocation5] sm:$0xff] %vm1631_vm7, %v4835_v26  ;;  %6946 = vtanh.f32 %v4835_v26 }
0x2660   : > { %v6945_v36 = vpop.eup %6944 }
0x2661   : > { %v4818_v4 = vmul.f32 %v6945_v36, %v4816_v27  ;;  %vm4823_vm11 = vweird.f32 %v6945_v36 }
0x2662   : > { %vm4824_vm14 = vmor %vm4822_vm4, %vm4823_vm11 }
0x2663   : > { %v4819_v49 = vsub.f32 1.0, %v4818_v4 }
0x2665   : > { %v4820_v10 = vmul.f32 %v6945_v36, %v4819_v49  ;;  %v6947_v3 = vpop.eup %6946 }
0x2667   : > { %v4821_v30 = vadd.f32 %v6945_v36, %v4820_v10 }
0x2669   : > { %v4825_v32 = vsel %vm4824_vm14, %v6945_v36, %v4821_v30 }
0x266a   : > { %v4830_v56 = vsel %vm4827_vm15, %v4829_v50, %v4825_v32 }
0x266b   : > { %v4837_v13 = vmul.f32 %v6947_v3, %v4830_v56 }
0x266d   : > { %4842 = vperm.xlu0 %6637, %v4837_v13   ;;  %4838 = vst.msk [vmem:[#allocation4] sm:$0xff] %vm1631_vm7, %v4837_v13 }
0x2674   : > { %v4880_v33 = vld [vmem:[#allocation4] sm:$0xff] }
0x2675   : > { %4896 = vmatpush.msrb.mxu1 %v4880_v33 }
0x2676   : > { %6445 = vmatmul.msk.f32.vlgmr.msrb.gmra.mxu1 %vm1635_vm6, %v8349_v17 }
0x267e   : > { %6446 = vmatmul.msk.f32.gmra.mxu1 %vm1635_vm6, %v8354_v7 }
0x2686   : > { %6447 = vmatmul.msk.f32.gmra.mxu1 %vm1635_vm6, %v8359_v63 }
0x268e   : > { %6448 = vmatmul.msk.f32.gmra.mxu1 %vm1635_vm6, %v8367_v18 }
0x26df   : > { %v4843_v58 = vpop.permute.xlu0 %4842 }
0x26e0   : > { %v4845_v15 = vmul.f32 %v4843_v58, %v8344_v35 }
0x26e2   : > { %4846 = vst.msk [vmem:[#allocation3] sm:$0xff] %vm1635_vm6, %v4845_v15 }
0x26e9   : > { %v8432_v53 = vld [vmem:[#allocation3] sm:$0xff] }
0x26ea   : > { %v4848_v62 = vsel %vm1804_vm8, %v8432_v53, -inf }
0x26eb   : > { %4849 = vmax.xlane.f32.xlu2 %v4848_v62 }
0x26f3   : > { %v4898_v35 = vpop.f32.mrf.mxu1 }
0x26fb   : > { %v4901_v43 = vpop.f32.mrf.mxu1 }
0x2703   : > { %v4904_v14 = vpop.f32.mrf.mxu1 }
0x270b   : > { %v4907_v8 = vpop.f32.mrf.mxu1 }
0x275e   : > { %v4850_v42 = vpop.xlane.xlu2 %4849 }
0x275f   : > { %4866 = vmatpush.msra.mxu2 %v4850_v42 }
0x2760   : > { %6441 = vmatmul.msk.f32.vlgmr.msra.gmra.mxu2 %vm1635_vm6, %v8364_v5 }
0x2768   : > { %6442 = vmatmul.msk.f32.gmra.mxu2 %vm1635_vm6, %v8374_v23 }
0x2770   : > { %6443 = vmatmul.msk.f32.gmra.mxu2 %vm1635_vm6, %v8379_v55 }
0x2778   : > { %6444 = vmatmul.msk.f32.gmra.mxu2 %vm1635_vm6, %v8384_v28 }
0x27e3   : > { %v4868_v45 = vpop.f32.mrf.mxu2 }
0x27e4   : > { %v4869_v54 = vadd.f32 %v4868_v45, %v8389_v24 }
0x27e6   : > { %v4910_v16 = vadd.f32 %v4898_v35, %v4869_v54 }
0x27e8   : > { %v4914_v1 = vadd.f32 %v4910_v16, %v8393_v34 }
0x27ea   : > { %v6449_v60 = vmul.f32 -1.442695, %v4914_v1 }
0x27eb   : > { %v4871_v41 = vpop.f32.mrf.mxu2 }
0x27ec   : > { %6948 = vpow2.f32 %v6449_v60  ;;  %v4872_v44 = vadd.f32 %v4871_v41, %v8397_v12 }
0x27ee   : > { %v4911_v47 = vadd.f32 %v4901_v43, %v4872_v44  ;;  %v4976_v43 = vld [vmem:[#allocation5] sm:$0xff] }
0x27f0   : > { %v4915_v48 = vadd.f32 %v4911_v47, %v8401_v2 }
0x27f2   : > { %v6949_v21 = vpop.eup %6948  ;;  %v6450_v61 = vmul.f32 -1.442695, %v4915_v48 }
0x27f3   : > { %v4921_v19 = vadd.f32 1.0, %v6949_v21  ;;  %v4874_v11 = vpop.f32.mrf.mxu2 }
0x27f4   : > { %6950 = vpow2.f32 %v6450_v61  ;;  %v4875_v0 = vadd.f32 %v4874_v11, %v8405_v40 }
0x27f5   : > { %6952 = vrcp.f32 %v4921_v19  ;;  %v4933_v38 = vand.u32 2147483648, %v4921_v19  ;;  %vm4927_vm12 = vweird.f32 %v4921_v19  ;;  %v4931_v50 = vand.u32 2147483647, %v4921_v19 }
0x27f6   : > { %v4912_v9 = vadd.f32 %v4904_v14, %v4875_v0 }
0x27f7   : > { %v4934_v33 = vor.u32 1.1754944e-38, %v4933_v38  ;;  %vm4932_vm4 = vcmp.eq.f32.partialorder %v4931_v50, 8.507059e+37 }
0x27f8   : > { %v4916_v49 = vadd.f32 %v4912_v9, %v8416_v51  ;;  %v5353_v9 = vld [vmem:[%s8903_s5] sm:$0xff] }
0x27fa   : > { %v6951_v59 = vpop.eup %6950 }
0x27fb   : > { %v6953_v39 = vpop.eup %6952  ;;  %v4940_v29 = vadd.f32 1.0, %v6951_v59  ;;  %v4877_v6 = vpop.f32.mrf.mxu2 }
0x27fc   : > { %v4923_v27 = vmul.f32 %v6953_v39, %v4921_v19  ;;  %v4878_v31 = vadd.f32 %v4877_v6, %v8408_v37  ;;  %vm4928_vm0 = vweird.f32 %v6953_v39 }
0x27fd   : > { %6954 = vrcp.f32 %v4940_v29  ;;  %v4952_v32 = vand.u32 2147483648, %v4940_v29  ;;  %vm4929_vm3 = vmor %vm4927_vm12, %vm4928_vm0  ;;  %v4950_v13 = vand.u32 2147483647, %v4940_v29  ;;  %vm4946_vm11 = vweird.f32 %v4940_v29 }
0x27fe   : > { %v4924_v57 = vsub.f32 1.0, %v4923_v27  ;;  %v4913_v46 = vadd.f32 %v4907_v8, %v4878_v31 }
0x27ff   : > { %v4953_v62 = vor.u32 1.1754944e-38, %v4952_v32  ;;  %vm4951_vm15 = vcmp.eq.f32.partialorder %v4950_v13, 8.507059e+37 }
0x2800   : > { %v4925_v25 = vmul.f32 %v6953_v39, %v4924_v57  ;;  %v4917_v26 = vadd.f32 %v4913_v46, %v8413_v22  ;;  %v5282_v46 = vld [vmem:[%s8902_s3] sm:$0xff]  ;;  %s7198_s3 = smov 96  }
0x2802   : > { %v6451_v36 = vmul.f32 -1.442695, %v4917_v26  ;;  %v4926_v10 = vadd.f32 %v6953_v39, %v4925_v25 }
0x2803   : > { %v6955_v4 = vpop.eup %6954 }
0x2804   : > { %v4942_v20 = vmul.f32 %v6955_v4, %v4940_v29  ;;  %6956 = vpow2.f32 %v6451_v36  ;;  %vm4947_vm9 = vweird.f32 %v6955_v4  ;;  %v4930_v56 = vsel %vm4929_vm3, %v6953_v39, %v4926_v10 }
0x2805   : > { %6958 = vtanh.f32 %v4916_v49  ;;  %vm4948_vm14 = vmor %vm4946_vm11, %vm4947_vm9  ;;  %v4935_v42 = vsel %vm4932_vm4, %v4934_v33, %v4930_v56 }
0x2806   : > { %v4943_v30 = vsub.f32 1.0, %v4942_v20 }
0x2808   : > { %v4944_v3 = vmul.f32 %v6955_v4, %v4943_v30 }
0x280a   : > { %v6957_v58 = vpop.eup %6956  ;;  %v4945_v15 = vadd.f32 %v6955_v4, %v4944_v3 }
0x280b   : > { %v4960_v35 = vadd.f32 1.0, %v6957_v58  ;;  %v6959_v54 = vpop.eup %6958 }
0x280c   : > { %v4949_v45 = vsel %vm4948_vm14, %v6955_v4, %v4945_v15  ;;  %v4978_v60 = vmul.f32 %v6959_v54, %v4935_v42 }
0x280d   : > { %v4954_v16 = vsel %vm4951_vm15, %v4953_v62, %v4949_v45  ;;  %6960 = vrcp.f32 %v4960_v35  ;;  %v4972_v14 = vand.u32 2147483648, %v4960_v35  ;;  %v4970_v61 = vand.u32 2147483647, %v4960_v35 }
0x280e   : > { %v4977_v1 = vmul.f32 %v4976_v43, %v4954_v16  ;;  %vm4966_vm12 = vweird.f32 %v4960_v35 }
0x280f   : > { %v4973_v11 = vor.u32 1.1754944e-38, %v4972_v14  ;;  %vm4971_vm9 = vcmp.eq.f32.partialorder %v4970_v61, 8.507059e+37 }
0x2810   : > { %v4979_v41 = vadd.f32 %v4978_v60, %v4977_v1 }
0x2812   : > { %4983 = vst.msk [vmem:[#allocation5] sm:$0xff] %vm1631_vm7, %v4979_v41  ;;  %6962 = vtanh.f32 %v4979_v41 }
0x2813   : > { %v6961_v44 = vpop.eup %6960 }
0x2814   : > { %v4962_v47 = vmul.f32 %v6961_v44, %v4960_v35  ;;  %vm4967_vm0 = vweird.f32 %v6961_v44 }
0x2815   : > { %vm4968_vm3 = vmor %vm4966_vm12, %vm4967_vm0 }
0x2816   : > { %v4963_v48 = vsub.f32 1.0, %v4962_v47 }
0x2818   : > { %v4964_v21 = vmul.f32 %v6961_v44, %v4963_v48  ;;  %v6963_v39 = vpop.eup %6962 }
0x281a   : > { %v4965_v19 = vadd.f32 %v6961_v44, %v4964_v21 }
0x281c   : > { %v4969_v59 = vsel %vm4968_vm3, %v6961_v44, %v4965_v19 }
0x281d   : > { %v4974_v29 = vsel %vm4971_vm9, %v4973_v11, %v4969_v59 }
0x281e   : > { %v4981_v0 = vmul.f32 %v6963_v39, %v4974_v29 }
0x2820   : > { %4986 = vperm.xlu0 %6637, %v4981_v0   ;;  %4982 = vst.msk [vmem:[#allocation4] sm:$0xff] %vm1631_vm7, %v4981_v0 }
0x2827   : > { %v5024_v6 = vld [vmem:[#allocation4] sm:$0xff] }
0x2828   : > { %5040 = vmatpush.msrb.mxu0 %v5024_v6 }
0x2829   : > { %6456 = vmatmul.msk.f32.vlgmr.msrb.gmra.mxu0 %vm1635_vm6, %v8349_v17 }
0x2831   : > { %6457 = vmatmul.msk.f32.gmra.mxu0 %vm1635_vm6, %v8354_v7 }
0x2839   : > { %6458 = vmatmul.msk.f32.gmra.mxu0 %vm1635_vm6, %v8359_v63 }
0x2841   : > { %6459 = vmatmul.msk.f32.gmra.mxu0 %vm1635_vm6, %v8367_v18 }
0x2892   : > { %v4987_v8 = vpop.permute.xlu0 %4986 }
0x2893   : > { %v4989_v27 = vmul.f32 %v4987_v8, %v8432_v53 }
0x2895   : > { %4990 = vst.msk [vmem:[#allocation3] sm:$0xff] %vm1804_vm8, %v4989_v27 }
0x289c   : > { %v8464_v31 = vld [vmem:[#allocation3] sm:$0xff] }
0x289d   : > { %v4992_v57 = vsel %vm1949_vm10, %v8464_v31, -inf }
0x289e   : > { %4993 = vmax.xlane.f32.xlu0 %v4992_v57 }
0x28a6   : > { %v5042_v53 = vpop.f32.mrf.mxu0 }
0x28ae   : > { %v5045_v49 = vpop.f32.mrf.mxu0 }
0x28b2   : > { %5285 = vperm.xlu0 %6637, %v5282_v46  }
0x28b6   : > { %v5048_v3 = vpop.f32.mrf.mxu0 }
0x28ba   : > { %5357 = vperm.xlu0 %6637, %v5353_v9  }
0x28be   : > { %v5051_v54 = vpop.f32.mrf.mxu0 }
0x2911   : > { %v4994_v25 = vpop.xlane.xlu0 %4993 }
0x2912   : > { %5010 = vmatpush.msra.mxu3 %v4994_v25 }
0x2913   : > { %6452 = vmatmul.msk.f32.vlgmr.msra.gmra.mxu3 %vm1635_vm6, %v8364_v5 }
0x291b   : > { %6453 = vmatmul.msk.f32.gmra.mxu3 %vm1635_vm6, %v8374_v23 }
0x2923   : > { %6454 = vmatmul.msk.f32.gmra.mxu3 %vm1635_vm6, %v8379_v55 }
0x292b   : > { %6455 = vmatmul.msk.f32.gmra.mxu3 %vm1635_vm6, %v8384_v28 }
0x2996   : > { %v5012_v26 = vpop.f32.mrf.mxu3 }
0x2997   : > { %v5013_v36 = vadd.f32 %v5012_v26, %v8389_v24 }
0x2999   : > { %v5054_v4 = vadd.f32 %v5042_v53, %v5013_v36 }
0x299b   : > { %v5058_v20 = vadd.f32 %v5054_v4, %v8393_v34 }
0x299d   : > { %v6460_v10 = vmul.f32 -1.442695, %v5058_v20 }
0x299e   : > { %v5015_v38 = vpop.f32.mrf.mxu3 }
0x299f   : > { %6964 = vpow2.f32 %v6460_v10  ;;  %v5016_v30 = vadd.f32 %v5015_v38, %v8397_v12 }
0x29a1   : > { %v5055_v50 = vadd.f32 %v5045_v49, %v5016_v30  ;;  %v5120_v49 = vld [vmem:[#allocation5] sm:$0xff] }
0x29a3   : > { %v5059_v32 = vadd.f32 %v5055_v50, %v8401_v2 }
0x29a5   : > { %v6965_v56 = vpop.eup %6964  ;;  %v6461_v13 = vmul.f32 -1.442695, %v5059_v32 }
0x29a6   : > { %v5065_v33 = vadd.f32 1.0, %v6965_v56  ;;  %v5018_v58 = vpop.f32.mrf.mxu3 }
0x29a7   : > { %6966 = vpow2.f32 %v6461_v13  ;;  %v5019_v35 = vadd.f32 %v5018_v58, %v8405_v40 }
0x29a8   : > { %6968 = vrcp.f32 %v5065_v33  ;;  %v5077_v11 = vand.u32 2147483648, %v5065_v33  ;;  %vm5071_vm4 = vweird.f32 %v5065_v33  ;;  %v5075_v39 = vand.u32 2147483647, %v5065_v33 }
0x29a9   : > { %v5056_v41 = vadd.f32 %v5048_v3, %v5019_v35 }
0x29aa   : > { %v5078_v27 = vor.u32 1.1754944e-38, %v5077_v11  ;;  %vm5076_vm12 = vcmp.eq.f32.partialorder %v5075_v39, 8.507059e+37 }
0x29ab   : > { %v5060_v21 = vadd.f32 %v5056_v41, %v8416_v51 }
0x29ad   : > { %v6967_v15 = vpop.eup %6966 }
0x29ae   : > { %v6969_v62 = vpop.eup %6968  ;;  %v5084_v42 = vadd.f32 1.0, %v6967_v15  ;;  %v5021_v45 = vpop.f32.mrf.mxu3 }
0x29af   : > { %v5067_v16 = vmul.f32 %v6969_v62, %v5065_v33  ;;  %v5022_v43 = vadd.f32 %v5021_v45, %v8408_v37  ;;  %vm5072_vm11 = vweird.f32 %v6969_v62 }
0x29b0   : > { %6970 = vrcp.f32 %v5084_v42  ;;  %v5096_v29 = vand.u32 2147483648, %v5084_v42  ;;  %vm5073_vm14 = vmor %vm5071_vm4, %vm5072_vm11  ;;  %v5094_v8 = vand.u32 2147483647, %v5084_v42  ;;  %vm5090_vm0 = vweird.f32 %v5084_v42 }
0x29b1   : > { %v5068_v1 = vsub.f32 1.0, %v5067_v16  ;;  %v5057_v60 = vadd.f32 %v5051_v54, %v5022_v43 }
0x29b2   : > { %v5097_v9 = vor.u32 1.1754944e-38, %v5096_v29  ;;  %vm5095_vm9 = vcmp.eq.f32.partialorder %v5094_v8, 8.507059e+37 }
0x29b3   : > { %v5069_v44 = vmul.f32 %v6969_v62, %v5068_v1  ;;  %v5061_v47 = vadd.f32 %v5057_v60, %v8413_v22 }
0x29b5   : > { %v6462_v48 = vmul.f32 -1.442695, %v5061_v47  ;;  %v5070_v19 = vadd.f32 %v6969_v62, %v5069_v44 }
0x29b6   : > { %v6971_v14 = vpop.eup %6970 }
0x29b7   : > { %v5086_v61 = vmul.f32 %v6971_v14, %v5084_v42  ;;  %6972 = vpow2.f32 %v6462_v48  ;;  %vm5091_vm15 = vweird.f32 %v6971_v14  ;;  %v5074_v6 = vsel %vm5073_vm14, %v6969_v62, %v5070_v19 }
0x29b8   : > { %6974 = vtanh.f32 %v5060_v21  ;;  %vm5092_vm3 = vmor %vm5090_vm0, %vm5091_vm15  ;;  %v5079_v25 = vsel %vm5076_vm12, %v5078_v27, %v5074_v6  ;;  %v6644_v21 = vld [vmem:[%s8862_s4] ss:$0 sm:$0xff] }
0x29b9   : > { %v5087_v59 = vsub.f32 1.0, %v5086_v61  ;;  %5316 = vrot.lane.b32.xlu0 %v6644_v21, %s7198_s3  ;;  %s8904_s3 = sld [smem:[#allocation39_spill]] }
0x29bb   : > { %v5088_v0 = vmul.f32 %v6971_v14, %v5087_v59 }
0x29bd   : > { %v6973_v57 = vpop.eup %6972  ;;  %v5089_v46 = vadd.f32 %v6971_v14, %v5088_v0 }
0x29be   : > { %v5104_v53 = vadd.f32 1.0, %v6973_v57  ;;  %v6975_v36 = vpop.eup %6974 }
0x29bf   : > { %v5093_v26 = vsel %vm5092_vm3, %v6971_v14, %v5089_v46  ;;  %v5122_v10 = vmul.f32 %v6975_v36, %v5079_v25 }
0x29c0   : > { %v5098_v4 = vsel %vm5095_vm9, %v5097_v9, %v5093_v26  ;;  %6976 = vrcp.f32 %v5104_v53  ;;  %v5116_v3 = vand.u32 2147483648, %v5104_v53  ;;  %v5114_v13 = vand.u32 2147483647, %v5104_v53 }
0x29c1   : > { %v5121_v20 = vmul.f32 %v5120_v49, %v5098_v4  ;;  %vm5110_vm4 = vweird.f32 %v5104_v53 }
0x29c2   : > { %v5117_v58 = vor.u32 1.1754944e-38, %v5116_v3  ;;  %vm5115_vm15 = vcmp.eq.f32.partialorder %v5114_v13, 8.507059e+37 }
0x29c3   : > { %v5123_v38 = vadd.f32 %v5122_v10, %v5121_v20 }
0x29c5   : > { %5127 = vst.msk [vmem:[#allocation5] sm:$0xff] %vm1631_vm7, %v5123_v38  ;;  %6978 = vtanh.f32 %v5123_v38 }
0x29c6   : > { %v6977_v30 = vpop.eup %6976 }
0x29c7   : > { %v5106_v50 = vmul.f32 %v6977_v30, %v5104_v53  ;;  %vm5111_vm11 = vweird.f32 %v6977_v30 }
0x29c8   : > { %vm5112_vm14 = vmor %vm5110_vm4, %vm5111_vm11 }
0x29c9   : > { %v5107_v32 = vsub.f32 1.0, %v5106_v50 }
0x29cb   : > { %v5108_v56 = vmul.f32 %v6977_v30, %v5107_v32  ;;  %v6979_v62 = vpop.eup %6978 }
0x29cd   : > { %v5109_v33 = vadd.f32 %v6977_v30, %v5108_v56 }
0x29cf   : > { %v5113_v15 = vsel %vm5112_vm14, %v6977_v30, %v5109_v33  ;;  %v5264_v33 = vld [vmem:[#allocation5] sm:$0xff] }
0x29d0   : > { %v5118_v42 = vsel %vm5115_vm15, %v5117_v58, %v5113_v15 }
0x29d1   : > { %v5125_v35 = vmul.f32 %v6979_v62, %v5118_v42 }
0x29d3   : > { %5130 = vperm.xlu1 %6638, %v5125_v35   ;;  %5126 = vst.msk [vmem:[#allocation4] sm:$0xff] %vm1631_vm7, %v5125_v35 }
0x29da   : > { %v5168_v45 = vld [vmem:[#allocation4] sm:$0xff] }
0x29db   : > { %5184 = vmatpush.msra.mxu1 %v5168_v45 }
0x29dc   : > { %6467 = vmatmul.msk.f32.vlgmr.msra.gmra.mxu1 %vm1635_vm6, %v8349_v17 }
0x29e4   : > { %6468 = vmatmul.msk.f32.gmra.mxu1 %vm1635_vm6, %v8354_v7 }
0x29ec   : > { %6469 = vmatmul.msk.f32.gmra.mxu1 %vm1635_vm6, %v8359_v63 }
0x29f4   : > { %6470 = vmatmul.msk.f32.gmra.mxu1 %vm1635_vm6, %v8367_v18 }
0x2a45   : > { %v5131_v54 = vpop.permute.xlu1 %5130 }
0x2a46   : > { %v5133_v16 = vmul.f32 %v5131_v54, %v8464_v31 }
0x2a48   : > { %5134 = vst.msk [vmem:[#allocation3] sm:$0xff] %vm1949_vm10, %v5133_v16 }
0x2a4f   : > { %v8498_v43 = vld [vmem:[#allocation3] sm:$0xff] }
0x2a50   : > { %v5136_v1 = vsel %vm2094_vm13, %v8498_v43, -inf }
0x2a51   : > { %5137 = vmax.xlane.f32.xlu2 %v5136_v1 }
0x2a59   : > { %v5186_v7 = vpop.f32.mrf.mxu1 }
0x2a61   : > { %v5189_v60 = vpop.f32.mrf.mxu1 }
0x2a69   : > { %v5192_v48 = vpop.f32.mrf.mxu1 }
0x2ac4   : > { %v5138_v17 = vpop.xlane.xlu2 %5137 }
0x2ac5   : > { %5154 = vmatpush.msrb.mxu2 %v5138_v17 }
0x2ac6   : > { %6463 = vmatmul.msk.f32.vlgmr.msrb.gmra.mxu2 %vm1635_vm6, %v8364_v5 }
0x2ace   : > { %6464 = vmatmul.msk.f32.gmra.mxu2 %vm1635_vm6, %v8374_v23 }
0x2ad6   : > { %6465 = vmatmul.msk.f32.gmra.mxu2 %vm1635_vm6, %v8379_v55 }
0x2ade   : > { %6466 = vmatmul.msk.f32.gmra.mxu2 %vm1635_vm6, %v8384_v28 }
0x2b49   : > { %v5156_v63 = vpop.f32.mrf.mxu2 }
0x2b4a   : > { %v5157_v18 = vadd.f32 %v5156_v63, %v8389_v24 }
0x2b4c   : > { %v5198_v31 = vadd.f32 %v5186_v7, %v5157_v18 }
0x2b4e   : > { %v5202_v41 = vadd.f32 %v5198_v31, %v8393_v34 }
0x2b50   : > { %v6471_v44 = vmul.f32 -1.442695, %v5202_v41  ;;  %v5354_v41 = vld [vmem:[%s8903_s5 + $0x8] sm:$0xff]  ;;  %s8905_s5 = sld [smem:[#allocation41_spill]] }
0x2b51   : > { %v5159_v5 = vpop.f32.mrf.mxu2 }
0x2b52   : > { %6980 = vpow2.f32 %v6471_v44  ;;  %v5160_v23 = vadd.f32 %v5159_v5, %v8397_v12  ;;  %v5195_v12 = vpop.f32.mrf.mxu1  ;;  %v5286_v44 = vpop.permute.xlu0 %5285 }
0x2b54   : > { %v5199_v47 = vadd.f32 %v5189_v60, %v5160_v23 }
0x2b56   : > { %v5203_v55 = vadd.f32 %v5199_v47, %v8401_v2 }
0x2b58   : > { %v6981_v14 = vpop.eup %6980  ;;  %v6472_v28 = vmul.f32 -1.442695, %v5203_v55 }
0x2b59   : > { %v5209_v61 = vadd.f32 1.0, %v6981_v14  ;;  %v5162_v19 = vpop.f32.mrf.mxu2 }
0x2b5a   : > { %6982 = vpow2.f32 %v6472_v28  ;;  %v5163_v59 = vadd.f32 %v5162_v19, %v8405_v40  ;;  %v5358_v23 = vpop.permute.xlu0 %5357  ;;  %v5340_v28 = vld [vmem:[%s7825_s12] sm:$0x1] }
0x2b5b   : > { %6984 = vrcp.f32 %v5209_v61  ;;  %v5221_v40 = vand.u32 2147483648, %v5209_v61  ;;  %vm5215_vm12 = vweird.f32 %v5209_v61  ;;  %v5219_v4 = vand.u32 2147483647, %v5209_v61  ;;  %v7068_v19 = vld [vmem:[#allocation2] sm:$0xff] }
0x2b5c   : > { %v5200_v8 = vadd.f32 %v5192_v48, %v5163_v59  ;;  %v5281_v48 = vld [vmem:[%s8904_s3] sm:$0xff]  ;;  %s8908_s3 = sld [smem:[#allocation43_spill]] }
0x2b5d   : > { %vm5220_vm4 = vcmp.eq.f32.partialorder %v5219_v4, 8.507059e+37 }
0x2b5e   : > { %v5204_v25 = vadd.f32 %v5200_v8, %v8416_v51 }
0x2b60   : > { %v6983_v24 = vpop.eup %6982 }
0x2b61   : > { %v6985_v34 = vpop.eup %6984  ;;  %v5228_v11 = vadd.f32 1.0, %v6983_v24  ;;  %v5165_v39 = vpop.f32.mrf.mxu2 }
0x2b62   : > { %v5211_v29 = vmul.f32 %v6985_v34, %v5209_v61  ;;  %v5166_v2 = vadd.f32 %v5165_v39, %v8408_v37  ;;  %vm5216_vm0 = vweird.f32 %v6985_v34  ;;  %v5317_v55 = vpop.permute.xlu0 %5316  ;;  %v5351_v39 = vld [vmem:[%s8905_s5] sm:$0xff] }
0x2b63   : > { %6986 = vrcp.f32 %v5228_v11  ;;  %v5240_v37 = vand.u32 2147483648, %v5228_v11  ;;  %vm5217_vm3 = vmor %vm5215_vm12, %vm5216_vm0  ;;  %v5238_v10 = vand.u32 2147483647, %v5228_v11  ;;  %vm5234_vm11 = vweird.f32 %v5228_v11 }
0x2b64   : > { %v5212_v0 = vsub.f32 1.0, %v5211_v29  ;;  %v5201_v6 = vadd.f32 %v5195_v12, %v5166_v2  ;;  %v5352_v12 = vld [vmem:[%s8905_s5 + $0x8] sm:$0xff]  ;;  %s8910_s5 = sld [smem:[#allocation46_spill]] }
0x2b65   : > { %v5241_v30 = vor.u32 1.1754944e-38, %v5240_v37  ;;  %vm5239_vm15 = vcmp.eq.f32.partialorder %v5238_v10, 8.507059e+37 }
0x2b66   : > { %v5213_v27 = vmul.f32 %v6985_v34, %v5212_v0  ;;  %v5205_v57 = vadd.f32 %v5201_v6, %v8413_v22  ;;  %v5222_v22 = vor.u32 1.1754944e-38, %v5221_v40 }
0x2b68   : > { %v6473_v46 = vmul.f32 -1.442695, %v5205_v57  ;;  %v5214_v26 = vadd.f32 %v6985_v34, %v5213_v27 }
0x2b69   : > { %v6987_v9 = vpop.eup %6986 }
0x2b6a   : > { %v5230_v53 = vmul.f32 %v6987_v9, %v5228_v11  ;;  %6988 = vpow2.f32 %v6473_v46  ;;  %vm5235_vm9 = vweird.f32 %v6987_v9  ;;  %v5218_v20 = vsel %vm5217_vm3, %v6985_v34, %v5214_v26 }
0x2b6b   : > { %6990 = vtanh.f32 %v5204_v25  ;;  %vm5236_vm14 = vmor %vm5234_vm11, %vm5235_vm9  ;;  %v5223_v50 = vsel %vm5220_vm4, %v5222_v22, %v5218_v20 }
0x2b6c   : > { %v5231_v36 = vsub.f32 1.0, %v5230_v53 }
0x2b6e   : > { %v5232_v49 = vmul.f32 %v6987_v9, %v5231_v36 }
0x2b70   : > { %v6989_v38 = vpop.eup %6988  ;;  %v5233_v51 = vadd.f32 %v6987_v9, %v5232_v49 }
0x2b71   : > { %v5248_v32 = vadd.f32 1.0, %v6989_v38  ;;  %v6991_v56 = vpop.eup %6990 }
0x2b72   : > { %v5237_v3 = vsel %vm5236_vm14, %v6987_v9, %v5233_v51  ;;  %v5266_v15 = vmul.f32 %v6991_v56, %v5223_v50 }
0x2b73   : > { %v5242_v13 = vsel %vm5239_vm15, %v5241_v30, %v5237_v3  ;;  %6992 = vrcp.f32 %v5248_v32  ;;  %v5260_v54 = vand.u32 2147483648, %v5248_v32  ;;  %v5258_v1 = vand.u32 2147483647, %v5248_v32 }
0x2b74   : > { %v5265_v58 = vmul.f32 %v5264_v33, %v5242_v13  ;;  %vm5254_vm12 = vweird.f32 %v5248_v32  ;;  %v8564_v33 = vld [vmem:[%s8908_s3] sm:$0xff] }
0x2b75   : > { %v5261_v7 = vor.u32 1.1754944e-38, %v5260_v54  ;;  %vm5259_vm9 = vcmp.eq.f32.partialorder %v5258_v1, 8.507059e+37 }
0x2b76   : > { %v5267_v62 = vadd.f32 %v5266_v15, %v5265_v58 }
0x2b78   : > { %5271 = vst.msk [vmem:[#allocation5] sm:$0xff] %vm1631_vm7, %v5267_v62  ;;  %6994 = vtanh.f32 %v5267_v62  ;;  %v8574_v62 = vld [vmem:[%s8908_s3 + $0x8] sm:$0xff] }
0x2b79   : > { %v6993_v42 = vpop.eup %6992  ;;  %5438 = vst.msk [vmem:[#allocation5] sm:$0xff] %vm1631_vm7, %v7191_v52 }
0x2b7a   : > { %v5250_v35 = vmul.f32 %v6993_v42, %v5248_v32  ;;  %vm5255_vm0 = vweird.f32 %v6993_v42 }
0x2b7b   : > { %vm5256_vm3 = vmor %vm5254_vm12, %vm5255_vm0 }
0x2b7c   : > { %v5251_v45 = vsub.f32 1.0, %v5250_v35  ;;  %v8584_v35 = vld [vmem:[%s8908_s3 + $0x18] sm:$0xff] }
0x2b7e   : > { %v5252_v16 = vmul.f32 %v6993_v42, %v5251_v45  ;;  %v6995_v18 = vpop.eup %6994 }
0x2b80   : > { %v5253_v17 = vadd.f32 %v6993_v42, %v5252_v16 }
0x2b82   : > { %v5257_v63 = vsel %vm5256_vm3, %v6993_v42, %v5253_v17  ;;  %v8579_v42 = vld [vmem:[%s8908_s3 + $0x10] sm:$0xff]  ;;  %v8593_v17 = vld [vmem:[%s8910_s5] sm:$0xff]  ;;  %s6122_s3 = scalar_lea.hbm %s7461_s20, %s7484_s0  ;;  %s8912_s0 = sand.u32 1, %s7124_s23  }
0x2b83   : > { %v5262_v31 = vsel %vm5259_vm9, %v5261_v7, %v5257_v63 }
0x2b84   : > { %v5269_v60 = vmul.f32 %v6995_v18, %v5262_v31 }
0x2b86   : > { %5274 = vperm.xlu2 %6636, %v5269_v60   ;;  %5270 = vst.msk [vmem:[#allocation4] sm:$0xff] %vm1631_vm7, %v5269_v60 }
0x2b87   : > { %5437 = vst.msk [vmem:[#allocation4] sm:$0xff] %vm1631_vm7, %v7191_v52 }
0x2b8e   : > { %5362 = vperm.xlu2 %6636, %v5354_v41   ;;  %v5484_v32 = vld [vmem:[#allocation4] sm:$0xff] }
0x2be0   : > { %v5275_v5 = vpop.permute.xlu2 %5274 }
0x2be1   : > { %v5277_v47 = vmul.f32 %v5275_v5, %v8498_v43  ;;  %v8601_v5 = vld [vmem:[%s8910_s5 + $0x8] sm:$0xff] }
0x2be3   : > { %5278 = vst.msk [vmem:[#allocation3] sm:$0xff] %vm2094_vm13, %v5277_v47 }
0x2be8   : > { %v5363_v2 = vpop.permute.xlu2 %5362 }
0x2bea   : > { %v5279_v14 = vld [vmem:[#allocation3] sm:$0xff] }
0x2beb   : > { %5306 = vmatpush.msrb.mxu3 %v5279_v14  ;;  %5335 = vmatpush.msra.mxu0 %v5279_v14 }
0x2bec   : > { %6474 = vmatmul.msk.f32.vlgmr.msrb.gmra.mxu3 %vm1635_vm6, %v5281_v48  ;;  %6475 = vmatmul.msk.f32.vlgmr.msra.gmra.mxu0 %vm1635_vm6, %v5317_v55 }
0x2bed   : > { %5512 = vmatpush.msrb.mxu0 %v5484_v32 }
0x2c69   : > { %v5337_v52 = vpop.f32.mrf.mxu0 }
0x2c6a   : > { %v5341_v21 = vadd.f32 %v5340_v28, %v5337_v52 }
0x2c6c   : > { %5342 = vst.msk [vmem:[%s7825_s12] sm:$0x1] %vm2299_vm2, %v5341_v21 }
0x2c6f   : > { %v5308_v61 = vpop.f32.mrf.mxu3 }
0x2c70   : > { %v5309_v43 = vadd.f32 %v5308_v61, %v5286_v44 }
0x2c72   : > { %v5311_v24 = vadd.f32 %v7068_v19, %v5309_v43 }
0x2c74   : > { %5312 = vst.msk [vmem:[#allocation2] sm:$0xff] %vm1613_vm5, %v5311_v24 }
0x2c7b   : > { %v5343_v34 = vld [vmem:[#allocation2] sm:$0xff] }
0x2c7c   : > { %5348 = vrot.lane.b32.xlu1 %v5343_v34, %s8874_s15  ;;  %s8907_s15 = smov 8  }
0x2c84   : > { %5345 = vrot.lane.b32.xlu1 %v5343_v34, %s8875_s2  ;;  %s8906_s2 = sld [smem:[#allocation44_spill]] }
0x2c8a   : > { %v8549_v3 = vld [vmem:[%s8906_s2] sm:$0xff]  ;;  %v8554_v56 = vld [vmem:[%s8906_s2 + $0x8] sm:$0xff]  ;;  %v8559_v13 = vld [vmem:[%s8906_s2 + $0x10] sm:$0xff] }
0x2c8b   : > { %6483 = vmatmul.msk.f32.vlgmr.msrb.gmra.mxu0 %vm1635_vm6, %v8549_v3  ;;  %v8567_v15 = vld [vmem:[%s8906_s2 + $0x18] sm:$0xff]  ;;  %s7199_s2 = smov 88  }
0x2c93   : > { %6484 = vmatmul.msk.f32.gmra.mxu0 %vm1635_vm6, %v8554_v56 }
0x2c9b   : > { %6485 = vmatmul.msk.f32.gmra.mxu0 %vm1635_vm6, %v8559_v13 }
0x2ca3   : > { %6486 = vmatmul.msk.f32.gmra.mxu0 %vm1635_vm6, %v8567_v15 }
0x2cee   : > { %v5349_v11 = vpop.permute.xlu1 %5348 }
0x2cef   : > { %5384 = vmatpush.msra.mxu2 %v5349_v11 }
0x2cf6   : > { %v5346_v59 = vpop.permute.xlu1 %5345 }
0x2cf7   : > { %5385 = vmatpush.msra.mxu2 %v5346_v59 }
0x2cf9   : > { %5386 = vmatpush.msra.mxu2 %v5343_v34 }
0x2cfa   : > { %6476 = vmatmul.msk.f32.vlgmr.msra.gmra.mxu2 %vm2323_vm1, %v5351_v39 }
0x2d02   : > { %6477 = vmatmul.msk.f32.gmra.mxu2 %vm2323_vm1, %v5352_v12 }
0x2d08   : > { %v5514_v45 = vpop.f32.mrf.mxu0 }
0x2d10   : > { %v5517_v63 = vpop.f32.mrf.mxu0 }
0x2d18   : > { %v5520_v55 = vpop.f32.mrf.mxu0 }
0x2d20   : > { %v5523_v59 = vpop.f32.mrf.mxu0 }
0x2d7d   : > { %v5388_v29 = vpop.f32.mrf.mxu2 }
0x2d7e   : > { %v5389_v9 = vadd.f32 %v5388_v29, %v5358_v23  ;;  %v8613_v29 = vld [vmem:[%s8910_s5 + $0x18] sm:$0xff] }
0x2d85   : > { %v5391_v0 = vpop.f32.mrf.mxu2 }
0x2d86   : > { %v5392_v6 = vadd.f32 %v5391_v0, %v5363_v2 }
0x2d88   : > { %v6478_v8 = vmul.f32 -1.442695, %v5392_v6 }
0x2d8a   : > { %6996 = vpow2.f32 %v6478_v8  ;;  %v8616_v8 = vld [vmem:[%s8910_s5 + $0x10] sm:$0xff]  ;;  %s6114_s5 = scalar_lea.sflag [#allocation8], %s8912_s0 }
0x2d90   : > { %v6997_v27 = vpop.eup %6996 }
0x2d91   : > { %v5398_v57 = vadd.f32 1.0, %v6997_v27 }
0x2d93   : > { %6998 = vrcp.f32 %v5398_v57  ;;  %v5410_v26 = vand.u32 2147483648, %v5398_v57  ;;  %v5408_v36 = vand.u32 2147483647, %v5398_v57  ;;  %vm5404_vm1 = vweird.f32 %v5398_v57 }
0x2d94   : > { %7000 = vtanh.f32 %v5389_v9 }
0x2d95   : > { %v5411_v37 = vor.u32 1.1754944e-38, %v5410_v26  ;;  %vm5409_vm14 = vcmp.eq.f32.partialorder %v5408_v36, 8.507059e+37 }
0x2d99   : > { %v6999_v46 = vpop.eup %6998 }
0x2d9a   : > { %v5400_v25 = vmul.f32 %v6999_v46, %v5398_v57  ;;  %vm5405_vm11 = vweird.f32 %v6999_v46  ;;  %v7001_v20 = vpop.eup %7000 }
0x2d9b   : > { %vm5406_vm4 = vmor %vm5404_vm1, %vm5405_vm11 }
0x2d9c   : > { %v5401_v53 = vsub.f32 1.0, %v5400_v25 }
0x2d9e   : > { %v5402_v40 = vmul.f32 %v6999_v46, %v5401_v53 }
0x2da0   : > { %v5403_v4 = vadd.f32 %v6999_v46, %v5402_v40 }
0x2da2   : > { %v5407_v49 = vsel %vm5406_vm4, %v6999_v46, %v5403_v4 }
0x2da3   : > { %v5412_v10 = vsel %vm5409_vm14, %v5411_v37, %v5407_v49 }
0x2da4   : > { %v5414_v22 = vmul.f32 %v7001_v20, %v5412_v10 }
0x2da6   : > { %5416 = vrot.lane.b32.xlu1 %v5414_v22, %s8907_s15  ;;  %s8909_s15 = sld [smem:[#allocation45_spill]] }
0x2dac   : > { %v8589_v54 = vld [vmem:[%s8909_s15] sm:$0xff]  ;;  %v8597_v31 = vld [vmem:[%s8909_s15 + $0x8] sm:$0xff]  ;;  %v8605_v21 = vld [vmem:[%s8909_s15 + $0x10] sm:$0xff] }
0x2dad   : > { %v8608_v61 = vld [vmem:[%s8909_s15 + $0x18] sm:$0xff] }
0x2e18   : > { %v5417_v38 = vpop.permute.xlu1 %5416 }
0x2e19   : > { %v5419_v51 = vsel %vm1635_vm6, 0.0, %v5417_v38 }
0x2e1a   : > { %5420 = vst.msk [vmem:[#allocation3] sm:$0xff] %vm1613_vm5, %v5419_v51 }
0x2e21   : > { %v8544_v30 = vld [vmem:[#allocation3] sm:$0xff] }
0x2e22   : > { %v5440_v50 = vsel %vm1635_vm6, %v8544_v30, -inf }
0x2e23   : > { %5441 = vmax.xlane.f32.xlu2 %v5440_v50 }
0x2e96   : > { %v5442_v58 = vpop.xlane.xlu2 %5441 }
0x2e97   : > { %5470 = vmatpush.msra.mxu3 %v5442_v58  ;;  %v5592_v58 = vld [vmem:[#allocation5] sm:$0xff] }
0x2e98   : > { %6479 = vmatmul.msk.f32.vlgmr.msra.gmra.mxu3 %vm1635_vm6, %v8564_v33 }
0x2ea0   : > { %6480 = vmatmul.msk.f32.gmra.mxu3 %vm1635_vm6, %v8574_v62 }
0x2ea8   : > { %6481 = vmatmul.msk.f32.gmra.mxu3 %vm1635_vm6, %v8579_v42 }
0x2eb0   : > { %6482 = vmatmul.msk.f32.gmra.mxu3 %vm1635_vm6, %v8584_v35 }
0x2f1b   : > { %v5472_v16 = vpop.f32.mrf.mxu3 }
0x2f1c   : > { %v5473_v1 = vadd.f32 %v5472_v16, %v8589_v54 }
0x2f1e   : > { %v5526_v7 = vadd.f32 %v5514_v45, %v5473_v1 }
0x2f20   : > { %v5530_v18 = vadd.f32 %v5526_v7, %v8593_v17 }
0x2f22   : > { %v6487_v60 = vmul.f32 -1.442695, %v5530_v18 }
0x2f23   : > { %v5475_v41 = vpop.f32.mrf.mxu3 }
0x2f24   : > { %7002 = vpow2.f32 %v6487_v60  ;;  %v5476_v44 = vadd.f32 %v5475_v41, %v8597_v31 }
0x2f26   : > { %v5527_v23 = vadd.f32 %v5517_v63, %v5476_v44 }
0x2f28   : > { %v5531_v47 = vadd.f32 %v5527_v23, %v8601_v5 }
0x2f2a   : > { %v7003_v48 = vpop.eup %7002  ;;  %v6488_v14 = vmul.f32 -1.442695, %v5531_v47 }
0x2f2b   : > { %v5537_v52 = vadd.f32 1.0, %v7003_v48  ;;  %v5478_v28 = vpop.f32.mrf.mxu3 }
0x2f2c   : > { %7004 = vpow2.f32 %v6488_v14  ;;  %v5479_v34 = vadd.f32 %v5478_v28, %v8605_v21 }
0x2f2d   : > { %7006 = vrcp.f32 %v5537_v52  ;;  %v5549_v40 = vand.u32 2147483648, %v5537_v52  ;;  %vm5543_vm0 = vweird.f32 %v5537_v52  ;;  %v5547_v4 = vand.u32 2147483647, %v5537_v52 }
0x2f2e   : > { %v5528_v6 = vadd.f32 %v5520_v55, %v5479_v34 }
0x2f2f   : > { %v5550_v22 = vor.u32 1.1754944e-38, %v5549_v40  ;;  %vm5548_vm11 = vcmp.eq.f32.partialorder %v5547_v4, 8.507059e+37 }
0x2f30   : > { %v5532_v25 = vadd.f32 %v5528_v6, %v8616_v8 }
0x2f32   : > { %v7005_v43 = vpop.eup %7004 }
0x2f33   : > { %v7007_v19 = vpop.eup %7006  ;;  %v5556_v24 = vadd.f32 1.0, %v7005_v43  ;;  %v5481_v11 = vpop.f32.mrf.mxu3 }
0x2f34   : > { %v5539_v39 = vmul.f32 %v7007_v19, %v5537_v52  ;;  %v5482_v12 = vadd.f32 %v5481_v11, %v8608_v61  ;;  %vm5544_vm15 = vweird.f32 %v7007_v19 }
0x2f35   : > { %7008 = vrcp.f32 %v5556_v24  ;;  %v5568_v37 = vand.u32 2147483648, %v5556_v24  ;;  %vm5545_vm12 = vmor %vm5543_vm0, %vm5544_vm15  ;;  %v5566_v10 = vand.u32 2147483647, %v5556_v24  ;;  %vm5562_vm9 = vweird.f32 %v5556_v24 }
0x2f36   : > { %v5540_v2 = vsub.f32 1.0, %v5539_v39  ;;  %v5529_v0 = vadd.f32 %v5523_v59, %v5482_v12 }
0x2f37   : > { %v5569_v50 = vor.u32 1.1754944e-38, %v5568_v37  ;;  %vm5567_vm4 = vcmp.eq.f32.partialorder %v5566_v10, 8.507059e+37 }
0x2f38   : > { %v5541_v27 = vmul.f32 %v7007_v19, %v5540_v2  ;;  %v5533_v57 = vadd.f32 %v5529_v0, %v8613_v29 }
0x2f3a   : > { %v6489_v46 = vmul.f32 -1.442695, %v5533_v57  ;;  %v5542_v26 = vadd.f32 %v7007_v19, %v5541_v27 }
0x2f3b   : > { %v7009_v9 = vpop.eup %7008 }
0x2f3c   : > { %v5558_v53 = vmul.f32 %v7009_v9, %v5556_v24  ;;  %7010 = vpow2.f32 %v6489_v46  ;;  %vm5563_vm3 = vweird.f32 %v7009_v9  ;;  %v5546_v20 = vsel %vm5545_vm12, %v7007_v19, %v5542_v26 }
0x2f3d   : > { %7012 = vtanh.f32 %v5532_v25  ;;  %vm5564_vm1 = vmor %vm5562_vm9, %vm5563_vm3  ;;  %v5551_v32 = vsel %vm5548_vm11, %v5550_v22, %v5546_v20 }
0x2f3e   : > { %v5559_v36 = vsub.f32 1.0, %v5558_v53 }
0x2f40   : > { %v5560_v49 = vmul.f32 %v7009_v9, %v5559_v36 }
0x2f42   : > { %v7011_v38 = vpop.eup %7010  ;;  %v5561_v51 = vadd.f32 %v7009_v9, %v5560_v49 }
0x2f43   : > { %v5576_v45 = vadd.f32 1.0, %v7011_v38  ;;  %v7013_v1 = vpop.eup %7012 }
0x2f44   : > { %v5565_v16 = vsel %vm5564_vm1, %v7009_v9, %v5561_v51  ;;  %v5594_v18 = vmul.f32 %v7013_v1, %v5551_v32 }
0x2f45   : > { %v5570_v7 = vsel %vm5567_vm4, %v5569_v50, %v5565_v16  ;;  %7014 = vrcp.f32 %v5576_v45  ;;  %v5588_v47 = vand.u32 2147483648, %v5576_v45  ;;  %v5586_v48 = vand.u32 2147483647, %v5576_v45 }
0x2f46   : > { %v5593_v63 = vmul.f32 %v5592_v58, %v5570_v7  ;;  %vm5582_vm15 = vweird.f32 %v5576_v45 }
0x2f47   : > { %v5589_v52 = vor.u32 1.1754944e-38, %v5588_v47  ;;  %vm5587_vm12 = vcmp.eq.f32.partialorder %v5586_v48, 8.507059e+37 }
0x2f48   : > { %v5595_v60 = vadd.f32 %v5594_v18, %v5593_v63 }
0x2f4a   : > { %5599 = vst.msk [vmem:[#allocation5] sm:$0xff] %vm1631_vm7, %v5595_v60  ;;  %7016 = vtanh.f32 %v5595_v60 }
0x2f4b   : > { %v7015_v41 = vpop.eup %7014 }
0x2f4c   : > { %v5578_v44 = vmul.f32 %v7015_v41, %v5576_v45  ;;  %vm5583_vm14 = vweird.f32 %v7015_v41 }
0x2f4d   : > { %vm5584_vm0 = vmor %vm5582_vm15, %vm5583_vm14 }
0x2f4e   : > { %v5579_v23 = vsub.f32 1.0, %v5578_v44 }
0x2f50   : > { %v5580_v55 = vmul.f32 %v7015_v41, %v5579_v23  ;;  %v7017_v43 = vpop.eup %7016 }
0x2f52   : > { %v5581_v14 = vadd.f32 %v7015_v41, %v5580_v55 }
0x2f54   : > { %v5585_v28 = vsel %vm5584_vm0, %v7015_v41, %v5581_v14 }
0x2f55   : > { %v5590_v19 = vsel %vm5587_vm12, %v5589_v52, %v5585_v28 }
0x2f56   : > { %v5597_v24 = vmul.f32 %v7017_v43, %v5590_v19 }
0x2f58   : > { %5602 = vperm.xlu1 %6638, %v5597_v24   ;;  %5598 = vst.msk [vmem:[#allocation4] sm:$0xff] %vm1631_vm7, %v5597_v24 }
0x2f5f   : > { %v5640_v34 = vld [vmem:[#allocation4] sm:$0xff] }
0x2f60   : > { %5656 = vmatpush.msrb.mxu2 %v5640_v34 }
0x2f61   : > { %6494 = vmatmul.msk.f32.vlgmr.msrb.gmra.mxu2 %vm1635_vm6, %v8549_v3 }
0x2f69   : > { %6495 = vmatmul.msk.f32.gmra.mxu2 %vm1635_vm6, %v8554_v56 }
0x2f71   : > { %6496 = vmatmul.msk.f32.gmra.mxu2 %vm1635_vm6, %v8559_v13 }
0x2f79   : > { %6497 = vmatmul.msk.f32.gmra.mxu2 %vm1635_vm6, %v8567_v15 }
0x2fca   : > { %v5603_v11 = vpop.permute.xlu1 %5602 }
0x2fcb   : > { %v5605_v59 = vmul.f32 %v5603_v11, %v8544_v30 }
0x2fcd   : > { %5606 = vst.msk [vmem:[#allocation3] sm:$0xff] %vm1635_vm6, %v5605_v59 }
0x2fd4   : > { %v8632_v39 = vld [vmem:[#allocation3] sm:$0xff] }
0x2fd5   : > { %v5608_v12 = vsel %vm1804_vm8, %v8632_v39, -inf }
0x2fd6   : > { %5609 = vmax.xlane.f32.xlu0 %v5608_v12 }
0x2fe4   : > { %v5658_v30 = vpop.f32.mrf.mxu2 }
0x2fec   : > { %v5661_v57 = vpop.f32.mrf.mxu2 }
0x2ff4   : > { %v5664_v36 = vpop.f32.mrf.mxu2 }
0x2ffc   : > { %v5667_v32 = vpop.f32.mrf.mxu2 }
0x3049   : > { %v5610_v2 = vpop.xlane.xlu0 %5609 }
0x304a   : > { %5626 = vmatpush.msrb.mxu1 %v5610_v2 }
0x304b   : > { %6490 = vmatmul.msk.f32.vlgmr.msrb.gmra.mxu1 %vm1635_vm6, %v8564_v33 }
0x3053   : > { %6491 = vmatmul.msk.f32.gmra.mxu1 %vm1635_vm6, %v8574_v62 }
0x305b   : > { %6492 = vmatmul.msk.f32.gmra.mxu1 %vm1635_vm6, %v8579_v42 }
0x3063   : > { %6493 = vmatmul.msk.f32.gmra.mxu1 %vm1635_vm6, %v8584_v35 }
0x30c8   : > { %v5628_v0 = vpop.f32.mrf.mxu1 }
0x30c9   : > { %v5629_v6 = vadd.f32 %v5628_v0, %v8589_v54 }
0x30cb   : > { %v5670_v27 = vadd.f32 %v5658_v30, %v5629_v6 }
0x30cd   : > { %v5674_v46 = vadd.f32 %v5670_v27, %v8593_v17  ;;  %v5736_v27 = vld [vmem:[#allocation5] sm:$0xff] }
0x30cf   : > { %v6498_v9 = vmul.f32 -1.442695, %v5674_v46 }
0x30d0   : > { %v5631_v25 = vpop.f32.mrf.mxu1 }
0x30d1   : > { %7018 = vpow2.f32 %v6498_v9  ;;  %v5632_v53 = vadd.f32 %v5631_v25, %v8597_v31 }
0x30d3   : > { %v5671_v26 = vadd.f32 %v5661_v57, %v5632_v53 }
0x30d5   : > { %v5675_v40 = vadd.f32 %v5671_v26, %v8601_v5 }
0x30d7   : > { %v7019_v4 = vpop.eup %7018  ;;  %v6499_v37 = vmul.f32 -1.442695, %v5675_v40 }
0x30d8   : > { %v5681_v49 = vadd.f32 1.0, %v7019_v4  ;;  %v5634_v20 = vpop.f32.mrf.mxu1 }
0x30d9   : > { %7020 = vpow2.f32 %v6499_v37  ;;  %v5635_v51 = vadd.f32 %v5634_v20, %v8605_v21 }
0x30da   : > { %7022 = vrcp.f32 %v5681_v49  ;;  %v5693_v55 = vand.u32 2147483648, %v5681_v49  ;;  %vm5687_vm9 = vweird.f32 %v5681_v49  ;;  %v5691_v14 = vand.u32 2147483647, %v5681_v49 }
0x30db   : > { %v5672_v7 = vadd.f32 %v5664_v36, %v5635_v51 }
0x30dc   : > { %v5694_v24 = vor.u32 1.1754944e-38, %v5693_v55  ;;  %vm5692_vm14 = vcmp.eq.f32.partialorder %v5691_v14, 8.507059e+37 }
0x30dd   : > { %v5676_v44 = vadd.f32 %v5672_v7, %v8616_v8 }
0x30df   : > { %v7021_v10 = vpop.eup %7020 }
0x30e0   : > { %v7023_v22 = vpop.eup %7022  ;;  %v5700_v38 = vadd.f32 1.0, %v7021_v10  ;;  %v5637_v50 = vpop.f32.mrf.mxu1 }
0x30e1   : > { %v5683_v58 = vmul.f32 %v7023_v22, %v5681_v49  ;;  %v5638_v45 = vadd.f32 %v5637_v50, %v8608_v61  ;;  %vm5688_vm3 = vweird.f32 %v7023_v22 }
0x30e2   : > { %7024 = vrcp.f32 %v5700_v38  ;;  %v5712_v52 = vand.u32 2147483648, %v5700_v38  ;;  %vm5689_vm11 = vmor %vm5687_vm9, %vm5688_vm3  ;;  %v5710_v19 = vand.u32 2147483647, %v5700_v38  ;;  %vm5706_vm4 = vweird.f32 %v5700_v38 }
0x30e3   : > { %v5684_v16 = vsub.f32 1.0, %v5683_v58  ;;  %v5673_v1 = vadd.f32 %v5667_v32, %v5638_v45 }
0x30e4   : > { %v5713_v59 = vor.u32 1.1754944e-38, %v5712_v52  ;;  %vm5711_vm0 = vcmp.eq.f32.partialorder %v5710_v19, 8.507059e+37 }
0x30e5   : > { %v5685_v63 = vmul.f32 %v7023_v22, %v5684_v16  ;;  %v5677_v18 = vadd.f32 %v5673_v1, %v8613_v29 }
0x30e7   : > { %v6500_v60 = vmul.f32 -1.442695, %v5677_v18  ;;  %v5686_v47 = vadd.f32 %v7023_v22, %v5685_v63 }
0x30e8   : > { %v7025_v41 = vpop.eup %7024 }
0x30e9   : > { %v5702_v23 = vmul.f32 %v7025_v41, %v5700_v38  ;;  %7026 = vpow2.f32 %v6500_v60  ;;  %vm5707_vm1 = vweird.f32 %v7025_v41  ;;  %v5690_v43 = vsel %vm5689_vm11, %v7023_v22, %v5686_v47 }
0x30ea   : > { %7028 = vtanh.f32 %v5676_v44  ;;  %vm5708_vm15 = vmor %vm5706_vm4, %vm5707_vm1  ;;  %v5695_v12 = vsel %vm5692_vm14, %v5694_v24, %v5690_v43 }
0x30eb   : > { %v5703_v48 = vsub.f32 1.0, %v5702_v23 }
0x30ed   : > { %v5704_v28 = vmul.f32 %v7025_v41, %v5703_v48 }
0x30ef   : > { %v7027_v34 = vpop.eup %7026  ;;  %v5705_v11 = vadd.f32 %v7025_v41, %v5704_v28 }
0x30f0   : > { %v5720_v2 = vadd.f32 1.0, %v7027_v34  ;;  %v7029_v0 = vpop.eup %7028 }
0x30f1   : > { %v5709_v30 = vsel %vm5708_vm15, %v7025_v41, %v5705_v11  ;;  %v5738_v46 = vmul.f32 %v7029_v0, %v5695_v12 }
0x30f2   : > { %v5714_v6 = vsel %vm5711_vm0, %v5713_v59, %v5709_v30  ;;  %7030 = vrcp.f32 %v5720_v2  ;;  %v5732_v40 = vand.u32 2147483648, %v5720_v2  ;;  %v5730_v4 = vand.u32 2147483647, %v5720_v2 }
0x30f3   : > { %v5737_v57 = vmul.f32 %v5736_v27, %v5714_v6  ;;  %vm5726_vm3 = vweird.f32 %v5720_v2 }
0x30f4   : > { %v5733_v49 = vor.u32 1.1754944e-38, %v5732_v40  ;;  %vm5731_vm11 = vcmp.eq.f32.partialorder %v5730_v4, 8.507059e+37 }
0x30f5   : > { %v5739_v9 = vadd.f32 %v5738_v46, %v5737_v57 }
0x30f7   : > { %5743 = vst.msk [vmem:[#allocation5] sm:$0xff] %vm1631_vm7, %v5739_v9  ;;  %7032 = vtanh.f32 %v5739_v9 }
0x30f8   : > { %v7031_v25 = vpop.eup %7030 }
0x30f9   : > { %v5722_v53 = vmul.f32 %v7031_v25, %v5720_v2  ;;  %vm5727_vm12 = vweird.f32 %v7031_v25 }
0x30fa   : > { %vm5728_vm9 = vmor %vm5726_vm3, %vm5727_vm12 }
0x30fb   : > { %v5723_v26 = vsub.f32 1.0, %v5722_v53 }
0x30fd   : > { %v5724_v36 = vmul.f32 %v7031_v25, %v5723_v26  ;;  %v7033_v10 = vpop.eup %7032 }
0x30ff   : > { %v5725_v37 = vadd.f32 %v7031_v25, %v5724_v36 }
0x3101   : > { %v5729_v20 = vsel %vm5728_vm9, %v7031_v25, %v5725_v37 }
0x3102   : > { %v5734_v22 = vsel %vm5731_vm11, %v5733_v49, %v5729_v20 }
0x3103   : > { %v5741_v38 = vmul.f32 %v7033_v10, %v5734_v22 }
0x3105   : > { %5746 = vperm.xlu1 %6638, %v5741_v38   ;;  %5742 = vst.msk [vmem:[#allocation4] sm:$0xff] %vm1631_vm7, %v5741_v38 }
0x310c   : > { %v5784_v51 = vld [vmem:[#allocation4] sm:$0xff] }
0x310d   : > { %5800 = vmatpush.msra.mxu0 %v5784_v51 }
0x310e   : > { %6505 = vmatmul.msk.f32.vlgmr.msra.gmra.mxu0 %vm1635_vm6, %v8549_v3 }
0x3116   : > { %6506 = vmatmul.msk.f32.gmra.mxu0 %vm1635_vm6, %v8554_v56 }
0x311e   : > { %6507 = vmatmul.msk.f32.gmra.mxu0 %vm1635_vm6, %v8559_v13 }
0x3126   : > { %6508 = vmatmul.msk.f32.gmra.mxu0 %vm1635_vm6, %v8567_v15 }
0x3177   : > { %v5747_v50 = vpop.permute.xlu1 %5746 }
0x3178   : > { %v5749_v32 = vmul.f32 %v5747_v50, %v8632_v39 }
0x317a   : > { %5750 = vst.msk [vmem:[#allocation3] sm:$0xff] %vm1804_vm8, %v5749_v32 }
0x3181   : > { %v8664_v58 = vld [vmem:[#allocation3] sm:$0xff] }
0x3182   : > { %v5752_v45 = vsel %vm1949_vm10, %v8664_v58, -inf }
0x3183   : > { %5753 = vmax.xlane.f32.xlu1 %v5752_v45 }
0x318b   : > { %v5802_v39 = vpop.f32.mrf.mxu0 }
0x3193   : > { %v5805_v18 = vpop.f32.mrf.mxu0 }
0x319b   : > { %v5808_v48 = vpop.f32.mrf.mxu0 }
0x31a3   : > { %v5811_v12 = vpop.f32.mrf.mxu0 }
0x31f6   : > { %v5754_v16 = vpop.xlane.xlu1 %5753 }
0x31f7   : > { %5770 = vmatpush.msrb.mxu3 %v5754_v16 }
0x31f8   : > { %6501 = vmatmul.msk.f32.vlgmr.msrb.gmra.mxu3 %vm1635_vm6, %v8564_v33 }
0x3200   : > { %6502 = vmatmul.msk.f32.gmra.mxu3 %vm1635_vm6, %v8574_v62 }
0x3208   : > { %6503 = vmatmul.msk.f32.gmra.mxu3 %vm1635_vm6, %v8579_v42 }
0x3210   : > { %6504 = vmatmul.msk.f32.gmra.mxu3 %vm1635_vm6, %v8584_v35 }
0x327b   : > { %v5772_v1 = vpop.f32.mrf.mxu3 }
0x327c   : > { %v5773_v7 = vadd.f32 %v5772_v1, %v8589_v54 }
0x327e   : > { %v5814_v63 = vadd.f32 %v5802_v39, %v5773_v7 }
0x3280   : > { %v5818_v60 = vadd.f32 %v5814_v63, %v8593_v17  ;;  %v5880_v63 = vld [vmem:[#allocation5] sm:$0xff] }
0x3282   : > { %v6509_v41 = vmul.f32 -1.442695, %v5818_v60 }
0x3283   : > { %v5775_v44 = vpop.f32.mrf.mxu3 }
0x3284   : > { %7034 = vpow2.f32 %v6509_v41  ;;  %v5776_v23 = vadd.f32 %v5775_v44, %v8597_v31 }
0x3286   : > { %v5815_v47 = vadd.f32 %v5805_v18, %v5776_v23 }
0x3288   : > { %v5819_v55 = vadd.f32 %v5815_v47, %v8601_v5 }
0x328a   : > { %v7035_v14 = vpop.eup %7034  ;;  %v6510_v52 = vmul.f32 -1.442695, %v5819_v55 }
0x328b   : > { %v5825_v28 = vadd.f32 1.0, %v7035_v14  ;;  %v5778_v43 = vpop.f32.mrf.mxu3 }
0x328c   : > { %7036 = vpow2.f32 %v6510_v52  ;;  %v5779_v11 = vadd.f32 %v5778_v43, %v8605_v21 }
0x328d   : > { %7038 = vrcp.f32 %v5825_v28  ;;  %v5837_v36 = vand.u32 2147483648, %v5825_v28  ;;  %vm5831_vm1 = vweird.f32 %v5825_v28  ;;  %v5835_v37 = vand.u32 2147483647, %v5825_v28 }
0x328e   : > { %v5816_v27 = vadd.f32 %v5808_v48, %v5779_v11  ;;  %v6104_v11 = vld [vmem:[#allocation6] sm:$0x1] }
0x328f   : > { %v5838_v38 = vor.u32 1.1754944e-38, %v5837_v36  ;;  %vm5836_vm0 = vcmp.eq.f32.partialorder %v5835_v37, 8.507059e+37 }
0x3290   : > { %v5820_v53 = vadd.f32 %v5816_v27, %v8616_v8 }
0x3292   : > { %v7037_v19 = vpop.eup %7036 }
0x3293   : > { %v7039_v24 = vpop.eup %7038  ;;  %v5844_v34 = vadd.f32 1.0, %v7037_v19  ;;  %v5781_v59 = vpop.f32.mrf.mxu3 }
0x3294   : > { %v5827_v2 = vmul.f32 %v7039_v24, %v5825_v28  ;;  %v5782_v30 = vadd.f32 %v5781_v59, %v8608_v61  ;;  %vm5832_vm8 = vweird.f32 %v7039_v24 }
0x3295   : > { %7040 = vrcp.f32 %v5844_v34  ;;  %v5856_v49 = vand.u32 2147483648, %v5844_v34  ;;  %vm5833_vm4 = vmor %vm5831_vm1, %vm5832_vm8  ;;  %v5854_v22 = vand.u32 2147483647, %v5844_v34  ;;  %vm5850_vm15 = vweird.f32 %v5844_v34 }
0x3296   : > { %v5828_v0 = vsub.f32 1.0, %v5827_v2  ;;  %v5817_v6 = vadd.f32 %v5811_v12, %v5782_v30  ;;  %v6042_v12 = vld [vmem:[%s7448_s27] sm:$0xff] }
0x3297   : > { %v5857_v32 = vor.u32 1.1754944e-38, %v5856_v49  ;;  %vm5855_vm3 = vcmp.eq.f32.partialorder %v5854_v22, 8.507059e+37 }
0x3298   : > { %v5829_v57 = vmul.f32 %v7039_v24, %v5828_v0  ;;  %v5821_v46 = vadd.f32 %v5817_v6, %v8613_v29 }
0x329a   : > { %v6511_v9 = vmul.f32 -1.442695, %v5821_v46  ;;  %v5830_v40 = vadd.f32 %v7039_v24, %v5829_v57 }
0x329b   : > { %v7041_v25 = vpop.eup %7040 }
0x329c   : > { %v5846_v26 = vmul.f32 %v7041_v25, %v5844_v34  ;;  %7042 = vpow2.f32 %v6511_v9  ;;  %vm5851_vm14 = vweird.f32 %v7041_v25  ;;  %v5834_v10 = vsel %vm5833_vm4, %v7039_v24, %v5830_v40 }
0x329d   : > { %7044 = vtanh.f32 %v5820_v53  ;;  %vm5852_vm12 = vmor %vm5850_vm15, %vm5851_vm14  ;;  %v5839_v45 = vsel %vm5836_vm0, %v5838_v38, %v5834_v10 }
0x329e   : > { %v5847_v4 = vsub.f32 1.0, %v5846_v26 }
0x32a0   : > { %v5848_v20 = vmul.f32 %v7041_v25, %v5847_v4 }
0x32a2   : > { %v7043_v51 = vpop.eup %7042  ;;  %v5849_v50 = vadd.f32 %v7041_v25, %v5848_v20 }
0x32a3   : > { %v5864_v16 = vadd.f32 1.0, %v7043_v51  ;;  %v7045_v1 = vpop.eup %7044 }
0x32a4   : > { %v5853_v39 = vsel %vm5852_vm12, %v7041_v25, %v5849_v50  ;;  %v5882_v60 = vmul.f32 %v7045_v1, %v5839_v45  ;;  %v6645_v50 = vld [vmem:[%s8862_s4] ss:$0 sm:$0xff]  ;;  %s6126_s4 = sshll.u32 %s6122_s3, 4  ;;  %s7090_s3 = scalar_lea.hbm %s7461_s20, 2  ;;  %s6127_s4 = int_to_ptr.hbm [resolvable:$true] %s6126_s4 }
0x32a5   : > { %v5858_v7 = vsel %vm5855_vm3, %v5857_v32, %v5853_v39  ;;  %7046 = vrcp.f32 %v5864_v16  ;;  %v5876_v55 = vand.u32 2147483648, %v5864_v16  ;;  %v5874_v14 = vand.u32 2147483647, %v5864_v16  ;;  %6076 = vrot.lane.b32.xlu1 %v6645_v50, %s7199_s2  ;;  %s8911_s2 = sld [smem:[#allocation47_spill]]  ;;  %s7084_s6 = sshra.s32 %s6127_s4, 4  ;;  %s7085_s6 = int_to_ptr.hbm [resolvable:$true] %s7084_s6 }
0x32a6   : > { %v5881_v18 = vmul.f32 %v5880_v63, %v5858_v7  ;;  %vm5870_vm11 = vweird.f32 %v5864_v16  ;;  %s7086_s7 = scalar_lea.hbm %s7085_s6, 1  ;;  %p7091_p0 = scmp.lt.s32.totalorder %s7085_s6, %s7461_s20 }
0x32a7   : > { %v5877_v28 = vor.u32 1.1754944e-38, %v5876_v55  ;;  %vm5875_vm1 = vcmp.eq.f32.partialorder %v5874_v14, 8.507059e+37  ;;  %p7087_p11 = scmp.ne.s32.totalorder %s7085_s6, %s7086_s7  ;;  %p7092_p1 = scmp.lt.s32.totalorder %s7090_s3, %s7086_s7 }
0x32a8   : > { %v5883_v41 = vadd.f32 %v5882_v60, %v5881_v18 }
0x32a9   : > { %p7088_p12 = pnand %p7087_p11, %p7501_p5  ;;  %p7093_p2 = por %p7092_p1, %p7091_p0 }
0x32aa   : > { %5887 = vst.msk [vmem:[#allocation5] sm:$0xff] %vm1631_vm7, %v5883_v41  ;;  %7048 = vtanh.f32 %v5883_v41 }
0x32ab   : > { %v7047_v44 = vpop.eup %7046  ;;  %p7089_p13 = pneg %p7088_p12 }
0x32ac   : > { %v5866_v23 = vmul.f32 %v7047_v44, %v5864_v16  ;;  %vm5871_vm9 = vweird.f32 %v7047_v44 }
0x32ad   : > { %vm5872_vm8 = vmor %vm5870_vm11, %vm5871_vm9  ;;  %p7094_p3 = pnand %p7093_p2, %p7089_p13 }
0x32ae   : > { %v5867_v47 = vsub.f32 1.0, %v5866_v23 }
0x32b0   : > { %v5868_v48 = vmul.f32 %v7047_v44, %v5867_v47  ;;  %v7049_v19 = vpop.eup %7048 }
0x32b2   : > { %v5869_v52 = vadd.f32 %v7047_v44, %v5868_v48 }
0x32b4   : > { %v5873_v43 = vsel %vm5872_vm8, %v7047_v44, %v5869_v52 }
0x32b5   : > { %v5878_v24 = vsel %vm5875_vm1, %v5877_v28, %v5873_v43  ;;  %v6024_v28 = vld [vmem:[#allocation5] sm:$0xff] }
0x32b6   : > { %v5885_v34 = vmul.f32 %v7049_v19, %v5878_v24 }
0x32b8   : > { %5890 = vperm.xlu2 %6636, %v5885_v34   ;;  %5886 = vst.msk [vmem:[#allocation4] sm:$0xff] %vm1631_vm7, %v5885_v34 }
0x32bf   : > { %v5928_v59 = vld [vmem:[#allocation4] sm:$0xff] }
0x32c0   : > { %6107 = vperm.xlu2 %6636, %v6104_v11   ;;  %5944 = vmatpush.msra.mxu2 %v5928_v59 }
0x32c1   : > { %6516 = vmatmul.msk.f32.vlgmr.msra.gmra.mxu2 %vm1635_vm6, %v8549_v3 }
0x32c8   : > { %6045 = vperm.xlu2 %6636, %v6042_v12  }
0x32c9   : > { %6517 = vmatmul.msk.f32.gmra.mxu2 %vm1635_vm6, %v8554_v56 }
0x32d1   : > { %6518 = vmatmul.msk.f32.gmra.mxu2 %vm1635_vm6, %v8559_v13 }
0x32d9   : > { %6519 = vmatmul.msk.f32.gmra.mxu2 %vm1635_vm6, %v8567_v15 }
0x3312   : > { %v5891_v2 = vpop.permute.xlu2 %5890 }
0x3313   : > { %v5893_v30 = vmul.f32 %v5891_v2, %v8664_v58 }
0x3315   : > { %5894 = vst.msk [vmem:[#allocation3] sm:$0xff] %vm1949_vm10, %v5893_v30 }
0x331c   : > { %v8697_v0 = vld [vmem:[#allocation3] sm:$0xff] }
0x331d   : > { %v5896_v3 = vsel %vm2094_vm13, %v8697_v0, -inf }
0x331e   : > { %5897 = vmax.xlane.f32.xlu0 %v5896_v3 }
0x3344   : > { %v5946_v56 = vpop.f32.mrf.mxu2 }
0x334c   : > { %v5949_v27 = vpop.f32.mrf.mxu2 }
0x3391   : > { %v5898_v6 = vpop.xlane.xlu0 %5897 }
0x3392   : > { %5914 = vmatpush.msra.mxu1 %v5898_v6 }
0x3393   : > { %6512 = vmatmul.msk.f32.vlgmr.msra.gmra.mxu1 %vm1635_vm6, %v8564_v33 }
0x339b   : > { %6513 = vmatmul.msk.f32.gmra.mxu1 %vm1635_vm6, %v8574_v62 }
0x33a3   : > { %6514 = vmatmul.msk.f32.gmra.mxu1 %vm1635_vm6, %v8579_v42  ;;  %v5952_v42 = vpop.f32.mrf.mxu2 }
0x33ab   : > { %6515 = vmatmul.msk.f32.gmra.mxu1 %vm1635_vm6, %v8584_v35  ;;  %v5955_v49 = vpop.f32.mrf.mxu2 }
0x3410   : > { %v5916_v13 = vpop.f32.mrf.mxu1 }
0x3411   : > { %v5917_v15 = vadd.f32 %v5916_v13, %v8589_v54 }
0x3413   : > { %v5958_v58 = vadd.f32 %v5946_v56, %v5917_v15 }
0x3415   : > { %v5962_v57 = vadd.f32 %v5958_v58, %v8593_v17 }
0x3417   : > { %v6520_v46 = vmul.f32 -1.442695, %v5962_v57 }
0x3418   : > { %v5919_v9 = vpop.f32.mrf.mxu1 }
0x3419   : > { %7050 = vpow2.f32 %v6520_v46  ;;  %v5920_v33 = vadd.f32 %v5919_v9, %v8597_v31  ;;  %v6077_v46 = vpop.permute.xlu1 %6076  ;;  %v6041_v9 = vld [vmem:[%s8911_s2] sm:$0xff]  ;;  %s6124_s2 = sshll.u32 %s7825_s12, 4  ;;  %s6125_s2 = int_to_ptr.vmem [resolvable:$true] %s6124_s2 }
0x341b   : > { %v5959_v62 = vadd.f32 %v5949_v27, %v5920_v33 }
0x341d   : > { %v5963_v25 = vadd.f32 %v5959_v62, %v8601_v5  ;;  %v6108_v62 = vpop.permute.xlu2 %6107 }
0x341f   : > { %v7051_v53 = vpop.eup %7050  ;;  %v6521_v26 = vmul.f32 -1.442695, %v5963_v25 }
0x3420   : > { %v5969_v35 = vadd.f32 1.0, %v7051_v53  ;;  %v5922_v40 = vpop.f32.mrf.mxu1 }
0x3421   : > { %7052 = vpow2.f32 %v6521_v26  ;;  %v5923_v17 = vadd.f32 %v5922_v40, %v8605_v21  ;;  %v6110_v40 = vperm.slane %v6108_v62, 0 }
0x3422   : > { %7054 = vrcp.f32 %v5969_v35  ;;  %v5981_v1 = vand.u32 2147483648, %v5969_v35  ;;  %vm5975_vm4 = vweird.f32 %v5969_v35  ;;  %v5979_v7 = vand.u32 2147483647, %v5969_v35 }
0x3423   : > { %v5960_v22 = vadd.f32 %v5952_v42, %v5923_v17  ;;  %v6100_v42 = vld [vmem:[%s7825_s12] sm:$0x1] }
0x3424   : > { %v5982_v41 = vor.u32 1.1754944e-38, %v5981_v1  ;;  %vm5980_vm12 = vcmp.eq.f32.partialorder %v5979_v7, 8.507059e+37 }
0x3425   : > { %v5964_v16 = vadd.f32 %v5960_v22, %v8616_v8 }
0x3427   : > { %v7053_v54 = vpop.eup %7052 }
0x3428   : > { %v7055_v36 = vpop.eup %7054  ;;  %v5988_v4 = vadd.f32 1.0, %v7053_v54  ;;  %v5925_v37 = vpop.f32.mrf.mxu1  ;;  %v7069_v54 = vld [vmem:[#allocation2] sm:$0xff] }
0x3429   : > { %v5971_v20 = vmul.f32 %v7055_v36, %v5969_v35  ;;  %v5926_v31 = vadd.f32 %v5925_v37, %v8608_v61  ;;  %vm5976_vm10 = vweird.f32 %v7055_v36 }
0x342a   : > { %7056 = vrcp.f32 %v5988_v4  ;;  %v6000_v63 = vand.u32 2147483648, %v5988_v4  ;;  %vm5977_vm14 = vmor %vm5975_vm4, %vm5976_vm10  ;;  %v5998_v60 = vand.u32 2147483647, %v5988_v4  ;;  %vm5994_vm0 = vweird.f32 %v5988_v4 }
0x342b   : > { %v5972_v5 = vsub.f32 1.0, %v5971_v20  ;;  %v5961_v10 = vadd.f32 %v5955_v49, %v5926_v31 }
0x342c   : > { %v6001_v23 = vor.u32 1.1754944e-38, %v6000_v63  ;;  %vm5999_vm9 = vcmp.eq.f32.partialorder %v5998_v60, 8.507059e+37 }
0x342d   : > { %v5973_v38 = vmul.f32 %v7055_v36, %v5972_v5  ;;  %v5965_v51 = vadd.f32 %v5961_v10, %v8613_v29 }
0x342f   : > { %v6522_v32 = vmul.f32 -1.442695, %v5965_v51  ;;  %v5974_v39 = vadd.f32 %v7055_v36, %v5973_v38 }
0x3430   : > { %v7057_v45 = vpop.eup %7056 }
0x3431   : > { %v5990_v21 = vmul.f32 %v7057_v45, %v5988_v4  ;;  %7058 = vpow2.f32 %v6522_v32  ;;  %vm5995_vm15 = vweird.f32 %v7057_v45  ;;  %v5978_v29 = vsel %vm5977_vm14, %v7055_v36, %v5974_v39 }
0x3432   : > { %7060 = vtanh.f32 %v5964_v16  ;;  %vm5996_vm3 = vmor %vm5994_vm0, %vm5995_vm15  ;;  %v5983_v47 = vsel %vm5980_vm12, %v5982_v41, %v5978_v29 }
0x3433   : > { %v5991_v61 = vsub.f32 1.0, %v5990_v21 }
0x3435   : > { %v5992_v18 = vmul.f32 %v7057_v45, %v5991_v61 }
0x3437   : > { %v7059_v44 = vpop.eup %7058  ;;  %v5993_v8 = vadd.f32 %v7057_v45, %v5992_v18 }
0x3438   : > { %v6008_v55 = vadd.f32 1.0, %v7059_v44  ;;  %v7061_v14 = vpop.eup %7060 }
0x3439   : > { %v5997_v48 = vsel %vm5996_vm3, %v7057_v45, %v5993_v8  ;;  %v6026_v19 = vmul.f32 %v7061_v14, %v5983_v47 }
0x343a   : > { %v6002_v52 = vsel %vm5999_vm9, %v6001_v23, %v5997_v48  ;;  %7062 = vrcp.f32 %v6008_v55  ;;  %v6020_v12 = vand.u32 2147483648, %v6008_v55  ;;  %v6018_v30 = vand.u32 2147483647, %v6008_v55 }
0x343b   : > { %v6025_v43 = vmul.f32 %v6024_v28, %v6002_v52  ;;  %vm6014_vm8 = vweird.f32 %v6008_v55 }
0x343c   : > { %v6021_v6 = vor.u32 1.1754944e-38, %v6020_v12  ;;  %vm6019_vm10 = vcmp.eq.f32.partialorder %v6018_v30, 8.507059e+37 }
0x343d   : > { %v6027_v24 = vadd.f32 %v6026_v19, %v6025_v43 }
0x343f   : > { %6031 = vst.msk [vmem:[#allocation5] sm:$0xff] %vm1631_vm7, %v6027_v24  ;;  %7064 = vtanh.f32 %v6027_v24 }
0x3440   : > { %v7063_v34 = vpop.eup %7062 }
0x3441   : > { %v6010_v11 = vmul.f32 %v7063_v34, %v6008_v55  ;;  %vm6015_vm11 = vweird.f32 %v7063_v34 }
0x3442   : > { %vm6016_vm1 = vmor %vm6014_vm8, %vm6015_vm11 }
0x3443   : > { %v6011_v59 = vsub.f32 1.0, %v6010_v11 }
0x3445   : > { %v6012_v2 = vmul.f32 %v7063_v34, %v6011_v59  ;;  %v7065_v13 = vpop.eup %7064 }
0x3447   : > { %v6013_v3 = vadd.f32 %v7063_v34, %v6012_v2 }
0x3449   : > { %v6017_v56 = vsel %vm6016_vm1, %v7063_v34, %v6013_v3 }
0x344a   : > { %v6022_v15 = vsel %vm6019_vm10, %v6021_v6, %v6017_v56 }
0x344b   : > { %v6029_v58 = vmul.f32 %v7065_v13, %v6022_v15 }
0x344d   : > { %6034 = vperm.xlu0 %6637, %v6029_v58   ;;  %6030 = vst.msk [vmem:[#allocation4] sm:$0xff] %vm1631_vm7, %v6029_v58 }
0x34bf   : > { %v6035_v27 = vpop.permute.xlu0 %6034 }
0x34c0   : > { %v6037_v57 = vmul.f32 %v6035_v27, %v8697_v0  ;;  %v6046_v0 = vpop.permute.xlu2 %6045 }
0x34c2   : > { %6038 = vst.msk [vmem:[#allocation3] sm:$0xff] %vm2094_vm13, %v6037_v57 }
0x34c9   : > { %v6039_v33 = vld [vmem:[#allocation3] sm:$0xff] }
0x34ca   : > { %6066 = vmatpush.msra.mxu3 %v6039_v33  ;;  %6095 = vmatpush.msrb.mxu0 %v6039_v33 }
0x34cb   : > { %6523 = vmatmul.msk.f32.vlgmr.msra.gmra.mxu3 %vm1635_vm6, %v6041_v9  ;;  %6524 = vmatmul.msk.f32.vlgmr.msrb.gmra.mxu0 %vm1635_vm6, %v6077_v46 }
0x3548   : > { %v6097_v25 = vpop.f32.mrf.mxu0 }
0x3549   : > { %v6101_v53 = vadd.f32 %v6100_v42, %v6097_v25 }
0x354b   : > { %6102 = vst.msk [vmem:[%s7825_s12] sm:$0x1] %vm2299_vm2, %v6101_v53 }
0x354e   : > { %v6068_v26 = vpop.f32.mrf.mxu3 }
0x354f   : > { %v6069_v35 = vadd.f32 %v6068_v26, %v6046_v0 }
0x3551   : > { %v6071_v36 = vadd.f32 %v7069_v54, %v6069_v35 }
0x3552   : > { %v6103_v4 = vld [vmem:[%s7825_s12] sm:$0x1] }
0x3553   : > { %6072 = vst.msk [vmem:[#allocation2] sm:$0xff] %vm1613_vm5, %v6071_v36  ;;  %v6111_v17 = vadd.f32 %v6110_v40, %v6103_v4 }
0x3555   : > { %6112 = vst.msk [vmem:[%s7825_s12] sm:$0x1] %vm2299_vm2, %v6111_v17 }
0x3556   : > { %7097 = shalt.err (!%p7094_p3)
}
0x3557   : > { %6527 = dma.vmem_to_hbm [thread:$0]  (%p7501_p5), %s6125_s2, 16, %s6127_s4, %s6114_s5  }
0x3558 PF: > { %p6533_p4 = scmp.ge.s32.totalorder %s7132_s28, 2  ;;  %s6138_s12 = sand.u32 1, %s7120_s22  }
0x3559   : > { %s6139_s0 = scalar_lea.sflag [#allocation8], %s6138_s12 }
0x355a   : > { %p6530_p7 = pnand %p6533_p4, %p7505_p6 }
0x355c   : > { %p6531_p8 = pneg %p6530_p7 }
0x355e   : > { %7115 = dma.done.wait (%p6531_p8), %s6139_s0, 16  }
0x355f   : > { %7117 = vsyncadd (%p6531_p8), %s6139_s0, 4294967280  ;;  %p115_p9 = scmp.ge.s32.totalorder %s7488_s1, 4   ;;  %s8913_s22 = smov %s7124_s23 }
0x3560   : > { %s8914_s23 = smov %s7128_s26  ;;  %s8915_s26 = smov %s7499_s10 }
0x3561   : > { %s8916_s28 = smov %s7488_s1  ;;  %117 = sbr.rel (!%p115_p9) target bundleno = 117 (0x75), region = 310 }
0x3566   :  { %6144 = vsyncpa [#allocation8], 1 }
0x3567   :  { %6146 = vsyncpa [#allocation8 + $0x1], 1 }

</bundles_post_ra>
